<compile_context>
chip_gen: v7x
topology: tpu7x:2x2x1
jax: 0.10.0
libtpu: 0.0.40
codegen_flags: <defaults>
</compile_context>

<pallas_src>
import functools

import jax
import jax.numpy as jnp
from jax.experimental import pallas as pl
from jax.experimental.pallas import tpu as pltpu


def _resblocks_kernel(x_ref, w1_ref, w2_ref, out_ref, act_ref, mid_ref, mask_ref,
                      *, W, Wp):
    # x_ref   : (1, slab, C)  width-padded, row-flattened input (pad columns are zero)
    # w1_ref  : (3, 3, C, C)  block-d first  conv weights (HWIO), compute dtype
    # w2_ref  : (3, 3, C, C)  block-d second conv weights (HWIO), compute dtype
    # out_ref : (1, slab, C)  final activation in the padded layout; written at last d
    # act_ref : (R, C) VMEM   zero-padded running activation (persists across d)
    # mid_ref : (R, C) VMEM   zero-padded ReLU(conv1(act))
    # mask_ref: (slab, C) VMEM  0/1 interior-column mask (built once per batch element)
    d = pl.program_id(1)
    n_depth = pl.num_programs(1)

    slab, C = x_ref.shape[1], x_ref.shape[2]
    S = 2 * Wp  # store base: interior value (y, x) lives at flat row S + y*Wp + x
    cdt = act_ref.dtype

    # ---- one-time init per batch element ----
    @pl.when(d == 0)
    def _init():
        act_ref[...] = jnp.zeros(act_ref.shape, act_ref.dtype)
        mid_ref[...] = jnp.zeros(mid_ref.shape, mid_ref.dtype)
        # Single contiguous, aligned slab store (pad columns of x are already zero).
        act_ref[S:S + slab, :] = x_ref[0].astype(cdt)
        # Interior-column mask: flat column (o mod Wp) < W.  Built once; the i32
        # remainder/compare does not run in the steady-state depth loop.
        col = jax.lax.broadcasted_iota(jnp.int32, (slab, C), 0) % Wp
        mask_ref[...] = (col < W).astype(cdt)

    mask = mask_ref[...]

    # ---- conv1: 9 contiguous (slab, C) x (C, C) MXU matmuls, f32 accumulation ----
    # Tap offset of (dy, dx) relative to output row o = y*Wp + x is (dy+1)*Wp + (dx-1);
    # dx == 1 taps and the store base S are sublane-aligned because Wp % sublane == 0.
    acc1 = jnp.zeros((slab, C), jnp.float32)
    for dy in range(3):
        for dx in range(3):
            k = (dy + 1) * Wp + (dx - 1)
            acc1 = acc1 + jnp.dot(act_ref[k:k + slab, :], w1_ref[dy, dx],
                                  preferred_element_type=jnp.float32)

    # ReLU + masked store: junk/pad columns are forced to zero so the zero borders of
    # mid_ref are preserved for conv2 (and for the next depth step).
    mid_ref[S:S + slab, :] = (jnp.maximum(acc1, 0.0) * mask).astype(cdt)

    # ---- conv2 ----
    acc2 = jnp.zeros((slab, C), jnp.float32)
    for dy in range(3):
        for dx in range(3):
            k = (dy + 1) * Wp + (dx - 1)
            acc2 = acc2 + jnp.dot(mid_ref[k:k + slab, :], w2_ref[dy, dx],
                                  preferred_element_type=jnp.float32)

    # ---- residual add; activation stays resident in VMEM for the next block ----
    new_act = (act_ref[S:S + slab, :].astype(jnp.float32) + acc2) * mask
    act_ref[S:S + slab, :] = new_act.astype(cdt)

    # ---- write the final activation back to HBM once, at the last block ----
    @pl.when(d == n_depth - 1)
    def _finalize():
        out_ref[0, :, :] = new_act.astype(out_ref.dtype)


def resblocks_pallas(x, w1_stack, w2_stack, *, compute_dtype=jnp.bfloat16):
    """Fused ResBlocks forward.

    x        : (N, H, W, C) float32, NHWC
    w1_stack : (depth, 3, 3, C, C) HWIO weights of conv1 of each block
    w2_stack : (depth, 3, 3, C, C) HWIO weights of conv2 of each block
    compute_dtype : dtype of the matmul operands / resident activation (f32 accumulate).
    """
    N, H, W, C = x.shape
    depth = w1_stack.shape[0]

    itemsize = jnp.dtype(compute_dtype).itemsize
    sub = 32 // itemsize                       # sublane multiple: 8 for f32, 16 for bf16
    Wp = ((W + 2 + sub - 1) // sub) * sub      # padded width, sublane-aligned tap offsets
    slab = H * Wp                              # flattened output-slab rows (incl. junk cols)
    R = ((3 * Wp + 1 + slab + sub - 1) // sub) * sub   # scratch rows (covers max tap slice)

    # Wrapper-side width pad + row flatten: kernel init becomes one contiguous store and
    # the pad columns arrive already zeroed.
    x_flat = jnp.pad(x, ((0, 0), (0, 0), (0, Wp - W), (0, 0))).reshape(N, slab, C)

    # Weights in the MXU compute dtype (cast once here, not per grid step).
    w1c = w1_stack.astype(compute_dtype)
    w2c = w2_stack.astype(compute_dtype)

    # Explicit scoped-VMEM limit: scratch slabs + double-buffered x/out blocks + weights,
    # computed with lane/sublane padding and generous headroom.
    Cp = max(((C + 127) // 128) * 128, 128)
    Cs = ((C + sub - 1) // sub) * sub
    est = (3 * R * Cp * itemsize                       # act / mid / mask scratch
           + 2 * 2 * slab * Cp * 4                     # x and out blocks, double-buffered
           + 2 * 2 * 9 * Cs * Cp * itemsize)           # w1 / w2 blocks, double-buffered
    vmem_limit = int(min(max(2 * est, 32 << 20), 128 << 20))

    kernel = functools.partial(_resblocks_kernel, W=W, Wp=Wp)

    out_flat = pl.pallas_call(
        kernel,
        out_shape=jax.ShapeDtypeStruct((N, slab, C), x.dtype),
        grid_spec=pltpu.PrefetchScalarGridSpec(
            num_scalar_prefetch=0,
            grid=(N, depth),
            in_specs=[
                # input slab: block index constant over depth -> one DMA per batch element
                pl.BlockSpec((1, slab, C), lambda b, d: (b, 0, 0)),
                # per-block weights: leading depth dim squeezed away inside the kernel
                pl.BlockSpec((None, 3, 3, C, C), lambda b, d: (d, 0, 0, 0, 0)),
                pl.BlockSpec((None, 3, 3, C, C), lambda b, d: (d, 0, 0, 0, 0)),
            ],
            out_specs=pl.BlockSpec((1, slab, C), lambda b, d: (b, 0, 0)),
            scratch_shapes=[
                pltpu.VMEM((R, C), compute_dtype),     # act_ref (persists across depth)
                pltpu.VMEM((R, C), compute_dtype),     # mid_ref
                pltpu.VMEM((slab, C), compute_dtype),  # mask_ref
            ],
        ),
        compiler_params=pltpu.CompilerParams(
            dimension_semantics=("parallel", "arbitrary"),
            vmem_limit_bytes=vmem_limit),
    )(x_flat, w1c, w2c)

    # Strip the junk/pad columns in the wrapper (lane-dense slab store inside the kernel).
    return out_flat.reshape(N, H, Wp, C)[:, :, :W, :]


@functools.partial(jax.jit, static_argnames=("compute_dtype",))
def resblocks_forward(x, w1_stack, w2_stack, compute_dtype=jnp.bfloat16):
    return resblocks_pallas(x, w1_stack, w2_stack, compute_dtype=compute_dtype)


def resblocks_reference(x, w1_stack, w2_stack):
    """Pure-JAX reference matching the PyTorch module (NHWC / HWIO)."""
    dn = ("NHWC", "HWIO", "NHWC")
    for i in range(w1_stack.shape[0]):
        y = jax.lax.conv_general_dilated(x, w1_stack[i], (1, 1), "SAME",
                                         dimension_numbers=dn)
        y = jnp.maximum(y, 0.0)
        y = jax.lax.conv_general_dilated(y, w2_stack[i], (1, 1), "SAME",
                                         dimension_numbers=dn)
        x = x + y
    return x


if __name__ == "__main__":
    depth = 2
    N, C, H, W = 2, 4, 16, 16  # PyTorch input would be NCHW (2, 4, 16, 16)

    key = jax.random.PRNGKey(0)
    key, xk = jax.random.split(key)
    x_nchw = jax.random.normal(xk, (N, C, H, W), dtype=jnp.float32)
    x_nhwc = jnp.transpose(x_nchw, (0, 2, 3, 1))  # NCHW -> NHWC

    # Per-block conv weights in HWIO layout, stacked over depth: (depth, 3, 3, C, C).
    w1_list, w2_list = [], []
    for _ in range(depth):
        key, k1, k2 = jax.random.split(key, 3)
        w1_list.append(0.1 * jax.random.normal(k1, (3, 3, C, C), dtype=jnp.float32))
        w2_list.append(0.1 * jax.random.normal(k2, (3, 3, C, C), dtype=jnp.float32))
    w1_stack = jnp.stack(w1_list)
    w2_stack = jnp.stack(w2_list)

    ref = jax.block_until_ready(resblocks_reference(x_nhwc, w1_stack, w2_stack))

    # Exact-ish f32 path: tight check against the f32 reference.
    out_f32 = jax.block_until_ready(
        resblocks_forward(x_nhwc, w1_stack, w2_stack, compute_dtype=jnp.float32))
    assert out_f32.shape == (N, H, W, C)
    err_f32 = float(jnp.max(jnp.abs(out_f32 - ref)))
    assert jnp.allclose(out_f32, ref, rtol=1e-4, atol=1e-4), err_f32

    # bf16 MXU path (the performance configuration): loosened tolerance vs. f32 reference.
    out_bf16 = jax.block_until_ready(
        resblocks_forward(x_nhwc, w1_stack, w2_stack, compute_dtype=jnp.bfloat16))
    assert out_bf16.shape == (N, H, W, C)
    err_bf16 = float(jnp.max(jnp.abs(out_bf16 - ref)))
    assert jnp.allclose(out_bf16, ref, rtol=1e-1, atol=1e-1), err_bf16

    print("KERNEL_OK")
</pallas_src>

<mosaic_0001>
module attributes {stable_mosaic.version = 11 : i64} {
  func.func @_resblocks_kernel(%arg0: i32, %arg1: i32, %arg2: memref<1x384x4xf32, #tpu.memory_space<vmem>>, %arg3: memref<1x3x3x4x4xf32, #tpu.memory_space<vmem>>, %arg4: memref<1x3x3x4x4xf32, #tpu.memory_space<vmem>>, %arg5: memref<1x384x4xf32, #tpu.memory_space<vmem>>, %arg6: memref<464x4xf32, #tpu.memory_space<vmem>>, %arg7: memref<464x4xf32, #tpu.memory_space<vmem>>, %arg8: memref<384x4xf32, #tpu.memory_space<vmem>>) attributes {dimension_semantics = [#tpu.dimension_semantics<parallel>, #tpu.dimension_semantics<arbitrary>], iteration_bounds = array<i64: 2, 2>, scalar_prefetch = 0 : i64, scratch_operands = 3 : i64, tpu.core_type = #tpu.core_type<tc>, window_params = [{transform_indices = @transform_0, window_bounds = array<i64: 1, 384, 4>}, {transform_indices = @transform_1, window_bounds = array<i64: 1, 3, 3, 4, 4>}, {transform_indices = @transform_2, window_bounds = array<i64: 1, 3, 3, 4, 4>}, {transform_indices = @transform_3, window_bounds = array<i64: 1, 384, 4>}]} {
    %c0_i32 = arith.constant 0 : i32
    %0 = arith.cmpi eq, %arg1, %c0_i32 : i32
    %1 = arith.extui %0 : i1 to i32
    %c0_i32_0 = arith.constant 0 : i32
    %2 = arith.cmpi ne, %1, %c0_i32_0 : i32
    scf.if %2 {
      %cst_144 = arith.constant 0.000000e+00 : f32
      %107 = vector.broadcast %cst_144 : f32 to vector<464x4xf32>
      %c0_145 = arith.constant 0 : index
      %c0_146 = arith.constant 0 : index
      %108 = vector.load %arg6[%c0_145, %c0_146] : memref<464x4xf32, #tpu.memory_space<vmem>>, vector<464x4xf32>
      tpu.vector_store %arg6[%c0_145, %c0_146], %107 {strides = array<i32>} : memref<464x4xf32, #tpu.memory_space<vmem>>, vector<464x4xf32>,
      %cst_147 = arith.constant 0.000000e+00 : f32
      %109 = vector.broadcast %cst_147 : f32 to vector<464x4xf32>
      %c0_148 = arith.constant 0 : index
      %c0_149 = arith.constant 0 : index
      %110 = vector.load %arg7[%c0_148, %c0_149] : memref<464x4xf32, #tpu.memory_space<vmem>>, vector<464x4xf32>
      tpu.vector_store %arg7[%c0_148, %c0_149], %109 {strides = array<i32>} : memref<464x4xf32, #tpu.memory_space<vmem>>, vector<464x4xf32>,
      %c0_150 = arith.constant 0 : index
      %c0_151 = arith.constant 0 : index
      %c0_152 = arith.constant 0 : index
      %111 = vector.load %arg2[%c0_150, %c0_151, %c0_152] : memref<1x384x4xf32, #tpu.memory_space<vmem>>, vector<1x384x4xf32>
      %112 = vector.shape_cast %111 : vector<1x384x4xf32> to vector<384x4xf32>
      %c48_153 = arith.constant 48 : index
      %c0_154 = arith.constant 0 : index
      %113 = vector.load %arg6[%c48_153, %c0_154] : memref<464x4xf32, #tpu.memory_space<vmem>>, vector<384x4xf32>
      tpu.vector_store %arg6[%c48_153, %c0_154], %112 {strides = array<i32>} : memref<464x4xf32, #tpu.memory_space<vmem>>, vector<384x4xf32>,
      %114 = tpu.iota {dimensions = array<i32: 0>} : vector<384x4xi32>
      %c24_i32 = arith.constant 24 : i32
      %c0_i32_155 = arith.constant 0 : i32
      %115 = arith.cmpi eq, %c24_i32, %c0_i32_155 : i32
      %c1_i32_156 = arith.constant 1 : i32
      %116 = arith.select %115, %c1_i32_156, %c24_i32 : i32
      %117 = vector.broadcast %116 : i32 to vector<384x4xi32>
      %118 = arith.remsi %114, %117 : vector<384x4xi32>
      %c0_i32_157 = arith.constant 0 : i32
      %119 = vector.broadcast %c0_i32_157 : i32 to vector<384x4xi32>
      %120 = arith.cmpi ne, %118, %119 : vector<384x4xi32>
      %c0_i32_158 = arith.constant 0 : i32
      %121 = vector.broadcast %c0_i32_158 : i32 to vector<384x4xi32>
      %122 = arith.cmpi slt, %118, %121 : vector<384x4xi32>
      %c0_i32_159 = arith.constant 0 : i32
      %123 = arith.cmpi slt, %116, %c0_i32_159 : i32
      %124 = vector.broadcast %123 : i1 to vector<384x4xi1>
      %125 = vector.broadcast %124 : vector<384x4xi1> to vector<384x4xi1>
      %126 = arith.xori %122, %125 : vector<384x4xi1>
      %127 = arith.andi %126, %120 : vector<384x4xi1>
      %128 = vector.broadcast %116 : i32 to vector<384x4xi32>
      %129 = arith.addi %118, %128 : vector<384x4xi32>
      %130 = arith.select %127, %129, %118 : vector<384x4xi1>, vector<384x4xi32>
      %c16_i32 = arith.constant 16 : i32
      %131 = vector.broadcast %c16_i32 : i32 to vector<384x4xi32>
      %132 = arith.cmpi slt, %130, %131 : vector<384x4xi32>
      %133 = arith.extui %132 : vector<384x4xi1> to vector<384x4xi32>
      %134 = arith.sitofp %133 : vector<384x4xi32> to vector<384x4xf32>
      %c0_160 = arith.constant 0 : index
      %c0_161 = arith.constant 0 : index
      %135 = vector.load %arg8[%c0_160, %c0_161] : memref<384x4xf32, #tpu.memory_space<vmem>>, vector<384x4xf32>
      tpu.vector_store %arg8[%c0_160, %c0_161], %134 {strides = array<i32>} : memref<384x4xf32, #tpu.memory_space<vmem>>, vector<384x4xf32>,
    } else {
    }
    %c0 = arith.constant 0 : index
    %c0_1 = arith.constant 0 : index
    %3 = vector.load %arg8[%c0, %c0_1] : memref<384x4xf32, #tpu.memory_space<vmem>>, vector<384x4xf32>
    %cst = arith.constant 0.000000e+00 : f32
    %4 = vector.broadcast %cst : f32 to vector<384x4xf32>
    %c23 = arith.constant 23 : index
    %c0_2 = arith.constant 0 : index
    %5 = vector.load %arg6[%c23, %c0_2] : memref<464x4xf32, #tpu.memory_space<vmem>>, vector<384x4xf32>
    %c0_3 = arith.constant 0 : index
    %c0_4 = arith.constant 0 : index
    %c0_5 = arith.constant 0 : index
    %c0_6 = arith.constant 0 : index
    %c0_7 = arith.constant 0 : index
    %6 = vector.load %arg3[%c0_3, %c0_4, %c0_5, %c0_6, %c0_7] : memref<1x3x3x4x4xf32, #tpu.memory_space<vmem>>, vector<1x1x1x4x4xf32>
    %7 = vector.shape_cast %6 : vector<1x1x1x4x4xf32> to vector<4x4xf32>
    %cst_8 = arith.constant dense<0.000000e+00> : vector<384x4xf32>
    %8 = tpu.matmul %5, %7, %cst_8 {dimension_numbers = #tpu.dot_dimension_numbers<[1], [0], [0], [1], [0, 0, 1, 1], [], []>} : vector<384x4xf32>, vector<4x4xf32>, vector<384x4xf32> -> vector<384x4xf32>
    %9 = arith.addf %4, %8 : vector<384x4xf32>
    %c24 = arith.constant 24 : index
    %c0_9 = arith.constant 0 : index
    %10 = vector.load %arg6[%c24, %c0_9] : memref<464x4xf32, #tpu.memory_space<vmem>>, vector<384x4xf32>
    %c0_10 = arith.constant 0 : index
    %c0_11 = arith.constant 0 : index
    %c1 = arith.constant 1 : index
    %c0_12 = arith.constant 0 : index
    %c0_13 = arith.constant 0 : index
    %11 = vector.load %arg3[%c0_10, %c0_11, %c1, %c0_12, %c0_13] : memref<1x3x3x4x4xf32, #tpu.memory_space<vmem>>, vector<1x1x1x4x4xf32>
    %12 = vector.shape_cast %11 : vector<1x1x1x4x4xf32> to vector<4x4xf32>
    %cst_14 = arith.constant dense<0.000000e+00> : vector<384x4xf32>
    %13 = tpu.matmul %10, %12, %cst_14 {dimension_numbers = #tpu.dot_dimension_numbers<[1], [0], [0], [1], [0, 0, 1, 1], [], []>} : vector<384x4xf32>, vector<4x4xf32>, vector<384x4xf32> -> vector<384x4xf32>
    %14 = arith.addf %9, %13 : vector<384x4xf32>
    %c25 = arith.constant 25 : index
    %c0_15 = arith.constant 0 : index
    %15 = vector.load %arg6[%c25, %c0_15] : memref<464x4xf32, #tpu.memory_space<vmem>>, vector<384x4xf32>
    %c0_16 = arith.constant 0 : index
    %c0_17 = arith.constant 0 : index
    %c2 = arith.constant 2 : index
    %c0_18 = arith.constant 0 : index
    %c0_19 = arith.constant 0 : index
    %16 = vector.load %arg3[%c0_16, %c0_17, %c2, %c0_18, %c0_19] : memref<1x3x3x4x4xf32, #tpu.memory_space<vmem>>, vector<1x1x1x4x4xf32>
    %17 = vector.shape_cast %16 : vector<1x1x1x4x4xf32> to vector<4x4xf32>
    %cst_20 = arith.constant dense<0.000000e+00> : vector<384x4xf32>
    %18 = tpu.matmul %15, %17, %cst_20 {dimension_numbers = #tpu.dot_dimension_numbers<[1], [0], [0], [1], [0, 0, 1, 1], [], []>} : vector<384x4xf32>, vector<4x4xf32>, vector<384x4xf32> -> vector<384x4xf32>
    %19 = arith.addf %14, %18 : vector<384x4xf32>
    %c47 = arith.constant 47 : index
    %c0_21 = arith.constant 0 : index
    %20 = vector.load %arg6[%c47, %c0_21] : memref<464x4xf32, #tpu.memory_space<vmem>>, vector<384x4xf32>
    %c0_22 = arith.constant 0 : index
    %c1_23 = arith.constant 1 : index
    %c0_24 = arith.constant 0 : index
    %c0_25 = arith.constant 0 : index
    %c0_26 = arith.constant 0 : index
    %21 = vector.load %arg3[%c0_22, %c1_23, %c0_24, %c0_25, %c0_26] : memref<1x3x3x4x4xf32, #tpu.memory_space<vmem>>, vector<1x1x1x4x4xf32>
    %22 = vector.shape_cast %21 : vector<1x1x1x4x4xf32> to vector<4x4xf32>
    %cst_27 = arith.constant dense<0.000000e+00> : vector<384x4xf32>
    %23 = tpu.matmul %20, %22, %cst_27 {dimension_numbers = #tpu.dot_dimension_numbers<[1], [0], [0], [1], [0, 0, 1, 1], [], []>} : vector<384x4xf32>, vector<4x4xf32>, vector<384x4xf32> -> vector<384x4xf32>
    %24 = arith.addf %19, %23 : vector<384x4xf32>
    %c48 = arith.constant 48 : index
    %c0_28 = arith.constant 0 : index
    %25 = vector.load %arg6[%c48, %c0_28] : memref<464x4xf32, #tpu.memory_space<vmem>>, vector<384x4xf32>
    %c0_29 = arith.constant 0 : index
    %c1_30 = arith.constant 1 : index
    %c1_31 = arith.constant 1 : index
    %c0_32 = arith.constant 0 : index
    %c0_33 = arith.constant 0 : index
    %26 = vector.load %arg3[%c0_29, %c1_30, %c1_31, %c0_32, %c0_33] : memref<1x3x3x4x4xf32, #tpu.memory_space<vmem>>, vector<1x1x1x4x4xf32>
    %27 = vector.shape_cast %26 : vector<1x1x1x4x4xf32> to vector<4x4xf32>
    %cst_34 = arith.constant dense<0.000000e+00> : vector<384x4xf32>
    %28 = tpu.matmul %25, %27, %cst_34 {dimension_numbers = #tpu.dot_dimension_numbers<[1], [0], [0], [1], [0, 0, 1, 1], [], []>} : vector<384x4xf32>, vector<4x4xf32>, vector<384x4xf32> -> vector<384x4xf32>
    %29 = arith.addf %24, %28 : vector<384x4xf32>
    %c49 = arith.constant 49 : index
    %c0_35 = arith.constant 0 : index
    %30 = vector.load %arg6[%c49, %c0_35] : memref<464x4xf32, #tpu.memory_space<vmem>>, vector<384x4xf32>
    %c0_36 = arith.constant 0 : index
    %c1_37 = arith.constant 1 : index
    %c2_38 = arith.constant 2 : index
    %c0_39 = arith.constant 0 : index
    %c0_40 = arith.constant 0 : index
    %31 = vector.load %arg3[%c0_36, %c1_37, %c2_38, %c0_39, %c0_40] : memref<1x3x3x4x4xf32, #tpu.memory_space<vmem>>, vector<1x1x1x4x4xf32>
    %32 = vector.shape_cast %31 : vector<1x1x1x4x4xf32> to vector<4x4xf32>
    %cst_41 = arith.constant dense<0.000000e+00> : vector<384x4xf32>
    %33 = tpu.matmul %30, %32, %cst_41 {dimension_numbers = #tpu.dot_dimension_numbers<[1], [0], [0], [1], [0, 0, 1, 1], [], []>} : vector<384x4xf32>, vector<4x4xf32>, vector<384x4xf32> -> vector<384x4xf32>
    %34 = arith.addf %29, %33 : vector<384x4xf32>
    %c71 = arith.constant 71 : index
    %c0_42 = arith.constant 0 : index
    %35 = vector.load %arg6[%c71, %c0_42] : memref<464x4xf32, #tpu.memory_space<vmem>>, vector<384x4xf32>
    %c0_43 = arith.constant 0 : index
    %c2_44 = arith.constant 2 : index
    %c0_45 = arith.constant 0 : index
    %c0_46 = arith.constant 0 : index
    %c0_47 = arith.constant 0 : index
    %36 = vector.load %arg3[%c0_43, %c2_44, %c0_45, %c0_46, %c0_47] : memref<1x3x3x4x4xf32, #tpu.memory_space<vmem>>, vector<1x1x1x4x4xf32>
    %37 = vector.shape_cast %36 : vector<1x1x1x4x4xf32> to vector<4x4xf32>
    %cst_48 = arith.constant dense<0.000000e+00> : vector<384x4xf32>
    %38 = tpu.matmul %35, %37, %cst_48 {dimension_numbers = #tpu.dot_dimension_numbers<[1], [0], [0], [1], [0, 0, 1, 1], [], []>} : vector<384x4xf32>, vector<4x4xf32>, vector<384x4xf32> -> vector<384x4xf32>
    %39 = arith.addf %34, %38 : vector<384x4xf32>
    %c72 = arith.constant 72 : index
    %c0_49 = arith.constant 0 : index
    %40 = vector.load %arg6[%c72, %c0_49] : memref<464x4xf32, #tpu.memory_space<vmem>>, vector<384x4xf32>
    %c0_50 = arith.constant 0 : index
    %c2_51 = arith.constant 2 : index
    %c1_52 = arith.constant 1 : index
    %c0_53 = arith.constant 0 : index
    %c0_54 = arith.constant 0 : index
    %41 = vector.load %arg3[%c0_50, %c2_51, %c1_52, %c0_53, %c0_54] : memref<1x3x3x4x4xf32, #tpu.memory_space<vmem>>, vector<1x1x1x4x4xf32>
    %42 = vector.shape_cast %41 : vector<1x1x1x4x4xf32> to vector<4x4xf32>
    %cst_55 = arith.constant dense<0.000000e+00> : vector<384x4xf32>
    %43 = tpu.matmul %40, %42, %cst_55 {dimension_numbers = #tpu.dot_dimension_numbers<[1], [0], [0], [1], [0, 0, 1, 1], [], []>} : vector<384x4xf32>, vector<4x4xf32>, vector<384x4xf32> -> vector<384x4xf32>
    %44 = arith.addf %39, %43 : vector<384x4xf32>
    %c73 = arith.constant 73 : index
    %c0_56 = arith.constant 0 : index
    %45 = vector.load %arg6[%c73, %c0_56] : memref<464x4xf32, #tpu.memory_space<vmem>>, vector<384x4xf32>
    %c0_57 = arith.constant 0 : index
    %c2_58 = arith.constant 2 : index
    %c2_59 = arith.constant 2 : index
    %c0_60 = arith.constant 0 : index
    %c0_61 = arith.constant 0 : index
    %46 = vector.load %arg3[%c0_57, %c2_58, %c2_59, %c0_60, %c0_61] : memref<1x3x3x4x4xf32, #tpu.memory_space<vmem>>, vector<1x1x1x4x4xf32>
    %47 = vector.shape_cast %46 : vector<1x1x1x4x4xf32> to vector<4x4xf32>
    %cst_62 = arith.constant dense<0.000000e+00> : vector<384x4xf32>
    %48 = tpu.matmul %45, %47, %cst_62 {dimension_numbers = #tpu.dot_dimension_numbers<[1], [0], [0], [1], [0, 0, 1, 1], [], []>} : vector<384x4xf32>, vector<4x4xf32>, vector<384x4xf32> -> vector<384x4xf32>
    %49 = arith.addf %44, %48 : vector<384x4xf32>
    %cst_63 = arith.constant 0.000000e+00 : f32
    %50 = vector.broadcast %cst_63 : f32 to vector<384x4xf32>
    %51 = arith.maximumf %49, %50 : vector<384x4xf32>
    %52 = arith.mulf %51, %3 : vector<384x4xf32>
    %c48_64 = arith.constant 48 : index
    %c0_65 = arith.constant 0 : index
    %53 = vector.load %arg7[%c48_64, %c0_65] : memref<464x4xf32, #tpu.memory_space<vmem>>, vector<384x4xf32>
    tpu.vector_store %arg7[%c48_64, %c0_65], %52 {strides = array<i32>} : memref<464x4xf32, #tpu.memory_space<vmem>>, vector<384x4xf32>,
    %cst_66 = arith.constant 0.000000e+00 : f32
    %54 = vector.broadcast %cst_66 : f32 to vector<384x4xf32>
    %c23_67 = arith.constant 23 : index
    %c0_68 = arith.constant 0 : index
    %55 = vector.load %arg7[%c23_67, %c0_68] : memref<464x4xf32, #tpu.memory_space<vmem>>, vector<384x4xf32>
    %c0_69 = arith.constant 0 : index
    %c0_70 = arith.constant 0 : index
    %c0_71 = arith.constant 0 : index
    %c0_72 = arith.constant 0 : index
    %c0_73 = arith.constant 0 : index
    %56 = vector.load %arg4[%c0_69, %c0_70, %c0_71, %c0_72, %c0_73] : memref<1x3x3x4x4xf32, #tpu.memory_space<vmem>>, vector<1x1x1x4x4xf32>
    %57 = vector.shape_cast %56 : vector<1x1x1x4x4xf32> to vector<4x4xf32>
    %cst_74 = arith.constant dense<0.000000e+00> : vector<384x4xf32>
    %58 = tpu.matmul %55, %57, %cst_74 {dimension_numbers = #tpu.dot_dimension_numbers<[1], [0], [0], [1], [0, 0, 1, 1], [], []>} : vector<384x4xf32>, vector<4x4xf32>, vector<384x4xf32> -> vector<384x4xf32>
    %59 = arith.addf %54, %58 : vector<384x4xf32>
    %c24_75 = arith.constant 24 : index
    %c0_76 = arith.constant 0 : index
    %60 = vector.load %arg7[%c24_75, %c0_76] : memref<464x4xf32, #tpu.memory_space<vmem>>, vector<384x4xf32>
    %c0_77 = arith.constant 0 : index
    %c0_78 = arith.constant 0 : index
    %c1_79 = arith.constant 1 : index
    %c0_80 = arith.constant 0 : index
    %c0_81 = arith.constant 0 : index
    %61 = vector.load %arg4[%c0_77, %c0_78, %c1_79, %c0_80, %c0_81] : memref<1x3x3x4x4xf32, #tpu.memory_space<vmem>>, vector<1x1x1x4x4xf32>
    %62 = vector.shape_cast %61 : vector<1x1x1x4x4xf32> to vector<4x4xf32>
    %cst_82 = arith.constant dense<0.000000e+00> : vector<384x4xf32>
    %63 = tpu.matmul %60, %62, %cst_82 {dimension_numbers = #tpu.dot_dimension_numbers<[1], [0], [0], [1], [0, 0, 1, 1], [], []>} : vector<384x4xf32>, vector<4x4xf32>, vector<384x4xf32> -> vector<384x4xf32>
    %64 = arith.addf %59, %63 : vector<384x4xf32>
    %c25_83 = arith.constant 25 : index
    %c0_84 = arith.constant 0 : index
    %65 = vector.load %arg7[%c25_83, %c0_84] : memref<464x4xf32, #tpu.memory_space<vmem>>, vector<384x4xf32>
    %c0_85 = arith.constant 0 : index
    %c0_86 = arith.constant 0 : index
    %c2_87 = arith.constant 2 : index
    %c0_88 = arith.constant 0 : index
    %c0_89 = arith.constant 0 : index
    %66 = vector.load %arg4[%c0_85, %c0_86, %c2_87, %c0_88, %c0_89] : memref<1x3x3x4x4xf32, #tpu.memory_space<vmem>>, vector<1x1x1x4x4xf32>
    %67 = vector.shape_cast %66 : vector<1x1x1x4x4xf32> to vector<4x4xf32>
    %cst_90 = arith.constant dense<0.000000e+00> : vector<384x4xf32>
    %68 = tpu.matmul %65, %67, %cst_90 {dimension_numbers = #tpu.dot_dimension_numbers<[1], [0], [0], [1], [0, 0, 1, 1], [], []>} : vector<384x4xf32>, vector<4x4xf32>, vector<384x4xf32> -> vector<384x4xf32>
    %69 = arith.addf %64, %68 : vector<384x4xf32>
    %c47_91 = arith.constant 47 : index
    %c0_92 = arith.constant 0 : index
    %70 = vector.load %arg7[%c47_91, %c0_92] : memref<464x4xf32, #tpu.memory_space<vmem>>, vector<384x4xf32>
    %c0_93 = arith.constant 0 : index
    %c1_94 = arith.constant 1 : index
    %c0_95 = arith.constant 0 : index
    %c0_96 = arith.constant 0 : index
    %c0_97 = arith.constant 0 : index
    %71 = vector.load %arg4[%c0_93, %c1_94, %c0_95, %c0_96, %c0_97] : memref<1x3x3x4x4xf32, #tpu.memory_space<vmem>>, vector<1x1x1x4x4xf32>
    %72 = vector.shape_cast %71 : vector<1x1x1x4x4xf32> to vector<4x4xf32>
    %cst_98 = arith.constant dense<0.000000e+00> : vector<384x4xf32>
    %73 = tpu.matmul %70, %72, %cst_98 {dimension_numbers = #tpu.dot_dimension_numbers<[1], [0], [0], [1], [0, 0, 1, 1], [], []>} : vector<384x4xf32>, vector<4x4xf32>, vector<384x4xf32> -> vector<384x4xf32>
    %74 = arith.addf %69, %73 : vector<384x4xf32>
    %c48_99 = arith.constant 48 : index
    %c0_100 = arith.constant 0 : index
    %75 = vector.load %arg7[%c48_99, %c0_100] : memref<464x4xf32, #tpu.memory_space<vmem>>, vector<384x4xf32>
    %c0_101 = arith.constant 0 : index
    %c1_102 = arith.constant 1 : index
    %c1_103 = arith.constant 1 : index
    %c0_104 = arith.constant 0 : index
    %c0_105 = arith.constant 0 : index
    %76 = vector.load %arg4[%c0_101, %c1_102, %c1_103, %c0_104, %c0_105] : memref<1x3x3x4x4xf32, #tpu.memory_space<vmem>>, vector<1x1x1x4x4xf32>
    %77 = vector.shape_cast %76 : vector<1x1x1x4x4xf32> to vector<4x4xf32>
    %cst_106 = arith.constant dense<0.000000e+00> : vector<384x4xf32>
    %78 = tpu.matmul %75, %77, %cst_106 {dimension_numbers = #tpu.dot_dimension_numbers<[1], [0], [0], [1], [0, 0, 1, 1], [], []>} : vector<384x4xf32>, vector<4x4xf32>, vector<384x4xf32> -> vector<384x4xf32>
    %79 = arith.addf %74, %78 : vector<384x4xf32>
    %c49_107 = arith.constant 49 : index
    %c0_108 = arith.constant 0 : index
    %80 = vector.load %arg7[%c49_107, %c0_108] : memref<464x4xf32, #tpu.memory_space<vmem>>, vector<384x4xf32>
    %c0_109 = arith.constant 0 : index
    %c1_110 = arith.constant 1 : index
    %c2_111 = arith.constant 2 : index
    %c0_112 = arith.constant 0 : index
    %c0_113 = arith.constant 0 : index
    %81 = vector.load %arg4[%c0_109, %c1_110, %c2_111, %c0_112, %c0_113] : memref<1x3x3x4x4xf32, #tpu.memory_space<vmem>>, vector<1x1x1x4x4xf32>
    %82 = vector.shape_cast %81 : vector<1x1x1x4x4xf32> to vector<4x4xf32>
    %cst_114 = arith.constant dense<0.000000e+00> : vector<384x4xf32>
    %83 = tpu.matmul %80, %82, %cst_114 {dimension_numbers = #tpu.dot_dimension_numbers<[1], [0], [0], [1], [0, 0, 1, 1], [], []>} : vector<384x4xf32>, vector<4x4xf32>, vector<384x4xf32> -> vector<384x4xf32>
    %84 = arith.addf %79, %83 : vector<384x4xf32>
    %c71_115 = arith.constant 71 : index
    %c0_116 = arith.constant 0 : index
    %85 = vector.load %arg7[%c71_115, %c0_116] : memref<464x4xf32, #tpu.memory_space<vmem>>, vector<384x4xf32>
    %c0_117 = arith.constant 0 : index
    %c2_118 = arith.constant 2 : index
    %c0_119 = arith.constant 0 : index
    %c0_120 = arith.constant 0 : index
    %c0_121 = arith.constant 0 : index
    %86 = vector.load %arg4[%c0_117, %c2_118, %c0_119, %c0_120, %c0_121] : memref<1x3x3x4x4xf32, #tpu.memory_space<vmem>>, vector<1x1x1x4x4xf32>
    %87 = vector.shape_cast %86 : vector<1x1x1x4x4xf32> to vector<4x4xf32>
    %cst_122 = arith.constant dense<0.000000e+00> : vector<384x4xf32>
    %88 = tpu.matmul %85, %87, %cst_122 {dimension_numbers = #tpu.dot_dimension_numbers<[1], [0], [0], [1], [0, 0, 1, 1], [], []>} : vector<384x4xf32>, vector<4x4xf32>, vector<384x4xf32> -> vector<384x4xf32>
    %89 = arith.addf %84, %88 : vector<384x4xf32>
    %c72_123 = arith.constant 72 : index
    %c0_124 = arith.constant 0 : index
    %90 = vector.load %arg7[%c72_123, %c0_124] : memref<464x4xf32, #tpu.memory_space<vmem>>, vector<384x4xf32>
    %c0_125 = arith.constant 0 : index
    %c2_126 = arith.constant 2 : index
    %c1_127 = arith.constant 1 : index
    %c0_128 = arith.constant 0 : index
    %c0_129 = arith.constant 0 : index
    %91 = vector.load %arg4[%c0_125, %c2_126, %c1_127, %c0_128, %c0_129] : memref<1x3x3x4x4xf32, #tpu.memory_space<vmem>>, vector<1x1x1x4x4xf32>
    %92 = vector.shape_cast %91 : vector<1x1x1x4x4xf32> to vector<4x4xf32>
    %cst_130 = arith.constant dense<0.000000e+00> : vector<384x4xf32>
    %93 = tpu.matmul %90, %92, %cst_130 {dimension_numbers = #tpu.dot_dimension_numbers<[1], [0], [0], [1], [0, 0, 1, 1], [], []>} : vector<384x4xf32>, vector<4x4xf32>, vector<384x4xf32> -> vector<384x4xf32>
    %94 = arith.addf %89, %93 : vector<384x4xf32>
    %c73_131 = arith.constant 73 : index
    %c0_132 = arith.constant 0 : index
    %95 = vector.load %arg7[%c73_131, %c0_132] : memref<464x4xf32, #tpu.memory_space<vmem>>, vector<384x4xf32>
    %c0_133 = arith.constant 0 : index
    %c2_134 = arith.constant 2 : index
    %c2_135 = arith.constant 2 : index
    %c0_136 = arith.constant 0 : index
    %c0_137 = arith.constant 0 : index
    %96 = vector.load %arg4[%c0_133, %c2_134, %c2_135, %c0_136, %c0_137] : memref<1x3x3x4x4xf32, #tpu.memory_space<vmem>>, vector<1x1x1x4x4xf32>
    %97 = vector.shape_cast %96 : vector<1x1x1x4x4xf32> to vector<4x4xf32>
    %cst_138 = arith.constant dense<0.000000e+00> : vector<384x4xf32>
    %98 = tpu.matmul %95, %97, %cst_138 {dimension_numbers = #tpu.dot_dimension_numbers<[1], [0], [0], [1], [0, 0, 1, 1], [], []>} : vector<384x4xf32>, vector<4x4xf32>, vector<384x4xf32> -> vector<384x4xf32>
    %99 = arith.addf %94, %98 : vector<384x4xf32>
    %c48_139 = arith.constant 48 : index
    %c0_140 = arith.constant 0 : index
    %100 = vector.load %arg6[%c48_139, %c0_140] : memref<464x4xf32, #tpu.memory_space<vmem>>, vector<384x4xf32>
    %101 = arith.addf %100, %99 : vector<384x4xf32>
    %102 = arith.mulf %101, %3 : vector<384x4xf32>
    %c48_141 = arith.constant 48 : index
    %c0_142 = arith.constant 0 : index
    %103 = vector.load %arg6[%c48_141, %c0_142] : memref<464x4xf32, #tpu.memory_space<vmem>>, vector<384x4xf32>
    tpu.vector_store %arg6[%c48_141, %c0_142], %102 {strides = array<i32>} : memref<464x4xf32, #tpu.memory_space<vmem>>, vector<384x4xf32>,
    %c1_i32 = arith.constant 1 : i32
    %104 = arith.cmpi eq, %arg1, %c1_i32 : i32
    %105 = arith.extui %104 : i1 to i32
    %c0_i32_143 = arith.constant 0 : i32
    %106 = arith.cmpi ne, %105, %c0_i32_143 : i32
    scf.if %106 {
      %c0_144 = arith.constant 0 : index
      %c0_145 = arith.constant 0 : index
      %c0_146 = arith.constant 0 : index
      %107 = vector.load %arg5[%c0_144, %c0_145, %c0_146] : memref<1x384x4xf32, #tpu.memory_space<vmem>>, vector<1x384x4xf32>
      %108 = vector.shape_cast %107 : vector<1x384x4xf32> to vector<384x4xf32>
      %109 = vector.shape_cast %102 : vector<384x4xf32> to vector<1x384x4xf32>
      tpu.vector_store %arg5[%c0_144, %c0_145, %c0_146], %109 {strides = array<i32>} : memref<1x384x4xf32, #tpu.memory_space<vmem>>, vector<1x384x4xf32>,
    } else {
    }
    return
  }
  func.func @transform_0(%arg0: i32, %arg1: i32) -> (i32, i32, i32) {
    %c0_i32 = arith.constant 0 : i32
    %c0_i32_0 = arith.constant 0 : i32
    %c0_i32_1 = arith.constant 0 : i32
    return %arg0, %c0_i32, %c0_i32_0 : i32, i32, i32
  }
  func.func @transform_1(%arg0: i32, %arg1: i32) -> (i32, i32, i32, i32, i32) {
    %c0_i32 = arith.constant 0 : i32
    %c0_i32_0 = arith.constant 0 : i32
    %c0_i32_1 = arith.constant 0 : i32
    %c0_i32_2 = arith.constant 0 : i32
    %c0_i32_3 = arith.constant 0 : i32
    return %arg1, %c0_i32, %c0_i32_0, %c0_i32_1, %c0_i32_2 : i32, i32, i32, i32, i32
  }
  func.func @transform_2(%arg0: i32, %arg1: i32) -> (i32, i32, i32, i32, i32) {
    %c0_i32 = arith.constant 0 : i32
    %c0_i32_0 = arith.constant 0 : i32
    %c0_i32_1 = arith.constant 0 : i32
    %c0_i32_2 = arith.constant 0 : i32
    %c0_i32_3 = arith.constant 0 : i32
    return %arg1, %c0_i32, %c0_i32_0, %c0_i32_1, %c0_i32_2 : i32, i32, i32, i32, i32
  }
  func.func @transform_3(%arg0: i32, %arg1: i32) -> (i32, i32, i32) {
    %c0_i32 = arith.constant 0 : i32
    %c0_i32_0 = arith.constant 0 : i32
    %c0_i32_1 = arith.constant 0 : i32
    return %arg0, %c0_i32, %c0_i32_0 : i32, i32, i32
  }
}

</mosaic_0001>

<bundles_post_ra>
// kernel: resblocks_forward.1
= control target key start
LH: loop header
LB: loop body
LE: loop exit
PB: predicated region body
PF: predicated region fallthrough
CT: control target
= control target key end

     0   :  { %s15872_s12 = smov 0   ;;  %s15874_s13 = smov 0   ;;  %s19312_s0 = inlined_call_operand.vmem [shape: f32[2,384,4], index: 0, kind: input, shape index: {}]   ;;  %s19313_s1 = inlined_call_operand.vmem [shape: f32[2,3,3,4,4], index: 1, kind: input, shape index: {}]   ;;  %s19314_s2 = inlined_call_operand.vmem [shape: f32[2,3,3,4,4], index: 2, kind: input, shape index: {}]   ;;  %s19315_s3 = inlined_call_operand.vmem [shape: f32[2,384,4], index: 3, kind: output, shape index: {}]  }
   0x1   :  { %s15876_s14 = smov 0   ;;  %s15878_s15 = smov 0  }
   0x2   :  { %s15880_s16 = smov 0  }
   0x3 LB: > { %s22_s17 = sadd.s32 1, %s15841_s14  ;;  %s25_s18 = sadd.s32 1, %s15845_s15  ;;  %s15849_s16 = sphi %s15880_s16, %s13_s16   ;;  %s15845_s15 = sphi %s15878_s15, %s19745_s15   ;;  %s15841_s14 = sphi %s15876_s14, %s19744_s14   ;;  %s15837_s13 = sphi %s15874_s13, %s19743_s13   ;;  %s15833_s12 = sphi %s15872_s12, %s19742_s12  }
   0x4   : > { %p23_p0 = scmp.ge.s32.totalorder %s22_s17, 2  ;;  %p11687_p1 = scmp.ge.s32.totalorder %s15849_s16, 1 }
   0x5   : > { %p169_p2 = scmp.lt.s32.totalorder %s15849_s16, 5 }
   0x6   : > { %s19747_s17 = smov (%p23_p0, %s22_s17), 0  ;;  %s19749_s18 = smov (!%p23_p0, %s25_s18), %s15845_s15 }
   0x7   : > { %p170_p3 = pnand %p11687_p1, %p169_p2  ;;  %p27_p4 = scmp.ge.s32.totalorder %s19749_s18, 2 }
   0x9   : > { %s19751_s18 = smov (%p27_p4, %s19749_s18), 0  ;;  %173 = sbr.rel (%p170_p3) target bundleno = 2300 (0x8fc), region = 32 }
  0x10   : > { %p203_p5 = scmp.lt.s32.totalorder %s15837_s13, 1  ;;  %p208_p6 = scmp.lt.s32.totalorder %s15833_s12, 1 }
  0x11   : > { %p11692_p7 = scmp.ne.s32.totalorder %s15833_s12, 0 }
  0x12   : > { %s19753_s13 = smov (!%p203_p5, %s15837_s13), 1  ;;  %vm227_vm0 = vcmask (!%p11692_p7), 31744   ;;  %v440_v3 = vlaneseq (!%p11692_p7)  ;;  %v15851_v4 = vmov (!%p11692_p7), 0.0  }
  0x13   : > { %s209_s19 = scalar_select %p208_p6, %s15833_s12, 1 }
  0x14   : > { %s15624_s20 = smul.u32 384, %s19753_s13  ;;  %234 = vst.msk [vmem:[#allocation2 + $0x30] sm:$0xff] (!%p11692_p7), %vm227_vm0, %v15851_v4  ;;  %230 = vst.msk [vmem:[#allocation2 + $0x10] sm:$0xff] (!%p11692_p7), %vm227_vm0, %v15851_v4  ;;  %v16176_v11 = vshrl.u32 (!%p11692_p7), %v440_v3, 7 }
  0x15   : > { %s15625_s21 = smul.u32 36, %s209_s19  ;;  %231 = vst.msk [vmem:[#allocation2 + $0x18] sm:$0xff] (!%p11692_p7), %vm227_vm0, %v15851_v4  ;;  %232 = vst.msk [vmem:[#allocation2 + $0x20] sm:$0xff] (!%p11692_p7), %vm227_vm0, %v15851_v4 }
  0x16   : > { %s15909_s24 = scalar_lea.vmem %s19312_s0, %s15624_s20  ;;  %s15914_s27 = scalar_lea.vmem %s19315_s3, %s15624_s20  ;;  %233 = vst.msk [vmem:[#allocation2 + $0x28] sm:$0xff] (!%p11692_p7), %vm227_vm0, %v15851_v4  ;;  %235 = vst.msk [vmem:[#allocation2 + $0x38] sm:$0xff] (!%p11692_p7), %vm227_vm0, %v15851_v4  ;;  %v16191_v18 = vmul.u32.u64.low (!%p11692_p7), 2863311531, %v16176_v11  ;;  %v16192_v19 = vmul.u32.u64.high 2863311531, %v16176_v11, %v16191_v18  ;;  %v16195_v20 = vadd.s32 (!%p11692_p7), 8, %v16176_v11  ;;  %v16204_v24 = vadd.s32 (!%p11692_p7), 16, %v16176_v11 }
  0x17   : > { %s15919_s30 = scalar_lea.vmem %s19313_s1, %s15625_s21  ;;  %s15924_s6 = scalar_lea.vmem %s19314_s2, %s15625_s21  ;;  %v15928_v0 = vld [vmem:[%s15909_s24] sm:$0xff] (!%p11692_p7)  ;;  %v15931_v1 = vld [vmem:[%s15909_s24 + $0x8] sm:$0xff] (!%p11692_p7)  ;;  %v15934_v2 = vld [vmem:[%s15909_s24 + $0x10] sm:$0xff] (!%p11692_p7)  ;;  %236 = vst.msk [vmem:[#allocation2 + $0x40] sm:$0xff] (!%p11692_p7), %vm227_vm0, %v15851_v4  ;;  %v16207_v25 = vadd.s32 (!%p11692_p7), 24, %v16176_v11  ;;  %v16210_v26 = vadd.s32 (!%p11692_p7), 32, %v16176_v11 }
  0x18   : > { %226 = sbr.rel (%p11692_p7) target bundleno = 230 (0xe6), region = 36  ;;  %237 = vst.msk [vmem:[#allocation2 + $0x48] sm:$0xff] (!%p11692_p7), %vm227_vm0, %v15851_v4  ;;  %238 = vst.msk [vmem:[#allocation2 + $0x50] sm:$0xff] (!%p11692_p7), %vm227_vm0, %v15851_v4  ;;  %v347_v5 = vld [vmem:[%s15909_s24 + $0x18] sm:$0xff] (!%p11692_p7)  ;;  %v348_v6 = vld [vmem:[%s15909_s24 + $0x20] sm:$0xff] (!%p11692_p7)  ;;  %v16223_v32 = vadd.s32 (!%p11692_p7), 40, %v16176_v11 }
  0x19   : > { %239 = vst.msk [vmem:[#allocation2 + $0x58] sm:$0xff] (!%p11692_p7), %vm227_vm0, %v15851_v4  ;;  %240 = vst.msk [vmem:[#allocation2 + $0x60] sm:$0xff] (!%p11692_p7), %vm227_vm0, %v15851_v4  ;;  %v349_v7 = vld [vmem:[%s15909_s24 + $0x28] sm:$0xff] (!%p11692_p7)  ;;  %v350_v8 = vld [vmem:[%s15909_s24 + $0x30] sm:$0xff] (!%p11692_p7)  ;;  %v16219_v30 = vmul.u32.u64.low (!%p11692_p7), 2863311531, %v16195_v20  ;;  %v16220_v31 = vmul.u32.u64.high 2863311531, %v16195_v20, %v16219_v30 }
  0x1a   : > { %241 = vst.msk [vmem:[#allocation2 + $0x68] sm:$0xff] (!%p11692_p7), %vm227_vm0, %v15851_v4  ;;  %242 = vst.msk [vmem:[#allocation2 + $0x70] sm:$0xff] (!%p11692_p7), %vm227_vm0, %v15851_v4  ;;  %v351_v9 = vld [vmem:[%s15909_s24 + $0x38] sm:$0xff] (!%p11692_p7)  ;;  %v352_v10 = vld [vmem:[%s15909_s24 + $0x40] sm:$0xff] (!%p11692_p7)  ;;  %v16232_v36 = vmul.u32.u64.low (!%p11692_p7), 2863311531, %v16204_v24  ;;  %v16233_v37 = vmul.u32.u64.high 2863311531, %v16204_v24, %v16232_v36 }
  0x1b   : > { %243 = vst.msk [vmem:[#allocation2 + $0x78] sm:$0xff] (!%p11692_p7), %vm227_vm0, %v15851_v4  ;;  %244 = vst.msk [vmem:[#allocation2 + $0x80] sm:$0xff] (!%p11692_p7), %vm227_vm0, %v15851_v4  ;;  %v353_v12 = vld [vmem:[%s15909_s24 + $0x48] sm:$0xff] (!%p11692_p7)  ;;  %v354_v13 = vld [vmem:[%s15909_s24 + $0x50] sm:$0xff] (!%p11692_p7)  ;;  %v16236_v38 = vadd.s32 (!%p11692_p7), 48, %v16176_v11  ;;  %v495_v42 = vshrl.u32 (!%p11692_p7), %v16192_v19, 4 }
  0x1c   : > { %245 = vst.msk [vmem:[#allocation2 + $0x88] sm:$0xff] (!%p11692_p7), %vm227_vm0, %v15851_v4  ;;  %246 = vst.msk [vmem:[#allocation2 + $0x90] sm:$0xff] (!%p11692_p7), %vm227_vm0, %v15851_v4  ;;  %v355_v14 = vld [vmem:[%s15909_s24 + $0x58] sm:$0xff] (!%p11692_p7)  ;;  %v356_v15 = vld [vmem:[%s15909_s24 + $0x60] sm:$0xff] (!%p11692_p7)  ;;  %v16246_v43 = vmul.u32.u64.low (!%p11692_p7), 2863311531, %v16207_v25  ;;  %v16247_v44 = vmul.u32.u64.high 2863311531, %v16207_v25, %v16246_v43 }
  0x1d   : > { %247 = vst.msk [vmem:[#allocation2 + $0x98] sm:$0xff] (!%p11692_p7), %vm227_vm0, %v15851_v4  ;;  %248 = vst.msk [vmem:[#allocation2 + $0xa0] sm:$0xff] (!%p11692_p7), %vm227_vm0, %v15851_v4  ;;  %v357_v16 = vld [vmem:[%s15909_s24 + $0x68] sm:$0xff] (!%p11692_p7)  ;;  %v358_v17 = vld [vmem:[%s15909_s24 + $0x70] sm:$0xff] (!%p11692_p7)  ;;  %v16256_v48 = vmul.u32.u64.low (!%p11692_p7), 2863311531, %v16210_v26  ;;  %v16257_v49 = vmul.u32.u64.high 2863311531, %v16210_v26, %v16256_v48 }
  0x1e   : > { %249 = vst.msk [vmem:[#allocation2 + $0xa8] sm:$0xff] (!%p11692_p7), %vm227_vm0, %v15851_v4  ;;  %250 = vst.msk [vmem:[#allocation2 + $0xb0] sm:$0xff] (!%p11692_p7), %vm227_vm0, %v15851_v4  ;;  %v359_v21 = vld [vmem:[%s15909_s24 + $0x78] sm:$0xff] (!%p11692_p7)  ;;  %v360_v22 = vld [vmem:[%s15909_s24 + $0x80] sm:$0xff] (!%p11692_p7)  ;;  %v16260_v50 = vadd.s32 (!%p11692_p7), 56, %v16176_v11  ;;  %v496_v54 = vmul.u32 (!%p11692_p7), 24, %v495_v42 }
  0x1f   : > { %251 = vst.msk [vmem:[#allocation2 + $0xb8] sm:$0xff] %vm227_vm0, %v15851_v4  ;;  %252 = vst.msk [vmem:[#allocation2 + $0xc0] sm:$0xff] %vm227_vm0, %v15851_v4  ;;  %v361_v23 = vld [vmem:[%s15909_s24 + $0x88] sm:$0xff]  ;;  %v362_v27 = vld [vmem:[%s15909_s24 + $0x90] sm:$0xff]  ;;  %v506_v55 = vshrl.u32 %v16220_v31, 4  ;;  %v16270_v56 = vadd.s32 64, %v16176_v11 }
  0x20   : > { %253 = vst.msk [vmem:[#allocation2 + $0xc8] sm:$0xff] %vm227_vm0, %v15851_v4  ;;  %254 = vst.msk [vmem:[#allocation2 + $0xd0] sm:$0xff] %vm227_vm0, %v15851_v4  ;;  %v363_v28 = vld [vmem:[%s15909_s24 + $0x98] sm:$0xff]  ;;  %v364_v29 = vld [vmem:[%s15909_s24 + $0xa0] sm:$0xff]  ;;  %v517_v60 = vshrl.u32 %v16233_v37, 4  ;;  %v16325_v30 = vadd.s32 88, %v16176_v11 }
  0x21   : > { %255 = vst.msk [vmem:[#allocation2 + $0xd8] sm:$0xff] %vm227_vm0, %v15851_v4  ;;  %256 = vst.msk [vmem:[#allocation2 + $0xe0] sm:$0xff] %vm227_vm0, %v15851_v4  ;;  %v365_v33 = vld [vmem:[%s15909_s24 + $0xa8] sm:$0xff]  ;;  %v366_v34 = vld [vmem:[%s15909_s24 + $0xb0] sm:$0xff]  ;;  %v16280_v61 = vmul.u32.u64.low 2863311531, %v16223_v32  ;;  %v16281_v62 = vmul.u32.u64.high 2863311531, %v16223_v32, %v16280_v61 }
  0x22   : > { %257 = vst.msk [vmem:[#allocation2 + $0xe8] sm:$0xff] %vm227_vm0, %v15851_v4  ;;  %258 = vst.msk [vmem:[#allocation2 + $0xf0] sm:$0xff] %vm227_vm0, %v15851_v4  ;;  %v367_v35 = vld [vmem:[%s15909_s24 + $0xb8] sm:$0xff]  ;;  %v368_v39 = vld [vmem:[%s15909_s24 + $0xc0] sm:$0xff]  ;;  %v507_v3 = vmul.u32 24, %v506_v55  ;;  %v16345_v48 = vadd.s32 96, %v16176_v11 }
  0x23   : > { %259 = vst.msk [vmem:[#allocation2 + $0xf8] sm:$0xff] %vm227_vm0, %v15851_v4  ;;  %260 = vst.msk [vmem:[#allocation2 + $0x100] sm:$0xff] %vm227_vm0, %v15851_v4  ;;  %v369_v40 = vld [vmem:[%s15909_s24 + $0xc8] sm:$0xff]  ;;  %v370_v41 = vld [vmem:[%s15909_s24 + $0xd0] sm:$0xff] }
  0x24   : > { %261 = vst.msk [vmem:[#allocation2 + $0x108] sm:$0xff] %vm227_vm0, %v15851_v4  ;;  %262 = vst.msk [vmem:[#allocation2 + $0x110] sm:$0xff] %vm227_vm0, %v15851_v4  ;;  %v371_v45 = vld [vmem:[%s15909_s24 + $0xd8] sm:$0xff]  ;;  %v372_v46 = vld [vmem:[%s15909_s24 + $0xe0] sm:$0xff]  ;;  %v508_v18 = vsub.s32 %v16195_v20, %v507_v3 }
  0x25   : > { %263 = vst.msk [vmem:[#allocation2 + $0x118] sm:$0xff] %vm227_vm0, %v15851_v4  ;;  %264 = vst.msk [vmem:[#allocation2 + $0x120] sm:$0xff] %vm227_vm0, %v15851_v4  ;;  %v373_v47 = vld [vmem:[%s15909_s24 + $0xe8] sm:$0xff]  ;;  %v374_v51 = vld [vmem:[%s15909_s24 + $0xf0] sm:$0xff] }
  0x26   : > { %265 = vst.msk [vmem:[#allocation2 + $0x128] sm:$0xff] %vm227_vm0, %v15851_v4  ;;  %266 = vst.msk [vmem:[#allocation2 + $0x130] sm:$0xff] %vm227_vm0, %v15851_v4  ;;  %v375_v52 = vld [vmem:[%s15909_s24 + $0xf8] sm:$0xff]  ;;  %v376_v53 = vld [vmem:[%s15909_s24 + $0x100] sm:$0xff]  ;;  %vm1018_vm4 = vcmp.ne.s32.totalorder %v508_v18, 0  ;;  %vm1066_vm5 = vcmp.lt.s32.totalorder %v508_v18, 0 }
  0x27   : > { %267 = vst.msk [vmem:[#allocation2 + $0x138] sm:$0xff] %vm227_vm0, %v15851_v4  ;;  %268 = vst.msk [vmem:[#allocation2 + $0x140] sm:$0xff] %vm227_vm0, %v15851_v4  ;;  %v377_v57 = vld [vmem:[%s15909_s24 + $0x108] sm:$0xff]  ;;  %v378_v58 = vld [vmem:[%s15909_s24 + $0x110] sm:$0xff]  ;;  %v1162_v20 = vadd.s32 24, %v508_v18 }
  0x28   : > { %269 = vst.msk [vmem:[#allocation2 + $0x148] sm:$0xff] %vm227_vm0, %v15851_v4  ;;  %270 = vst.msk [vmem:[#allocation2 + $0x150] sm:$0xff] %vm227_vm0, %v15851_v4  ;;  %v379_v59 = vld [vmem:[%s15909_s24 + $0x118] sm:$0xff]  ;;  %v380_v63 = vld [vmem:[%s15909_s24 + $0x120] sm:$0xff] }
  0x29   : > { %271 = vst.msk [vmem:[#allocation2 + $0x158] sm:$0xff] %vm227_vm0, %v15851_v4  ;;  %272 = vst.msk [vmem:[#allocation2 + $0x160] sm:$0xff] %vm227_vm0, %v15851_v4  ;;  %v389_v19 = vld [vmem:[%s15909_s24 + $0x168] sm:$0xff] }
  0x2a   : > { %273 = vst.msk [vmem:[#allocation2 + $0x168] sm:$0xff] %vm227_vm0, %v15851_v4  ;;  %274 = vst.msk [vmem:[#allocation2 + $0x170] sm:$0xff] %vm227_vm0, %v15851_v4 }
  0x2b   : > { %275 = vst.msk [vmem:[#allocation2 + $0x178] sm:$0xff] %vm227_vm0, %v15851_v4  ;;  %276 = vst.msk [vmem:[#allocation2 + $0x180] sm:$0xff] %vm227_vm0, %v15851_v4 }
  0x2c   : > { %277 = vst.msk [vmem:[#allocation2 + $0x188] sm:$0xff] %vm227_vm0, %v15851_v4  ;;  %278 = vst.msk [vmem:[#allocation2 + $0x190] sm:$0xff] %vm227_vm0, %v15851_v4 }
  0x2d   : > { %279 = vst.msk [vmem:[#allocation2 + $0x198] sm:$0xff] %vm227_vm0, %v15851_v4  ;;  %280 = vst.msk [vmem:[#allocation2 + $0x1a0] sm:$0xff] %vm227_vm0, %v15851_v4 }
  0x2e   : > { %281 = vst.msk [vmem:[#allocation2 + $0x1a8] sm:$0xff] %vm227_vm0, %v15851_v4  ;;  %282 = vst.msk [vmem:[#allocation2 + $0x1b0] sm:$0xff] %vm227_vm0, %v15851_v4 }
  0x2f   : > { %283 = vst.msk [vmem:[#allocation2 + $0x1b8] sm:$0xff] %vm227_vm0, %v15851_v4  ;;  %284 = vst.msk [vmem:[#allocation2 + $0x1c0] sm:$0xff] %vm227_vm0, %v15851_v4 }
  0x30   : > { %285 = vst.msk [vmem:[#allocation2 + $0x1c8] sm:$0xff] %vm227_vm0, %v15851_v4  ;;  %288 = vst.msk [vmem:[#allocation3 + $0x10] sm:$0xff] %vm227_vm0, %v15851_v4 }
  0x31   : > { %289 = vst.msk [vmem:[#allocation3 + $0x18] sm:$0xff] %vm227_vm0, %v15851_v4  ;;  %290 = vst.msk [vmem:[#allocation3 + $0x20] sm:$0xff] %vm227_vm0, %v15851_v4 }
  0x32   : > { %291 = vst.msk [vmem:[#allocation3 + $0x28] sm:$0xff] %vm227_vm0, %v15851_v4  ;;  %292 = vst.msk [vmem:[#allocation3 + $0x30] sm:$0xff] %vm227_vm0, %v15851_v4 }
  0x33   : > { %293 = vst.msk [vmem:[#allocation3 + $0x38] sm:$0xff] %vm227_vm0, %v15851_v4  ;;  %294 = vst.msk [vmem:[#allocation3 + $0x40] sm:$0xff] %vm227_vm0, %v15851_v4 }
  0x34   : > { %295 = vst.msk [vmem:[#allocation3 + $0x48] sm:$0xff] %vm227_vm0, %v15851_v4  ;;  %296 = vst.msk [vmem:[#allocation3 + $0x50] sm:$0xff] %vm227_vm0, %v15851_v4 }
  0x35   : > { %297 = vst.msk [vmem:[#allocation3 + $0x58] sm:$0xff] %vm227_vm0, %v15851_v4  ;;  %298 = vst.msk [vmem:[#allocation3 + $0x60] sm:$0xff] %vm227_vm0, %v15851_v4 }
  0x36   : > { %299 = vst.msk [vmem:[#allocation3 + $0x68] sm:$0xff] %vm227_vm0, %v15851_v4  ;;  %300 = vst.msk [vmem:[#allocation3 + $0x70] sm:$0xff] %vm227_vm0, %v15851_v4 }
  0x37   : > { %301 = vst.msk [vmem:[#allocation3 + $0x78] sm:$0xff] %vm227_vm0, %v15851_v4  ;;  %302 = vst.msk [vmem:[#allocation3 + $0x80] sm:$0xff] %vm227_vm0, %v15851_v4 }
  0x38   : > { %303 = vst.msk [vmem:[#allocation3 + $0x88] sm:$0xff] %vm227_vm0, %v15851_v4  ;;  %304 = vst.msk [vmem:[#allocation3 + $0x90] sm:$0xff] %vm227_vm0, %v15851_v4 }
  0x39   : > { %305 = vst.msk [vmem:[#allocation3 + $0x98] sm:$0xff] %vm227_vm0, %v15851_v4  ;;  %306 = vst.msk [vmem:[#allocation3 + $0xa0] sm:$0xff] %vm227_vm0, %v15851_v4 }
  0x3a   : > { %307 = vst.msk [vmem:[#allocation3 + $0xa8] sm:$0xff] %vm227_vm0, %v15851_v4  ;;  %308 = vst.msk [vmem:[#allocation3 + $0xb0] sm:$0xff] %vm227_vm0, %v15851_v4 }
  0x3b   : > { %309 = vst.msk [vmem:[#allocation3 + $0xb8] sm:$0xff] %vm227_vm0, %v15851_v4  ;;  %310 = vst.msk [vmem:[#allocation3 + $0xc0] sm:$0xff] %vm227_vm0, %v15851_v4 }
  0x3c   : > { %311 = vst.msk [vmem:[#allocation3 + $0xc8] sm:$0xff] %vm227_vm0, %v15851_v4  ;;  %312 = vst.msk [vmem:[#allocation3 + $0xd0] sm:$0xff] %vm227_vm0, %v15851_v4 }
  0x3d   : > { %313 = vst.msk [vmem:[#allocation3 + $0xd8] sm:$0xff] %vm227_vm0, %v15851_v4  ;;  %314 = vst.msk [vmem:[#allocation3 + $0xe0] sm:$0xff] %vm227_vm0, %v15851_v4 }
  0x3e   : > { %315 = vst.msk [vmem:[#allocation3 + $0xe8] sm:$0xff] %vm227_vm0, %v15851_v4  ;;  %316 = vst.msk [vmem:[#allocation3 + $0xf0] sm:$0xff] %vm227_vm0, %v15851_v4 }
  0x3f   : > { %317 = vst.msk [vmem:[#allocation3 + $0xf8] sm:$0xff] %vm227_vm0, %v15851_v4  ;;  %318 = vst.msk [vmem:[#allocation3 + $0x100] sm:$0xff] %vm227_vm0, %v15851_v4 }
  0x40   : > { %319 = vst.msk [vmem:[#allocation3 + $0x108] sm:$0xff] %vm227_vm0, %v15851_v4  ;;  %320 = vst.msk [vmem:[#allocation3 + $0x110] sm:$0xff] %vm227_vm0, %v15851_v4 }
  0x41   : > { %321 = vst.msk [vmem:[#allocation3 + $0x118] sm:$0xff] %vm227_vm0, %v15851_v4  ;;  %322 = vst.msk [vmem:[#allocation3 + $0x120] sm:$0xff] %vm227_vm0, %v15851_v4 }
  0x42   : > { %323 = vst.msk [vmem:[#allocation3 + $0x128] sm:$0xff] %vm227_vm0, %v15851_v4  ;;  %324 = vst.msk [vmem:[#allocation3 + $0x130] sm:$0xff] %vm227_vm0, %v15851_v4 }
  0x43   : > { %325 = vst.msk [vmem:[#allocation3 + $0x138] sm:$0xff] %vm227_vm0, %v15851_v4  ;;  %326 = vst.msk [vmem:[#allocation3 + $0x140] sm:$0xff] %vm227_vm0, %v15851_v4 }
  0x44   : > { %327 = vst.msk [vmem:[#allocation3 + $0x148] sm:$0xff] %vm227_vm0, %v15851_v4  ;;  %328 = vst.msk [vmem:[#allocation3 + $0x150] sm:$0xff] %vm227_vm0, %v15851_v4 }
  0x45   : > { %329 = vst.msk [vmem:[#allocation3 + $0x158] sm:$0xff] %vm227_vm0, %v15851_v4  ;;  %330 = vst.msk [vmem:[#allocation3 + $0x160] sm:$0xff] %vm227_vm0, %v15851_v4 }
  0x46   : > { %331 = vst.msk [vmem:[#allocation3 + $0x168] sm:$0xff] %vm227_vm0, %v15851_v4  ;;  %332 = vst.msk [vmem:[#allocation3 + $0x170] sm:$0xff] %vm227_vm0, %v15851_v4 }
  0x47   : > { %333 = vst.msk [vmem:[#allocation3 + $0x178] sm:$0xff] %vm227_vm0, %v15851_v4  ;;  %334 = vst.msk [vmem:[#allocation3 + $0x180] sm:$0xff] %vm227_vm0, %v15851_v4 }
  0x48   : > { %335 = vst.msk [vmem:[#allocation3 + $0x188] sm:$0xff] %vm227_vm0, %v15851_v4  ;;  %336 = vst.msk [vmem:[#allocation3 + $0x190] sm:$0xff] %vm227_vm0, %v15851_v4 }
  0x49   : > { %337 = vst.msk [vmem:[#allocation3 + $0x198] sm:$0xff] %vm227_vm0, %v15851_v4  ;;  %338 = vst.msk [vmem:[#allocation3 + $0x1a0] sm:$0xff] %vm227_vm0, %v15851_v4 }
  0x4a   : > { %339 = vst.msk [vmem:[#allocation3 + $0x1a8] sm:$0xff] %vm227_vm0, %v15851_v4  ;;  %340 = vst.msk [vmem:[#allocation3 + $0x1b0] sm:$0xff] %vm227_vm0, %v15851_v4 }
  0x4b   : > { %341 = vst.msk [vmem:[#allocation3 + $0x1b8] sm:$0xff] %vm227_vm0, %v15851_v4  ;;  %342 = vst.msk [vmem:[#allocation3 + $0x1c0] sm:$0xff] %vm227_vm0, %v15851_v4 }
  0x4c   : > { %343 = vst.msk [vmem:[#allocation3 + $0x1c8] sm:$0xff] %vm227_vm0, %v15851_v4  ;;  %392 = vst.msk [vmem:[#allocation2 + $0x30] sm:$0xff] %vm227_vm0, %v15928_v0  ;;  %v381_v0 = vld [vmem:[%s15909_s24 + $0x128] sm:$0xff] }
  0x4d   : > { %393 = vst.msk [vmem:[#allocation2 + $0x38] sm:$0xff] %vm227_vm0, %v15931_v1  ;;  %394 = vst.msk [vmem:[#allocation2 + $0x40] sm:$0xff] %vm227_vm0, %v15934_v2  ;;  %v382_v1 = vld [vmem:[%s15909_s24 + $0x130] sm:$0xff]  ;;  %v497_v2 = vsub.s32 %v16176_v11, %v496_v54 }
  0x4e   : > { %395 = vst.msk [vmem:[#allocation2 + $0x48] sm:$0xff] %vm227_vm0, %v347_v5  ;;  %396 = vst.msk [vmem:[#allocation2 + $0x50] sm:$0xff] %vm227_vm0, %v348_v6  ;;  %v528_v5 = vshrl.u32 %v16247_v44, 4  ;;  %v16292_v6 = vadd.s32 72, %v16176_v11  ;;  %v16337_v43 = vmul.u32.u64.low 2863311531, %v16236_v38  ;;  %v16338_v44 = vmul.u32.u64.high 2863311531, %v16236_v38, %v16337_v43 }
  0x4f   : > { %397 = vst.msk [vmem:[#allocation2 + $0x58] sm:$0xff] %vm227_vm0, %v349_v7  ;;  %398 = vst.msk [vmem:[#allocation2 + $0x60] sm:$0xff] %vm227_vm0, %v350_v8  ;;  %v383_v7 = vld [vmem:[%s15909_s24 + $0x138] sm:$0xff]  ;;  %v384_v8 = vld [vmem:[%s15909_s24 + $0x140] sm:$0xff]  ;;  %vm1017_vm1 = vcmp.ne.s32.totalorder %v497_v2, 0  ;;  %vm1065_vm2 = vcmp.lt.s32.totalorder %v497_v2, 0 }
  0x50   : > { %399 = vst.msk [vmem:[#allocation2 + $0x68] sm:$0xff] %vm227_vm0, %v351_v9  ;;  %400 = vst.msk [vmem:[#allocation2 + $0x70] sm:$0xff] %vm227_vm0, %v352_v10  ;;  %v385_v9 = vld [vmem:[%s15909_s24 + $0x148] sm:$0xff]  ;;  %v518_v10 = vmul.u32 24, %v517_v60  ;;  %v561_v54 = vshrl.u32 %v16338_v44, 4 }
  0x51   : > { %401 = vst.msk [vmem:[#allocation2 + $0x78] sm:$0xff] %vm227_vm0, %v353_v12  ;;  %402 = vst.msk [vmem:[#allocation2 + $0x80] sm:$0xff] %vm227_vm0, %v354_v13  ;;  %v539_v12 = vshrl.u32 %v16257_v49, 4  ;;  %v16302_v13 = vadd.s32 80, %v16176_v11  ;;  %v16361_v60 = vmul.u32.u64.low 2863311531, %v16292_v6  ;;  %v16362_v61 = vmul.u32.u64.high 2863311531, %v16292_v6, %v16361_v60 }
  0x52   : > { %403 = vst.msk [vmem:[#allocation2 + $0x88] sm:$0xff] %vm227_vm0, %v355_v14  ;;  %404 = vst.msk [vmem:[#allocation2 + $0x90] sm:$0xff] %vm227_vm0, %v356_v15  ;;  %v386_v14 = vld [vmem:[%s15909_s24 + $0x150] sm:$0xff]  ;;  %v387_v15 = vld [vmem:[%s15909_s24 + $0x158] sm:$0xff] }
  0x53   : > { %405 = vst.msk [vmem:[#allocation2 + $0x98] sm:$0xff] %vm227_vm0, %v357_v16  ;;  %406 = vst.msk [vmem:[#allocation2 + $0xa0] sm:$0xff] %vm227_vm0, %v358_v17  ;;  %v388_v16 = vld [vmem:[%s15909_s24 + $0x160] sm:$0xff]  ;;  %v1161_v17 = vadd.s32 24, %v497_v2 }
  0x54   : > { %407 = vst.msk [vmem:[#allocation2 + $0xa8] sm:$0xff] %vm227_vm0, %v359_v21  ;;  %408 = vst.msk [vmem:[#allocation2 + $0xb0] sm:$0xff] %vm227_vm0, %v360_v22  ;;  %v390_v21 = vld [vmem:[%s15909_s24 + $0x170] sm:$0xff]  ;;  %v391_v22 = vld [vmem:[%s15909_s24 + $0x178] sm:$0xff] }
  0x55   : > { %409 = vst.msk [vmem:[#allocation2 + $0xb8] sm:$0xff] %vm227_vm0, %v361_v23  ;;  %410 = vst.msk [vmem:[#allocation2 + $0xc0] sm:$0xff] %vm227_vm0, %v362_v27  ;;  %v519_v23 = vsub.s32 %v16204_v24, %v518_v10  ;;  %v529_v27 = vmul.u32 24, %v528_v5  ;;  %v16370_v3 = vmul.u32.u64.low 2863311531, %v16325_v30  ;;  %v16371_v5 = vmul.u32.u64.high 2863311531, %v16325_v30, %v16370_v3 }
  0x56   : > { %411 = vst.msk [vmem:[#allocation2 + $0xc8] sm:$0xff] %vm227_vm0, %v363_v28  ;;  %412 = vst.msk [vmem:[#allocation2 + $0xd0] sm:$0xff] %vm227_vm0, %v364_v29  ;;  %v540_v28 = vmul.u32 24, %v539_v12  ;;  %v550_v29 = vshrl.u32 %v16281_v62, 4  ;;  %v562_v62 = vmul.u32 24, %v561_v54 }
  0x57   : > { %413 = vst.msk [vmem:[#allocation2 + $0xd8] sm:$0xff] %vm227_vm0, %v365_v33  ;;  %414 = vst.msk [vmem:[#allocation2 + $0xe0] sm:$0xff] %vm227_vm0, %v366_v34  ;;  %vm1019_vm7 = vcmp.ne.s32.totalorder %v519_v23, 0  ;;  %vm1067_vm8 = vcmp.lt.s32.totalorder %v519_v23, 0  ;;  %v1163_v31 = vadd.s32 24, %v519_v23  ;;  %v530_v34 = vsub.s32 %v16207_v25, %v529_v27 }
  0x58   : > { %415 = vst.msk [vmem:[#allocation2 + $0xe8] sm:$0xff] %vm227_vm0, %v367_v35  ;;  %416 = vst.msk [vmem:[#allocation2 + $0xf0] sm:$0xff] %vm227_vm0, %v368_v39  ;;  %v541_v35 = vsub.s32 %v16210_v26, %v540_v28  ;;  %v551_v39 = vmul.u32 24, %v550_v29 }
  0x59   : > { %417 = vst.msk [vmem:[#allocation2 + $0xf8] sm:$0xff] %vm227_vm0, %v369_v40  ;;  %418 = vst.msk [vmem:[#allocation2 + $0x100] sm:$0xff] %vm227_vm0, %v370_v41  ;;  %vm1020_vm13 = vcmp.ne.s32.totalorder %v530_v34, 0  ;;  %vm1068_vm14 = vcmp.lt.s32.totalorder %v530_v34, 0  ;;  %v1164_v25 = vadd.s32 24, %v530_v34 }
  0x5a   : > { %419 = vst.msk [vmem:[#allocation2 + $0x108] sm:$0xff] %vm227_vm0, %v371_v45  ;;  %420 = vst.msk [vmem:[#allocation2 + $0x110] sm:$0xff] %vm227_vm0, %v372_v46  ;;  %v1165_v26 = vadd.s32 24, %v541_v35  ;;  %v552_v42 = vsub.s32 %v16223_v32, %v551_v39  ;;  %v16398_v39 = vadd.s32 120, %v16176_v11 }
  0x5b   : > { %421 = vst.msk [vmem:[#allocation2 + $0x118] sm:$0xff] %vm227_vm0, %v373_v47  ;;  %422 = vst.msk [vmem:[#allocation2 + $0x120] sm:$0xff] %vm227_vm0, %v374_v51  ;;  %v16341_v46 = vmul.u32.u64.low 2863311531, %v16260_v50  ;;  %v16342_v47 = vmul.u32.u64.high 2863311531, %v16260_v50, %v16341_v46 }
  0x5c   : > { %423 = vst.msk [vmem:[#allocation2 + $0x128] sm:$0xff] %vm227_vm0, %v375_v52  ;;  %424 = vst.msk [vmem:[#allocation2 + $0x130] sm:$0xff] %vm227_vm0, %v376_v53  ;;  %v1166_v32 = vadd.s32 24, %v552_v42  ;;  %v16349_v52 = vadd.s32 104, %v16176_v11 }
  0x5d   : > { %425 = vst.msk [vmem:[#allocation2 + $0x138] sm:$0xff] %vm227_vm0, %v377_v57  ;;  %426 = vst.msk [vmem:[#allocation2 + $0x140] sm:$0xff] %vm227_vm0, %v378_v58  ;;  %v16355_v55 = vmul.u32.u64.low 2863311531, %v16270_v56  ;;  %v16356_v57 = vmul.u32.u64.high 2863311531, %v16270_v56, %v16355_v55 }
  0x5e   : > { %427 = vst.msk [vmem:[#allocation2 + $0x148] sm:$0xff] %vm227_vm0, %v379_v59  ;;  %428 = vst.msk [vmem:[#allocation2 + $0x150] sm:$0xff] %vm227_vm0, %v380_v63  ;;  %v572_v59 = vshrl.u32 %v16342_v47, 4 }
  0x5f   : > { %429 = vst.msk [vmem:[#allocation2 + $0x158] sm:$0xff] %vm227_vm0, %v381_v0  ;;  %430 = vst.msk [vmem:[#allocation2 + $0x160] sm:$0xff] %vm227_vm0, %v382_v1  ;;  %v16365_v63 = vmul.u32.u64.low 2863311531, %v16302_v13  ;;  %v16366_v0 = vmul.u32.u64.high 2863311531, %v16302_v13, %v16365_v63 }
  0x60   : > { %431 = vst.msk [vmem:[#allocation2 + $0x168] sm:$0xff] %vm227_vm0, %v383_v7  ;;  %432 = vst.msk [vmem:[#allocation2 + $0x170] sm:$0xff] %vm227_vm0, %v384_v8  ;;  %v563_v7 = vsub.s32 %v16236_v38, %v562_v62  ;;  %v583_v8 = vshrl.u32 %v16356_v57, 4  ;;  %v458_v62 = vadd.s32 136, %v16176_v11  ;;  %v459_v63 = vadd.s32 144, %v16176_v11 }
  0x61   : > { %433 = vst.msk [vmem:[#allocation2 + $0x178] sm:$0xff] %vm227_vm0, %v385_v9  ;;  %434 = vst.msk [vmem:[#allocation2 + $0x180] sm:$0xff] %vm227_vm0, %v386_v14  ;;  %v16377_v9 = vmul.u32.u64.low 2863311531, %v16345_v48  ;;  %v16378_v10 = vmul.u32.u64.high 2863311531, %v16345_v48, %v16377_v9  ;;  %v594_v14 = vshrl.u32 %v16362_v61, 4 }
  0x62   : > { %435 = vst.msk [vmem:[#allocation2 + $0x188] sm:$0xff] %vm227_vm0, %v387_v15  ;;  %436 = vst.msk [vmem:[#allocation2 + $0x190] sm:$0xff] %vm227_vm0, %v388_v16  ;;  %v16383_v15 = vmul.u32.u64.low 2863311531, %v16349_v52  ;;  %v16384_v16 = vmul.u32.u64.high 2863311531, %v16349_v52, %v16383_v15 }
  0x63   : > { %437 = vst.msk [vmem:[#allocation2 + $0x198] sm:$0xff] %vm227_vm0, %v389_v19  ;;  %438 = vst.msk [vmem:[#allocation2 + $0x1a0] sm:$0xff] %vm227_vm0, %v390_v21  ;;  %v595_v19 = vmul.u32 24, %v594_v14  ;;  %v627_v29 = vshrl.u32 %v16378_v10, 4  ;;  %v16439_v14 = vadd.s32 160, %v16176_v11 }
  0x64   : > { %439 = vst.msk [vmem:[#allocation2 + $0x1a8] sm:$0xff] %vm227_vm0, %v391_v22  ;;  %vm1113_vm3 = vmand %vm1065_vm2, %vm1017_vm1  ;;  %vm1021_vm1 = vcmp.ne.s32.totalorder %v541_v35, 0  ;;  %vm1069_vm2 = vcmp.lt.s32.totalorder %v541_v35, 0 }
  0x65   : > { %v1209_v24 = vsel %vm1113_vm3, %v1161_v17, %v497_v2  ;;  %vm1114_vm6 = vmand %vm1066_vm5, %vm1018_vm4  ;;  %vm1022_vm5 = vcmp.ne.s32.totalorder %v552_v42, 0  ;;  %v573_v2 = vmul.u32 24, %v572_v59  ;;  %v1167_v17 = vadd.s32 24, %v563_v7 }
  0x66   : > { %vm1257_vm9 = vcmp.lt.s32.totalorder %v1209_v24, 16  ;;  %v1210_v33 = vsel %vm1114_vm6, %v1162_v20, %v508_v18  ;;  %vm1115_vm10 = vmand %vm1067_vm8, %vm1019_vm7  ;;  %vm1070_vm6 = vcmp.lt.s32.totalorder %v552_v42, 0  ;;  %v584_v18 = vmul.u32 24, %v583_v8 }
  0x67   : > { %v11693_v36 = vsel %vm1257_vm9, 1.0, %v15851_v4  ;;  %vm1258_vm11 = vcmp.lt.s32.totalorder %v1210_v33, 16  ;;  %v1211_v37 = vsel %vm1115_vm10, %v1163_v31, %v519_v23  ;;  %vm1116_vm15 = vmand %vm1068_vm14, %vm1020_vm13  ;;  %v574_v12 = vsub.s32 %v16260_v50, %v573_v2 }
  0x68   : > { %1401 = vst.msk [vmem:[#allocation4] sm:$0xff] %vm227_vm0, %v11693_v36  ;;  %v11694_v40 = vsel %vm1258_vm11, 1.0, %v15851_v4  ;;  %vm1259_vm12 = vcmp.lt.s32.totalorder %v1211_v37, 16  ;;  %vm1117_vm3 = vmand %vm1069_vm2, %vm1021_vm1  ;;  %v1212_v45 = vsel %vm1116_vm15, %v1164_v25, %v530_v34  ;;  %vm1023_vm10 = vcmp.ne.s32.totalorder %v563_v7, 0 }
  0x69   : > { %1402 = vst.msk [vmem:[#allocation4 + $0x8] sm:$0xff] %vm227_vm0, %v11694_v40  ;;  %v11695_v41 = vsel %vm1259_vm12, 1.0, %v15851_v4  ;;  %vm1260_vm4 = vcmp.lt.s32.totalorder %v1212_v45, 16  ;;  %v1213_v49 = vsel %vm1117_vm3, %v1165_v26, %v541_v35  ;;  %vm1118_vm8 = vmand %vm1070_vm6, %vm1022_vm5  ;;  %vm1071_vm11 = vcmp.lt.s32.totalorder %v563_v7, 0 }
  0x6a   : > { %1403 = vst.msk [vmem:[#allocation4 + $0x10] sm:$0xff] %vm227_vm0, %v11695_v41  ;;  %v11696_v51 = vsel %vm1260_vm4, 1.0, %v15851_v4  ;;  %vm1261_vm7 = vcmp.lt.s32.totalorder %v1213_v49, 16  ;;  %v1214_v58 = vsel %vm1118_vm8, %v1166_v32, %v552_v42  ;;  %vm1119_vm12 = vmand %vm1071_vm11, %vm1023_vm10  ;;  %vm1024_vm13 = vcmp.ne.s32.totalorder %v574_v12, 0 }
  0x6b   : > { %1404 = vst.msk [vmem:[#allocation4 + $0x18] sm:$0xff] %vm227_vm0, %v11696_v51  ;;  %v11697_v53 = vsel %vm1261_vm7, 1.0, %v15851_v4  ;;  %vm1262_vm9 = vcmp.lt.s32.totalorder %v1214_v58, 16  ;;  %vm1072_vm14 = vcmp.lt.s32.totalorder %v574_v12, 0  ;;  %v1168_v38 = vadd.s32 24, %v574_v12 }
  0x6c   : > { %1405 = vst.msk [vmem:[#allocation4 + $0x20] sm:$0xff] %vm227_vm0, %v11697_v53  ;;  %v11698_v1 = vsel %vm1262_vm9, 1.0, %v15851_v4  ;;  %v1215_v21 = vsel %vm1119_vm12, %v1167_v17, %v563_v7  ;;  %vm1120_vm15 = vmand %vm1072_vm14, %vm1024_vm13  ;;  %v585_v22 = vsub.s32 %v16270_v56, %v584_v18  ;;  %v605_v50 = vshrl.u32 %v16366_v0, 4 }
  0x6d   : > { %1406 = vst.msk [vmem:[#allocation4 + $0x28] sm:$0xff] %vm227_vm0, %v11698_v1  ;;  %v616_v23 = vshrl.u32 %v16371_v5, 4  ;;  %vm1263_vm1 = vcmp.lt.s32.totalorder %v1215_v21, 16  ;;  %v1216_v27 = vsel %vm1120_vm15, %v1168_v38, %v574_v12  ;;  %v596_v28 = vsub.s32 %v16292_v6, %v595_v19 }
  0x6e   : > { %v11699_v20 = vsel %vm1263_vm1, 1.0, %v15851_v4  ;;  %vm1264_vm2 = vcmp.lt.s32.totalorder %v1216_v27, 16  ;;  %vm1025_vm3 = vcmp.ne.s32.totalorder %v585_v22, 0  ;;  %vm1073_vm4 = vcmp.lt.s32.totalorder %v585_v22, 0 }
  0x6f   : > { %1407 = vst.msk [vmem:[#allocation4 + $0x30] sm:$0xff] %vm227_vm0, %v11699_v20  ;;  %v11700_v24 = vsel %vm1264_vm2, 1.0, %v15851_v4  ;;  %vm1121_vm5 = vmand %vm1073_vm4, %vm1025_vm3  ;;  %v1169_v56 = vadd.s32 24, %v585_v22  ;;  %vm1026_vm6 = vcmp.ne.s32.totalorder %v596_v28, 0  ;;  %vm1074_vm7 = vcmp.lt.s32.totalorder %v596_v28, 0 }
  0x70   : > { %1408 = vst.msk [vmem:[#allocation4 + $0x38] sm:$0xff] %vm227_vm0, %v11700_v24  ;;  %vm1122_vm8 = vmand %vm1074_vm7, %vm1026_vm6  ;;  %v1170_v31 = vadd.s32 24, %v596_v28  ;;  %v606_v6 = vmul.u32 24, %v605_v50  ;;  %v617_v33 = vmul.u32 24, %v616_v23  ;;  %v638_v34 = vshrl.u32 %v16384_v16, 4 }
  0x71   : > { %v1217_v35 = vsel %vm1121_vm5, %v1169_v56, %v585_v22  ;;  %v628_v36 = vmul.u32 24, %v627_v29  ;;  %v455_v37 = vadd.s32 112, %v16176_v11  ;;  %v457_v59 = vadd.s32 128, %v16176_v11 }
  0x72   : > { %vm1265_vm9 = vcmp.lt.s32.totalorder %v1217_v35, 16  ;;  %v1218_v40 = vsel %vm1122_vm8, %v1170_v31, %v596_v28  ;;  %v607_v41 = vsub.s32 %v16302_v13, %v606_v6  ;;  %v618_v25 = vsub.s32 %v16325_v30, %v617_v33 }
  0x73   : > { %v11701_v26 = vsel %vm1265_vm9, 1.0, %v15851_v4  ;;  %vm1266_vm10 = vcmp.lt.s32.totalorder %v1218_v40, 16  ;;  %v629_v42 = vsub.s32 %v16345_v48, %v628_v36  ;;  %v639_v43 = vmul.u32 24, %v638_v34 }
  0x74   : > { %1409 = vst.msk [vmem:[#allocation4 + $0x40] sm:$0xff] %vm227_vm0, %v11701_v26  ;;  %v11702_v44 = vsel %vm1266_vm10, 1.0, %v15851_v4  ;;  %vm1027_vm11 = vcmp.ne.s32.totalorder %v607_v41, 0  ;;  %vm1075_vm12 = vcmp.lt.s32.totalorder %v607_v41, 0  ;;  %v1171_v45 = vadd.s32 24, %v607_v41 }
  0x75   : > { %1410 = vst.msk [vmem:[#allocation4 + $0x48] sm:$0xff] %vm227_vm0, %v11702_v44  ;;  %vm1123_vm13 = vmand %vm1075_vm12, %vm1027_vm11  ;;  %vm1028_vm14 = vcmp.ne.s32.totalorder %v618_v25, 0  ;;  %vm1076_vm15 = vcmp.lt.s32.totalorder %v618_v25, 0  ;;  %v1172_v13 = vadd.s32 24, %v618_v25  ;;  %vm1029_vm1 = vcmp.ne.s32.totalorder %v629_v42, 0 }
  0x76   : > { %v1219_v30 = vsel %vm1123_vm13, %v1171_v45, %v607_v41  ;;  %vm1124_vm2 = vmand %vm1076_vm15, %vm1028_vm14  ;;  %vm1077_vm3 = vcmp.lt.s32.totalorder %v629_v42, 0  ;;  %v1173_v46 = vadd.s32 24, %v629_v42  ;;  %v640_v47 = vsub.s32 %v16349_v52, %v639_v43 }
  0x77   : > { %vm1267_vm4 = vcmp.lt.s32.totalorder %v1219_v30, 16  ;;  %v1220_v48 = vsel %vm1124_vm2, %v1172_v13, %v618_v25  ;;  %vm1125_vm5 = vmand %vm1077_vm3, %vm1029_vm1  ;;  %v16408_v49 = vmul.u32.u64.low 2863311531, %v455_v37  ;;  %v16409_v51 = vmul.u32.u64.high 2863311531, %v455_v37, %v16408_v49 }
  0x78   : > { %v11703_v32 = vsel %vm1267_vm4, 1.0, %v15851_v4  ;;  %vm1268_vm6 = vcmp.lt.s32.totalorder %v1220_v48, 16  ;;  %v1221_v53 = vsel %vm1125_vm5, %v1173_v46, %v629_v42  ;;  %vm1030_vm7 = vcmp.ne.s32.totalorder %v640_v47, 0 }
  0x79   : > { %1411 = vst.msk [vmem:[#allocation4 + $0x50] sm:$0xff] %vm227_vm0, %v11703_v32  ;;  %v11704_v54 = vsel %vm1268_vm6, 1.0, %v15851_v4  ;;  %vm1269_vm8 = vcmp.lt.s32.totalorder %v1221_v53, 16  ;;  %vm1078_vm9 = vcmp.lt.s32.totalorder %v640_v47, 0  ;;  %v1174_v55 = vadd.s32 24, %v640_v47 }
  0x7a   : > { %1412 = vst.msk [vmem:[#allocation4 + $0x58] sm:$0xff] %vm227_vm0, %v11704_v54  ;;  %v11705_v52 = vsel %vm1269_vm8, 1.0, %v15851_v4  ;;  %vm1126_vm10 = vmand %vm1078_vm9, %vm1030_vm7  ;;  %v16417_v57 = vmul.u32.u64.low 2863311531, %v16398_v39  ;;  %v16418_v58 = vmul.u32.u64.high 2863311531, %v16398_v39, %v16417_v57  ;;  %v649_v61 = vshrl.u32 %v16409_v51, 4 }
  0x7b   : > { %1413 = vst.msk [vmem:[#allocation4 + $0x60] sm:$0xff] %vm227_vm0, %v11705_v52  ;;  %v1222_v60 = vsel %vm1126_vm10, %v1174_v55, %v640_v47  ;;  %v16425_v0 = vmul.u32.u64.low 2863311531, %v457_v59  ;;  %v16426_v1 = vmul.u32.u64.high 2863311531, %v457_v59, %v16425_v0  ;;  %v460_v2 = vadd.s32 152, %v16176_v11 }
  0x7c   : > { %vm1270_vm11 = vcmp.lt.s32.totalorder %v1222_v60, 16  ;;  %v650_v5 = vmul.u32 24, %v649_v61  ;;  %v16430_v7 = vmul.u32.u64.low 2863311531, %v458_v62  ;;  %v16431_v8 = vmul.u32.u64.high 2863311531, %v458_v62, %v16430_v7 }
  0x7d   : > { %v11706_v3 = vsel %vm1270_vm11, 1.0, %v15851_v4  ;;  %v660_v9 = vshrl.u32 %v16418_v58, 4  ;;  %v16435_v10 = vmul.u32.u64.low 2863311531, %v459_v63  ;;  %v16436_v12 = vmul.u32.u64.high 2863311531, %v459_v63, %v16435_v10 }
  0x7e   : > { %1414 = vst.msk [vmem:[#allocation4 + $0x68] sm:$0xff] %vm227_vm0, %v11706_v3  ;;  %v651_v15 = vsub.s32 %v455_v37, %v650_v5  ;;  %v16441_v16 = vmul.u32.u64.low 2863311531, %v460_v2  ;;  %v16442_v17 = vmul.u32.u64.high 2863311531, %v460_v2, %v16441_v16  ;;  %v16445_v18 = vadd.s32 168, %v16176_v11 }
  0x7f   : > { %v661_v38 = vmul.u32 24, %v660_v9  ;;  %v671_v19 = vshrl.u32 %v16426_v1, 4  ;;  %v16449_v21 = vmul.u32.u64.low 2863311531, %v16439_v14  ;;  %v16450_v22 = vmul.u32.u64.high 2863311531, %v16439_v14, %v16449_v21 }
  0x80   : > { %vm1031_vm12 = vcmp.ne.s32.totalorder %v651_v15, 0  ;;  %vm1079_vm13 = vcmp.lt.s32.totalorder %v651_v15, 0  ;;  %v1175_v50 = vadd.s32 24, %v651_v15  ;;  %v682_v23 = vshrl.u32 %v16431_v8, 4 }
  0x81   : > { %vm1127_vm14 = vmand %vm1079_vm13, %vm1031_vm12  ;;  %v662_v27 = vsub.s32 %v16398_v39, %v661_v38  ;;  %v672_v28 = vmul.u32 24, %v671_v19  ;;  %v693_v29 = vshrl.u32 %v16436_v12, 4  ;;  %v16456_v20 = vadd.s32 176, %v16176_v11 }
  0x82   : > { %v1223_v24 = vsel %vm1127_vm14, %v1175_v50, %v651_v15  ;;  %v683_v56 = vmul.u32 24, %v682_v23  ;;  %v704_v31 = vshrl.u32 %v16442_v17, 4  ;;  %v16460_v6 = vadd.s32 184, %v16176_v11 }
  0x83   : > { %vm1271_vm15 = vcmp.lt.s32.totalorder %v1223_v24, 16  ;;  %vm1032_vm1 = vcmp.ne.s32.totalorder %v662_v27, 0  ;;  %vm1080_vm2 = vcmp.lt.s32.totalorder %v662_v27, 0  ;;  %v1176_v33 = vadd.s32 24, %v662_v27 }
  0x84   : > { %v11707_v34 = vsel %vm1271_vm15, 1.0, %v15851_v4  ;;  %vm1128_vm3 = vmand %vm1080_vm2, %vm1032_vm1  ;;  %v673_v35 = vsub.s32 %v457_v59, %v672_v28  ;;  %v684_v36 = vsub.s32 %v458_v62, %v683_v56  ;;  %v694_v37 = vmul.u32 24, %v693_v29 }
  0x85   : > { %1415 = vst.msk [vmem:[#allocation4 + $0x70] sm:$0xff] %vm227_vm0, %v11707_v34  ;;  %v1224_v39 = vsel %vm1128_vm3, %v1176_v33, %v662_v27  ;;  %v705_v40 = vmul.u32 24, %v704_v31  ;;  %v715_v41 = vshrl.u32 %v16450_v22, 4  ;;  %v16466_v25 = vadd.s32 192, %v16176_v11 }
  0x86   : > { %vm1272_vm4 = vcmp.lt.s32.totalorder %v1224_v39, 16  ;;  %vm1033_vm5 = vcmp.ne.s32.totalorder %v673_v35, 0  ;;  %vm1081_vm6 = vcmp.lt.s32.totalorder %v673_v35, 0  ;;  %v1177_v26 = vadd.s32 24, %v673_v35 }
  0x87   : > { %v11708_v42 = vsel %vm1272_vm4, 1.0, %v15851_v4  ;;  %vm1129_vm7 = vmand %vm1081_vm6, %vm1033_vm5  ;;  %vm1034_vm8 = vcmp.ne.s32.totalorder %v684_v36, 0  ;;  %vm1082_vm9 = vcmp.lt.s32.totalorder %v684_v36, 0  ;;  %v1178_v43 = vadd.s32 24, %v684_v36 }
  0x88   : > { %1416 = vst.msk [vmem:[#allocation4 + $0x78] sm:$0xff] %vm227_vm0, %v11708_v42  ;;  %v1225_v44 = vsel %vm1129_vm7, %v1177_v26, %v673_v35  ;;  %vm1130_vm10 = vmand %vm1082_vm9, %vm1034_vm8  ;;  %v695_v45 = vsub.s32 %v459_v63, %v694_v37  ;;  %v706_v13 = vsub.s32 %v460_v2, %v705_v40  ;;  %v716_v30 = vmul.u32 24, %v715_v41 }
  0x89   : > { %vm1273_vm11 = vcmp.lt.s32.totalorder %v1225_v44, 16  ;;  %v1226_v46 = vsel %vm1130_vm10, %v1178_v43, %v684_v36  ;;  %v16471_v47 = vmul.u32.u64.low 2863311531, %v16445_v18  ;;  %v16472_v48 = vmul.u32.u64.high 2863311531, %v16445_v18, %v16471_v47 }
  0x8a   : > { %v11709_v49 = vsel %vm1273_vm11, 1.0, %v15851_v4  ;;  %vm1274_vm12 = vcmp.lt.s32.totalorder %v1226_v46, 16  ;;  %vm1035_vm13 = vcmp.ne.s32.totalorder %v695_v45, 0  ;;  %vm1083_vm14 = vcmp.lt.s32.totalorder %v695_v45, 0 }
  0x8b   : > { %1417 = vst.msk [vmem:[#allocation4 + $0x80] sm:$0xff] %vm227_vm0, %v11709_v49  ;;  %v11710_v51 = vsel %vm1274_vm12, 1.0, %v15851_v4  ;;  %vm1131_vm15 = vmand %vm1083_vm14, %vm1035_vm13  ;;  %v1179_v32 = vadd.s32 24, %v695_v45  ;;  %vm1036_vm1 = vcmp.ne.s32.totalorder %v706_v13, 0  ;;  %vm1084_vm2 = vcmp.lt.s32.totalorder %v706_v13, 0 }
  0x8c   : > { %1418 = vst.msk [vmem:[#allocation4 + $0x88] sm:$0xff] %vm227_vm0, %v11710_v51  ;;  %vm1132_vm3 = vmand %vm1084_vm2, %vm1036_vm1  ;;  %v1180_v53 = vadd.s32 24, %v706_v13  ;;  %v717_v54 = vsub.s32 %v16439_v14, %v716_v30  ;;  %v16480_v55 = vmul.u32.u64.low 2863311531, %v16456_v20  ;;  %v16481_v52 = vmul.u32.u64.high 2863311531, %v16456_v20, %v16480_v55 }
  0x8d   : > { %v1227_v57 = vsel %vm1131_vm15, %v1179_v32, %v695_v45  ;;  %v726_v58 = vshrl.u32 %v16472_v48, 4  ;;  %v16485_v59 = vmul.u32.u64.low 2863311531, %v16460_v6  ;;  %v16486_v60 = vmul.u32.u64.high 2863311531, %v16460_v6, %v16485_v59 }
  0x8e   : > { %vm1275_vm4 = vcmp.lt.s32.totalorder %v1227_v57, 16  ;;  %v1228_v61 = vsel %vm1132_vm3, %v1180_v53, %v706_v13  ;;  %vm1037_vm5 = vcmp.ne.s32.totalorder %v717_v54, 0  ;;  %vm1085_vm6 = vcmp.lt.s32.totalorder %v717_v54, 0 }
  0x8f   : > { %v11711_v62 = vsel %vm1275_vm4, 1.0, %v15851_v4  ;;  %vm1276_vm7 = vcmp.lt.s32.totalorder %v1228_v61, 16  ;;  %vm1133_vm8 = vmand %vm1085_vm6, %vm1037_vm5  ;;  %v1181_v63 = vadd.s32 24, %v717_v54  ;;  %v727_v0 = vmul.u32 24, %v726_v58 }
  0x90   : > { %1419 = vst.msk [vmem:[#allocation4 + $0x90] sm:$0xff] %vm227_vm0, %v11711_v62  ;;  %v11712_v1 = vsel %vm1276_vm7, 1.0, %v15851_v4  ;;  %v737_v2 = vshrl.u32 %v16481_v52, 4  ;;  %v16493_v3 = vmul.u32.u64.low 2863311531, %v16466_v25  ;;  %v16494_v5 = vmul.u32.u64.high 2863311531, %v16466_v25, %v16493_v3 }
  0x91   : > { %1420 = vst.msk [vmem:[#allocation4 + $0x98] sm:$0xff] %vm227_vm0, %v11712_v1  ;;  %v1229_v7 = vsel %vm1133_vm8, %v1181_v63, %v717_v54  ;;  %v728_v8 = vsub.s32 %v16445_v18, %v727_v0  ;;  %v748_v9 = vshrl.u32 %v16486_v60, 4  ;;  %v466_v10 = vadd.s32 200, %v16176_v11 }
  0x92   : > { %vm1277_vm9 = vcmp.lt.s32.totalorder %v1229_v7, 16  ;;  %v738_v12 = vmul.u32 24, %v737_v2  ;;  %v759_v38 = vshrl.u32 %v16494_v5, 4  ;;  %v467_v18 = vadd.s32 208, %v16176_v11 }
  0x93   : > { %v11713_v14 = vsel %vm1277_vm9, 1.0, %v15851_v4  ;;  %vm1038_vm10 = vcmp.ne.s32.totalorder %v728_v8, 0  ;;  %vm1086_vm11 = vcmp.lt.s32.totalorder %v728_v8, 0  ;;  %v1182_v15 = vadd.s32 24, %v728_v8 }
  0x94   : > { %1421 = vst.msk [vmem:[#allocation4 + $0xa0] sm:$0xff] %vm227_vm0, %v11713_v14  ;;  %vm1134_vm12 = vmand %vm1086_vm11, %vm1038_vm10  ;;  %v739_v16 = vsub.s32 %v16456_v20, %v738_v12  ;;  %v749_v17 = vmul.u32 24, %v748_v9  ;;  %v16505_v21 = vmul.u32.u64.low 2863311531, %v466_v10  ;;  %v16506_v22 = vmul.u32.u64.high 2863311531, %v466_v10, %v16505_v21 }
  0x95   : > { %v1230_v19 = vsel %vm1134_vm12, %v1182_v15, %v728_v8  ;;  %v760_v28 = vmul.u32 24, %v759_v38  ;;  %v468_v29 = vadd.s32 216, %v16176_v11  ;;  %v16516_v31 = vadd.s32 224, %v16176_v11 }
  0x96   : > { %vm1278_vm13 = vcmp.lt.s32.totalorder %v1230_v19, 16  ;;  %vm1039_vm14 = vcmp.ne.s32.totalorder %v739_v16, 0  ;;  %vm1087_vm15 = vcmp.lt.s32.totalorder %v739_v16, 0  ;;  %v1183_v50 = vadd.s32 24, %v739_v16 }
  0x97   : > { %v11714_v23 = vsel %vm1278_vm13, 1.0, %v15851_v4  ;;  %vm1135_vm1 = vmand %vm1087_vm15, %vm1039_vm14  ;;  %v750_v27 = vsub.s32 %v16460_v6, %v749_v17  ;;  %v16512_v24 = vmul.u32.u64.low 2863311531, %v467_v18  ;;  %v16513_v56 = vmul.u32.u64.high 2863311531, %v467_v18, %v16512_v24 }
  0x98   : > { %1422 = vst.msk [vmem:[#allocation4 + $0xa8] sm:$0xff] %vm227_vm0, %v11714_v23  ;;  %v1231_v20 = vsel %vm1135_vm1, %v1183_v50, %v739_v16  ;;  %v761_v6 = vsub.s32 %v16466_v25, %v760_v28  ;;  %v770_v35 = vshrl.u32 %v16506_v22, 4  ;;  %v16522_v36 = vadd.s32 232, %v16176_v11 }
  0x99   : > { %vm1279_vm2 = vcmp.lt.s32.totalorder %v1231_v20, 16  ;;  %vm1040_vm3 = vcmp.ne.s32.totalorder %v750_v27, 0  ;;  %vm1088_vm4 = vcmp.lt.s32.totalorder %v750_v27, 0  ;;  %v1184_v33 = vadd.s32 24, %v750_v27 }
  0x9a   : > { %v11715_v34 = vsel %vm1279_vm2, 1.0, %v15851_v4  ;;  %vm1136_vm5 = vmand %vm1088_vm4, %vm1040_vm3  ;;  %v16525_v39 = vmul.u32.u64.low 2863311531, %v468_v29  ;;  %v16526_v40 = vmul.u32.u64.high 2863311531, %v468_v29, %v16525_v39  ;;  %v16529_v41 = vadd.s32 240, %v16176_v11 }
  0x9b   : > { %1423 = vst.msk [vmem:[#allocation4 + $0xb0] sm:$0xff] %vm227_vm0, %v11715_v34  ;;  %v1232_v37 = vsel %vm1136_vm5, %v1184_v33, %v750_v27  ;;  %vm1041_vm7 = vcmp.ne.s32.totalorder %v761_v6, 0  ;;  %vm1089_vm8 = vcmp.lt.s32.totalorder %v761_v6, 0  ;;  %v1185_v26 = vadd.s32 24, %v761_v6 }
  0x9c   : > { %vm1280_vm6 = vcmp.lt.s32.totalorder %v1232_v37, 16  ;;  %vm1137_vm9 = vmand %vm1089_vm8, %vm1041_vm7  ;;  %v771_v42 = vmul.u32 24, %v770_v35  ;;  %v781_v43 = vshrl.u32 %v16513_v56, 4  ;;  %v16534_v44 = vadd.s32 248, %v16176_v11 }
  0x9d   : > { %v11716_v25 = vsel %vm1280_vm6, 1.0, %v15851_v4  ;;  %v1233_v45 = vsel %vm1137_vm9, %v1185_v26, %v761_v6  ;;  %v16538_v13 = vmul.u32.u64.low 2863311531, %v16516_v31  ;;  %v16539_v30 = vmul.u32.u64.high 2863311531, %v16516_v31, %v16538_v13 }
  0x9e   : > { %1424 = vst.msk [vmem:[#allocation4 + $0xb8] sm:$0xff] %vm227_vm0, %v11716_v25  ;;  %v16542_v46 = vadd.s32 256, %v16176_v11  ;;  %vm1281_vm10 = vcmp.lt.s32.totalorder %v1233_v45, 16  ;;  %v772_v47 = vsub.s32 %v466_v10, %v771_v42  ;;  %v782_v48 = vmul.u32 24, %v781_v43 }
  0x9f   : > { %v792_v49 = vshrl.u32 %v16526_v40, 4  ;;  %v11717_v51 = vsel %vm1281_vm10, 1.0, %v15851_v4  ;;  %v16547_v32 = vmul.u32.u64.low 2863311531, %v16522_v36  ;;  %v16548_v53 = vmul.u32.u64.high 2863311531, %v16522_v36, %v16547_v32 }
  0xa0   : > { %v16551_v54 = vadd.s32 264, %v16176_v11  ;;  %1425 = vst.msk [vmem:[#allocation4 + $0xc0] sm:$0xff] %vm227_vm0, %v11717_v51  ;;  %vm1042_vm11 = vcmp.ne.s32.totalorder %v772_v47, 0  ;;  %vm1090_vm12 = vcmp.lt.s32.totalorder %v772_v47, 0  ;;  %v1186_v55 = vadd.s32 24, %v772_v47 }
  0xa1   : > { %v783_v52 = vsub.s32 %v467_v18, %v782_v48  ;;  %vm1138_vm13 = vmand %vm1090_vm12, %vm1042_vm11  ;;  %v793_v57 = vmul.u32 24, %v792_v49  ;;  %v803_v58 = vshrl.u32 %v16539_v30, 4  ;;  %v814_v1 = vshrl.u32 %v16548_v53, 4 }
  0xa2   : > { %v16556_v59 = vmul.u32.u64.low 2863311531, %v16529_v41  ;;  %v16557_v60 = vmul.u32.u64.high 2863311531, %v16529_v41, %v16556_v59  ;;  %v1234_v61 = vsel %vm1138_vm13, %v1186_v55, %v772_v47  ;;  %v16575_v38 = vadd.s32 272, %v16176_v11 }
  0xa3   : > { %vm1043_vm14 = vcmp.ne.s32.totalorder %v783_v52, 0  ;;  %vm1091_vm15 = vcmp.lt.s32.totalorder %v783_v52, 0  ;;  %v1187_v62 = vadd.s32 24, %v783_v52  ;;  %vm1282_vm1 = vcmp.lt.s32.totalorder %v1234_v61, 16 }
  0xa4   : > { %vm1139_vm2 = vmand %vm1091_vm15, %vm1043_vm14  ;;  %v794_v63 = vsub.s32 %v468_v29, %v793_v57  ;;  %v804_v0 = vmul.u32 24, %v803_v58  ;;  %v11718_v2 = vsel %vm1282_vm1, 1.0, %v15851_v4  ;;  %v815_v12 = vmul.u32 24, %v814_v1 }
  0xa5   : > { %v1235_v3 = vsel %vm1139_vm2, %v1187_v62, %v783_v52  ;;  %v16562_v5 = vmul.u32.u64.low 2863311531, %v16534_v44  ;;  %v16563_v7 = vmul.u32.u64.high 2863311531, %v16534_v44, %v16562_v5  ;;  %1426 = vst.msk [vmem:[#allocation4 + $0xc8] sm:$0xff] %vm227_vm0, %v11718_v2  ;;  %v825_v14 = vshrl.u32 %v16557_v60, 4 }
  0xa6   : > { %vm1283_vm3 = vcmp.lt.s32.totalorder %v1235_v3, 16  ;;  %vm1044_vm4 = vcmp.ne.s32.totalorder %v794_v63, 0  ;;  %vm1092_vm5 = vcmp.lt.s32.totalorder %v794_v63, 0  ;;  %v1188_v8 = vadd.s32 24, %v794_v63 }
  0xa7   : > { %v11719_v9 = vsel %vm1283_vm3, 1.0, %v15851_v4  ;;  %vm1140_vm6 = vmand %vm1092_vm5, %vm1044_vm4  ;;  %v805_v10 = vsub.s32 %v16516_v31, %v804_v0  ;;  %v16571_v16 = vmul.u32.u64.low 2863311531, %v16542_v46  ;;  %v16572_v17 = vmul.u32.u64.high 2863311531, %v16542_v46, %v16571_v16 }
  0xa8   : > { %1427 = vst.msk [vmem:[#allocation4 + $0xd0] sm:$0xff] %vm227_vm0, %v11719_v9  ;;  %v1236_v15 = vsel %vm1140_vm6, %v1188_v8, %v794_v63  ;;  %v816_v21 = vsub.s32 %v16522_v36, %v815_v12  ;;  %v826_v22 = vmul.u32 24, %v825_v14  ;;  %v836_v50 = vshrl.u32 %v16563_v7, 4 }
  0xa9   : > { %vm1284_vm7 = vcmp.lt.s32.totalorder %v1236_v15, 16  ;;  %vm1045_vm8 = vcmp.ne.s32.totalorder %v805_v10, 0  ;;  %vm1093_vm9 = vcmp.lt.s32.totalorder %v805_v10, 0  ;;  %v1189_v18 = vadd.s32 24, %v805_v10 }
  0xaa   : > { %v11720_v19 = vsel %vm1284_vm7, 1.0, %v15851_v4  ;;  %vm1141_vm10 = vmand %vm1093_vm9, %vm1045_vm8  ;;  %v16582_v27 = vmul.u32.u64.low 2863311531, %v16551_v54  ;;  %v16583_v28 = vmul.u32.u64.high 2863311531, %v16551_v54, %v16582_v27  ;;  %v16586_v29 = vadd.s32 280, %v16176_v11 }
  0xab   : > { %1428 = vst.msk [vmem:[#allocation4 + $0xd8] sm:$0xff] %vm227_vm0, %v11720_v19  ;;  %v1237_v23 = vsel %vm1141_vm10, %v1189_v18, %v805_v10  ;;  %vm1046_vm12 = vcmp.ne.s32.totalorder %v816_v21, 0  ;;  %vm1094_vm13 = vcmp.lt.s32.totalorder %v816_v21, 0  ;;  %v1190_v20 = vadd.s32 24, %v816_v21 }
  0xac   : > { %vm1285_vm11 = vcmp.lt.s32.totalorder %v1237_v23, 16  ;;  %vm1142_vm14 = vmand %vm1094_vm13, %vm1046_vm12  ;;  %v827_v56 = vsub.s32 %v16529_v41, %v826_v22  ;;  %v837_v31 = vmul.u32 24, %v836_v50  ;;  %v847_v33 = vshrl.u32 %v16572_v17, 4 }
  0xad   : > { %v11721_v24 = vsel %vm1285_vm11, 1.0, %v15851_v4  ;;  %v1238_v34 = vsel %vm1142_vm14, %v1190_v20, %v816_v21  ;;  %v16593_v6 = vmul.u32.u64.low 2863311531, %v16575_v38  ;;  %v16594_v35 = vmul.u32.u64.high 2863311531, %v16575_v38, %v16593_v6 }
  0xae   : > { %1429 = vst.msk [vmem:[#allocation4 + $0xe0] sm:$0xff] %vm227_vm0, %v11721_v24  ;;  %v16597_v36 = vadd.s32 288, %v16176_v11  ;;  %vm1286_vm15 = vcmp.lt.s32.totalorder %v1238_v34, 16  ;;  %vm1047_vm1 = vcmp.ne.s32.totalorder %v827_v56, 0  ;;  %vm1095_vm2 = vcmp.lt.s32.totalorder %v827_v56, 0 }
  0xaf   : > { %v1191_v37 = vadd.s32 24, %v827_v56  ;;  %v11722_v39 = vsel %vm1286_vm15, 1.0, %v15851_v4  ;;  %vm1143_vm3 = vmand %vm1095_vm2, %vm1047_vm1  ;;  %v838_v40 = vsub.s32 %v16534_v44, %v837_v31  ;;  %v848_v41 = vmul.u32 24, %v847_v33 }
  0xb0   : > { %v858_v26 = vshrl.u32 %v16583_v28, 4  ;;  %1430 = vst.msk [vmem:[#allocation4 + $0xe8] sm:$0xff] %vm227_vm0, %v11722_v39  ;;  %v16604_v42 = vmul.u32.u64.low 2863311531, %v16586_v29  ;;  %v16605_v43 = vmul.u32.u64.high 2863311531, %v16586_v29, %v16604_v42  ;;  %v16608_v45 = vadd.s32 296, %v16176_v11 }
  0xb1   : > { %v1239_v25 = vsel %vm1143_vm3, %v1191_v37, %v827_v56  ;;  %vm1048_vm5 = vcmp.ne.s32.totalorder %v838_v40, 0  ;;  %vm1096_vm6 = vcmp.lt.s32.totalorder %v838_v40, 0  ;;  %v1192_v13 = vadd.s32 24, %v838_v40 }
  0xb2   : > { %vm1287_vm4 = vcmp.lt.s32.totalorder %v1239_v25, 16  ;;  %vm1144_vm7 = vmand %vm1096_vm6, %vm1048_vm5  ;;  %v849_v44 = vsub.s32 %v16542_v46, %v848_v41  ;;  %v859_v47 = vmul.u32 24, %v858_v26  ;;  %v869_v48 = vshrl.u32 %v16594_v35, 4 }
  0xb3   : > { %v11723_v30 = vsel %vm1287_vm4, 1.0, %v15851_v4  ;;  %v1240_v49 = vsel %vm1144_vm7, %v1192_v13, %v838_v40  ;;  %v16615_v51 = vmul.u32.u64.low 2863311531, %v16597_v36  ;;  %v16616_v32 = vmul.u32.u64.high 2863311531, %v16597_v36, %v16615_v51 }
  0xb4   : > { %1431 = vst.msk [vmem:[#allocation4 + $0xf0] sm:$0xff] %vm227_vm0, %v11723_v30  ;;  %v16619_v53 = vadd.s32 304, %v16176_v11  ;;  %vm1288_vm8 = vcmp.lt.s32.totalorder %v1240_v49, 16  ;;  %vm1049_vm9 = vcmp.ne.s32.totalorder %v849_v44, 0  ;;  %vm1097_vm10 = vcmp.lt.s32.totalorder %v849_v44, 0 }
  0xb5   : > { %v1193_v55 = vadd.s32 24, %v849_v44  ;;  %v11724_v52 = vsel %vm1288_vm8, 1.0, %v15851_v4  ;;  %vm1145_vm11 = vmand %vm1097_vm10, %vm1049_vm9  ;;  %v860_v46 = vsub.s32 %v16551_v54, %v859_v47  ;;  %v870_v57 = vmul.u32 24, %v869_v48 }
  0xb6   : > { %v880_v58 = vshrl.u32 %v16605_v43, 4  ;;  %1432 = vst.msk [vmem:[#allocation4 + $0xf8] sm:$0xff] %vm227_vm0, %v11724_v52  ;;  %v16626_v60 = vmul.u32.u64.low 2863311531, %v16608_v45  ;;  %v16627_v61 = vmul.u32.u64.high 2863311531, %v16608_v45, %v16626_v60  ;;  %v16630_v62 = vadd.s32 312, %v16176_v11 }
  0xb7   : > { %v1241_v59 = vsel %vm1145_vm11, %v1193_v55, %v849_v44  ;;  %vm1050_vm13 = vcmp.ne.s32.totalorder %v860_v46, 0  ;;  %vm1098_vm14 = vcmp.lt.s32.totalorder %v860_v46, 0  ;;  %v1194_v63 = vadd.s32 24, %v860_v46 }
  0xb8   : > { %vm1289_vm12 = vcmp.lt.s32.totalorder %v1241_v59, 16  ;;  %vm1146_vm15 = vmand %vm1098_vm14, %vm1050_vm13  ;;  %v871_v54 = vsub.s32 %v16575_v38, %v870_v57  ;;  %v881_v1 = vmul.u32 24, %v880_v58  ;;  %v891_v2 = vshrl.u32 %v16616_v32, 4 }
  0xb9   : > { %v11725_v0 = vsel %vm1289_vm12, 1.0, %v15851_v4  ;;  %v1242_v3 = vsel %vm1146_vm15, %v1194_v63, %v860_v46  ;;  %v16637_v5 = vmul.u32.u64.low 2863311531, %v16619_v53  ;;  %v16638_v7 = vmul.u32.u64.high 2863311531, %v16619_v53, %v16637_v5 }
  0xba   : > { %1433 = vst.msk [vmem:[#allocation4 + $0x100] sm:$0xff] %vm227_vm0, %v11725_v0  ;;  %v16641_v8 = vadd.s32 320, %v16176_v11  ;;  %vm1290_vm1 = vcmp.lt.s32.totalorder %v1242_v3, 16  ;;  %vm1051_vm2 = vcmp.ne.s32.totalorder %v871_v54, 0  ;;  %vm1099_vm3 = vcmp.lt.s32.totalorder %v871_v54, 0 }
  0xbb   : > { %v1195_v9 = vadd.s32 24, %v871_v54  ;;  %v11726_v10 = vsel %vm1290_vm1, 1.0, %v15851_v4  ;;  %vm1147_vm4 = vmand %vm1099_vm3, %vm1051_vm2  ;;  %v882_v12 = vsub.s32 %v16586_v29, %v881_v1  ;;  %v892_v14 = vmul.u32 24, %v891_v2 }
  0xbc   : > { %v902_v15 = vshrl.u32 %v16627_v61, 4  ;;  %1434 = vst.msk [vmem:[#allocation4 + $0x108] sm:$0xff] %vm227_vm0, %v11726_v10  ;;  %v16648_v17 = vmul.u32.u64.low 2863311531, %v16630_v62  ;;  %v16649_v38 = vmul.u32.u64.high 2863311531, %v16630_v62, %v16648_v17  ;;  %v16652_v18 = vadd.s32 328, %v16176_v11 }
  0xbd   : > { %v1243_v16 = vsel %vm1147_vm4, %v1195_v9, %v871_v54  ;;  %vm1052_vm6 = vcmp.ne.s32.totalorder %v882_v12, 0  ;;  %vm1100_vm7 = vcmp.lt.s32.totalorder %v882_v12, 0  ;;  %v1196_v19 = vadd.s32 24, %v882_v12 }
  0xbe   : > { %vm1291_vm5 = vcmp.lt.s32.totalorder %v1243_v16, 16  ;;  %vm1148_vm8 = vmand %vm1100_vm7, %vm1052_vm6  ;;  %v893_v22 = vsub.s32 %v16597_v36, %v892_v14  ;;  %v903_v50 = vmul.u32 24, %v902_v15  ;;  %v913_v23 = vshrl.u32 %v16638_v7, 4 }
  0xbf   : > { %v11727_v21 = vsel %vm1291_vm5, 1.0, %v15851_v4  ;;  %v1244_v27 = vsel %vm1148_vm8, %v1196_v19, %v882_v12  ;;  %v16659_v28 = vmul.u32.u64.low 2863311531, %v16641_v8  ;;  %v16660_v29 = vmul.u32.u64.high 2863311531, %v16641_v8, %v16659_v28 }
  0xc0   : > { %1435 = vst.msk [vmem:[#allocation4 + $0x110] sm:$0xff] %vm227_vm0, %v11727_v21  ;;  %v16663_v20 = vadd.s32 336, %v16176_v11  ;;  %vm1292_vm9 = vcmp.lt.s32.totalorder %v1244_v27, 16  ;;  %vm1053_vm10 = vcmp.ne.s32.totalorder %v893_v22, 0  ;;  %vm1101_vm11 = vcmp.lt.s32.totalorder %v893_v22, 0 }
  0xc1   : > { %v1197_v24 = vadd.s32 24, %v893_v22  ;;  %v11728_v56 = vsel %vm1292_vm9, 1.0, %v15851_v4  ;;  %vm1149_vm12 = vmand %vm1101_vm11, %vm1053_vm10  ;;  %v904_v31 = vsub.s32 %v16608_v45, %v903_v50  ;;  %v914_v33 = vmul.u32 24, %v913_v23 }
  0xc2   : > { %v924_v34 = vshrl.u32 %v16649_v38, 4  ;;  %1436 = vst.msk [vmem:[#allocation4 + $0x118] sm:$0xff] %vm227_vm0, %v11728_v56  ;;  %v16670_v35 = vmul.u32.u64.low 2863311531, %v16652_v18  ;;  %v16671_v36 = vmul.u32.u64.high 2863311531, %v16652_v18, %v16670_v35  ;;  %v16674_v37 = vadd.s32 344, %v16176_v11 }
  0xc3   : > { %v1245_v6 = vsel %vm1149_vm12, %v1197_v24, %v893_v22  ;;  %vm1054_vm14 = vcmp.ne.s32.totalorder %v904_v31, 0  ;;  %vm1102_vm15 = vcmp.lt.s32.totalorder %v904_v31, 0  ;;  %v1198_v39 = vadd.s32 24, %v904_v31 }
  0xc4   : > { %vm1293_vm13 = vcmp.lt.s32.totalorder %v1245_v6, 16  ;;  %vm1150_vm1 = vmand %vm1102_vm15, %vm1054_vm14  ;;  %v915_v41 = vsub.s32 %v16619_v53, %v914_v33  ;;  %v925_v26 = vmul.u32 24, %v924_v34  ;;  %v935_v25 = vshrl.u32 %v16660_v29, 4 }
  0xc5   : > { %v11729_v40 = vsel %vm1293_vm13, 1.0, %v15851_v4  ;;  %v1246_v42 = vsel %vm1150_vm1, %v1198_v39, %v904_v31  ;;  %v16681_v43 = vmul.u32.u64.low 2863311531, %v16663_v20  ;;  %v16682_v45 = vmul.u32.u64.high 2863311531, %v16663_v20, %v16681_v43 }
  0xc6   : > { %1437 = vst.msk [vmem:[#allocation4 + $0x120] sm:$0xff] %vm227_vm0, %v11729_v40  ;;  %v16685_v13 = vadd.s32 352, %v16176_v11  ;;  %vm1294_vm2 = vcmp.lt.s32.totalorder %v1246_v42, 16  ;;  %vm1055_vm3 = vcmp.ne.s32.totalorder %v915_v41, 0  ;;  %vm1103_vm4 = vcmp.lt.s32.totalorder %v915_v41, 0 }
  0xc7   : > { %v1199_v30 = vadd.s32 24, %v915_v41  ;;  %v11730_v44 = vsel %vm1294_vm2, 1.0, %v15851_v4  ;;  %vm1151_vm5 = vmand %vm1103_vm4, %vm1055_vm3  ;;  %v926_v47 = vsub.s32 %v16630_v62, %v925_v26  ;;  %v936_v48 = vmul.u32 24, %v935_v25 }
  0xc8   : > { %v946_v49 = vshrl.u32 %v16671_v36, 4  ;;  %1438 = vst.msk [vmem:[#allocation4 + $0x128] sm:$0xff] %vm227_vm0, %v11730_v44  ;;  %v16692_v32 = vmul.u32.u64.low 2863311531, %v16674_v37  ;;  %v16693_v53 = vmul.u32.u64.high 2863311531, %v16674_v37, %v16692_v32  ;;  %v16696_v55 = vadd.s32 360, %v16176_v11 }
  0xc9   : > { %v1247_v51 = vsel %vm1151_vm5, %v1199_v30, %v915_v41  ;;  %vm1056_vm7 = vcmp.ne.s32.totalorder %v926_v47, 0  ;;  %vm1104_vm8 = vcmp.lt.s32.totalorder %v926_v47, 0  ;;  %v1200_v52 = vadd.s32 24, %v926_v47 }
  0xca   : > { %vm1295_vm6 = vcmp.lt.s32.totalorder %v1247_v51, 16  ;;  %vm1152_vm9 = vmand %vm1104_vm8, %vm1056_vm7  ;;  %v937_v57 = vsub.s32 %v16641_v8, %v936_v48  ;;  %v947_v58 = vmul.u32 24, %v946_v49  ;;  %v957_v59 = vshrl.u32 %v16682_v45, 4 }
  0xcb   : > { %v11731_v46 = vsel %vm1295_vm6, 1.0, %v15851_v4  ;;  %v1248_v60 = vsel %vm1152_vm9, %v1200_v52, %v926_v47  ;;  %v16703_v61 = vmul.u32.u64.low 2863311531, %v16685_v13  ;;  %v16704_v62 = vmul.u32.u64.high 2863311531, %v16685_v13, %v16703_v61 }
  0xcc   : > { %1439 = vst.msk [vmem:[#allocation4 + $0x130] sm:$0xff] %vm227_vm0, %v11731_v46  ;;  %v16707_v63 = vadd.s32 368, %v16176_v11  ;;  %vm1296_vm10 = vcmp.lt.s32.totalorder %v1248_v60, 16  ;;  %vm1057_vm11 = vcmp.ne.s32.totalorder %v937_v57, 0  ;;  %vm1105_vm12 = vcmp.lt.s32.totalorder %v937_v57, 0 }
  0xcd   : > { %v1201_v0 = vadd.s32 24, %v937_v57  ;;  %v11732_v54 = vsel %vm1296_vm10, 1.0, %v15851_v4  ;;  %vm1153_vm13 = vmand %vm1105_vm12, %vm1057_vm11  ;;  %v948_v1 = vsub.s32 %v16652_v18, %v947_v58  ;;  %v958_v2 = vmul.u32 24, %v957_v59 }
  0xce   : > { %v968_v3 = vshrl.u32 %v16693_v53, 4  ;;  %1440 = vst.msk [vmem:[#allocation4 + $0x138] sm:$0xff] %vm227_vm0, %v11732_v54  ;;  %v16714_v7 = vmul.u32.u64.low 2863311531, %v16696_v55  ;;  %v16715_v8 = vmul.u32.u64.high 2863311531, %v16696_v55, %v16714_v7  ;;  %v16718_v9 = vadd.s32 376, %v16176_v11 }
  0xcf   : > { %v1249_v5 = vsel %vm1153_vm13, %v1201_v0, %v937_v57  ;;  %vm1058_vm15 = vcmp.ne.s32.totalorder %v948_v1, 0  ;;  %vm1106_vm1 = vcmp.lt.s32.totalorder %v948_v1, 0  ;;  %v1202_v10 = vadd.s32 24, %v948_v1 }
  0xd0   : > { %vm1297_vm14 = vcmp.lt.s32.totalorder %v1249_v5, 16  ;;  %vm1154_vm2 = vmand %vm1106_vm1, %vm1058_vm15  ;;  %v959_v14 = vsub.s32 %v16663_v20, %v958_v2  ;;  %v969_v15 = vmul.u32 24, %v968_v3  ;;  %v979_v16 = vshrl.u32 %v16704_v62, 4 }
  0xd1   : > { %v11733_v12 = vsel %vm1297_vm14, 1.0, %v15851_v4  ;;  %v1250_v17 = vsel %vm1154_vm2, %v1202_v10, %v948_v1  ;;  %v16725_v38 = vmul.u32.u64.low 2863311531, %v16707_v63  ;;  %v16726_v18 = vmul.u32.u64.high 2863311531, %v16707_v63, %v16725_v38 }
  0xd2   : > { %1441 = vst.msk [vmem:[#allocation4 + $0x140] sm:$0xff] %vm227_vm0, %v11733_v12  ;;  %vm1298_vm3 = vcmp.lt.s32.totalorder %v1250_v17, 16  ;;  %vm1059_vm4 = vcmp.ne.s32.totalorder %v959_v14, 0  ;;  %vm1107_vm5 = vcmp.lt.s32.totalorder %v959_v14, 0  ;;  %v1203_v11 = vadd.s32 24, %v959_v14 }
  0xd3   : > { %v11734_v19 = vsel %vm1298_vm3, 1.0, %v15851_v4  ;;  %vm1155_vm6 = vmand %vm1107_vm5, %vm1059_vm4  ;;  %v970_v21 = vsub.s32 %v16674_v37, %v969_v15  ;;  %v980_v22 = vmul.u32 24, %v979_v16  ;;  %v990_v50 = vshrl.u32 %v16715_v8, 4 }
  0xd4   : > { %1442 = vst.msk [vmem:[#allocation4 + $0x148] sm:$0xff] %vm227_vm0, %v11734_v19  ;;  %v1251_v23 = vsel %vm1155_vm6, %v1203_v11, %v959_v14  ;;  %v16733_v27 = vmul.u32.u64.low 2863311531, %v16718_v9  ;;  %v16734_v28 = vmul.u32.u64.high 2863311531, %v16718_v9, %v16733_v27  ;;  %v1001_v31 = vshrl.u32 %v16726_v18, 4 }
  0xd5   : > { %vm1299_vm7 = vcmp.lt.s32.totalorder %v1251_v23, 16  ;;  %vm1060_vm8 = vcmp.ne.s32.totalorder %v970_v21, 0  ;;  %vm1108_vm9 = vcmp.lt.s32.totalorder %v970_v21, 0  ;;  %v1204_v29 = vadd.s32 24, %v970_v21 }
  0xd6   : > { %v11735_v20 = vsel %vm1299_vm7, 1.0, %v15851_v4  ;;  %vm1156_vm10 = vmand %vm1108_vm9, %vm1060_vm8  ;;  %v981_v24 = vsub.s32 %v16685_v13, %v980_v22  ;;  %v991_v56 = vmul.u32 24, %v990_v50  ;;  %v1002_v36 = vmul.u32 24, %v1001_v31 }
  0xd7   : > { %1443 = vst.msk [vmem:[#allocation4 + $0x150] sm:$0xff] %vm227_vm0, %v11735_v20  ;;  %v1252_v33 = vsel %vm1156_vm10, %v1204_v29, %v970_v21  ;;  %v1012_v37 = vshrl.u32 %v16734_v28, 4 }
  0xd8   : > { %vm1300_vm11 = vcmp.lt.s32.totalorder %v1252_v33, 16  ;;  %vm1061_vm12 = vcmp.ne.s32.totalorder %v981_v24, 0  ;;  %vm1109_vm13 = vcmp.lt.s32.totalorder %v981_v24, 0  ;;  %v1205_v34 = vadd.s32 24, %v981_v24 }
  0xd9   : > { %v11736_v6 = vsel %vm1300_vm11, 1.0, %v15851_v4  ;;  %vm1157_vm14 = vmand %vm1109_vm13, %vm1061_vm12  ;;  %v992_v35 = vsub.s32 %v16696_v55, %v991_v56  ;;  %v1003_v26 = vsub.s32 %v16707_v63, %v1002_v36  ;;  %v1013_v25 = vmul.u32 24, %v1012_v37 }
  0xda   : > { %1444 = vst.msk [vmem:[#allocation4 + $0x158] sm:$0xff] %vm227_vm0, %v11736_v6  ;;  %v1253_v39 = vsel %vm1157_vm14, %v1205_v34, %v981_v24 }
  0xdb   : > { %vm1301_vm15 = vcmp.lt.s32.totalorder %v1253_v39, 16  ;;  %vm1062_vm1 = vcmp.ne.s32.totalorder %v992_v35, 0  ;;  %vm1110_vm2 = vcmp.lt.s32.totalorder %v992_v35, 0  ;;  %v1206_v40 = vadd.s32 24, %v992_v35 }
  0xdc   : > { %v11737_v41 = vsel %vm1301_vm15, 1.0, %v15851_v4  ;;  %vm1158_vm3 = vmand %vm1110_vm2, %vm1062_vm1  ;;  %vm1063_vm5 = vcmp.ne.s32.totalorder %v1003_v26, 0  ;;  %vm1111_vm6 = vcmp.lt.s32.totalorder %v1003_v26, 0  ;;  %v1207_v43 = vadd.s32 24, %v1003_v26 }
  0xdd   : > { %1445 = vst.msk [vmem:[#allocation4 + $0x160] sm:$0xff] %vm227_vm0, %v11737_v41  ;;  %v1254_v42 = vsel %vm1158_vm3, %v1206_v40, %v992_v35  ;;  %vm1159_vm7 = vmand %vm1111_vm6, %vm1063_vm5  ;;  %v1014_v13 = vsub.s32 %v16718_v9, %v1013_v25 }
  0xde   : > { %vm1302_vm4 = vcmp.lt.s32.totalorder %v1254_v42, 16  ;;  %v1255_v30 = vsel %vm1159_vm7, %v1207_v43, %v1003_v26 }
  0xdf   : > { %v11738_v45 = vsel %vm1302_vm4, 1.0, %v15851_v4  ;;  %vm1303_vm8 = vcmp.lt.s32.totalorder %v1255_v30, 16  ;;  %vm1064_vm9 = vcmp.ne.s32.totalorder %v1014_v13, 0  ;;  %vm1112_vm10 = vcmp.lt.s32.totalorder %v1014_v13, 0 }
  0xe0   : > { %1446 = vst.msk [vmem:[#allocation4 + $0x168] sm:$0xff] %vm227_vm0, %v11738_v45  ;;  %v1208_v44 = vadd.s32 24, %v1014_v13  ;;  %v11739_v47 = vsel %vm1303_vm8, 1.0, %v15851_v4  ;;  %vm1160_vm11 = vmand %vm1112_vm10, %vm1064_vm9 }
  0xe1   : > { %1447 = vst.msk [vmem:[#allocation4 + $0x170] sm:$0xff] %vm227_vm0, %v11739_v47 }
  0xe2   : > { %v1256_v48 = vsel %vm1160_vm11, %v1208_v44, %v1014_v13 }
  0xe3   : > { %vm1304_vm12 = vcmp.lt.s32.totalorder %v1256_v48, 16 }
  0xe4   : > { %v11740_v49 = vsel %vm1304_vm12, 1.0, %v15851_v4 }
  0xe5   : > { %1448 = vst.msk [vmem:[#allocation4 + $0x178] sm:$0xff] %vm227_vm0, %v11740_v49 }
  0xe6 PF: > { %v11741_v51 = vld [vmem:[%s15919_s30 + $0x4] sm:$0xf]  ;;  %vm1741_vm13 = vcmask 1043456   ;;  %v1546_v32 = vld [vmem:[#allocation2 + $0x18] sm:$0xff]  ;;  %vm1596_vm14 = vcmask 31744   ;;  %v1548_v52 = vld [vmem:[#allocation2 + $0x28] sm:$0xff] }
  0xe7   : > { %v1547_v53 = vld [vmem:[#allocation2 + $0x20] sm:$0xff]  ;;  %13524 = vmatprep.subr.msk.mxu0 %vm1741_vm13, %v11741_v51  ;;  %13526 = vmatprep.mubr.msk.f32.mxu0 %vm1596_vm14, %v1546_v32  ;;  %v16763_v4 = vld [vmem:[#allocation2 + $0x30] sm:$0xff]  ;;  %v16765_v46 = vld [vmem:[#allocation2 + $0x38] sm:$0xff]  ;;  %p12639_p8 = scmp.ne.s32.totalorder %s15833_s12, 1 }
  0xe8   : > { %v1545_v55 = vld [vmem:[%s15919_s30] sm:$0xf]  ;;  %13525 = vmatpush3.msk.msra.mxu0 %vm1741_vm13, %v11741_v51  ;;  %v16773_v58 = vld [vmem:[#allocation2 + $0x48] sm:$0xff]  ;;  %v16779_v59 = vld [vmem:[#allocation2 + $0x50] sm:$0xff] }
  0xe9   : > { %13527 = vmatmul.mubr.msk.f32.vlgmr.msra.gmra.mrb[0].mxu0 %vm1596_vm14, %v1547_v53  ;;  %13598 = vmatprep.subr.msk.mxu0 %vm1741_vm13, %v1545_v55  ;;  %v16771_v57 = vld [vmem:[#allocation2 + $0x40] sm:$0xff]  ;;  %v16781_v60 = vld [vmem:[#allocation2 + $0x58] sm:$0xff]  ;;  %v16789_v62 = vld [vmem:[#allocation2 + $0x68] sm:$0xff] }
  0xea   : > { %13599 = vmatpush3.msk.msra.mxu0 %vm1741_vm13, %v1545_v55  ;;  %13529 = vmatprep.mubr.msk.f32.mxu0 %vm1596_vm14, %v1548_v52  ;;  %v16787_v61 = vld [vmem:[#allocation2 + $0x60] sm:$0xff]  ;;  %v16792_v63 = vld [vmem:[%s15919_s30 + $0x8] sm:$0xf]  ;;  %v16800_v0 = vld [vmem:[#allocation2 + $0x70] sm:$0xff] }
  0xeb   : > { %13672 = vmatprep.subr.msk.mxu0 %vm1741_vm13, %v16792_v63  ;;  %v16802_v54 = vld [vmem:[#allocation2 + $0x78] sm:$0xff]  ;;  %v16808_v1 = vld [vmem:[#allocation2 + $0x80] sm:$0xff]  ;;  %v16810_v2 = vld [vmem:[#allocation2 + $0x88] sm:$0xff] }
  0xec   : > { %v16816_v3 = vld [vmem:[#allocation2 + $0x90] sm:$0xff]  ;;  %v16818_v5 = vld [vmem:[#allocation2 + $0x98] sm:$0xff]  ;;  %v16824_v7 = vld [vmem:[#allocation2 + $0xa0] sm:$0xff] }
  0xed   : > { %13530 = vmatmul.mubr.msk.f32.gmra.mrb[2].mxu0 %vm1596_vm14, %v16763_v4  ;;  %19458 = vst [vmem:[#allocation5_spill] sm:$0xff] %v16816_v3  ;;  %19459 = vst [vmem:[#allocation6_spill] sm:$0xff] %v16818_v5  ;;  %v16826_v8 = vld [vmem:[#allocation2 + $0xa8] sm:$0xff]  ;;  %v16832_v9 = vld [vmem:[#allocation2 + $0xb0] sm:$0xff] }
  0xee   : > { %13532 = vmatprep.mubr.msk.f32.mxu0 %vm1596_vm14, %v16765_v46  ;;  %19460 = vst [vmem:[#allocation7_spill] sm:$0xff] %v16824_v7  ;;  %19461 = vst [vmem:[#allocation8_spill] sm:$0xff] %v16826_v8  ;;  %v16834_v10 = vld [vmem:[#allocation2 + $0xb8] sm:$0xff]  ;;  %v16840_v12 = vld [vmem:[#allocation2 + $0xc0] sm:$0xff] }
  0xef   : > { %19462 = vst [vmem:[#allocation9_spill] sm:$0xff] %v16832_v9  ;;  %19463 = vst [vmem:[#allocation10_spill] sm:$0xff] %v16834_v10  ;;  %v16842_v14 = vld [vmem:[#allocation2 + $0xc8] sm:$0xff]  ;;  %v16848_v15 = vld [vmem:[#allocation2 + $0xd0] sm:$0xff] }
  0xf0   : > { %19464 = vst [vmem:[#allocation11_spill] sm:$0xff] %v16840_v12  ;;  %19465 = vst [vmem:[#allocation12_spill] sm:$0xff] %v16842_v14  ;;  %v16850_v16 = vld [vmem:[#allocation2 + $0xd8] sm:$0xff]  ;;  %v16856_v17 = vld [vmem:[#allocation2 + $0xe0] sm:$0xff] }
  0xf1   : > { %13533 = vmatmul.mubr.msk.f32.gmra.mrb[4].mxu0 %vm1596_vm14, %v16771_v57  ;;  %19466 = vst [vmem:[#allocation13_spill] sm:$0xff] %v16848_v15  ;;  %19467 = vst [vmem:[#allocation14_spill] sm:$0xff] %v16850_v16  ;;  %v16858_v38 = vld [vmem:[#allocation2 + $0xe8] sm:$0xff]  ;;  %v16864_v18 = vld [vmem:[#allocation2 + $0xf0] sm:$0xff] }
  0xf2   : > { %13535 = vmatprep.mubr.msk.f32.mxu0 %vm1596_vm14, %v16773_v58  ;;  %19468 = vst [vmem:[#allocation15_spill] sm:$0xff] %v16856_v17  ;;  %19469 = vst [vmem:[#allocation16_spill] sm:$0xff] %v16858_v38  ;;  %v16866_v11 = vld [vmem:[#allocation2 + $0xf8] sm:$0xff]  ;;  %v16872_v19 = vld [vmem:[#allocation2 + $0x100] sm:$0xff] }
  0xf3   : > { %19470 = vst [vmem:[#allocation17_spill] sm:$0xff] %v16864_v18  ;;  %19471 = vst [vmem:[#allocation18_spill] sm:$0xff] %v16866_v11  ;;  %v16874_v21 = vld [vmem:[#allocation2 + $0x108] sm:$0xff]  ;;  %v16880_v22 = vld [vmem:[#allocation2 + $0x110] sm:$0xff] }
  0xf4   : > { %19472 = vst [vmem:[#allocation19_spill] sm:$0xff] %v16872_v19  ;;  %19473 = vst [vmem:[#allocation20_spill] sm:$0xff] %v16874_v21  ;;  %v16882_v50 = vld [vmem:[#allocation2 + $0x118] sm:$0xff]  ;;  %v16888_v23 = vld [vmem:[#allocation2 + $0x120] sm:$0xff] }
  0xf5   : > { %13536 = vmatmul.mubr.msk.f32.gmra.mrb[6].mxu0 %vm1596_vm14, %v16779_v59  ;;  %19474 = vst [vmem:[#allocation21_spill] sm:$0xff] %v16880_v22  ;;  %19475 = vst [vmem:[#allocation22_spill] sm:$0xff] %v16882_v50  ;;  %v16890_v27 = vld [vmem:[#allocation2 + $0x128] sm:$0xff]  ;;  %v16896_v28 = vld [vmem:[#allocation2 + $0x130] sm:$0xff] }
  0xf6   : > { %13538 = vmatprep.mubr.msk.f32.mxu0 %vm1596_vm14, %v16781_v60  ;;  %19476 = vst [vmem:[#allocation23_spill] sm:$0xff] %v16888_v23  ;;  %19477 = vst [vmem:[#allocation24_spill] sm:$0xff] %v16890_v27  ;;  %v16898_v29 = vld [vmem:[#allocation2 + $0x138] sm:$0xff]  ;;  %v16904_v20 = vld [vmem:[#allocation2 + $0x140] sm:$0xff] }
  0xf7   : > { %19478 = vst [vmem:[#allocation25_spill] sm:$0xff] %v16896_v28  ;;  %19479 = vst [vmem:[#allocation26_spill] sm:$0xff] %v16898_v29  ;;  %v16906_v24 = vld [vmem:[#allocation2 + $0x148] sm:$0xff]  ;;  %v16912_v56 = vld [vmem:[#allocation2 + $0x150] sm:$0xff] }
  0xf8   : > { %19480 = vst [vmem:[#allocation27_spill] sm:$0xff] %v16904_v20  ;;  %19481 = vst [vmem:[#allocation28_spill] sm:$0xff] %v16906_v24  ;;  %v16914_v31 = vld [vmem:[#allocation2 + $0x158] sm:$0xff]  ;;  %v16920_v33 = vld [vmem:[#allocation2 + $0x160] sm:$0xff] }
  0xf9   : > { %13539 = vmatmul.mubr.msk.f32.gmra.mrb[8].mxu0 %vm1596_vm14, %v16787_v61  ;;  %19482 = vst [vmem:[#allocation29_spill] sm:$0xff] %v16912_v56  ;;  %19483 = vst [vmem:[#allocation30_spill] sm:$0xff] %v16914_v31  ;;  %v16922_v34 = vld [vmem:[#allocation2 + $0x168] sm:$0xff]  ;;  %v16928_v6 = vld [vmem:[#allocation2 + $0x170] sm:$0xff] }
  0xfa   : > { %13541 = vmatprep.mubr.msk.f32.mxu0 %vm1596_vm14, %v16789_v62  ;;  %19484 = vst [vmem:[#allocation31_spill] sm:$0xff] %v16920_v33  ;;  %19485 = vst [vmem:[#allocation32_spill] sm:$0xff] %v16922_v34  ;;  %v16930_v35 = vld [vmem:[#allocation2 + $0x178] sm:$0xff]  ;;  %v16936_v36 = vld [vmem:[#allocation2 + $0x180] sm:$0xff] }
  0xfb   : > { %19486 = vst [vmem:[#allocation33_spill] sm:$0xff] %v16928_v6  ;;  %19487 = vst [vmem:[#allocation34_spill] sm:$0xff] %v16930_v35  ;;  %v16938_v37 = vld [vmem:[#allocation2 + $0x188] sm:$0xff]  ;;  %v16944_v39 = vld [vmem:[#allocation2 + $0x190] sm:$0xff] }
  0xfc   : > { %19488 = vst [vmem:[#allocation35_spill] sm:$0xff] %v16936_v36  ;;  %19489 = vst [vmem:[#allocation36_spill] sm:$0xff] %v16938_v37  ;;  %v1497_v40 = vld [vmem:[#allocation2 + $0x17] sm:$0xff]  ;;  %v1498_v41 = vld [vmem:[#allocation2 + $0x1f] sm:$0xff] }
  0xfd   : > { %13542 = vmatmul.mubr.msk.f32.gmra.mrb[10].mxu0 %vm1596_vm14, %v16800_v0  ;;  %19490 = vst [vmem:[#allocation37_spill] sm:$0xff] %v16944_v39  ;;  %v1499_v26 = vld [vmem:[#allocation2 + $0x27] sm:$0xff]  ;;  %v16956_v42 = vld [vmem:[#allocation2 + $0x2f] sm:$0xff]  ;;  %v16958_v43 = vld [vmem:[#allocation2 + $0x37] sm:$0xff] }
  0xfe   : > { %13544 = vmatprep.mubr.msk.f32.mxu0 %vm1596_vm14, %v16802_v54  ;;  %v16950_v25 = vld [vmem:[%s15919_s30 + $0xc] sm:$0xf]  ;;  %v16966_v45 = vld [vmem:[#allocation2 + $0x3f] sm:$0xff]  ;;  %v16976_v44 = vld [vmem:[#allocation2 + $0x57] sm:$0xff] }
  0xff   : > { %v16968_v13 = vld [vmem:[#allocation2 + $0x47] sm:$0xff]  ;;  %v16974_v30 = vld [vmem:[#allocation2 + $0x4f] sm:$0xff]  ;;  %v16982_v47 = vld [vmem:[#allocation2 + $0x5f] sm:$0xff] }
 0x100   : > { %v16984_v48 = vld [vmem:[#allocation2 + $0x67] sm:$0xff]  ;;  %v16990_v49 = vld [vmem:[#allocation2 + $0x6f] sm:$0xff]  ;;  %v16992_v51 = vld [vmem:[#allocation2 + $0x77] sm:$0xff] }
 0x101   : > { %13545 = vmatmul.mubr.msk.f32.gmra.mrb[12].mxu0 %vm1596_vm14, %v16808_v1  ;;  %v16998_v32 = vld [vmem:[#allocation2 + $0x7f] sm:$0xff]  ;;  %v17000_v53 = vld [vmem:[#allocation2 + $0x87] sm:$0xff]  ;;  %v17006_v55 = vld [vmem:[#allocation2 + $0x8f] sm:$0xff] }
 0x102   : > { %13547 = vmatprep.mubr.msk.f32.mxu0 %vm1596_vm14, %v16810_v2  ;;  %v17008_v52 = vld [vmem:[#allocation2 + $0x97] sm:$0xff] }
 0x105   : > { %13548 = vmatmul.mubr.msk.f32.gmra.mrb[14].mxu0 %vm1596_vm14, %v16816_v3  ;;  %v17148_v3 = vld [vmem:[#allocation2 + $0x39] sm:$0xff] }
 0x106   : > { %13550 = vmatprep.mubr.msk.f32.mxu0 %vm1596_vm14, %v16818_v5  ;;  %v17146_v5 = vld [vmem:[#allocation2 + $0x31] sm:$0xff]  ;;  %19492 = vst [vmem:[#allocation39_spill] sm:$0xff] %v17148_v3 }
 0x107   : > { %19491 = vst [vmem:[#allocation38_spill] sm:$0xff] %v17146_v5 }
 0x109   : > { %13551 = vmatmul.mubr.msk.f32.gmra.mrb[16].mxu0 %vm1596_vm14, %v16824_v7  ;;  %v17140_v7 = vld [vmem:[%s15919_s30 + $0x10] sm:$0xf] }
 0x10a   : > { %13553 = vmatprep.mubr.msk.f32.mxu0 %vm1596_vm14, %v16826_v8  ;;  %v2504_v8 = vld [vmem:[#allocation2 + $0x29] sm:$0xff] }
 0x10d   : > { %13554 = vmatmul.mubr.msk.f32.gmra.mrb[18].mxu0 %vm1596_vm14, %v16832_v9  ;;  %v2503_v9 = vld [vmem:[#allocation2 + $0x21] sm:$0xff] }
 0x10e   : > { %13556 = vmatprep.mubr.msk.f32.mxu0 %vm1596_vm14, %v16834_v10  ;;  %v2502_v10 = vld [vmem:[#allocation2 + $0x19] sm:$0xff] }
 0x111   : > { %13557 = vmatmul.mubr.msk.f32.gmra.mrb[20].mxu0 %vm1596_vm14, %v16840_v12  ;;  %v17134_v12 = vld [vmem:[#allocation2 + $0x18f] sm:$0xff] }
 0x112   : > { %13559 = vmatprep.mubr.msk.f32.mxu0 %vm1596_vm14, %v16842_v14  ;;  %v17128_v14 = vld [vmem:[#allocation2 + $0x187] sm:$0xff] }
 0x115   : > { %13560 = vmatmul.mubr.msk.f32.gmra.mrb[22].mxu0 %vm1596_vm14, %v16848_v15  ;;  %v17126_v15 = vld [vmem:[#allocation2 + $0x17f] sm:$0xff] }
 0x116   : > { %13562 = vmatprep.mubr.msk.f32.mxu0 %vm1596_vm14, %v16850_v16  ;;  %v17120_v16 = vld [vmem:[#allocation2 + $0x177] sm:$0xff] }
 0x119   : > { %13563 = vmatmul.mubr.msk.f32.gmra.mrb[24].mxu0 %vm1596_vm14, %v16856_v17  ;;  %v17118_v17 = vld [vmem:[#allocation2 + $0x16f] sm:$0xff] }
 0x11a   : > { %13565 = vmatprep.mubr.msk.f32.mxu0 %vm1596_vm14, %v16858_v38  ;;  %v17112_v38 = vld [vmem:[#allocation2 + $0x167] sm:$0xff] }
 0x11d   : > { %13566 = vmatmul.mubr.msk.f32.gmra.mrb[26].mxu0 %vm1596_vm14, %v16864_v18  ;;  %v17110_v18 = vld [vmem:[#allocation2 + $0x15f] sm:$0xff] }
 0x11e   : > { %13568 = vmatprep.mubr.msk.f32.mxu0 %vm1596_vm14, %v16866_v11  ;;  %v17104_v11 = vld [vmem:[#allocation2 + $0x157] sm:$0xff] }
 0x121   : > { %13569 = vmatmul.mubr.msk.f32.gmra.mrb[28].mxu0 %vm1596_vm14, %v16872_v19  ;;  %v17102_v19 = vld [vmem:[#allocation2 + $0x14f] sm:$0xff] }
 0x122   : > { %13571 = vmatprep.mubr.msk.f32.mxu0 %vm1596_vm14, %v16874_v21  ;;  %v17096_v21 = vld [vmem:[#allocation2 + $0x147] sm:$0xff] }
 0x125   : > { %13572 = vmatmul.mubr.msk.f32.gmra.mrb[30].mxu0 %vm1596_vm14, %v16880_v22  ;;  %v17094_v22 = vld [vmem:[#allocation2 + $0x13f] sm:$0xff] }
 0x126   : > { %13574 = vmatprep.mubr.msk.f32.mxu0 %vm1596_vm14, %v16882_v50  ;;  %v17088_v50 = vld [vmem:[#allocation2 + $0x137] sm:$0xff] }
 0x129   : > { %13575 = vmatmul.mubr.msk.f32.gmra.mrb[32].mxu0 %vm1596_vm14, %v16888_v23  ;;  %v17086_v23 = vld [vmem:[#allocation2 + $0x12f] sm:$0xff] }
 0x12a   : > { %13577 = vmatprep.mubr.msk.f32.mxu0 %vm1596_vm14, %v16890_v27  ;;  %v17080_v27 = vld [vmem:[#allocation2 + $0x127] sm:$0xff] }
 0x12d   : > { %13578 = vmatmul.mubr.msk.f32.gmra.mrb[34].mxu0 %vm1596_vm14, %v16896_v28  ;;  %v17078_v28 = vld [vmem:[#allocation2 + $0x11f] sm:$0xff] }
 0x12e   : > { %13580 = vmatprep.mubr.msk.f32.mxu0 %vm1596_vm14, %v16898_v29  ;;  %v17072_v29 = vld [vmem:[#allocation2 + $0x117] sm:$0xff] }
 0x131   : > { %13581 = vmatmul.mubr.msk.f32.gmra.mrb[36].mxu0 %vm1596_vm14, %v16904_v20  ;;  %v17070_v20 = vld [vmem:[#allocation2 + $0x10f] sm:$0xff] }
 0x132   : > { %13583 = vmatprep.mubr.msk.f32.mxu0 %vm1596_vm14, %v16906_v24  ;;  %v17064_v24 = vld [vmem:[#allocation2 + $0x107] sm:$0xff] }
 0x135   : > { %13584 = vmatmul.mubr.msk.f32.gmra.mrb[38].mxu0 %vm1596_vm14, %v16912_v56  ;;  %v17062_v56 = vld [vmem:[#allocation2 + $0xff] sm:$0xff] }
 0x136   : > { %13586 = vmatprep.mubr.msk.f32.mxu0 %vm1596_vm14, %v16914_v31  ;;  %v17056_v31 = vld [vmem:[#allocation2 + $0xf7] sm:$0xff] }
 0x139   : > { %13587 = vmatmul.mubr.msk.f32.gmra.mrb[40].mxu0 %vm1596_vm14, %v16920_v33  ;;  %v17054_v33 = vld [vmem:[#allocation2 + $0xef] sm:$0xff] }
 0x13a   : > { %13589 = vmatprep.mubr.msk.f32.mxu0 %vm1596_vm14, %v16922_v34  ;;  %v17048_v34 = vld [vmem:[#allocation2 + $0xe7] sm:$0xff] }
 0x13d   : > { %13590 = vmatmul.mubr.msk.f32.gmra.mrb[42].mxu0 %vm1596_vm14, %v16928_v6  ;;  %v17046_v6 = vld [vmem:[#allocation2 + $0xdf] sm:$0xff] }
 0x13e   : > { %13592 = vmatprep.mubr.msk.f32.mxu0 %vm1596_vm14, %v16930_v35  ;;  %v17040_v35 = vld [vmem:[#allocation2 + $0xd7] sm:$0xff] }
 0x141   : > { %13593 = vmatmul.mubr.msk.f32.gmra.mrb[44].mxu0 %vm1596_vm14, %v16936_v36  ;;  %v17038_v36 = vld [vmem:[#allocation2 + $0xcf] sm:$0xff] }
 0x142   : > { %13595 = vmatprep.mubr.msk.f32.mxu0 %vm1596_vm14, %v16938_v37  ;;  %v17032_v37 = vld [vmem:[#allocation2 + $0xc7] sm:$0xff] }
 0x145   : > { %13596 = vmatmul.mubr.msk.f32.gmra.mrb[46].mxu0 %vm1596_vm14, %v16944_v39  ;;  %v17030_v39 = vld [vmem:[#allocation2 + $0xbf] sm:$0xff] }
 0x146   : > { %13600 = vmatprep.mubr.msk.f32.mxu0 %vm1596_vm14, %v1497_v40  ;;  %v17016_v40 = vld [vmem:[#allocation2 + $0xa7] sm:$0xff] }
 0x149   : > { %13601 = vmatmul.mubr.msk.f32.vlgmr.msra.gmra.mrb[0].mxu0 %vm1596_vm14, %v1498_v41  ;;  %v17022_v41 = vld [vmem:[#allocation2 + $0xaf] sm:$0xff] }
 0x14a   : > { %13673 = vmatpush3.msk.msra.mxu0 %vm1741_vm13, %v16792_v63  ;;  %13603 = vmatprep.mubr.msk.f32.mxu0 %vm1596_vm14, %v1499_v26  ;;  %v17014_v63 = vld [vmem:[#allocation2 + $0x9f] sm:$0xff]  ;;  %v17024_v26 = vld [vmem:[#allocation2 + $0xb7] sm:$0xff] }
 0x14b   : > { %13746 = vmatprep.subr.msk.mxu0 %vm1741_vm13, %v16950_v25 }
 0x14d   : > { %13604 = vmatmul.mubr.msk.f32.gmra.mrb[2].mxu0 %vm1596_vm14, %v16956_v42 }
 0x14e   : > { %13606 = vmatprep.mubr.msk.f32.mxu0 %vm1596_vm14, %v16958_v43 }
 0x151   : > { %13607 = vmatmul.mubr.msk.f32.gmra.mrb[4].mxu0 %vm1596_vm14, %v16966_v45 }
 0x152   : > { %13609 = vmatprep.mubr.msk.f32.mxu0 %vm1596_vm14, %v16968_v13 }
 0x155   : > { %13610 = vmatmul.mubr.msk.f32.gmra.mrb[6].mxu0 %vm1596_vm14, %v16974_v30 }
 0x156   : > { %13612 = vmatprep.mubr.msk.f32.mxu0 %vm1596_vm14, %v16976_v44 }
 0x159   : > { %13613 = vmatmul.mubr.msk.f32.gmra.mrb[8].mxu0 %vm1596_vm14, %v16982_v47 }
 0x15a   : > { %13615 = vmatprep.mubr.msk.f32.mxu0 %vm1596_vm14, %v16984_v48 }
 0x15d   : > { %13616 = vmatmul.mubr.msk.f32.gmra.mrb[10].mxu0 %vm1596_vm14, %v16990_v49 }
 0x15e   : > { %13618 = vmatprep.mubr.msk.f32.mxu0 %vm1596_vm14, %v16992_v51 }
 0x161   : > { %13619 = vmatmul.mubr.msk.f32.gmra.mrb[12].mxu0 %vm1596_vm14, %v16998_v32 }
 0x162   : > { %13621 = vmatprep.mubr.msk.f32.mxu0 %vm1596_vm14, %v17000_v53 }
 0x165   : > { %13622 = vmatmul.mubr.msk.f32.gmra.mrb[14].mxu0 %vm1596_vm14, %v17006_v55 }
 0x166   : > { %13624 = vmatprep.mubr.msk.f32.mxu0 %vm1596_vm14, %v17008_v52 }
 0x169   : > { %13625 = vmatmul.mubr.msk.f32.gmra.mrb[16].mxu0 %vm1596_vm14, %v17014_v63 }
 0x16a   : > { %13627 = vmatprep.mubr.msk.f32.mxu0 %vm1596_vm14, %v17016_v40 }
 0x16d   : > { %13628 = vmatmul.mubr.msk.f32.gmra.mrb[18].mxu0 %vm1596_vm14, %v17022_v41 }
 0x16e   : > { %13630 = vmatprep.mubr.msk.f32.mxu0 %vm1596_vm14, %v17024_v26 }
 0x171   : > { %13631 = vmatmul.mubr.msk.f32.gmra.mrb[20].mxu0 %vm1596_vm14, %v17030_v39 }
 0x172   : > { %13633 = vmatprep.mubr.msk.f32.mxu0 %vm1596_vm14, %v17032_v37 }
 0x175   : > { %13634 = vmatmul.mubr.msk.f32.gmra.mrb[22].mxu0 %vm1596_vm14, %v17038_v36 }
 0x176   : > { %13636 = vmatprep.mubr.msk.f32.mxu0 %vm1596_vm14, %v17040_v35 }
 0x179   : > { %13637 = vmatmul.mubr.msk.f32.gmra.mrb[24].mxu0 %vm1596_vm14, %v17046_v6 }
 0x17a   : > { %13639 = vmatprep.mubr.msk.f32.mxu0 %vm1596_vm14, %v17048_v34 }
 0x17d   : > { %13640 = vmatmul.mubr.msk.f32.gmra.mrb[26].mxu0 %vm1596_vm14, %v17054_v33 }
 0x17e   : > { %13642 = vmatprep.mubr.msk.f32.mxu0 %vm1596_vm14, %v17056_v31 }
 0x181   : > { %13643 = vmatmul.mubr.msk.f32.gmra.mrb[28].mxu0 %vm1596_vm14, %v17062_v56 }
 0x182   : > { %13645 = vmatprep.mubr.msk.f32.mxu0 %vm1596_vm14, %v17064_v24 }
 0x185   : > { %13646 = vmatmul.mubr.msk.f32.gmra.mrb[30].mxu0 %vm1596_vm14, %v17070_v20 }
 0x186   : > { %13648 = vmatprep.mubr.msk.f32.mxu0 %vm1596_vm14, %v17072_v29 }
 0x189   : > { %13649 = vmatmul.mubr.msk.f32.gmra.mrb[32].mxu0 %vm1596_vm14, %v17078_v28 }
 0x18a   : > { %13651 = vmatprep.mubr.msk.f32.mxu0 %vm1596_vm14, %v17080_v27 }
 0x18d   : > { %13652 = vmatmul.mubr.msk.f32.gmra.mrb[34].mxu0 %vm1596_vm14, %v17086_v23 }
 0x18e   : > { %13654 = vmatprep.mubr.msk.f32.mxu0 %vm1596_vm14, %v17088_v50 }
 0x191   : > { %13655 = vmatmul.mubr.msk.f32.gmra.mrb[36].mxu0 %vm1596_vm14, %v17094_v22 }
 0x192   : > { %13657 = vmatprep.mubr.msk.f32.mxu0 %vm1596_vm14, %v17096_v21 }
 0x195   : > { %13658 = vmatmul.mubr.msk.f32.gmra.mrb[38].mxu0 %vm1596_vm14, %v17102_v19 }
 0x196   : > { %13660 = vmatprep.mubr.msk.f32.mxu0 %vm1596_vm14, %v17104_v11 }
 0x199   : > { %13661 = vmatmul.mubr.msk.f32.gmra.mrb[40].mxu0 %vm1596_vm14, %v17110_v18 }
 0x19a   : > { %13663 = vmatprep.mubr.msk.f32.mxu0 %vm1596_vm14, %v17112_v38 }
 0x19d   : > { %13664 = vmatmul.mubr.msk.f32.gmra.mrb[42].mxu0 %vm1596_vm14, %v17118_v17 }
 0x19e   : > { %13666 = vmatprep.mubr.msk.f32.mxu0 %vm1596_vm14, %v17120_v16 }
 0x1a1   : > { %13667 = vmatmul.mubr.msk.f32.gmra.mrb[44].mxu0 %vm1596_vm14, %v17126_v15 }
 0x1a2   : > { %13669 = vmatprep.mubr.msk.f32.mxu0 %vm1596_vm14, %v17128_v14 }
 0x1a5   : > { %13670 = vmatmul.mubr.msk.f32.gmra.mrb[46].mxu0 %vm1596_vm14, %v17134_v12 }
 0x1a6   : > { %13674 = vmatprep.mubr.msk.f32.mxu0 %vm1596_vm14, %v2502_v10  ;;  %v17156_v10 = vld [vmem:[#allocation2 + $0x41] sm:$0xff] }
 0x1a7   : > { %19493 = vst [vmem:[#allocation40_spill] sm:$0xff] %v17156_v10 }
 0x1a9   : > { %13675 = vmatmul.mubr.msk.f32.vlgmr.msra.gmra.mrb[0].mxu0 %vm1596_vm14, %v2503_v9  ;;  %v17158_v9 = vld [vmem:[#allocation2 + $0x49] sm:$0xff] }
 0x1aa   : > { %13747 = vmatpush3.msk.msra.mxu0 %vm1741_vm13, %v16950_v25  ;;  %13677 = vmatprep.mubr.msk.f32.mxu0 %vm1596_vm14, %v2504_v8  ;;  %19494 = vst [vmem:[#allocation41_spill] sm:$0xff] %v17158_v9  ;;  %v17164_v8 = vld [vmem:[#allocation2 + $0x51] sm:$0xff]  ;;  %v17166_v25 = vld [vmem:[#allocation2 + $0x59] sm:$0xff] }
 0x1ab   : > { %13820 = vmatprep.subr.msk.mxu0 %vm1741_vm13, %v17140_v7  ;;  %19495 = vst [vmem:[#allocation42_spill] sm:$0xff] %v17164_v8  ;;  %19496 = vst [vmem:[#allocation43_spill] sm:$0xff] %v17166_v25 }
 0x1ad   : > { %13678 = vmatmul.mubr.msk.f32.gmra.mrb[2].mxu0 %vm1596_vm14, %v17146_v5  ;;  %v17174_v5 = vld [vmem:[#allocation2 + $0x69] sm:$0xff] }
 0x1ae   : > { %13680 = vmatprep.mubr.msk.f32.mxu0 %vm1596_vm14, %v17148_v3  ;;  %v17172_v3 = vld [vmem:[#allocation2 + $0x61] sm:$0xff]  ;;  %19498 = vst [vmem:[#allocation45_spill] sm:$0xff] %v17174_v5 }
 0x1af   : > { %19497 = vst [vmem:[#allocation44_spill] sm:$0xff] %v17172_v3 }
 0x1b1   : > { %13681 = vmatmul.mubr.msk.f32.gmra.mrb[4].mxu0 %vm1596_vm14, %v17156_v10  ;;  %v17182_v10 = vld [vmem:[#allocation2 + $0x79] sm:$0xff] }
 0x1b2   : > { %13683 = vmatprep.mubr.msk.f32.mxu0 %vm1596_vm14, %v17158_v9  ;;  %v17180_v9 = vld [vmem:[#allocation2 + $0x71] sm:$0xff]  ;;  %19500 = vst [vmem:[#allocation47_spill] sm:$0xff] %v17182_v10 }
 0x1b3   : > { %19499 = vst [vmem:[#allocation46_spill] sm:$0xff] %v17180_v9 }
 0x1b5   : > { %13684 = vmatmul.mubr.msk.f32.gmra.mrb[6].mxu0 %vm1596_vm14, %v17164_v8  ;;  %v17190_v8 = vld [vmem:[#allocation2 + $0x89] sm:$0xff] }
 0x1b6   : > { %13686 = vmatprep.mubr.msk.f32.mxu0 %vm1596_vm14, %v17166_v25  ;;  %v17188_v25 = vld [vmem:[#allocation2 + $0x81] sm:$0xff]  ;;  %19502 = vst [vmem:[#allocation49_spill] sm:$0xff] %v17190_v8 }
 0x1b7   : > { %19501 = vst [vmem:[#allocation48_spill] sm:$0xff] %v17188_v25 }
 0x1b9   : > { %13687 = vmatmul.mubr.msk.f32.gmra.mrb[8].mxu0 %vm1596_vm14, %v17172_v3  ;;  %v17198_v3 = vld [vmem:[#allocation2 + $0x99] sm:$0xff] }
 0x1ba   : > { %13689 = vmatprep.mubr.msk.f32.mxu0 %vm1596_vm14, %v17174_v5  ;;  %v17196_v5 = vld [vmem:[#allocation2 + $0x91] sm:$0xff]  ;;  %19504 = vst [vmem:[#allocation51_spill] sm:$0xff] %v17198_v3 }
 0x1bb   : > { %19503 = vst [vmem:[#allocation50_spill] sm:$0xff] %v17196_v5 }
 0x1bd   : > { %13690 = vmatmul.mubr.msk.f32.gmra.mrb[10].mxu0 %vm1596_vm14, %v17180_v9  ;;  %v17206_v9 = vld [vmem:[#allocation2 + $0xa9] sm:$0xff] }
 0x1be   : > { %13692 = vmatprep.mubr.msk.f32.mxu0 %vm1596_vm14, %v17182_v10  ;;  %v17204_v10 = vld [vmem:[#allocation2 + $0xa1] sm:$0xff]  ;;  %19506 = vst [vmem:[#allocation53_spill] sm:$0xff] %v17206_v9 }
 0x1bf   : > { %19505 = vst [vmem:[#allocation52_spill] sm:$0xff] %v17204_v10 }
 0x1c1   : > { %13693 = vmatmul.mubr.msk.f32.gmra.mrb[12].mxu0 %vm1596_vm14, %v17188_v25  ;;  %v17214_v25 = vld [vmem:[#allocation2 + $0xb9] sm:$0xff] }
 0x1c2   : > { %13695 = vmatprep.mubr.msk.f32.mxu0 %vm1596_vm14, %v17190_v8  ;;  %v17212_v8 = vld [vmem:[#allocation2 + $0xb1] sm:$0xff]  ;;  %19508 = vst [vmem:[#allocation55_spill] sm:$0xff] %v17214_v25 }
 0x1c3   : > { %19507 = vst [vmem:[#allocation54_spill] sm:$0xff] %v17212_v8 }
 0x1c5   : > { %13696 = vmatmul.mubr.msk.f32.gmra.mrb[14].mxu0 %vm1596_vm14, %v17196_v5  ;;  %v17222_v5 = vld [vmem:[#allocation2 + $0xc9] sm:$0xff] }
 0x1c6   : > { %13698 = vmatprep.mubr.msk.f32.mxu0 %vm1596_vm14, %v17198_v3  ;;  %v17220_v3 = vld [vmem:[#allocation2 + $0xc1] sm:$0xff]  ;;  %19510 = vst [vmem:[#allocation57_spill] sm:$0xff] %v17222_v5 }
 0x1c7   : > { %19509 = vst [vmem:[#allocation56_spill] sm:$0xff] %v17220_v3 }
 0x1c9   : > { %13699 = vmatmul.mubr.msk.f32.gmra.mrb[16].mxu0 %vm1596_vm14, %v17204_v10  ;;  %v17230_v10 = vld [vmem:[#allocation2 + $0xd9] sm:$0xff] }
 0x1ca   : > { %13701 = vmatprep.mubr.msk.f32.mxu0 %vm1596_vm14, %v17206_v9  ;;  %v17228_v9 = vld [vmem:[#allocation2 + $0xd1] sm:$0xff]  ;;  %19512 = vst [vmem:[#allocation59_spill] sm:$0xff] %v17230_v10 }
 0x1cb   : > { %19511 = vst [vmem:[#allocation58_spill] sm:$0xff] %v17228_v9 }
 0x1cd   : > { %13702 = vmatmul.mubr.msk.f32.gmra.mrb[18].mxu0 %vm1596_vm14, %v17212_v8  ;;  %v17238_v8 = vld [vmem:[#allocation2 + $0xe9] sm:$0xff] }
 0x1ce   : > { %13704 = vmatprep.mubr.msk.f32.mxu0 %vm1596_vm14, %v17214_v25  ;;  %v17236_v25 = vld [vmem:[#allocation2 + $0xe1] sm:$0xff]  ;;  %19514 = vst [vmem:[#allocation61_spill] sm:$0xff] %v17238_v8 }
 0x1cf   : > { %19513 = vst [vmem:[#allocation60_spill] sm:$0xff] %v17236_v25 }
 0x1d1   : > { %13705 = vmatmul.mubr.msk.f32.gmra.mrb[20].mxu0 %vm1596_vm14, %v17220_v3  ;;  %v17246_v3 = vld [vmem:[#allocation2 + $0xf9] sm:$0xff] }
 0x1d2   : > { %13707 = vmatprep.mubr.msk.f32.mxu0 %vm1596_vm14, %v17222_v5  ;;  %v17244_v5 = vld [vmem:[#allocation2 + $0xf1] sm:$0xff]  ;;  %19516 = vst [vmem:[#allocation63_spill] sm:$0xff] %v17246_v3 }
 0x1d3   : > { %19515 = vst [vmem:[#allocation62_spill] sm:$0xff] %v17244_v5 }
 0x1d5   : > { %13708 = vmatmul.mubr.msk.f32.gmra.mrb[22].mxu0 %vm1596_vm14, %v17228_v9  ;;  %v17254_v9 = vld [vmem:[#allocation2 + $0x109] sm:$0xff] }
 0x1d6   : > { %13710 = vmatprep.mubr.msk.f32.mxu0 %vm1596_vm14, %v17230_v10  ;;  %v17252_v10 = vld [vmem:[#allocation2 + $0x101] sm:$0xff]  ;;  %19518 = vst [vmem:[#allocation65_spill] sm:$0xff] %v17254_v9 }
 0x1d7   : > { %19517 = vst [vmem:[#allocation64_spill] sm:$0xff] %v17252_v10 }
 0x1d9   : > { %13711 = vmatmul.mubr.msk.f32.gmra.mrb[24].mxu0 %vm1596_vm14, %v17236_v25  ;;  %v17262_v25 = vld [vmem:[#allocation2 + $0x119] sm:$0xff] }
 0x1da   : > { %13713 = vmatprep.mubr.msk.f32.mxu0 %vm1596_vm14, %v17238_v8  ;;  %v17260_v8 = vld [vmem:[#allocation2 + $0x111] sm:$0xff]  ;;  %19520 = vst [vmem:[#allocation67_spill] sm:$0xff] %v17262_v25 }
 0x1db   : > { %19519 = vst [vmem:[#allocation66_spill] sm:$0xff] %v17260_v8 }
 0x1dd   : > { %13714 = vmatmul.mubr.msk.f32.gmra.mrb[26].mxu0 %vm1596_vm14, %v17244_v5  ;;  %v17270_v5 = vld [vmem:[#allocation2 + $0x129] sm:$0xff] }
 0x1de   : > { %13716 = vmatprep.mubr.msk.f32.mxu0 %vm1596_vm14, %v17246_v3  ;;  %v17268_v3 = vld [vmem:[#allocation2 + $0x121] sm:$0xff]  ;;  %19522 = vst [vmem:[#allocation69_spill] sm:$0xff] %v17270_v5 }
 0x1df   : > { %19521 = vst [vmem:[#allocation68_spill] sm:$0xff] %v17268_v3 }
 0x1e1   : > { %13717 = vmatmul.mubr.msk.f32.gmra.mrb[28].mxu0 %vm1596_vm14, %v17252_v10  ;;  %v17278_v10 = vld [vmem:[#allocation2 + $0x139] sm:$0xff] }
 0x1e2   : > { %13719 = vmatprep.mubr.msk.f32.mxu0 %vm1596_vm14, %v17254_v9  ;;  %v17276_v9 = vld [vmem:[#allocation2 + $0x131] sm:$0xff]  ;;  %19524 = vst [vmem:[#allocation71_spill] sm:$0xff] %v17278_v10 }
 0x1e3   : > { %19523 = vst [vmem:[#allocation70_spill] sm:$0xff] %v17276_v9 }
 0x1e5   : > { %13720 = vmatmul.mubr.msk.f32.gmra.mrb[30].mxu0 %vm1596_vm14, %v17260_v8  ;;  %v17286_v8 = vld [vmem:[#allocation2 + $0x149] sm:$0xff] }
 0x1e6   : > { %13722 = vmatprep.mubr.msk.f32.mxu0 %vm1596_vm14, %v17262_v25  ;;  %v17284_v25 = vld [vmem:[#allocation2 + $0x141] sm:$0xff]  ;;  %19526 = vst [vmem:[#allocation73_spill] sm:$0xff] %v17286_v8 }
 0x1e7   : > { %19525 = vst [vmem:[#allocation72_spill] sm:$0xff] %v17284_v25 }
 0x1e9   : > { %13723 = vmatmul.mubr.msk.f32.gmra.mrb[32].mxu0 %vm1596_vm14, %v17268_v3  ;;  %v17294_v3 = vld [vmem:[#allocation2 + $0x159] sm:$0xff] }
 0x1ea   : > { %13725 = vmatprep.mubr.msk.f32.mxu0 %vm1596_vm14, %v17270_v5  ;;  %v17292_v5 = vld [vmem:[#allocation2 + $0x151] sm:$0xff]  ;;  %19528 = vst [vmem:[#allocation75_spill] sm:$0xff] %v17294_v3 }
 0x1eb   : > { %19527 = vst [vmem:[#allocation74_spill] sm:$0xff] %v17292_v5 }
 0x1ed   : > { %13726 = vmatmul.mubr.msk.f32.gmra.mrb[34].mxu0 %vm1596_vm14, %v17276_v9  ;;  %v17302_v9 = vld [vmem:[#allocation2 + $0x169] sm:$0xff] }
 0x1ee   : > { %13728 = vmatprep.mubr.msk.f32.mxu0 %vm1596_vm14, %v17278_v10  ;;  %v17300_v10 = vld [vmem:[#allocation2 + $0x161] sm:$0xff]  ;;  %19529 = vst [vmem:[#allocation76_spill] sm:$0xff] %v17302_v9 }
 0x1f1   : > { %13729 = vmatmul.mubr.msk.f32.gmra.mrb[36].mxu0 %vm1596_vm14, %v17284_v25  ;;  %v17310_v25 = vld [vmem:[#allocation2 + $0x179] sm:$0xff] }
 0x1f2   : > { %13731 = vmatprep.mubr.msk.f32.mxu0 %vm1596_vm14, %v17286_v8  ;;  %v17308_v8 = vld [vmem:[#allocation2 + $0x171] sm:$0xff] }
 0x1f3   : > { %19530 = vst [vmem:[#allocation77_spill] sm:$0xff] %v17308_v8 }
 0x1f5   : > { %13732 = vmatmul.mubr.msk.f32.gmra.mrb[38].mxu0 %vm1596_vm14, %v17292_v5  ;;  %v17318_v5 = vld [vmem:[#allocation2 + $0x189] sm:$0xff] }
 0x1f6   : > { %13734 = vmatprep.mubr.msk.f32.mxu0 %vm1596_vm14, %v17294_v3  ;;  %v17316_v3 = vld [vmem:[#allocation2 + $0x181] sm:$0xff] }
 0x1f9   : > { %13735 = vmatmul.mubr.msk.f32.gmra.mrb[40].mxu0 %vm1596_vm14, %v17300_v10 }
 0x1fa   : > { %13737 = vmatprep.mubr.msk.f32.mxu0 %vm1596_vm14, %v17302_v9  ;;  %v17324_v9 = vld [vmem:[#allocation2 + $0x191] sm:$0xff] }
 0x1fd   : > { %13738 = vmatmul.mubr.msk.f32.gmra.mrb[42].mxu0 %vm1596_vm14, %v17308_v8  ;;  %v11990_v8 = vld [vmem:[%s15919_s30 + $0x14] sm:$0xf] }
 0x1fe   : > { %13740 = vmatprep.mubr.msk.f32.mxu0 %vm1596_vm14, %v17310_v25 }
 0x201   : > { %13741 = vmatmul.mubr.msk.f32.gmra.mrb[44].mxu0 %vm1596_vm14, %v17316_v3 }
 0x202   : > { %13743 = vmatprep.mubr.msk.f32.mxu0 %vm1596_vm14, %v17318_v5 }
 0x205   : > { %13744 = vmatmul.mubr.msk.f32.gmra.mrb[46].mxu0 %vm1596_vm14, %v17324_v9 }
 0x206   : > { %13748 = vmatprep.mubr.msk.f32.mxu0 %vm1596_vm14, %v16956_v42  ;;  %v17424_v42 = vld [vmem:[#allocation2 + $0x19f] sm:$0xff] }
 0x209   : > { %13749 = vmatmul.mubr.msk.f32.vlgmr.msra.gmra.mrb[0].mxu0 %vm1596_vm14, %v16958_v43  ;;  %v17430_v43 = vld [vmem:[#allocation2 + $0x1a7] sm:$0xff] }
 0x20a   : > { %13821 = vmatpush3.msk.msra.mxu0 %vm1741_vm13, %v17140_v7  ;;  %13751 = vmatprep.mubr.msk.f32.mxu0 %vm1596_vm14, %v16966_v45  ;;  %v17422_v7 = vld [vmem:[#allocation2 + $0x197] sm:$0xff] }
 0x20b   : > { %13894 = vmatprep.subr.msk.mxu0 %vm1741_vm13, %v11990_v8  ;;  %v12040_v45 = vld [vmem:[%s15919_s30 + $0x18] sm:$0xf] }
 0x20d   : > { %13752 = vmatmul.mubr.msk.f32.gmra.mrb[2].mxu0 %vm1596_vm14, %v16968_v13 }
 0x20e   : > { %13754 = vmatprep.mubr.msk.f32.mxu0 %vm1596_vm14, %v16974_v30 }
 0x211   : > { %13755 = vmatmul.mubr.msk.f32.gmra.mrb[4].mxu0 %vm1596_vm14, %v16976_v44 }
 0x212   : > { %13757 = vmatprep.mubr.msk.f32.mxu0 %vm1596_vm14, %v16982_v47 }
 0x215   : > { %13758 = vmatmul.mubr.msk.f32.gmra.mrb[6].mxu0 %vm1596_vm14, %v16984_v48 }
 0x216   : > { %13760 = vmatprep.mubr.msk.f32.mxu0 %vm1596_vm14, %v16990_v49 }
 0x219   : > { %13761 = vmatmul.mubr.msk.f32.gmra.mrb[8].mxu0 %vm1596_vm14, %v16992_v51 }
 0x21a   : > { %13763 = vmatprep.mubr.msk.f32.mxu0 %vm1596_vm14, %v16998_v32 }
 0x21d   : > { %13764 = vmatmul.mubr.msk.f32.gmra.mrb[10].mxu0 %vm1596_vm14, %v17000_v53 }
 0x21e   : > { %13766 = vmatprep.mubr.msk.f32.mxu0 %vm1596_vm14, %v17006_v55 }
 0x221   : > { %13767 = vmatmul.mubr.msk.f32.gmra.mrb[12].mxu0 %vm1596_vm14, %v17008_v52 }
 0x222   : > { %13769 = vmatprep.mubr.msk.f32.mxu0 %vm1596_vm14, %v17014_v63 }
 0x225   : > { %13770 = vmatmul.mubr.msk.f32.gmra.mrb[14].mxu0 %vm1596_vm14, %v17016_v40 }
 0x226   : > { %13772 = vmatprep.mubr.msk.f32.mxu0 %vm1596_vm14, %v17022_v41 }
 0x229   : > { %13773 = vmatmul.mubr.msk.f32.gmra.mrb[16].mxu0 %vm1596_vm14, %v17024_v26 }
 0x22a   : > { %13775 = vmatprep.mubr.msk.f32.mxu0 %vm1596_vm14, %v17030_v39 }
 0x22d   : > { %13776 = vmatmul.mubr.msk.f32.gmra.mrb[18].mxu0 %vm1596_vm14, %v17032_v37 }
 0x22e   : > { %13778 = vmatprep.mubr.msk.f32.mxu0 %vm1596_vm14, %v17038_v36 }
 0x231   : > { %13779 = vmatmul.mubr.msk.f32.gmra.mrb[20].mxu0 %vm1596_vm14, %v17040_v35 }
 0x232   : > { %13781 = vmatprep.mubr.msk.f32.mxu0 %vm1596_vm14, %v17046_v6 }
 0x235   : > { %13782 = vmatmul.mubr.msk.f32.gmra.mrb[22].mxu0 %vm1596_vm14, %v17048_v34 }
 0x236   : > { %13784 = vmatprep.mubr.msk.f32.mxu0 %vm1596_vm14, %v17054_v33 }
 0x239   : > { %13785 = vmatmul.mubr.msk.f32.gmra.mrb[24].mxu0 %vm1596_vm14, %v17056_v31 }
 0x23a   : > { %13787 = vmatprep.mubr.msk.f32.mxu0 %vm1596_vm14, %v17062_v56 }
 0x23d   : > { %13788 = vmatmul.mubr.msk.f32.gmra.mrb[26].mxu0 %vm1596_vm14, %v17064_v24 }
 0x23e   : > { %13790 = vmatprep.mubr.msk.f32.mxu0 %vm1596_vm14, %v17070_v20 }
 0x241   : > { %13791 = vmatmul.mubr.msk.f32.gmra.mrb[28].mxu0 %vm1596_vm14, %v17072_v29 }
 0x242   : > { %13793 = vmatprep.mubr.msk.f32.mxu0 %vm1596_vm14, %v17078_v28 }
 0x245   : > { %13794 = vmatmul.mubr.msk.f32.gmra.mrb[30].mxu0 %vm1596_vm14, %v17080_v27 }
 0x246   : > { %13796 = vmatprep.mubr.msk.f32.mxu0 %vm1596_vm14, %v17086_v23 }
 0x249   : > { %13797 = vmatmul.mubr.msk.f32.gmra.mrb[32].mxu0 %vm1596_vm14, %v17088_v50 }
 0x24a   : > { %13799 = vmatprep.mubr.msk.f32.mxu0 %vm1596_vm14, %v17094_v22 }
 0x24d   : > { %13800 = vmatmul.mubr.msk.f32.gmra.mrb[34].mxu0 %vm1596_vm14, %v17096_v21 }
 0x24e   : > { %13802 = vmatprep.mubr.msk.f32.mxu0 %vm1596_vm14, %v17102_v19 }
 0x251   : > { %13803 = vmatmul.mubr.msk.f32.gmra.mrb[36].mxu0 %vm1596_vm14, %v17104_v11 }
 0x252   : > { %13805 = vmatprep.mubr.msk.f32.mxu0 %vm1596_vm14, %v17110_v18 }
 0x255   : > { %13806 = vmatmul.mubr.msk.f32.gmra.mrb[38].mxu0 %vm1596_vm14, %v17112_v38 }
 0x256   : > { %13808 = vmatprep.mubr.msk.f32.mxu0 %vm1596_vm14, %v17118_v17 }
 0x259   : > { %13809 = vmatmul.mubr.msk.f32.gmra.mrb[40].mxu0 %vm1596_vm14, %v17120_v16 }
 0x25a   : > { %13811 = vmatprep.mubr.msk.f32.mxu0 %vm1596_vm14, %v17126_v15 }
 0x25d   : > { %13812 = vmatmul.mubr.msk.f32.gmra.mrb[42].mxu0 %vm1596_vm14, %v17128_v14 }
 0x25e   : > { %13814 = vmatprep.mubr.msk.f32.mxu0 %vm1596_vm14, %v17134_v12 }
 0x261   : > { %13815 = vmatmul.mubr.msk.f32.gmra.mrb[44].mxu0 %vm1596_vm14, %v17422_v7 }
 0x262   : > { %13817 = vmatprep.mubr.msk.f32.mxu0 %vm1596_vm14, %v17424_v42 }
 0x265   : > { %13818 = vmatmul.mubr.msk.f32.gmra.mrb[46].mxu0 %vm1596_vm14, %v17430_v43 }
 0x266   : > { %13822 = vmatprep.mubr.msk.f32.mxu0 %vm1596_vm14, %v16763_v4  ;;  %v19531_v4 = vld [vmem:[#allocation5_spill] sm:$0xff] }
 0x269   : > { %13823 = vmatmul.mubr.msk.f32.vlgmr.msra.gmra.mrb[0].mxu0 %vm1596_vm14, %v16765_v46  ;;  %v19532_v46 = vld [vmem:[#allocation6_spill] sm:$0xff] }
 0x26a   : > { %13895 = vmatpush3.msk.msra.mxu0 %vm1741_vm13, %v11990_v8  ;;  %13825 = vmatprep.mubr.msk.f32.mxu0 %vm1596_vm14, %v16771_v57  ;;  %v19533_v57 = vld [vmem:[#allocation7_spill] sm:$0xff]  ;;  %v19543_v8 = vld [vmem:[#allocation17_spill] sm:$0xff] }
 0x26b   : > { %13968 = vmatprep.subr.msk.mxu0 %vm1741_vm13, %v12040_v45 }
 0x26d   : > { %13826 = vmatmul.mubr.msk.f32.gmra.mrb[2].mxu0 %vm1596_vm14, %v16773_v58  ;;  %v19534_v58 = vld [vmem:[#allocation8_spill] sm:$0xff] }
 0x26e   : > { %13828 = vmatprep.mubr.msk.f32.mxu0 %vm1596_vm14, %v16779_v59  ;;  %v19535_v59 = vld [vmem:[#allocation9_spill] sm:$0xff] }
 0x271   : > { %13829 = vmatmul.mubr.msk.f32.gmra.mrb[4].mxu0 %vm1596_vm14, %v16781_v60  ;;  %v19536_v60 = vld [vmem:[#allocation10_spill] sm:$0xff] }
 0x272   : > { %13831 = vmatprep.mubr.msk.f32.mxu0 %vm1596_vm14, %v16787_v61  ;;  %v19537_v61 = vld [vmem:[#allocation11_spill] sm:$0xff] }
 0x275   : > { %13832 = vmatmul.mubr.msk.f32.gmra.mrb[6].mxu0 %vm1596_vm14, %v16789_v62  ;;  %v19538_v62 = vld [vmem:[#allocation12_spill] sm:$0xff] }
 0x276   : > { %13834 = vmatprep.mubr.msk.f32.mxu0 %vm1596_vm14, %v16800_v0  ;;  %v19539_v0 = vld [vmem:[#allocation13_spill] sm:$0xff] }
 0x279   : > { %13835 = vmatmul.mubr.msk.f32.gmra.mrb[8].mxu0 %vm1596_vm14, %v16802_v54  ;;  %v19540_v54 = vld [vmem:[#allocation14_spill] sm:$0xff] }
 0x27a   : > { %13837 = vmatprep.mubr.msk.f32.mxu0 %vm1596_vm14, %v16808_v1  ;;  %v19541_v1 = vld [vmem:[#allocation15_spill] sm:$0xff] }
 0x27d   : > { %13838 = vmatmul.mubr.msk.f32.gmra.mrb[10].mxu0 %vm1596_vm14, %v16810_v2  ;;  %v19542_v2 = vld [vmem:[#allocation16_spill] sm:$0xff] }
 0x27e   : > { %13840 = vmatprep.mubr.msk.f32.mxu0 %vm1596_vm14, %v19531_v4  ;;  %v19544_v4 = vld [vmem:[#allocation18_spill] sm:$0xff] }
 0x281   : > { %13841 = vmatmul.mubr.msk.f32.gmra.mrb[12].mxu0 %vm1596_vm14, %v19532_v46  ;;  %v19545_v46 = vld [vmem:[#allocation19_spill] sm:$0xff] }
 0x282   : > { %13843 = vmatprep.mubr.msk.f32.mxu0 %vm1596_vm14, %v19533_v57  ;;  %v19546_v57 = vld [vmem:[#allocation20_spill] sm:$0xff] }
 0x285   : > { %13844 = vmatmul.mubr.msk.f32.gmra.mrb[14].mxu0 %vm1596_vm14, %v19534_v58  ;;  %v19547_v58 = vld [vmem:[#allocation21_spill] sm:$0xff] }
 0x286   : > { %13846 = vmatprep.mubr.msk.f32.mxu0 %vm1596_vm14, %v19535_v59  ;;  %v19548_v59 = vld [vmem:[#allocation22_spill] sm:$0xff] }
 0x289   : > { %13847 = vmatmul.mubr.msk.f32.gmra.mrb[16].mxu0 %vm1596_vm14, %v19536_v60  ;;  %v19549_v60 = vld [vmem:[#allocation23_spill] sm:$0xff] }
 0x28a   : > { %13849 = vmatprep.mubr.msk.f32.mxu0 %vm1596_vm14, %v19537_v61  ;;  %v19550_v61 = vld [vmem:[#allocation24_spill] sm:$0xff] }
 0x28d   : > { %13850 = vmatmul.mubr.msk.f32.gmra.mrb[18].mxu0 %vm1596_vm14, %v19538_v62  ;;  %v19551_v62 = vld [vmem:[#allocation25_spill] sm:$0xff] }
 0x28e   : > { %13852 = vmatprep.mubr.msk.f32.mxu0 %vm1596_vm14, %v19539_v0  ;;  %v19552_v0 = vld [vmem:[#allocation26_spill] sm:$0xff] }
 0x291   : > { %13853 = vmatmul.mubr.msk.f32.gmra.mrb[20].mxu0 %vm1596_vm14, %v19540_v54  ;;  %v19553_v54 = vld [vmem:[#allocation27_spill] sm:$0xff] }
 0x292   : > { %13855 = vmatprep.mubr.msk.f32.mxu0 %vm1596_vm14, %v19541_v1  ;;  %v19554_v1 = vld [vmem:[#allocation28_spill] sm:$0xff] }
 0x295   : > { %13856 = vmatmul.mubr.msk.f32.gmra.mrb[22].mxu0 %vm1596_vm14, %v19542_v2  ;;  %v19555_v2 = vld [vmem:[#allocation29_spill] sm:$0xff] }
 0x296   : > { %13858 = vmatprep.mubr.msk.f32.mxu0 %vm1596_vm14, %v19543_v8  ;;  %v19556_v8 = vld [vmem:[#allocation30_spill] sm:$0xff] }
 0x299   : > { %13859 = vmatmul.mubr.msk.f32.gmra.mrb[24].mxu0 %vm1596_vm14, %v19544_v4  ;;  %v19557_v4 = vld [vmem:[#allocation31_spill] sm:$0xff] }
 0x29a   : > { %13861 = vmatprep.mubr.msk.f32.mxu0 %vm1596_vm14, %v19545_v46  ;;  %v19558_v46 = vld [vmem:[#allocation32_spill] sm:$0xff] }
 0x29d   : > { %13862 = vmatmul.mubr.msk.f32.gmra.mrb[26].mxu0 %vm1596_vm14, %v19546_v57  ;;  %v19559_v57 = vld [vmem:[#allocation33_spill] sm:$0xff] }
 0x29e   : > { %13864 = vmatprep.mubr.msk.f32.mxu0 %vm1596_vm14, %v19547_v58  ;;  %v19560_v58 = vld [vmem:[#allocation34_spill] sm:$0xff] }
 0x2a1   : > { %13865 = vmatmul.mubr.msk.f32.gmra.mrb[28].mxu0 %vm1596_vm14, %v19548_v59  ;;  %v19561_v59 = vld [vmem:[#allocation35_spill] sm:$0xff] }
 0x2a2   : > { %13867 = vmatprep.mubr.msk.f32.mxu0 %vm1596_vm14, %v19549_v60  ;;  %v19562_v60 = vld [vmem:[#allocation36_spill] sm:$0xff] }
 0x2a5   : > { %13868 = vmatmul.mubr.msk.f32.gmra.mrb[30].mxu0 %vm1596_vm14, %v19550_v61  ;;  %v19563_v61 = vld [vmem:[#allocation37_spill] sm:$0xff] }
 0x2a6   : > { %13870 = vmatprep.mubr.msk.f32.mxu0 %vm1596_vm14, %v19551_v62  ;;  %v17527_v62 = vld [vmem:[#allocation2 + $0x198] sm:$0xff] }
 0x2a9   : > { %13871 = vmatmul.mubr.msk.f32.gmra.mrb[32].mxu0 %vm1596_vm14, %v19552_v0  ;;  %v17529_v0 = vld [vmem:[#allocation2 + $0x1a0] sm:$0xff] }
 0x2aa   : > { %13873 = vmatprep.mubr.msk.f32.mxu0 %vm1596_vm14, %v19553_v54  ;;  %v17535_v54 = vld [vmem:[#allocation2 + $0x1a8] sm:$0xff] }
 0x2ad   : > { %13874 = vmatmul.mubr.msk.f32.gmra.mrb[34].mxu0 %vm1596_vm14, %v19554_v1  ;;  %v19564_v1 = vld [vmem:[#allocation38_spill] sm:$0xff] }
 0x2ae   : > { %13876 = vmatprep.mubr.msk.f32.mxu0 %vm1596_vm14, %v19555_v2  ;;  %v12090_v2 = vld [vmem:[%s15919_s30 + $0x1c] sm:$0xf] }
 0x2b1   : > { %13877 = vmatmul.mubr.msk.f32.gmra.mrb[36].mxu0 %vm1596_vm14, %v19556_v8  ;;  %v19565_v8 = vld [vmem:[#allocation39_spill] sm:$0xff] }
 0x2b2   : > { %13879 = vmatprep.mubr.msk.f32.mxu0 %vm1596_vm14, %v19557_v4  ;;  %v19566_v4 = vld [vmem:[#allocation40_spill] sm:$0xff] }
 0x2b5   : > { %13880 = vmatmul.mubr.msk.f32.gmra.mrb[38].mxu0 %vm1596_vm14, %v19558_v46  ;;  %v19567_v46 = vld [vmem:[#allocation41_spill] sm:$0xff] }
 0x2b6   : > { %13882 = vmatprep.mubr.msk.f32.mxu0 %vm1596_vm14, %v19559_v57  ;;  %v19568_v57 = vld [vmem:[#allocation42_spill] sm:$0xff] }
 0x2b9   : > { %13883 = vmatmul.mubr.msk.f32.gmra.mrb[40].mxu0 %vm1596_vm14, %v19560_v58  ;;  %v19569_v58 = vld [vmem:[#allocation43_spill] sm:$0xff] }
 0x2ba   : > { %13885 = vmatprep.mubr.msk.f32.mxu0 %vm1596_vm14, %v19561_v59  ;;  %v19570_v59 = vld [vmem:[#allocation44_spill] sm:$0xff] }
 0x2bd   : > { %13886 = vmatmul.mubr.msk.f32.gmra.mrb[42].mxu0 %vm1596_vm14, %v19562_v60  ;;  %v19571_v60 = vld [vmem:[#allocation45_spill] sm:$0xff] }
 0x2be   : > { %13888 = vmatprep.mubr.msk.f32.mxu0 %vm1596_vm14, %v19563_v61  ;;  %v19573_v61 = vld [vmem:[#allocation47_spill] sm:$0xff] }
 0x2c1   : > { %13889 = vmatmul.mubr.msk.f32.gmra.mrb[44].mxu0 %vm1596_vm14, %v17527_v62 }
 0x2c2   : > { %13891 = vmatprep.mubr.msk.f32.mxu0 %vm1596_vm14, %v17529_v0 }
 0x2c5   : > { %13892 = vmatmul.mubr.msk.f32.gmra.mrb[46].mxu0 %vm1596_vm14, %v17535_v54 }
 0x2c6   : > { %13896 = vmatprep.mubr.msk.f32.mxu0 %vm1596_vm14, %v19564_v1  ;;  %v19574_v1 = vld [vmem:[#allocation48_spill] sm:$0xff] }
 0x2c9   : > { %13897 = vmatmul.mubr.msk.f32.vlgmr.msra.gmra.mrb[0].mxu0 %vm1596_vm14, %v19565_v8  ;;  %v19575_v8 = vld [vmem:[#allocation49_spill] sm:$0xff] }
 0x2ca   : > { %13969 = vmatpush3.msk.msra.mxu0 %vm1741_vm13, %v12040_v45  ;;  %13899 = vmatprep.mubr.msk.f32.mxu0 %vm1596_vm14, %v19566_v4  ;;  %v19572_v45 = vld [vmem:[#allocation46_spill] sm:$0xff] }
 0x2cb   : > { %14042 = vmatprep.subr.msk.mxu0 %vm1741_vm13, %v12090_v2  ;;  %v19576_v4 = vld [vmem:[#allocation50_spill] sm:$0xff] }
 0x2cd   : > { %13900 = vmatmul.mubr.msk.f32.gmra.mrb[2].mxu0 %vm1596_vm14, %v19567_v46  ;;  %v19577_v46 = vld [vmem:[#allocation51_spill] sm:$0xff] }
 0x2ce   : > { %13902 = vmatprep.mubr.msk.f32.mxu0 %vm1596_vm14, %v19568_v57  ;;  %v19578_v57 = vld [vmem:[#allocation52_spill] sm:$0xff] }
 0x2d1   : > { %13903 = vmatmul.mubr.msk.f32.gmra.mrb[4].mxu0 %vm1596_vm14, %v19569_v58  ;;  %v19579_v58 = vld [vmem:[#allocation53_spill] sm:$0xff] }
 0x2d2   : > { %13905 = vmatprep.mubr.msk.f32.mxu0 %vm1596_vm14, %v19570_v59  ;;  %v19580_v59 = vld [vmem:[#allocation54_spill] sm:$0xff] }
 0x2d5   : > { %13906 = vmatmul.mubr.msk.f32.gmra.mrb[6].mxu0 %vm1596_vm14, %v19571_v60  ;;  %v19581_v60 = vld [vmem:[#allocation55_spill] sm:$0xff] }
 0x2d6   : > { %13908 = vmatprep.mubr.msk.f32.mxu0 %vm1596_vm14, %v19572_v45  ;;  %v19582_v45 = vld [vmem:[#allocation56_spill] sm:$0xff] }
 0x2d9   : > { %13909 = vmatmul.mubr.msk.f32.gmra.mrb[8].mxu0 %vm1596_vm14, %v19573_v61  ;;  %v19583_v61 = vld [vmem:[#allocation57_spill] sm:$0xff] }
 0x2da   : > { %13911 = vmatprep.mubr.msk.f32.mxu0 %vm1596_vm14, %v19574_v1  ;;  %v19584_v1 = vld [vmem:[#allocation58_spill] sm:$0xff] }
 0x2dd   : > { %13912 = vmatmul.mubr.msk.f32.gmra.mrb[10].mxu0 %vm1596_vm14, %v19575_v8  ;;  %v19585_v8 = vld [vmem:[#allocation59_spill] sm:$0xff] }
 0x2de   : > { %13914 = vmatprep.mubr.msk.f32.mxu0 %vm1596_vm14, %v19576_v4  ;;  %v19586_v4 = vld [vmem:[#allocation60_spill] sm:$0xff] }
 0x2e1   : > { %13915 = vmatmul.mubr.msk.f32.gmra.mrb[12].mxu0 %vm1596_vm14, %v19577_v46  ;;  %v19587_v46 = vld [vmem:[#allocation61_spill] sm:$0xff] }
 0x2e2   : > { %13917 = vmatprep.mubr.msk.f32.mxu0 %vm1596_vm14, %v19578_v57  ;;  %v19588_v57 = vld [vmem:[#allocation62_spill] sm:$0xff] }
 0x2e5   : > { %13918 = vmatmul.mubr.msk.f32.gmra.mrb[14].mxu0 %vm1596_vm14, %v19579_v58  ;;  %v19589_v58 = vld [vmem:[#allocation63_spill] sm:$0xff] }
 0x2e6   : > { %13920 = vmatprep.mubr.msk.f32.mxu0 %vm1596_vm14, %v19580_v59  ;;  %v19590_v59 = vld [vmem:[#allocation64_spill] sm:$0xff] }
 0x2e9   : > { %13921 = vmatmul.mubr.msk.f32.gmra.mrb[16].mxu0 %vm1596_vm14, %v19581_v60  ;;  %v19591_v60 = vld [vmem:[#allocation65_spill] sm:$0xff] }
 0x2ea   : > { %13923 = vmatprep.mubr.msk.f32.mxu0 %vm1596_vm14, %v19582_v45  ;;  %v19592_v45 = vld [vmem:[#allocation66_spill] sm:$0xff] }
 0x2ed   : > { %13924 = vmatmul.mubr.msk.f32.gmra.mrb[18].mxu0 %vm1596_vm14, %v19583_v61  ;;  %v19593_v61 = vld [vmem:[#allocation67_spill] sm:$0xff] }
 0x2ee   : > { %13926 = vmatprep.mubr.msk.f32.mxu0 %vm1596_vm14, %v19584_v1  ;;  %v19594_v1 = vld [vmem:[#allocation68_spill] sm:$0xff] }
 0x2f1   : > { %13927 = vmatmul.mubr.msk.f32.gmra.mrb[20].mxu0 %vm1596_vm14, %v19585_v8  ;;  %v19595_v8 = vld [vmem:[#allocation69_spill] sm:$0xff] }
 0x2f2   : > { %13929 = vmatprep.mubr.msk.f32.mxu0 %vm1596_vm14, %v19586_v4  ;;  %v19596_v4 = vld [vmem:[#allocation70_spill] sm:$0xff] }
 0x2f5   : > { %13930 = vmatmul.mubr.msk.f32.gmra.mrb[22].mxu0 %vm1596_vm14, %v19587_v46  ;;  %v19597_v46 = vld [vmem:[#allocation71_spill] sm:$0xff] }
 0x2f6   : > { %13932 = vmatprep.mubr.msk.f32.mxu0 %vm1596_vm14, %v19588_v57  ;;  %v19598_v57 = vld [vmem:[#allocation72_spill] sm:$0xff] }
 0x2f9   : > { %13933 = vmatmul.mubr.msk.f32.gmra.mrb[24].mxu0 %vm1596_vm14, %v19589_v58  ;;  %v19599_v58 = vld [vmem:[#allocation73_spill] sm:$0xff] }
 0x2fa   : > { %13935 = vmatprep.mubr.msk.f32.mxu0 %vm1596_vm14, %v19590_v59  ;;  %v19600_v59 = vld [vmem:[#allocation74_spill] sm:$0xff] }
 0x2fd   : > { %13936 = vmatmul.mubr.msk.f32.gmra.mrb[26].mxu0 %vm1596_vm14, %v19591_v60  ;;  %v19601_v60 = vld [vmem:[#allocation75_spill] sm:$0xff] }
 0x2fe   : > { %13938 = vmatprep.mubr.msk.f32.mxu0 %vm1596_vm14, %v19592_v45  ;;  %v19602_v45 = vld [vmem:[#allocation76_spill] sm:$0xff] }
 0x301   : > { %13939 = vmatmul.mubr.msk.f32.gmra.mrb[28].mxu0 %vm1596_vm14, %v19593_v61  ;;  %v19603_v61 = vld [vmem:[#allocation77_spill] sm:$0xff] }
 0x302   : > { %13941 = vmatprep.mubr.msk.f32.mxu0 %vm1596_vm14, %v19594_v1  ;;  %v17632_v1 = vld [vmem:[#allocation2 + $0x199] sm:$0xff] }
 0x305   : > { %13942 = vmatmul.mubr.msk.f32.gmra.mrb[30].mxu0 %vm1596_vm14, %v19595_v8  ;;  %v5802_v8 = vld [vmem:[#allocation2 + $0x49] sm:$0xff] }
 0x306   : > { %13944 = vmatprep.mubr.msk.f32.mxu0 %vm1596_vm14, %v19596_v4  ;;  %v5803_v4 = vld [vmem:[#allocation2 + $0x51] sm:$0xff] }
 0x309   : > { %13945 = vmatmul.mubr.msk.f32.gmra.mrb[32].mxu0 %vm1596_vm14, %v19597_v46  ;;  %v5807_v46 = vld [vmem:[#allocation2 + $0x71] sm:$0xff] }
 0x30a   : > { %13947 = vmatprep.mubr.msk.f32.mxu0 %vm1596_vm14, %v19598_v57  ;;  %v5808_v57 = vld [vmem:[#allocation2 + $0x79] sm:$0xff] }
 0x30d   : > { %13948 = vmatmul.mubr.msk.f32.gmra.mrb[34].mxu0 %vm1596_vm14, %v19599_v58  ;;  %v5809_v58 = vld [vmem:[#allocation2 + $0x81] sm:$0xff] }
 0x30e   : > { %13950 = vmatprep.mubr.msk.f32.mxu0 %vm1596_vm14, %v19600_v59  ;;  %v5810_v59 = vld [vmem:[#allocation2 + $0x89] sm:$0xff] }
 0x311   : > { %13951 = vmatmul.mubr.msk.f32.gmra.mrb[36].mxu0 %vm1596_vm14, %v19601_v60  ;;  %v5811_v60 = vld [vmem:[#allocation2 + $0x91] sm:$0xff] }
 0x312   : > { %13953 = vmatprep.mubr.msk.f32.mxu0 %vm1596_vm14, %v17300_v10  ;;  %v17634_v10 = vld [vmem:[#allocation2 + $0x1a1] sm:$0xff] }
 0x315   : > { %13954 = vmatmul.mubr.msk.f32.gmra.mrb[38].mxu0 %vm1596_vm14, %v19602_v45  ;;  %v5812_v45 = vld [vmem:[#allocation2 + $0x99] sm:$0xff] }
 0x316   : > { %13956 = vmatprep.mubr.msk.f32.mxu0 %vm1596_vm14, %v19603_v61  ;;  %v5813_v61 = vld [vmem:[#allocation2 + $0xa1] sm:$0xff] }
 0x319   : > { %13957 = vmatmul.mubr.msk.f32.gmra.mrb[40].mxu0 %vm1596_vm14, %v17310_v25  ;;  %v17640_v25 = vld [vmem:[#allocation2 + $0x1a9] sm:$0xff] }
 0x31a   : > { %13959 = vmatprep.mubr.msk.f32.mxu0 %vm1596_vm14, %v17316_v3  ;;  %v12140_v3 = vld [vmem:[%s15919_s30 + $0x20] sm:$0xf] }
 0x31d   : > { %13960 = vmatmul.mubr.msk.f32.gmra.mrb[42].mxu0 %vm1596_vm14, %v17318_v5  ;;  %v4747_v5 = vld [vmem:[#allocation2 + $0x1af] sm:$0xff] }
 0x31e   : > { %13962 = vmatprep.mubr.msk.f32.mxu0 %vm1596_vm14, %v17324_v9  ;;  %v5292_v9 = vld [vmem:[#allocation2 + $0x188] sm:$0xff] }
 0x321   : > { %13963 = vmatmul.mubr.msk.f32.gmra.mrb[44].mxu0 %vm1596_vm14, %v17632_v1 }
 0x322   : > { %13965 = vmatprep.mubr.msk.f32.mxu0 %vm1596_vm14, %v17634_v10 }
 0x325   : > { %13966 = vmatmul.mubr.msk.f32.gmra.mrb[46].mxu0 %vm1596_vm14, %v17640_v25 }
 0x326   : > { %13970 = vmatprep.mubr.msk.f32.mxu0 %vm1596_vm14, %v16968_v13  ;;  %v5277_v13 = vld [vmem:[#allocation2 + $0x110] sm:$0xff] }
 0x329   : > { %13971 = vmatmul.mubr.msk.f32.vlgmr.msra.gmra.mrb[0].mxu0 %vm1596_vm14, %v16974_v30  ;;  %v5278_v30 = vld [vmem:[#allocation2 + $0x118] sm:$0xff] }
 0x32a   : > { %14043 = vmatpush3.msk.msra.mxu0 %vm1741_vm13, %v12090_v2  ;;  %13973 = vmatprep.mubr.msk.f32.mxu0 %vm1596_vm14, %v16976_v44  ;;  %v5279_v44 = vld [vmem:[#allocation2 + $0x120] sm:$0xff] }
 0x32b   : > { %14116 = vmatprep.subr.msk.mxu0 %vm1741_vm13, %v12140_v3  ;;  %v5299_v2 = vld [vmem:[#allocation2 + $0x1c0] sm:$0xff] }
 0x32d   : > { %13974 = vmatmul.mubr.msk.f32.gmra.mrb[2].mxu0 %vm1596_vm14, %v16982_v47  ;;  %v5280_v47 = vld [vmem:[#allocation2 + $0x128] sm:$0xff] }
 0x32e   : > { %13976 = vmatprep.mubr.msk.f32.mxu0 %vm1596_vm14, %v16984_v48  ;;  %v5281_v48 = vld [vmem:[#allocation2 + $0x130] sm:$0xff] }
 0x331   : > { %13977 = vmatmul.mubr.msk.f32.gmra.mrb[4].mxu0 %vm1596_vm14, %v16990_v49  ;;  %v5282_v49 = vld [vmem:[#allocation2 + $0x138] sm:$0xff] }
 0x332   : > { %13979 = vmatprep.mubr.msk.f32.mxu0 %vm1596_vm14, %v16992_v51  ;;  %v5283_v51 = vld [vmem:[#allocation2 + $0x140] sm:$0xff] }
 0x335   : > { %13980 = vmatmul.mubr.msk.f32.gmra.mrb[6].mxu0 %vm1596_vm14, %v16998_v32  ;;  %v5284_v32 = vld [vmem:[#allocation2 + $0x148] sm:$0xff] }
 0x336   : > { %13982 = vmatprep.mubr.msk.f32.mxu0 %vm1596_vm14, %v17000_v53  ;;  %v5285_v53 = vld [vmem:[#allocation2 + $0x150] sm:$0xff] }
 0x339   : > { %13983 = vmatmul.mubr.msk.f32.gmra.mrb[8].mxu0 %vm1596_vm14, %v17006_v55  ;;  %v5286_v55 = vld [vmem:[#allocation2 + $0x158] sm:$0xff] }
 0x33a   : > { %13985 = vmatprep.mubr.msk.f32.mxu0 %vm1596_vm14, %v17008_v52  ;;  %v5287_v52 = vld [vmem:[#allocation2 + $0x160] sm:$0xff] }
 0x33d   : > { %13986 = vmatmul.mubr.msk.f32.gmra.mrb[10].mxu0 %vm1596_vm14, %v17014_v63  ;;  %v5288_v63 = vld [vmem:[#allocation2 + $0x168] sm:$0xff] }
 0x33e   : > { %13988 = vmatprep.mubr.msk.f32.mxu0 %vm1596_vm14, %v17016_v40  ;;  %v5289_v40 = vld [vmem:[#allocation2 + $0x170] sm:$0xff] }
 0x341   : > { %13989 = vmatmul.mubr.msk.f32.gmra.mrb[12].mxu0 %vm1596_vm14, %v17022_v41  ;;  %v5290_v41 = vld [vmem:[#allocation2 + $0x178] sm:$0xff] }
 0x342   : > { %13991 = vmatprep.mubr.msk.f32.mxu0 %vm1596_vm14, %v17024_v26  ;;  %v5291_v26 = vld [vmem:[#allocation2 + $0x180] sm:$0xff] }
 0x345   : > { %13992 = vmatmul.mubr.msk.f32.gmra.mrb[14].mxu0 %vm1596_vm14, %v17030_v39  ;;  %v5276_v39 = vld [vmem:[#allocation2 + $0x108] sm:$0xff] }
 0x346   : > { %13994 = vmatprep.mubr.msk.f32.mxu0 %vm1596_vm14, %v17032_v37  ;;  %v5275_v37 = vld [vmem:[#allocation2 + $0x100] sm:$0xff] }
 0x349   : > { %13995 = vmatmul.mubr.msk.f32.gmra.mrb[16].mxu0 %vm1596_vm14, %v17038_v36  ;;  %v5274_v36 = vld [vmem:[#allocation2 + $0xf8] sm:$0xff] }
 0x34a   : > { %13997 = vmatprep.mubr.msk.f32.mxu0 %vm1596_vm14, %v17040_v35  ;;  %v5273_v35 = vld [vmem:[#allocation2 + $0xf0] sm:$0xff] }
 0x34d   : > { %13998 = vmatmul.mubr.msk.f32.gmra.mrb[18].mxu0 %vm1596_vm14, %v17046_v6  ;;  %v5272_v6 = vld [vmem:[#allocation2 + $0xe8] sm:$0xff] }
 0x34e   : > { %14000 = vmatprep.mubr.msk.f32.mxu0 %vm1596_vm14, %v17048_v34  ;;  %v5271_v34 = vld [vmem:[#allocation2 + $0xe0] sm:$0xff] }
 0x351   : > { %14001 = vmatmul.mubr.msk.f32.gmra.mrb[20].mxu0 %vm1596_vm14, %v17054_v33  ;;  %v5270_v33 = vld [vmem:[#allocation2 + $0xd8] sm:$0xff] }
 0x352   : > { %14003 = vmatprep.mubr.msk.f32.mxu0 %vm1596_vm14, %v17056_v31  ;;  %v5269_v31 = vld [vmem:[#allocation2 + $0xd0] sm:$0xff] }
 0x355   : > { %14004 = vmatmul.mubr.msk.f32.gmra.mrb[22].mxu0 %vm1596_vm14, %v17062_v56  ;;  %v5268_v56 = vld [vmem:[#allocation2 + $0xc8] sm:$0xff] }
 0x356   : > { %14006 = vmatprep.mubr.msk.f32.mxu0 %vm1596_vm14, %v17064_v24  ;;  %v5267_v24 = vld [vmem:[#allocation2 + $0xc0] sm:$0xff] }
 0x359   : > { %14007 = vmatmul.mubr.msk.f32.gmra.mrb[24].mxu0 %vm1596_vm14, %v17070_v20  ;;  %v5266_v20 = vld [vmem:[#allocation2 + $0xb8] sm:$0xff] }
 0x35a   : > { %14009 = vmatprep.mubr.msk.f32.mxu0 %vm1596_vm14, %v17072_v29  ;;  %v5265_v29 = vld [vmem:[#allocation2 + $0xb0] sm:$0xff] }
 0x35d   : > { %14010 = vmatmul.mubr.msk.f32.gmra.mrb[26].mxu0 %vm1596_vm14, %v17078_v28  ;;  %v5264_v28 = vld [vmem:[#allocation2 + $0xa8] sm:$0xff] }
 0x35e   : > { %14012 = vmatprep.mubr.msk.f32.mxu0 %vm1596_vm14, %v17080_v27  ;;  %v5263_v27 = vld [vmem:[#allocation2 + $0xa0] sm:$0xff] }
 0x361   : > { %14013 = vmatmul.mubr.msk.f32.gmra.mrb[28].mxu0 %vm1596_vm14, %v17086_v23  ;;  %v5262_v23 = vld [vmem:[#allocation2 + $0x98] sm:$0xff] }
 0x362   : > { %14015 = vmatprep.mubr.msk.f32.mxu0 %vm1596_vm14, %v17088_v50  ;;  %v5261_v50 = vld [vmem:[#allocation2 + $0x90] sm:$0xff] }
 0x365   : > { %14016 = vmatmul.mubr.msk.f32.gmra.mrb[30].mxu0 %vm1596_vm14, %v17094_v22  ;;  %v5260_v22 = vld [vmem:[#allocation2 + $0x88] sm:$0xff] }
 0x366   : > { %14018 = vmatprep.mubr.msk.f32.mxu0 %vm1596_vm14, %v17096_v21  ;;  %v5259_v21 = vld [vmem:[#allocation2 + $0x80] sm:$0xff] }
 0x369   : > { %14019 = vmatmul.mubr.msk.f32.gmra.mrb[32].mxu0 %vm1596_vm14, %v17102_v19  ;;  %v5258_v19 = vld [vmem:[#allocation2 + $0x78] sm:$0xff] }
 0x36a   : > { %14021 = vmatprep.mubr.msk.f32.mxu0 %vm1596_vm14, %v17104_v11  ;;  %v5257_v11 = vld [vmem:[#allocation2 + $0x70] sm:$0xff] }
 0x36d   : > { %14022 = vmatmul.mubr.msk.f32.gmra.mrb[34].mxu0 %vm1596_vm14, %v17110_v18  ;;  %v5256_v18 = vld [vmem:[#allocation2 + $0x68] sm:$0xff] }
 0x36e   : > { %14024 = vmatprep.mubr.msk.f32.mxu0 %vm1596_vm14, %v17112_v38  ;;  %v5255_v38 = vld [vmem:[#allocation2 + $0x60] sm:$0xff] }
 0x371   : > { %14025 = vmatmul.mubr.msk.f32.gmra.mrb[36].mxu0 %vm1596_vm14, %v17118_v17  ;;  %v5254_v17 = vld [vmem:[#allocation2 + $0x58] sm:$0xff] }
 0x372   : > { %14027 = vmatprep.mubr.msk.f32.mxu0 %vm1596_vm14, %v17120_v16  ;;  %v4748_v16 = vld [vmem:[#allocation2 + $0x1b7] sm:$0xff] }
 0x375   : > { %14028 = vmatmul.mubr.msk.f32.gmra.mrb[38].mxu0 %vm1596_vm14, %v17126_v15  ;;  %v4749_v15 = vld [vmem:[#allocation2 + $0x1bf] sm:$0xff] }
 0x376   : > { %14030 = vmatprep.mubr.msk.f32.mxu0 %vm1596_vm14, %v17128_v14  ;;  %v5252_v14 = vld [vmem:[#allocation2 + $0x48] sm:$0xff] }
 0x379   : > { %14031 = vmatmul.mubr.msk.f32.gmra.mrb[40].mxu0 %vm1596_vm14, %v17134_v12  ;;  %v5253_v12 = vld [vmem:[#allocation2 + $0x50] sm:$0xff] }
 0x37a   : > { %14033 = vmatprep.mubr.msk.f32.mxu0 %vm1596_vm14, %v17422_v7  ;;  %v5293_v7 = vld [vmem:[#allocation2 + $0x190] sm:$0xff] }
 0x37d   : > { %14034 = vmatmul.mubr.msk.f32.gmra.mrb[42].mxu0 %vm1596_vm14, %v17424_v42  ;;  %v5297_v42 = vld [vmem:[#allocation2 + $0x1b0] sm:$0xff] }
 0x37e   : > { %14036 = vmatprep.mubr.msk.f32.mxu0 %vm1596_vm14, %v17430_v43  ;;  %v5298_v43 = vld [vmem:[#allocation2 + $0x1b8] sm:$0xff] }
 0x381   : > { %14037 = vmatmul.mubr.msk.f32.gmra.mrb[44].mxu0 %vm1596_vm14, %v4747_v5  ;;  %v5815_v5 = vld [vmem:[#allocation2 + $0xb1] sm:$0xff] }
 0x382   : > { %14039 = vmatprep.mubr.msk.f32.mxu0 %vm1596_vm14, %v4748_v16  ;;  %v5816_v16 = vld [vmem:[#allocation2 + $0xb9] sm:$0xff] }
 0x385   : > { %14040 = vmatmul.mubr.msk.f32.gmra.mrb[46].mxu0 %vm1596_vm14, %v4749_v15  ;;  %v5817_v15 = vld [vmem:[#allocation2 + $0xc1] sm:$0xff] }
 0x386   : > { %14044 = vmatprep.mubr.msk.f32.mxu0 %vm1596_vm14, %v5252_v14  ;;  %v5818_v14 = vld [vmem:[#allocation2 + $0xc9] sm:$0xff] }
 0x389   : > { %14045 = vmatmul.mubr.msk.f32.vlgmr.msra.gmra.mrb[0].mxu0 %vm1596_vm14, %v5253_v12  ;;  %v5819_v12 = vld [vmem:[#allocation2 + $0xd1] sm:$0xff] }
 0x38a   : > { %14117 = vmatpush3.msk.msra.mxu0 %vm1741_vm13, %v12140_v3  ;;  %14047 = vmatprep.mubr.msk.f32.mxu0 %vm1596_vm14, %v5254_v17  ;;  %v5814_v3 = vld [vmem:[#allocation2 + $0xa9] sm:$0xff]  ;;  %v5820_v17 = vld [vmem:[#allocation2 + $0xd9] sm:$0xff] }
 0x38d   : > { %14048 = vmatmul.mubr.msk.f32.gmra.mrb[2].mxu0 %vm1596_vm14, %v5255_v38  ;;  %v5821_v38 = vld [vmem:[#allocation2 + $0xe1] sm:$0xff] }
 0x38e   : > { %14050 = vmatprep.mubr.msk.f32.mxu0 %vm1596_vm14, %v5256_v18  ;;  %v5822_v18 = vld [vmem:[#allocation2 + $0xe9] sm:$0xff] }
 0x391   : > { %14051 = vmatmul.mubr.msk.f32.gmra.mrb[4].mxu0 %vm1596_vm14, %v5257_v11  ;;  %v5823_v11 = vld [vmem:[#allocation2 + $0xf1] sm:$0xff] }
 0x392   : > { %14053 = vmatprep.mubr.msk.f32.mxu0 %vm1596_vm14, %v5258_v19  ;;  %v5824_v19 = vld [vmem:[#allocation2 + $0xf9] sm:$0xff] }
 0x395   : > { %14054 = vmatmul.mubr.msk.f32.gmra.mrb[6].mxu0 %vm1596_vm14, %v5259_v21  ;;  %v5825_v21 = vld [vmem:[#allocation2 + $0x101] sm:$0xff] }
 0x396   : > { %14056 = vmatprep.mubr.msk.f32.mxu0 %vm1596_vm14, %v5260_v22  ;;  %v5826_v22 = vld [vmem:[#allocation2 + $0x109] sm:$0xff] }
 0x399   : > { %14057 = vmatmul.mubr.msk.f32.gmra.mrb[8].mxu0 %vm1596_vm14, %v5261_v50  ;;  %v5827_v50 = vld [vmem:[#allocation2 + $0x111] sm:$0xff] }
 0x39a   : > { %14059 = vmatprep.mubr.msk.f32.mxu0 %vm1596_vm14, %v5262_v23  ;;  %v5828_v23 = vld [vmem:[#allocation2 + $0x119] sm:$0xff] }
 0x39d   : > { %14060 = vmatmul.mubr.msk.f32.gmra.mrb[10].mxu0 %vm1596_vm14, %v5263_v27  ;;  %v5829_v27 = vld [vmem:[#allocation2 + $0x121] sm:$0xff] }
 0x39e   : > { %14062 = vmatprep.mubr.msk.f32.mxu0 %vm1596_vm14, %v5264_v28  ;;  %v5830_v28 = vld [vmem:[#allocation2 + $0x129] sm:$0xff] }
 0x3a1   : > { %14063 = vmatmul.mubr.msk.f32.gmra.mrb[12].mxu0 %vm1596_vm14, %v5265_v29  ;;  %v5831_v29 = vld [vmem:[#allocation2 + $0x131] sm:$0xff] }
 0x3a2   : > { %14065 = vmatprep.mubr.msk.f32.mxu0 %vm1596_vm14, %v5266_v20  ;;  %v5832_v20 = vld [vmem:[#allocation2 + $0x139] sm:$0xff] }
 0x3a5   : > { %14066 = vmatmul.mubr.msk.f32.gmra.mrb[14].mxu0 %vm1596_vm14, %v5267_v24  ;;  %v5833_v24 = vld [vmem:[#allocation2 + $0x141] sm:$0xff] }
 0x3a6   : > { %14068 = vmatprep.mubr.msk.f32.mxu0 %vm1596_vm14, %v5268_v56  ;;  %v5834_v56 = vld [vmem:[#allocation2 + $0x149] sm:$0xff] }
 0x3a9   : > { %14069 = vmatmul.mubr.msk.f32.gmra.mrb[16].mxu0 %vm1596_vm14, %v5269_v31  ;;  %v5835_v31 = vld [vmem:[#allocation2 + $0x151] sm:$0xff] }
 0x3aa   : > { %14071 = vmatprep.mubr.msk.f32.mxu0 %vm1596_vm14, %v5270_v33  ;;  %v5836_v33 = vld [vmem:[#allocation2 + $0x159] sm:$0xff] }
 0x3ad   : > { %14072 = vmatmul.mubr.msk.f32.gmra.mrb[18].mxu0 %vm1596_vm14, %v5271_v34  ;;  %v5837_v34 = vld [vmem:[#allocation2 + $0x161] sm:$0xff] }
 0x3ae   : > { %14074 = vmatprep.mubr.msk.f32.mxu0 %vm1596_vm14, %v5272_v6  ;;  %v5838_v6 = vld [vmem:[#allocation2 + $0x169] sm:$0xff] }
 0x3b1   : > { %14075 = vmatmul.mubr.msk.f32.gmra.mrb[20].mxu0 %vm1596_vm14, %v5273_v35  ;;  %v5839_v35 = vld [vmem:[#allocation2 + $0x171] sm:$0xff] }
 0x3b2   : > { %14077 = vmatprep.mubr.msk.f32.mxu0 %vm1596_vm14, %v5274_v36  ;;  %v5840_v36 = vld [vmem:[#allocation2 + $0x179] sm:$0xff] }
 0x3b5   : > { %14078 = vmatmul.mubr.msk.f32.gmra.mrb[22].mxu0 %vm1596_vm14, %v5275_v37  ;;  %v5841_v37 = vld [vmem:[#allocation2 + $0x181] sm:$0xff] }
 0x3b6   : > { %14080 = vmatprep.mubr.msk.f32.mxu0 %vm1596_vm14, %v5276_v39  ;;  %v5842_v39 = vld [vmem:[#allocation2 + $0x189] sm:$0xff] }
 0x3b9   : > { %14081 = vmatmul.mubr.msk.f32.gmra.mrb[24].mxu0 %vm1596_vm14, %v5277_v13  ;;  %v5843_v13 = vld [vmem:[#allocation2 + $0x191] sm:$0xff] }
 0x3ba   : > { %14083 = vmatprep.mubr.msk.f32.mxu0 %vm1596_vm14, %v5278_v30  ;;  %v5847_v30 = vld [vmem:[#allocation2 + $0x1b1] sm:$0xff] }
 0x3bd   : > { %14084 = vmatmul.mubr.msk.f32.gmra.mrb[26].mxu0 %vm1596_vm14, %v5279_v44  ;;  %v5848_v44 = vld [vmem:[#allocation2 + $0x1b9] sm:$0xff] }
 0x3be   : > { %14086 = vmatprep.mubr.msk.f32.mxu0 %vm1596_vm14, %v5280_v47  ;;  %v5849_v47 = vld [vmem:[#allocation2 + $0x1c1] sm:$0xff] }
 0x3c1   : > { %14087 = vmatmul.mubr.msk.f32.gmra.mrb[28].mxu0 %vm1596_vm14, %v5281_v48  ;;  %v12190_v48 = vld [vmem:[%s15924_s6 + $0x4] sm:$0xf] }
 0x3c2   : > { %14089 = vmatprep.mubr.msk.f32.mxu0 %vm1596_vm14, %v5282_v49  ;;  %14190 = vmatprep.subr.msk.mxu1 %vm1741_vm13, %v12190_v48  ;;  %v6545_v49 = vld [vmem:[#allocation3 + $0x18] sm:$0xff] }
 0x3c3   : > { %14191 = vmatpush3.msk.msra.mxu1 %vm1741_vm13, %v12190_v48  ;;  %14192 = vmatprep.mubr.msk.f32.mxu1 %vm1596_vm14, %v6545_v49 }
 0x3c5   : > { %14090 = vmatmul.mubr.msk.f32.gmra.mrb[30].mxu0 %vm1596_vm14, %v5283_v51  ;;  %v17853_v51 = vld [vmem:[%s15924_s6 + $0x8] sm:$0xf] }
 0x3c6   : > { %14092 = vmatprep.mubr.msk.f32.mxu0 %vm1596_vm14, %v5284_v32  ;;  %v1450_v32 = vld [vmem:[#allocation4 + $0x8] sm:$0xff] }
 0x3c9   : > { %14093 = vmatmul.mubr.msk.f32.gmra.mrb[32].mxu0 %vm1596_vm14, %v5285_v53 }
 0x3ca   : > { %14095 = vmatprep.mubr.msk.f32.mxu0 %vm1596_vm14, %v5286_v55 }
 0x3cd   : > { %14096 = vmatmul.mubr.msk.f32.gmra.mrb[34].mxu0 %vm1596_vm14, %v5287_v52  ;;  %v1449_v52 = vld [vmem:[#allocation4] sm:$0xff] }
 0x3ce   : > { %14098 = vmatprep.mubr.msk.f32.mxu0 %vm1596_vm14, %v5288_v63 }
 0x3d1   : > { %14099 = vmatmul.mubr.msk.f32.gmra.mrb[36].mxu0 %vm1596_vm14, %v5289_v40 }
 0x3d2   : > { %14101 = vmatprep.mubr.msk.f32.mxu0 %vm1596_vm14, %v5290_v41 }
 0x3d5   : > { %14102 = vmatmul.mubr.msk.f32.gmra.mrb[38].mxu0 %vm1596_vm14, %v5291_v26 }
 0x3d6   : > { %14104 = vmatprep.mubr.msk.f32.mxu0 %vm1596_vm14, %v5292_v9  ;;  %v1452_v9 = vld [vmem:[#allocation4 + $0x18] sm:$0xff] }
 0x3d9   : > { %14105 = vmatmul.mubr.msk.f32.gmra.mrb[40].mxu0 %vm1596_vm14, %v5293_v7 }
 0x3da   : > { %14107 = vmatprep.mubr.msk.f32.mxu0 %vm1596_vm14, %v17527_v62  ;;  %v5804_v62 = vld [vmem:[#allocation2 + $0x59] sm:$0xff] }
 0x3dd   : > { %14108 = vmatmul.mubr.msk.f32.gmra.mrb[42].mxu0 %vm1596_vm14, %v17529_v0  ;;  %v5805_v0 = vld [vmem:[#allocation2 + $0x61] sm:$0xff] }
 0x3de   : > { %14110 = vmatprep.mubr.msk.f32.mxu0 %vm1596_vm14, %v17535_v54  ;;  %v5806_v54 = vld [vmem:[#allocation2 + $0x69] sm:$0xff] }
 0x3e1   : > { %14111 = vmatmul.mubr.msk.f32.gmra.mrb[44].mxu0 %vm1596_vm14, %v5297_v42 }
 0x3e2   : > { %14113 = vmatprep.mubr.msk.f32.mxu0 %vm1596_vm14, %v5298_v43  ;;  %v1451_v43 = vld [vmem:[#allocation4 + $0x10] sm:$0xff] }
 0x3e5   : > { %14114 = vmatmul.mubr.msk.f32.gmra.mrb[46].mxu0 %vm1596_vm14, %v5299_v2 }
 0x3e6   : > { %14118 = vmatprep.mubr.msk.f32.mxu0 %vm1596_vm14, %v5802_v8 }
 0x3e9   : > { %14119 = vmatmul.mubr.msk.f32.vlgmr.msra.gmra.mrb[0].mxu0 %vm1596_vm14, %v5803_v4 }
 0x3ea   : > { %14121 = vmatprep.mubr.msk.f32.mxu0 %vm1596_vm14, %v5804_v62 }
 0x3ed   : > { %14122 = vmatmul.mubr.msk.f32.gmra.mrb[2].mxu0 %vm1596_vm14, %v5805_v0  ;;  %v1454_v0 = vld [vmem:[#allocation4 + $0x28] sm:$0xff] }
 0x3ee   : > { %14124 = vmatprep.mubr.msk.f32.mxu0 %vm1596_vm14, %v5806_v54 }
 0x3f1   : > { %14125 = vmatmul.mubr.msk.f32.gmra.mrb[4].mxu0 %vm1596_vm14, %v5807_v46 }
 0x3f2   : > { %14127 = vmatprep.mubr.msk.f32.mxu0 %vm1596_vm14, %v5808_v57  ;;  %v1453_v57 = vld [vmem:[#allocation4 + $0x20] sm:$0xff] }
 0x3f5   : > { %14128 = vmatmul.mubr.msk.f32.gmra.mrb[6].mxu0 %vm1596_vm14, %v5809_v58 }
 0x3f6   : > { %14130 = vmatprep.mubr.msk.f32.mxu0 %vm1596_vm14, %v5810_v59 }
 0x3f9   : > { %14131 = vmatmul.mubr.msk.f32.gmra.mrb[8].mxu0 %vm1596_vm14, %v5811_v60 }
 0x3fa   : > { %14133 = vmatprep.mubr.msk.f32.mxu0 %vm1596_vm14, %v5812_v45 }
 0x3fd   : > { %14134 = vmatmul.mubr.msk.f32.gmra.mrb[10].mxu0 %vm1596_vm14, %v5813_v61  ;;  %v1456_v61 = vld [vmem:[#allocation4 + $0x38] sm:$0xff] }
 0x3fe   : > { %14136 = vmatprep.mubr.msk.f32.mxu0 %vm1596_vm14, %v5814_v3 }
 0x401   : > { %14137 = vmatmul.mubr.msk.f32.gmra.mrb[12].mxu0 %vm1596_vm14, %v5815_v5 }
 0x402   : > { %14139 = vmatprep.mubr.msk.f32.mxu0 %vm1596_vm14, %v5816_v16  ;;  %v1455_v16 = vld [vmem:[#allocation4 + $0x30] sm:$0xff] }
 0x405   : > { %14140 = vmatmul.mubr.msk.f32.gmra.mrb[14].mxu0 %vm1596_vm14, %v5817_v15 }
 0x406   : > { %14142 = vmatprep.mubr.msk.f32.mxu0 %vm1596_vm14, %v5818_v14 }
 0x409   : > { %14143 = vmatmul.mubr.msk.f32.gmra.mrb[16].mxu0 %vm1596_vm14, %v5819_v12 }
 0x40a   : > { %14145 = vmatprep.mubr.msk.f32.mxu0 %vm1596_vm14, %v5820_v17 }
 0x40d   : > { %14146 = vmatmul.mubr.msk.f32.gmra.mrb[18].mxu0 %vm1596_vm14, %v5821_v38 }
 0x40e   : > { %14148 = vmatprep.mubr.msk.f32.mxu0 %vm1596_vm14, %v5822_v18 }
 0x411   : > { %14149 = vmatmul.mubr.msk.f32.gmra.mrb[20].mxu0 %vm1596_vm14, %v5823_v11  ;;  %v1458_v11 = vld [vmem:[#allocation4 + $0x48] sm:$0xff] }
 0x412   : > { %14151 = vmatprep.mubr.msk.f32.mxu0 %vm1596_vm14, %v5824_v19 }
 0x415   : > { %14152 = vmatmul.mubr.msk.f32.gmra.mrb[22].mxu0 %vm1596_vm14, %v5825_v21 }
 0x416   : > { %14154 = vmatprep.mubr.msk.f32.mxu0 %vm1596_vm14, %v5826_v22  ;;  %v1457_v22 = vld [vmem:[#allocation4 + $0x40] sm:$0xff] }
 0x419   : > { %14155 = vmatmul.mubr.msk.f32.gmra.mrb[24].mxu0 %vm1596_vm14, %v5827_v50 }
 0x41a   : > { %14157 = vmatprep.mubr.msk.f32.mxu0 %vm1596_vm14, %v5828_v23 }
 0x41d   : > { %14158 = vmatmul.mubr.msk.f32.gmra.mrb[26].mxu0 %vm1596_vm14, %v5829_v27 }
 0x41e   : > { %14160 = vmatprep.mubr.msk.f32.mxu0 %vm1596_vm14, %v5830_v28 }
 0x421   : > { %14161 = vmatmul.mubr.msk.f32.gmra.mrb[28].mxu0 %vm1596_vm14, %v5831_v29 }
 0x422   : > { %14163 = vmatprep.mubr.msk.f32.mxu0 %vm1596_vm14, %v5832_v20 }
 0x425   : > { %14164 = vmatmul.mubr.msk.f32.gmra.mrb[30].mxu0 %vm1596_vm14, %v5833_v24  ;;  %v1460_v24 = vld [vmem:[#allocation4 + $0x58] sm:$0xff] }
 0x426   : > { %14166 = vmatprep.mubr.msk.f32.mxu0 %vm1596_vm14, %v5834_v56 }
 0x429   : > { %14167 = vmatmul.mubr.msk.f32.gmra.mrb[32].mxu0 %vm1596_vm14, %v5835_v31 }
 0x42a   : > { %14169 = vmatprep.mubr.msk.f32.mxu0 %vm1596_vm14, %v5836_v33  ;;  %v1459_v33 = vld [vmem:[#allocation4 + $0x50] sm:$0xff] }
 0x42d   : > { %14170 = vmatmul.mubr.msk.f32.gmra.mrb[34].mxu0 %vm1596_vm14, %v5837_v34 }
 0x42e   : > { %14172 = vmatprep.mubr.msk.f32.mxu0 %vm1596_vm14, %v5838_v6 }
 0x431   : > { %14173 = vmatmul.mubr.msk.f32.gmra.mrb[36].mxu0 %vm1596_vm14, %v5839_v35 }
 0x432   : > { %14175 = vmatprep.mubr.msk.f32.mxu0 %vm1596_vm14, %v5840_v36 }
 0x435   : > { %14176 = vmatmul.mubr.msk.f32.gmra.mrb[38].mxu0 %vm1596_vm14, %v5841_v37 }
 0x436   : > { %14178 = vmatprep.mubr.msk.f32.mxu0 %vm1596_vm14, %v5842_v39 }
 0x439   : > { %14179 = vmatmul.mubr.msk.f32.gmra.mrb[40].mxu0 %vm1596_vm14, %v5843_v13  ;;  %v1462_v13 = vld [vmem:[#allocation4 + $0x68] sm:$0xff] }
 0x43a   : > { %14181 = vmatprep.mubr.msk.f32.mxu0 %vm1596_vm14, %v17632_v1  ;;  %v6546_v1 = vld [vmem:[#allocation3 + $0x20] sm:$0xff] }
 0x43b   : > { %14193 = vmatmul.mubr.msk.f32.vlgmr.msra.gmra.mrb[0].mxu1 %vm1596_vm14, %v6546_v1 }
 0x43d   : > { %14182 = vmatmul.mubr.msk.f32.gmra.mrb[42].mxu0 %vm1596_vm14, %v17634_v10  ;;  %v6547_v10 = vld [vmem:[#allocation3 + $0x28] sm:$0xff] }
 0x43e   : > { %14184 = vmatprep.mubr.msk.f32.mxu0 %vm1596_vm14, %v17640_v25  ;;  %14195 = vmatprep.mubr.msk.f32.mxu1 %vm1596_vm14, %v6547_v10  ;;  %v6544_v25 = vld [vmem:[%s15924_s6] sm:$0xf] }
 0x43f   : > { %14264 = vmatprep.subr.msk.mxu1 %vm1741_vm13, %v6544_v25 }
 0x440   : > { %14265 = vmatpush3.msk.msra.mxu1 %vm1741_vm13, %v6544_v25 }
 0x441   : > { %14185 = vmatmul.mubr.msk.f32.gmra.mrb[44].mxu0 %vm1596_vm14, %v5847_v30  ;;  %14338 = vmatprep.subr.msk.mxu1 %vm1741_vm13, %v17853_v51 }
 0x442   : > { %14187 = vmatprep.mubr.msk.f32.mxu0 %vm1596_vm14, %v5848_v44 }
 0x445   : > { %14188 = vmatmul.mubr.msk.f32.gmra.mrb[46].mxu0 %vm1596_vm14, %v5849_v47  ;;  %v1461_v47 = vld [vmem:[#allocation4 + $0x60] sm:$0xff] }
 0x4bc   : > { %v14120_v53 = vpop.f32.mrb[0].mxu0 }
 0x4bd   : > { %v6353_v55 = vmax.f32 %v14120_v53, 0.0  ;;  %v6065_v63 = vpop.f32.mrb[1].mxu0  ;;  %v1464_v53 = vld [vmem:[#allocation4 + $0x78] sm:$0xff] }
 0x4be   : > { %v6352_v40 = vmax.f32 %v6065_v63, 0.0  ;;  %v1463_v63 = vld [vmem:[#allocation4 + $0x70] sm:$0xff] }
 0x4bf   : > { %v6401_v41 = vmul.f32 %v6353_v55, %v1450_v32 }
 0x4c0   : > { %v6400_v26 = vmul.f32 %v6352_v40, %v1449_v52  ;;  %v14123_v7 = vpop.f32.mrb[2].mxu0 }
 0x4c1   : > { %6449 = vst.msk [vmem:[#allocation3 + $0x38] sm:$0xff] %vm1596_vm14, %v6401_v41  ;;  %v6355_v42 = vmax.f32 %v14123_v7, 0.0  ;;  %v6075_v2 = vpop.f32.mrb[3].mxu0 }
 0x4c2   : > { %6448 = vst.msk [vmem:[#allocation3 + $0x30] sm:$0xff] %vm1596_vm14, %v6400_v26  ;;  %v6354_v8 = vmax.f32 %v6075_v2, 0.0 }
 0x4c3   : > { %v6403_v4 = vmul.f32 %v6355_v42, %v1452_v9 }
 0x4c4   : > { %v6402_v62 = vmul.f32 %v6354_v8, %v1451_v43  ;;  %v14126_v54 = vpop.f32.mrb[4].mxu0  ;;  %v1466_v43 = vld [vmem:[#allocation4 + $0x88] sm:$0xff] }
 0x4c5   : > { %6451 = vst.msk [vmem:[#allocation3 + $0x48] sm:$0xff] %vm1596_vm14, %v6403_v4  ;;  %v6357_v46 = vmax.f32 %v14126_v54, 0.0  ;;  %v6085_v58 = vpop.f32.mrb[5].mxu0  ;;  %v1465_v4 = vld [vmem:[#allocation4 + $0x80] sm:$0xff] }
 0x4c6   : > { %6450 = vst.msk [vmem:[#allocation3 + $0x40] sm:$0xff] %vm1596_vm14, %v6402_v62  ;;  %v6356_v59 = vmax.f32 %v6085_v58, 0.0 }
 0x4c7   : > { %v6405_v60 = vmul.f32 %v6357_v46, %v1454_v0 }
 0x4c8   : > { %v6404_v45 = vmul.f32 %v6356_v59, %v1453_v57  ;;  %v14129_v3 = vpop.f32.mrb[6].mxu0  ;;  %v6549_v17 = vld [vmem:[#allocation3 + $0x38] sm:$0xff]  ;;  %v1468_v59 = vld [vmem:[#allocation4 + $0x98] sm:$0xff] }
 0x4c9   : > { %6453 = vst.msk [vmem:[#allocation3 + $0x58] sm:$0xff] %vm1596_vm14, %v6405_v60  ;;  %v6359_v5 = vmax.f32 %v14129_v3, 0.0  ;;  %v6095_v15 = vpop.f32.mrb[7].mxu0  ;;  %v6548_v14 = vld [vmem:[#allocation3 + $0x30] sm:$0xff] }
 0x4ca   : > { %6452 = vst.msk [vmem:[#allocation3 + $0x50] sm:$0xff] %vm1596_vm14, %v6404_v45  ;;  %v6358_v12 = vmax.f32 %v6095_v15, 0.0  ;;  %14196 = vmatmul.mubr.msk.f32.gmra.mrb[2].mxu1 %vm1596_vm14, %v6548_v14 }
 0x4cb   : > { %v6407_v38 = vmul.f32 %v6359_v5, %v1456_v61  ;;  %14198 = vmatprep.mubr.msk.f32.mxu1 %vm1596_vm14, %v6549_v17  ;;  %v1467_v61 = vld [vmem:[#allocation4 + $0x90] sm:$0xff]  ;;  %v1470_v17 = vld [vmem:[#allocation4 + $0xa8] sm:$0xff] }
 0x4cc   : > { %v6406_v18 = vmul.f32 %v6358_v12, %v1455_v16  ;;  %v14132_v19 = vpop.f32.mrb[8].mxu0  ;;  %v6551_v28 = vld [vmem:[#allocation3 + $0x48] sm:$0xff] }
 0x4cd   : > { %6455 = vst.msk [vmem:[#allocation3 + $0x68] sm:$0xff] %vm1596_vm14, %v6407_v38  ;;  %v6361_v21 = vmax.f32 %v14132_v19, 0.0  ;;  %v6105_v50 = vpop.f32.mrb[9].mxu0  ;;  %v6550_v23 = vld [vmem:[#allocation3 + $0x40] sm:$0xff] }
 0x4ce   : > { %6454 = vst.msk [vmem:[#allocation3 + $0x60] sm:$0xff] %vm1596_vm14, %v6406_v18  ;;  %v6360_v27 = vmax.f32 %v6105_v50, 0.0  ;;  %14199 = vmatmul.mubr.msk.f32.gmra.mrb[4].mxu1 %vm1596_vm14, %v6550_v23 }
 0x4cf   : > { %v6409_v29 = vmul.f32 %v6361_v21, %v1458_v11  ;;  %14201 = vmatprep.mubr.msk.f32.mxu1 %vm1596_vm14, %v6551_v28  ;;  %v1469_v11 = vld [vmem:[#allocation4 + $0xa0] sm:$0xff]  ;;  %v1472_v28 = vld [vmem:[#allocation4 + $0xb8] sm:$0xff] }
 0x4d0   : > { %v6408_v20 = vmul.f32 %v6360_v27, %v1457_v22  ;;  %v14135_v56 = vpop.f32.mrb[10].mxu0  ;;  %v6553_v36 = vld [vmem:[#allocation3 + $0x58] sm:$0xff] }
 0x4d1   : > { %6457 = vst.msk [vmem:[#allocation3 + $0x78] sm:$0xff] %vm1596_vm14, %v6409_v29  ;;  %v6363_v31 = vmax.f32 %v14135_v56, 0.0  ;;  %v6115_v34 = vpop.f32.mrb[11].mxu0  ;;  %v6552_v6 = vld [vmem:[#allocation3 + $0x50] sm:$0xff] }
 0x4d2   : > { %6456 = vst.msk [vmem:[#allocation3 + $0x70] sm:$0xff] %vm1596_vm14, %v6408_v20  ;;  %v6362_v35 = vmax.f32 %v6115_v34, 0.0  ;;  %14202 = vmatmul.mubr.msk.f32.gmra.mrb[6].mxu1 %vm1596_vm14, %v6552_v6 }
 0x4d3   : > { %v6411_v37 = vmul.f32 %v6363_v31, %v1460_v24  ;;  %14204 = vmatprep.mubr.msk.f32.mxu1 %vm1596_vm14, %v6553_v36  ;;  %v1471_v24 = vld [vmem:[#allocation4 + $0xb0] sm:$0xff]  ;;  %v1474_v36 = vld [vmem:[#allocation4 + $0xc8] sm:$0xff] }
 0x4d4   : > { %v6410_v39 = vmul.f32 %v6362_v35, %v1459_v33  ;;  %v14138_v30 = vpop.f32.mrb[12].mxu0  ;;  %v6555_v10 = vld [vmem:[#allocation3 + $0x68] sm:$0xff] }
 0x4d5   : > { %6459 = vst.msk [vmem:[#allocation3 + $0x88] sm:$0xff] %vm1596_vm14, %v6411_v37  ;;  %v6365_v44 = vmax.f32 %v14138_v30, 0.0  ;;  %v6125_v48 = vpop.f32.mrb[13].mxu0  ;;  %v6554_v49 = vld [vmem:[#allocation3 + $0x60] sm:$0xff] }
 0x4d6   : > { %6458 = vst.msk [vmem:[#allocation3 + $0x80] sm:$0xff] %vm1596_vm14, %v6410_v39  ;;  %v6364_v1 = vmax.f32 %v6125_v48, 0.0  ;;  %14205 = vmatmul.mubr.msk.f32.gmra.mrb[8].mxu1 %vm1596_vm14, %v6554_v49 }
 0x4d7   : > { %v6413_v25 = vmul.f32 %v6365_v44, %v1462_v13  ;;  %14207 = vmatprep.mubr.msk.f32.mxu1 %vm1596_vm14, %v6555_v10  ;;  %v1473_v13 = vld [vmem:[#allocation4 + $0xc0] sm:$0xff]  ;;  %v1476_v10 = vld [vmem:[#allocation4 + $0xd8] sm:$0xff] }
 0x4d8   : > { %v6412_v32 = vmul.f32 %v6364_v1, %v1461_v47  ;;  %v14141_v55 = vpop.f32.mrb[14].mxu0  ;;  %v6557_v9 = vld [vmem:[#allocation3 + $0x78] sm:$0xff] }
 0x4d9   : > { %6461 = vst.msk [vmem:[#allocation3 + $0x98] sm:$0xff] %vm1596_vm14, %v6413_v25  ;;  %v6367_v52 = vmax.f32 %v14141_v55, 0.0  ;;  %v6135_v40 = vpop.f32.mrb[15].mxu0  ;;  %v6556_v41 = vld [vmem:[#allocation3 + $0x70] sm:$0xff] }
 0x4da   : > { %6460 = vst.msk [vmem:[#allocation3 + $0x90] sm:$0xff] %vm1596_vm14, %v6412_v32  ;;  %v6366_v26 = vmax.f32 %v6135_v40, 0.0  ;;  %14208 = vmatmul.mubr.msk.f32.gmra.mrb[10].mxu1 %vm1596_vm14, %v6556_v41 }
 0x4db   : > { %v6415_v7 = vmul.f32 %v6367_v52, %v1464_v53  ;;  %14210 = vmatprep.mubr.msk.f32.mxu1 %vm1596_vm14, %v6557_v9  ;;  %v1475_v53 = vld [vmem:[#allocation4 + $0xd0] sm:$0xff]  ;;  %v1478_v9 = vld [vmem:[#allocation4 + $0xe8] sm:$0xff] }
 0x4dc   : > { %v6414_v42 = vmul.f32 %v6366_v26, %v1463_v63  ;;  %v14144_v2 = vpop.f32.mrb[16].mxu0  ;;  %v6559_v46 = vld [vmem:[#allocation3 + $0x88] sm:$0xff] }
 0x4dd   : > { %6463 = vst.msk [vmem:[#allocation3 + $0xa8] sm:$0xff] %vm1596_vm14, %v6415_v7  ;;  %v6369_v8 = vmax.f32 %v14144_v2, 0.0  ;;  %v6145_v62 = vpop.f32.mrb[17].mxu0  ;;  %v6558_v0 = vld [vmem:[#allocation3 + $0x80] sm:$0xff] }
 0x4de   : > { %6462 = vst.msk [vmem:[#allocation3 + $0xa0] sm:$0xff] %vm1596_vm14, %v6414_v42  ;;  %v6368_v54 = vmax.f32 %v6145_v62, 0.0  ;;  %14211 = vmatmul.mubr.msk.f32.gmra.mrb[12].mxu1 %vm1596_vm14, %v6558_v0 }
 0x4df   : > { %v6417_v57 = vmul.f32 %v6369_v8, %v1466_v43  ;;  %14213 = vmatprep.mubr.msk.f32.mxu1 %vm1596_vm14, %v6559_v46  ;;  %v1477_v43 = vld [vmem:[#allocation4 + $0xe0] sm:$0xff]  ;;  %v1480_v46 = vld [vmem:[#allocation4 + $0xf8] sm:$0xff] }
 0x4e0   : > { %v6416_v58 = vmul.f32 %v6368_v54, %v1465_v4  ;;  %v14147_v60 = vpop.f32.mrb[18].mxu0  ;;  %v6561_v15 = vld [vmem:[#allocation3 + $0x98] sm:$0xff] }
 0x4e1   : > { %6465 = vst.msk [vmem:[#allocation3 + $0xb8] sm:$0xff] %vm1596_vm14, %v6417_v57  ;;  %v6371_v45 = vmax.f32 %v14147_v60, 0.0  ;;  %v6155_v3 = vpop.f32.mrb[19].mxu0  ;;  %v6560_v5 = vld [vmem:[#allocation3 + $0x90] sm:$0xff] }
 0x4e2   : > { %6464 = vst.msk [vmem:[#allocation3 + $0xb0] sm:$0xff] %vm1596_vm14, %v6416_v58  ;;  %v6370_v16 = vmax.f32 %v6155_v3, 0.0  ;;  %14214 = vmatmul.mubr.msk.f32.gmra.mrb[14].mxu1 %vm1596_vm14, %v6560_v5 }
 0x4e3   : > { %v6419_v14 = vmul.f32 %v6371_v45, %v1468_v59  ;;  %14216 = vmatprep.mubr.msk.f32.mxu1 %vm1596_vm14, %v6561_v15  ;;  %v1479_v59 = vld [vmem:[#allocation4 + $0xf0] sm:$0xff]  ;;  %v1482_v15 = vld [vmem:[#allocation4 + $0x108] sm:$0xff] }
 0x4e4   : > { %v6418_v12 = vmul.f32 %v6370_v16, %v1467_v61  ;;  %v14150_v38 = vpop.f32.mrb[20].mxu0  ;;  %v6563_v50 = vld [vmem:[#allocation3 + $0xa8] sm:$0xff] }
 0x4e5   : > { %6467 = vst.msk [vmem:[#allocation3 + $0xc8] sm:$0xff] %vm1596_vm14, %v6419_v14  ;;  %v6373_v18 = vmax.f32 %v14150_v38, 0.0  ;;  %v6165_v19 = vpop.f32.mrb[21].mxu0  ;;  %v6562_v21 = vld [vmem:[#allocation3 + $0xa0] sm:$0xff] }
 0x4e6   : > { %6466 = vst.msk [vmem:[#allocation3 + $0xc0] sm:$0xff] %vm1596_vm14, %v6418_v12  ;;  %v6372_v22 = vmax.f32 %v6165_v19, 0.0  ;;  %14217 = vmatmul.mubr.msk.f32.gmra.mrb[16].mxu1 %vm1596_vm14, %v6562_v21 }
 0x4e7   : > { %v6421_v23 = vmul.f32 %v6373_v18, %v1470_v17  ;;  %14219 = vmatprep.mubr.msk.f32.mxu1 %vm1596_vm14, %v6563_v50  ;;  %v1481_v17 = vld [vmem:[#allocation4 + $0x100] sm:$0xff]  ;;  %v1484_v50 = vld [vmem:[#allocation4 + $0x118] sm:$0xff] }
 0x4e8   : > { %v6420_v27 = vmul.f32 %v6372_v22, %v1469_v11  ;;  %v14153_v29 = vpop.f32.mrb[22].mxu0  ;;  %v17899_v34 = vld [vmem:[#allocation3 + $0xb8] sm:$0xff] }
 0x4e9   : > { %6469 = vst.msk [vmem:[#allocation3 + $0xd8] sm:$0xff] %vm1596_vm14, %v6421_v23  ;;  %v6375_v20 = vmax.f32 %v14153_v29, 0.0  ;;  %v6175_v56 = vpop.f32.mrb[23].mxu0  ;;  %v17894_v31 = vld [vmem:[#allocation3 + $0xb0] sm:$0xff] }
 0x4ea   : > { %6468 = vst.msk [vmem:[#allocation3 + $0xd0] sm:$0xff] %vm1596_vm14, %v6420_v27  ;;  %v6374_v33 = vmax.f32 %v6175_v56, 0.0  ;;  %14220 = vmatmul.mubr.msk.f32.gmra.mrb[18].mxu1 %vm1596_vm14, %v17894_v31 }
 0x4eb   : > { %v6423_v6 = vmul.f32 %v6375_v20, %v1472_v28  ;;  %14222 = vmatprep.mubr.msk.f32.mxu1 %vm1596_vm14, %v17899_v34  ;;  %v1483_v28 = vld [vmem:[#allocation4 + $0x110] sm:$0xff] }
 0x4ec   : > { %v6422_v35 = vmul.f32 %v6374_v33, %v1471_v24  ;;  %v14156_v37 = vpop.f32.mrb[24].mxu0  ;;  %v17909_v48 = vld [vmem:[#allocation3 + $0xc8] sm:$0xff] }
 0x4ed   : > { %6471 = vst.msk [vmem:[#allocation3 + $0xe8] sm:$0xff] %vm1596_vm14, %v6423_v6  ;;  %v6377_v39 = vmax.f32 %v14156_v37, 0.0  ;;  %v6185_v30 = vpop.f32.mrb[25].mxu0  ;;  %v17904_v44 = vld [vmem:[#allocation3 + $0xc0] sm:$0xff] }
 0x4ee   : > { %6470 = vst.msk [vmem:[#allocation3 + $0xe0] sm:$0xff] %vm1596_vm14, %v6422_v35  ;;  %v6376_v47 = vmax.f32 %v6185_v30, 0.0  ;;  %14223 = vmatmul.mubr.msk.f32.gmra.mrb[20].mxu1 %vm1596_vm14, %v17904_v44  ;;  %v1486_v35 = vld [vmem:[#allocation4 + $0x128] sm:$0xff] }
 0x4ef   : > { %v6425_v49 = vmul.f32 %v6377_v39, %v1474_v36  ;;  %14225 = vmatprep.mubr.msk.f32.mxu1 %vm1596_vm14, %v17909_v48  ;;  %v1485_v39 = vld [vmem:[#allocation4 + $0x120] sm:$0xff] }
 0x4f0   : > { %v6424_v1 = vmul.f32 %v6376_v47, %v1473_v13  ;;  %v14159_v25 = vpop.f32.mrb[26].mxu0  ;;  %v17919_v40 = vld [vmem:[#allocation3 + $0xd8] sm:$0xff] }
 0x4f1   : > { %6473 = vst.msk [vmem:[#allocation3 + $0xf8] sm:$0xff] %vm1596_vm14, %v6425_v49  ;;  %v6379_v32 = vmax.f32 %v14159_v25, 0.0  ;;  %v6195_v55 = vpop.f32.mrb[27].mxu0  ;;  %v17914_v52 = vld [vmem:[#allocation3 + $0xd0] sm:$0xff]  ;;  %v1488_v25 = vld [vmem:[#allocation4 + $0x138] sm:$0xff] }
 0x4f2   : > { %6472 = vst.msk [vmem:[#allocation3 + $0xf0] sm:$0xff] %vm1596_vm14, %v6424_v1  ;;  %v6378_v63 = vmax.f32 %v6195_v55, 0.0  ;;  %14226 = vmatmul.mubr.msk.f32.gmra.mrb[22].mxu1 %vm1596_vm14, %v17914_v52  ;;  %v1487_v55 = vld [vmem:[#allocation4 + $0x130] sm:$0xff] }
 0x4f3   : > { %v6427_v41 = vmul.f32 %v6379_v32, %v1476_v10  ;;  %14228 = vmatprep.mubr.msk.f32.mxu1 %vm1596_vm14, %v17919_v40 }
 0x4f4   : > { %v6426_v26 = vmul.f32 %v6378_v63, %v1475_v53  ;;  %v14162_v7 = vpop.f32.mrb[28].mxu0  ;;  %v17929_v62 = vld [vmem:[#allocation3 + $0xe8] sm:$0xff] }
 0x4f5   : > { %6475 = vst.msk [vmem:[#allocation3 + $0x108] sm:$0xff] %vm1596_vm14, %v6427_v41  ;;  %v6381_v42 = vmax.f32 %v14162_v7, 0.0  ;;  %v6205_v2 = vpop.f32.mrb[29].mxu0  ;;  %v17924_v8 = vld [vmem:[#allocation3 + $0xe0] sm:$0xff] }
 0x4f6   : > { %6474 = vst.msk [vmem:[#allocation3 + $0x100] sm:$0xff] %vm1596_vm14, %v6426_v26  ;;  %v6380_v4 = vmax.f32 %v6205_v2, 0.0  ;;  %14229 = vmatmul.mubr.msk.f32.gmra.mrb[24].mxu1 %vm1596_vm14, %v17924_v8 }
 0x4f7   : > { %v6429_v0 = vmul.f32 %v6381_v42, %v1478_v9  ;;  %14231 = vmatprep.mubr.msk.f32.mxu1 %vm1596_vm14, %v17929_v62 }
 0x4f8   : > { %v6428_v54 = vmul.f32 %v6380_v4, %v1477_v43  ;;  %v14165_v57 = vpop.f32.mrb[30].mxu0  ;;  %v17939_v3 = vld [vmem:[#allocation3 + $0xf8] sm:$0xff] }
 0x4f9   : > { %6477 = vst.msk [vmem:[#allocation3 + $0x118] sm:$0xff] %vm1596_vm14, %v6429_v0  ;;  %v6383_v58 = vmax.f32 %v14165_v57, 0.0  ;;  %v6215_v60 = vpop.f32.mrb[31].mxu0  ;;  %v17934_v45 = vld [vmem:[#allocation3 + $0xf0] sm:$0xff]  ;;  %v1490_v43 = vld [vmem:[#allocation4 + $0x148] sm:$0xff] }
 0x4fa   : > { %6476 = vst.msk [vmem:[#allocation3 + $0x110] sm:$0xff] %vm1596_vm14, %v6428_v54  ;;  %v6382_v61 = vmax.f32 %v6215_v60, 0.0  ;;  %14232 = vmatmul.mubr.msk.f32.gmra.mrb[26].mxu1 %vm1596_vm14, %v17934_v45  ;;  %v1489_v0 = vld [vmem:[#allocation4 + $0x140] sm:$0xff] }
 0x4fb   : > { %v6431_v5 = vmul.f32 %v6383_v58, %v1480_v46  ;;  %14234 = vmatprep.mubr.msk.f32.mxu1 %vm1596_vm14, %v17939_v3 }
 0x4fc   : > { %v6430_v16 = vmul.f32 %v6382_v61, %v1479_v59  ;;  %v14168_v14 = vpop.f32.mrb[32].mxu0  ;;  %v17949_v19 = vld [vmem:[#allocation3 + $0x108] sm:$0xff] }
 0x4fd   : > { %6479 = vst.msk [vmem:[#allocation3 + $0x128] sm:$0xff] %vm1596_vm14, %v6431_v5  ;;  %v6385_v12 = vmax.f32 %v14168_v14, 0.0  ;;  %v6225_v38 = vpop.f32.mrb[33].mxu0  ;;  %v17944_v18 = vld [vmem:[#allocation3 + $0x100] sm:$0xff]  ;;  %v1492_v61 = vld [vmem:[#allocation4 + $0x158] sm:$0xff] }
 0x4fe   : > { %6478 = vst.msk [vmem:[#allocation3 + $0x120] sm:$0xff] %vm1596_vm14, %v6430_v16  ;;  %v6384_v11 = vmax.f32 %v6225_v38, 0.0  ;;  %14235 = vmatmul.mubr.msk.f32.gmra.mrb[28].mxu1 %vm1596_vm14, %v17944_v18 }
 0x4ff   : > { %v6433_v21 = vmul.f32 %v6385_v12, %v1482_v15  ;;  %14237 = vmatprep.mubr.msk.f32.mxu1 %vm1596_vm14, %v17949_v19  ;;  %v1491_v15 = vld [vmem:[#allocation4 + $0x150] sm:$0xff] }
 0x500   : > { %v6432_v22 = vmul.f32 %v6384_v11, %v1481_v17  ;;  %v14171_v23 = vpop.f32.mrb[34].mxu0  ;;  %v17959_v56 = vld [vmem:[#allocation3 + $0x118] sm:$0xff] }
 0x501   : > { %6481 = vst.msk [vmem:[#allocation3 + $0x138] sm:$0xff] %vm1596_vm14, %v6433_v21  ;;  %v6387_v27 = vmax.f32 %v14171_v23, 0.0  ;;  %v6235_v29 = vpop.f32.mrb[35].mxu0  ;;  %v17954_v20 = vld [vmem:[#allocation3 + $0x110] sm:$0xff]  ;;  %19604 = vst [vmem:[#allocation5_spill] sm:$0xff] %v17959_v56 }
 0x502   : > { %6480 = vst.msk [vmem:[#allocation3 + $0x130] sm:$0xff] %vm1596_vm14, %v6432_v22  ;;  %v6386_v24 = vmax.f32 %v6235_v29, 0.0  ;;  %14238 = vmatmul.mubr.msk.f32.gmra.mrb[30].mxu1 %vm1596_vm14, %v17954_v20  ;;  %v1494_v22 = vld [vmem:[#allocation4 + $0x168] sm:$0xff] }
 0x503   : > { %v6435_v33 = vmul.f32 %v6387_v27, %v1484_v50  ;;  %14240 = vmatprep.mubr.msk.f32.mxu1 %vm1596_vm14, %v17959_v56  ;;  %v1493_v27 = vld [vmem:[#allocation4 + $0x160] sm:$0xff] }
 0x504   : > { %v6434_v6 = vmul.f32 %v6386_v24, %v1483_v28  ;;  %v14174_v36 = vpop.f32.mrb[36].mxu0  ;;  %v17969_v49 = vld [vmem:[#allocation3 + $0x128] sm:$0xff]  ;;  %v18237_v56 = vld [vmem:[#allocation3 + $0x31] sm:$0xff] }
 0x505   : > { %6483 = vst.msk [vmem:[#allocation3 + $0x148] sm:$0xff] %vm1596_vm14, %v6435_v33  ;;  %v6389_v37 = vmax.f32 %v14174_v36, 0.0  ;;  %v6245_v13 = vpop.f32.mrb[37].mxu0  ;;  %v17964_v30 = vld [vmem:[#allocation3 + $0x120] sm:$0xff]  ;;  %19606 = vst [vmem:[#allocation7_spill] sm:$0xff] %v17969_v49  ;;  %v1496_v36 = vld [vmem:[#allocation4 + $0x178] sm:$0xff] }
 0x506   : > { %19605 = vst [vmem:[#allocation6_spill] sm:$0xff] %v17964_v30  ;;  %6482 = vst.msk [vmem:[#allocation3 + $0x140] sm:$0xff] %vm1596_vm14, %v6434_v6  ;;  %v6388_v47 = vmax.f32 %v6245_v13, 0.0  ;;  %14241 = vmatmul.mubr.msk.f32.gmra.mrb[32].mxu1 %vm1596_vm14, %v17964_v30  ;;  %v1495_v13 = vld [vmem:[#allocation4 + $0x170] sm:$0xff]  ;;  %v7501_v30 = vld [vmem:[#allocation3 + $0x29] sm:$0xff] }
 0x507   : > { %v6437_v1 = vmul.f32 %v6389_v37, %v1486_v35  ;;  %14243 = vmatprep.mubr.msk.f32.mxu1 %vm1596_vm14, %v17969_v49  ;;  %v18229_v49 = vld [vmem:[%s15924_s6 + $0x10] sm:$0xf]  ;;  %19623 = vst [vmem:[#allocation24_spill] sm:$0xff] %v18237_v56 }
 0x508   : > { %v6436_v10 = vmul.f32 %v6388_v47, %v1485_v39  ;;  %v14177_v32 = vpop.f32.mrb[38].mxu0  ;;  %v17979_v9 = vld [vmem:[#allocation3 + $0x138] sm:$0xff] }
 0x509   : > { %6485 = vst.msk [vmem:[#allocation3 + $0x158] sm:$0xff] %vm1596_vm14, %v6437_v1  ;;  %v6391_v53 = vmax.f32 %v14177_v32, 0.0  ;;  %v6255_v63 = vpop.f32.mrb[39].mxu0  ;;  %v17974_v41 = vld [vmem:[#allocation3 + $0x130] sm:$0xff]  ;;  %19608 = vst [vmem:[#allocation9_spill] sm:$0xff] %v17979_v9 }
 0x50a   : > { %19607 = vst [vmem:[#allocation8_spill] sm:$0xff] %v17974_v41  ;;  %6484 = vst.msk [vmem:[#allocation3 + $0x150] sm:$0xff] %vm1596_vm14, %v6436_v10  ;;  %v6390_v26 = vmax.f32 %v6255_v63, 0.0  ;;  %14244 = vmatmul.mubr.msk.f32.gmra.mrb[34].mxu1 %vm1596_vm14, %v17974_v41  ;;  %v7500_v41 = vld [vmem:[#allocation3 + $0x21] sm:$0xff] }
 0x50b   : > { %v6439_v7 = vmul.f32 %v6391_v53, %v1488_v25  ;;  %14246 = vmatprep.mubr.msk.f32.mxu1 %vm1596_vm14, %v17979_v9 }
 0x50c   : > { %v6438_v42 = vmul.f32 %v6390_v26, %v1487_v55  ;;  %v14180_v2 = vpop.f32.mrb[40].mxu0  ;;  %v17989_v58 = vld [vmem:[#allocation3 + $0x148] sm:$0xff]  ;;  %v6496_v26 = vld [vmem:[#allocation3 + $0x17] sm:$0xff] }
 0x50d   : > { %6487 = vst.msk [vmem:[#allocation3 + $0x168] sm:$0xff] %vm1596_vm14, %v6439_v7  ;;  %v6393_v4 = vmax.f32 %v14180_v2, 0.0  ;;  %v6265_v54 = vpop.f32.mrb[41].mxu0  ;;  %v17984_v46 = vld [vmem:[#allocation3 + $0x140] sm:$0xff]  ;;  %19610 = vst [vmem:[#allocation11_spill] sm:$0xff] %v17989_v58 }
 0x50e   : > { %19609 = vst [vmem:[#allocation10_spill] sm:$0xff] %v17984_v46  ;;  %6486 = vst.msk [vmem:[#allocation3 + $0x160] sm:$0xff] %vm1596_vm14, %v6438_v42  ;;  %v6392_v57 = vmax.f32 %v6265_v54, 0.0  ;;  %14247 = vmatmul.mubr.msk.f32.gmra.mrb[36].mxu1 %vm1596_vm14, %v17984_v46  ;;  %v6497_v42 = vld [vmem:[#allocation3 + $0x1f] sm:$0xff] }
 0x50f   : > { %v6441_v59 = vmul.f32 %v6393_v4, %v1490_v43  ;;  %14249 = vmatprep.mubr.msk.f32.mxu1 %vm1596_vm14, %v17989_v58  ;;  %v6498_v43 = vld [vmem:[#allocation3 + $0x27] sm:$0xff]  ;;  %v18039_v2 = vld [vmem:[%s15924_s6 + $0xc] sm:$0xf]  ;;  %v18047_v4 = vld [vmem:[#allocation3 + $0x2f] sm:$0xff] }
 0x510   : > { %v6440_v60 = vmul.f32 %v6392_v57, %v1489_v0  ;;  %v14183_v5 = vpop.f32.mrb[42].mxu0  ;;  %v17999_v38 = vld [vmem:[#allocation3 + $0x158] sm:$0xff]  ;;  %v18063_v57 = vld [vmem:[#allocation3 + $0x4f] sm:$0xff] }
 0x511   : > { %6489 = vst.msk [vmem:[#allocation3 + $0x178] sm:$0xff] %vm1596_vm14, %v6441_v59  ;;  %v6395_v16 = vmax.f32 %v14183_v5, 0.0  ;;  %v6275_v14 = vpop.f32.mrb[43].mxu0  ;;  %v17994_v12 = vld [vmem:[#allocation3 + $0x150] sm:$0xff]  ;;  %19612 = vst [vmem:[#allocation13_spill] sm:$0xff] %v17999_v38  ;;  %v18055_v54 = vld [vmem:[#allocation3 + $0x3f] sm:$0xff] }
 0x512   : > { %19611 = vst [vmem:[#allocation12_spill] sm:$0xff] %v17994_v12  ;;  %6488 = vst.msk [vmem:[#allocation3 + $0x170] sm:$0xff] %vm1596_vm14, %v6440_v60  ;;  %v6394_v17 = vmax.f32 %v6275_v14, 0.0  ;;  %14250 = vmatmul.mubr.msk.f32.gmra.mrb[38].mxu1 %vm1596_vm14, %v17994_v12  ;;  %v18051_v0 = vld [vmem:[#allocation3 + $0x37] sm:$0xff]  ;;  %v18071_v60 = vld [vmem:[#allocation3 + $0x5f] sm:$0xff] }
 0x513   : > { %v6443_v11 = vmul.f32 %v6395_v16, %v1492_v61  ;;  %14252 = vmatprep.mubr.msk.f32.mxu1 %vm1596_vm14, %v17999_v38  ;;  %v18067_v59 = vld [vmem:[#allocation3 + $0x57] sm:$0xff]  ;;  %v18075_v61 = vld [vmem:[#allocation3 + $0x67] sm:$0xff]  ;;  %v18079_v5 = vld [vmem:[#allocation3 + $0x6f] sm:$0xff] }
 0x514   : > { %v6442_v21 = vmul.f32 %v6394_v17, %v1491_v15  ;;  %v14186_v50 = vpop.f32.mrb[44].mxu0  ;;  %v18009_v33 = vld [vmem:[#allocation3 + $0x168] sm:$0xff]  ;;  %v18083_v16 = vld [vmem:[#allocation3 + $0x77] sm:$0xff]  ;;  %v18087_v15 = vld [vmem:[#allocation3 + $0x7f] sm:$0xff] }
 0x515   : > { %6491 = vst.msk [vmem:[#allocation3 + $0x188] sm:$0xff] %vm1596_vm14, %v6443_v11  ;;  %v6397_v23 = vmax.f32 %v14186_v50, 0.0  ;;  %v6285_v28 = vpop.f32.mrb[45].mxu0  ;;  %v18004_v29 = vld [vmem:[#allocation3 + $0x160] sm:$0xff]  ;;  %19614 = vst [vmem:[#allocation15_spill] sm:$0xff] %v18009_v33  ;;  %v18095_v17 = vld [vmem:[#allocation3 + $0x8f] sm:$0xff] }
 0x516   : > { %19613 = vst [vmem:[#allocation14_spill] sm:$0xff] %v18004_v29  ;;  %6490 = vst.msk [vmem:[#allocation3 + $0x180] sm:$0xff] %vm1596_vm14, %v6442_v21  ;;  %v6396_v24 = vmax.f32 %v6285_v28, 0.0  ;;  %14253 = vmatmul.mubr.msk.f32.gmra.mrb[40].mxu1 %vm1596_vm14, %v18004_v29  ;;  %v18091_v14 = vld [vmem:[#allocation3 + $0x87] sm:$0xff]  ;;  %v18099_v11 = vld [vmem:[#allocation3 + $0x97] sm:$0xff] }
 0x517   : > { %v6445_v6 = vmul.f32 %v6397_v23, %v1494_v22  ;;  %14255 = vmatprep.mubr.msk.f32.mxu1 %vm1596_vm14, %v18009_v33  ;;  %v18103_v21 = vld [vmem:[#allocation3 + $0x9f] sm:$0xff]  ;;  %v18107_v22 = vld [vmem:[#allocation3 + $0xa7] sm:$0xff]  ;;  %v18111_v50 = vld [vmem:[#allocation3 + $0xaf] sm:$0xff] }
 0x518   : > { %v6444_v35 = vmul.f32 %v6396_v24, %v1493_v27  ;;  %v14189_v37 = vpop.f32.mrb[46].mxu0  ;;  %v18019_v25 = vld [vmem:[#allocation3 + $0x178] sm:$0xff]  ;;  %v18123_v28 = vld [vmem:[#allocation3 + $0xc7] sm:$0xff]  ;;  %v18127_v24 = vld [vmem:[#allocation3 + $0xcf] sm:$0xff] }
 0x519   : > { %6493 = vst.msk [vmem:[#allocation3 + $0x198] sm:$0xff] %vm1596_vm14, %v6445_v6  ;;  %v6399_v39 = vmax.f32 %v14189_v37, 0.0  ;;  %v6295_v47 = vpop.f32.mrb[47].mxu0  ;;  %v18014_v1 = vld [vmem:[#allocation3 + $0x170] sm:$0xff]  ;;  %19616 = vst [vmem:[#allocation17_spill] sm:$0xff] %v18019_v25  ;;  %v18119_v27 = vld [vmem:[#allocation3 + $0xbf] sm:$0xff] }
 0x51a   : > { %19615 = vst [vmem:[#allocation16_spill] sm:$0xff] %v18014_v1  ;;  %6492 = vst.msk [vmem:[#allocation3 + $0x190] sm:$0xff] %vm1596_vm14, %v6444_v35  ;;  %v6398_v10 = vmax.f32 %v6295_v47, 0.0  ;;  %14256 = vmatmul.mubr.msk.f32.gmra.mrb[42].mxu1 %vm1596_vm14, %v18014_v1  ;;  %v18115_v23 = vld [vmem:[#allocation3 + $0xb7] sm:$0xff]  ;;  %v18135_v35 = vld [vmem:[#allocation3 + $0xdf] sm:$0xff] }
 0x51b   : > { %v6447_v32 = vmul.f32 %v6399_v39, %v1496_v36  ;;  %14258 = vmatprep.mubr.msk.f32.mxu1 %vm1596_vm14, %v18019_v25  ;;  %v18131_v6 = vld [vmem:[#allocation3 + $0xd7] sm:$0xff]  ;;  %v18139_v36 = vld [vmem:[#allocation3 + $0xe7] sm:$0xff]  ;;  %v18143_v37 = vld [vmem:[#allocation3 + $0xef] sm:$0xff] }
 0x51c   : > { %v6446_v53 = vmul.f32 %v6398_v10, %v1495_v13  ;;  %v18029_v63 = vld [vmem:[#allocation3 + $0x188] sm:$0xff]  ;;  %v18147_v39 = vld [vmem:[#allocation3 + $0xf7] sm:$0xff]  ;;  %v18151_v13 = vld [vmem:[#allocation3 + $0xff] sm:$0xff] }
 0x51d   : > { %6495 = vst.msk [vmem:[#allocation3 + $0x1a8] sm:$0xff] %vm1596_vm14, %v6447_v32  ;;  %v18024_v55 = vld [vmem:[#allocation3 + $0x180] sm:$0xff]  ;;  %19618 = vst [vmem:[#allocation19_spill] sm:$0xff] %v18029_v63  ;;  %v18159_v10 = vld [vmem:[#allocation3 + $0x10f] sm:$0xff] }
 0x51e   : > { %19617 = vst [vmem:[#allocation18_spill] sm:$0xff] %v18024_v55  ;;  %6494 = vst.msk [vmem:[#allocation3 + $0x1a0] sm:$0xff] %vm1596_vm14, %v6446_v53  ;;  %14259 = vmatmul.mubr.msk.f32.gmra.mrb[44].mxu1 %vm1596_vm14, %v18024_v55  ;;  %v18155_v47 = vld [vmem:[#allocation3 + $0x107] sm:$0xff]  ;;  %v18163_v32 = vld [vmem:[#allocation3 + $0x117] sm:$0xff] }
 0x51f   : > { %14261 = vmatprep.mubr.msk.f32.mxu1 %vm1596_vm14, %v18029_v63  ;;  %v18167_v53 = vld [vmem:[#allocation3 + $0x11f] sm:$0xff]  ;;  %v18187_v63 = vld [vmem:[#allocation3 + $0x147] sm:$0xff]  ;;  %v18191_v55 = vld [vmem:[#allocation3 + $0x14f] sm:$0xff] }
 0x520   : > { %v18195_v25 = vld [vmem:[#allocation3 + $0x157] sm:$0xff]  ;;  %v18199_v1 = vld [vmem:[#allocation3 + $0x15f] sm:$0xff]  ;;  %v18203_v33 = vld [vmem:[#allocation3 + $0x167] sm:$0xff] }
 0x521   : > { %v18033_v7 = vld [vmem:[#allocation3 + $0x190] sm:$0xff]  ;;  %v18215_v12 = vld [vmem:[#allocation3 + $0x17f] sm:$0xff]  ;;  %v18219_v58 = vld [vmem:[#allocation3 + $0x187] sm:$0xff] }
 0x522   : > { %19619 = vst [vmem:[#allocation20_spill] sm:$0xff] %v18033_v7  ;;  %14262 = vmatmul.mubr.msk.f32.gmra.mrb[46].mxu1 %vm1596_vm14, %v18033_v7  ;;  %v18183_v7 = vld [vmem:[#allocation3 + $0x13f] sm:$0xff]  ;;  %v18207_v29 = vld [vmem:[#allocation3 + $0x16f] sm:$0xff]  ;;  %v18211_v38 = vld [vmem:[#allocation3 + $0x177] sm:$0xff] }
 0x523   : > { %14266 = vmatprep.mubr.msk.f32.mxu1 %vm1596_vm14, %v6496_v26  ;;  %v18171_v26 = vld [vmem:[#allocation3 + $0x127] sm:$0xff]  ;;  %19620 = vst [vmem:[#allocation21_spill] sm:$0xff] %v18215_v12  ;;  %19621 = vst [vmem:[#allocation22_spill] sm:$0xff] %v18219_v58  ;;  %v7499_v46 = vld [vmem:[#allocation3 + $0x19] sm:$0xff] }
 0x524   : > { %v18223_v9 = vld [vmem:[#allocation3 + $0x18f] sm:$0xff] }
 0x525   : > { %19622 = vst [vmem:[#allocation23_spill] sm:$0xff] %v18223_v9 }
 0x526   : > { %14267 = vmatmul.mubr.msk.f32.vlgmr.msra.gmra.mrb[0].mxu1 %vm1596_vm14, %v6497_v42  ;;  %v18175_v42 = vld [vmem:[#allocation3 + $0x12f] sm:$0xff] }
 0x527   : > { %14339 = vmatpush3.msk.msra.mxu1 %vm1741_vm13, %v17853_v51  ;;  %14269 = vmatprep.mubr.msk.f32.mxu1 %vm1596_vm14, %v6498_v43  ;;  %v18059_v51 = vld [vmem:[#allocation3 + $0x47] sm:$0xff]  ;;  %v18179_v43 = vld [vmem:[#allocation3 + $0x137] sm:$0xff] }
 0x528   : > { %14412 = vmatprep.subr.msk.mxu1 %vm1741_vm13, %v18039_v2 }
 0x52a   : > { %14270 = vmatmul.mubr.msk.f32.gmra.mrb[2].mxu1 %vm1596_vm14, %v18047_v4 }
 0x52b   : > { %14272 = vmatprep.mubr.msk.f32.mxu1 %vm1596_vm14, %v18051_v0 }
 0x52e   : > { %14273 = vmatmul.mubr.msk.f32.gmra.mrb[4].mxu1 %vm1596_vm14, %v18055_v54 }
 0x52f   : > { %14275 = vmatprep.mubr.msk.f32.mxu1 %vm1596_vm14, %v18059_v51 }
 0x532   : > { %14276 = vmatmul.mubr.msk.f32.gmra.mrb[6].mxu1 %vm1596_vm14, %v18063_v57 }
 0x533   : > { %14278 = vmatprep.mubr.msk.f32.mxu1 %vm1596_vm14, %v18067_v59 }
 0x536   : > { %14279 = vmatmul.mubr.msk.f32.gmra.mrb[8].mxu1 %vm1596_vm14, %v18071_v60 }
 0x537   : > { %14281 = vmatprep.mubr.msk.f32.mxu1 %vm1596_vm14, %v18075_v61 }
 0x53a   : > { %14282 = vmatmul.mubr.msk.f32.gmra.mrb[10].mxu1 %vm1596_vm14, %v18079_v5 }
 0x53b   : > { %14284 = vmatprep.mubr.msk.f32.mxu1 %vm1596_vm14, %v18083_v16 }
 0x53e   : > { %14285 = vmatmul.mubr.msk.f32.gmra.mrb[12].mxu1 %vm1596_vm14, %v18087_v15 }
 0x53f   : > { %14287 = vmatprep.mubr.msk.f32.mxu1 %vm1596_vm14, %v18091_v14 }
 0x542   : > { %14288 = vmatmul.mubr.msk.f32.gmra.mrb[14].mxu1 %vm1596_vm14, %v18095_v17 }
 0x543   : > { %14290 = vmatprep.mubr.msk.f32.mxu1 %vm1596_vm14, %v18099_v11 }
 0x546   : > { %14291 = vmatmul.mubr.msk.f32.gmra.mrb[16].mxu1 %vm1596_vm14, %v18103_v21 }
 0x547   : > { %14293 = vmatprep.mubr.msk.f32.mxu1 %vm1596_vm14, %v18107_v22 }
 0x54a   : > { %14294 = vmatmul.mubr.msk.f32.gmra.mrb[18].mxu1 %vm1596_vm14, %v18111_v50 }
 0x54b   : > { %14296 = vmatprep.mubr.msk.f32.mxu1 %vm1596_vm14, %v18115_v23 }
 0x54e   : > { %14297 = vmatmul.mubr.msk.f32.gmra.mrb[20].mxu1 %vm1596_vm14, %v18119_v27 }
 0x54f   : > { %14299 = vmatprep.mubr.msk.f32.mxu1 %vm1596_vm14, %v18123_v28 }
 0x552   : > { %14300 = vmatmul.mubr.msk.f32.gmra.mrb[22].mxu1 %vm1596_vm14, %v18127_v24 }
 0x553   : > { %14302 = vmatprep.mubr.msk.f32.mxu1 %vm1596_vm14, %v18131_v6 }
 0x556   : > { %14303 = vmatmul.mubr.msk.f32.gmra.mrb[24].mxu1 %vm1596_vm14, %v18135_v35 }
 0x557   : > { %14305 = vmatprep.mubr.msk.f32.mxu1 %vm1596_vm14, %v18139_v36 }
 0x55a   : > { %14306 = vmatmul.mubr.msk.f32.gmra.mrb[26].mxu1 %vm1596_vm14, %v18143_v37 }
 0x55b   : > { %14308 = vmatprep.mubr.msk.f32.mxu1 %vm1596_vm14, %v18147_v39 }
 0x55e   : > { %14309 = vmatmul.mubr.msk.f32.gmra.mrb[28].mxu1 %vm1596_vm14, %v18151_v13 }
 0x55f   : > { %14311 = vmatprep.mubr.msk.f32.mxu1 %vm1596_vm14, %v18155_v47 }
 0x562   : > { %14312 = vmatmul.mubr.msk.f32.gmra.mrb[30].mxu1 %vm1596_vm14, %v18159_v10 }
 0x563   : > { %14314 = vmatprep.mubr.msk.f32.mxu1 %vm1596_vm14, %v18163_v32 }
 0x566   : > { %14315 = vmatmul.mubr.msk.f32.gmra.mrb[32].mxu1 %vm1596_vm14, %v18167_v53 }
 0x567   : > { %14317 = vmatprep.mubr.msk.f32.mxu1 %vm1596_vm14, %v18171_v26 }
 0x56a   : > { %14318 = vmatmul.mubr.msk.f32.gmra.mrb[34].mxu1 %vm1596_vm14, %v18175_v42 }
 0x56b   : > { %14320 = vmatprep.mubr.msk.f32.mxu1 %vm1596_vm14, %v18179_v43 }
 0x56e   : > { %14321 = vmatmul.mubr.msk.f32.gmra.mrb[36].mxu1 %vm1596_vm14, %v18183_v7 }
 0x56f   : > { %14323 = vmatprep.mubr.msk.f32.mxu1 %vm1596_vm14, %v18187_v63 }
 0x572   : > { %14324 = vmatmul.mubr.msk.f32.gmra.mrb[38].mxu1 %vm1596_vm14, %v18191_v55 }
 0x573   : > { %14326 = vmatprep.mubr.msk.f32.mxu1 %vm1596_vm14, %v18195_v25 }
 0x576   : > { %14327 = vmatmul.mubr.msk.f32.gmra.mrb[40].mxu1 %vm1596_vm14, %v18199_v1 }
 0x577   : > { %14329 = vmatprep.mubr.msk.f32.mxu1 %vm1596_vm14, %v18203_v33 }
 0x57a   : > { %14330 = vmatmul.mubr.msk.f32.gmra.mrb[42].mxu1 %vm1596_vm14, %v18207_v29 }
 0x57b   : > { %14332 = vmatprep.mubr.msk.f32.mxu1 %vm1596_vm14, %v18211_v38 }
 0x57e   : > { %14333 = vmatmul.mubr.msk.f32.gmra.mrb[44].mxu1 %vm1596_vm14, %v18215_v12 }
 0x57f   : > { %14335 = vmatprep.mubr.msk.f32.mxu1 %vm1596_vm14, %v18219_v58 }
 0x582   : > { %14336 = vmatmul.mubr.msk.f32.gmra.mrb[46].mxu1 %vm1596_vm14, %v18223_v9 }
 0x583   : > { %14340 = vmatprep.mubr.msk.f32.mxu1 %vm1596_vm14, %v7499_v46  ;;  %v18241_v46 = vld [vmem:[#allocation3 + $0x39] sm:$0xff] }
 0x584   : > { %19624 = vst [vmem:[#allocation25_spill] sm:$0xff] %v18241_v46 }
 0x586   : > { %14341 = vmatmul.mubr.msk.f32.vlgmr.msra.gmra.mrb[0].mxu1 %vm1596_vm14, %v7500_v41  ;;  %v18245_v41 = vld [vmem:[#allocation3 + $0x41] sm:$0xff] }
 0x587   : > { %14343 = vmatprep.mubr.msk.f32.mxu1 %vm1596_vm14, %v7501_v30  ;;  %14413 = vmatpush3.msk.msra.mxu1 %vm1741_vm13, %v18039_v2  ;;  %19625 = vst [vmem:[#allocation26_spill] sm:$0xff] %v18245_v41  ;;  %v18249_v30 = vld [vmem:[#allocation3 + $0x49] sm:$0xff]  ;;  %v18253_v2 = vld [vmem:[#allocation3 + $0x51] sm:$0xff] }
 0x588   : > { %14486 = vmatprep.subr.msk.mxu1 %vm1741_vm13, %v18229_v49  ;;  %19626 = vst [vmem:[#allocation27_spill] sm:$0xff] %v18249_v30  ;;  %19627 = vst [vmem:[#allocation28_spill] sm:$0xff] %v18253_v2 }
 0x58a   : > { %14344 = vmatmul.mubr.msk.f32.gmra.mrb[2].mxu1 %vm1596_vm14, %v18237_v56  ;;  %v18257_v56 = vld [vmem:[#allocation3 + $0x59] sm:$0xff] }
 0x58b   : > { %14346 = vmatprep.mubr.msk.f32.mxu1 %vm1596_vm14, %v18241_v46  ;;  %19628 = vst [vmem:[#allocation29_spill] sm:$0xff] %v18257_v56  ;;  %v18261_v46 = vld [vmem:[#allocation3 + $0x61] sm:$0xff] }
 0x58c   : > { %19629 = vst [vmem:[#allocation30_spill] sm:$0xff] %v18261_v46 }
 0x58e   : > { %14347 = vmatmul.mubr.msk.f32.gmra.mrb[4].mxu1 %vm1596_vm14, %v18245_v41  ;;  %v18265_v41 = vld [vmem:[#allocation3 + $0x69] sm:$0xff] }
 0x58f   : > { %14349 = vmatprep.mubr.msk.f32.mxu1 %vm1596_vm14, %v18249_v30  ;;  %19630 = vst [vmem:[#allocation31_spill] sm:$0xff] %v18265_v41  ;;  %v18269_v30 = vld [vmem:[#allocation3 + $0x71] sm:$0xff] }
 0x590   : > { %19631 = vst [vmem:[#allocation32_spill] sm:$0xff] %v18269_v30 }
 0x592   : > { %14350 = vmatmul.mubr.msk.f32.gmra.mrb[6].mxu1 %vm1596_vm14, %v18253_v2  ;;  %v18273_v2 = vld [vmem:[#allocation3 + $0x79] sm:$0xff] }
 0x593   : > { %14352 = vmatprep.mubr.msk.f32.mxu1 %vm1596_vm14, %v18257_v56  ;;  %19632 = vst [vmem:[#allocation33_spill] sm:$0xff] %v18273_v2  ;;  %v18277_v56 = vld [vmem:[#allocation3 + $0x81] sm:$0xff] }
 0x594   : > { %19633 = vst [vmem:[#allocation34_spill] sm:$0xff] %v18277_v56 }
 0x596   : > { %14353 = vmatmul.mubr.msk.f32.gmra.mrb[8].mxu1 %vm1596_vm14, %v18261_v46  ;;  %v18281_v46 = vld [vmem:[#allocation3 + $0x89] sm:$0xff] }
 0x597   : > { %14355 = vmatprep.mubr.msk.f32.mxu1 %vm1596_vm14, %v18265_v41  ;;  %19634 = vst [vmem:[#allocation35_spill] sm:$0xff] %v18281_v46  ;;  %v18285_v41 = vld [vmem:[#allocation3 + $0x91] sm:$0xff] }
 0x598   : > { %19635 = vst [vmem:[#allocation36_spill] sm:$0xff] %v18285_v41 }
 0x59a   : > { %14356 = vmatmul.mubr.msk.f32.gmra.mrb[10].mxu1 %vm1596_vm14, %v18269_v30  ;;  %v18289_v30 = vld [vmem:[#allocation3 + $0x99] sm:$0xff] }
 0x59b   : > { %14358 = vmatprep.mubr.msk.f32.mxu1 %vm1596_vm14, %v18273_v2  ;;  %19636 = vst [vmem:[#allocation37_spill] sm:$0xff] %v18289_v30  ;;  %v18293_v2 = vld [vmem:[#allocation3 + $0xa1] sm:$0xff] }
 0x59c   : > { %19637 = vst [vmem:[#allocation38_spill] sm:$0xff] %v18293_v2 }
 0x59e   : > { %14359 = vmatmul.mubr.msk.f32.gmra.mrb[12].mxu1 %vm1596_vm14, %v18277_v56  ;;  %v18297_v56 = vld [vmem:[#allocation3 + $0xa9] sm:$0xff] }
 0x59f   : > { %14361 = vmatprep.mubr.msk.f32.mxu1 %vm1596_vm14, %v18281_v46  ;;  %19638 = vst [vmem:[#allocation39_spill] sm:$0xff] %v18297_v56  ;;  %v18301_v46 = vld [vmem:[#allocation3 + $0xb1] sm:$0xff] }
 0x5a0   : > { %19639 = vst [vmem:[#allocation40_spill] sm:$0xff] %v18301_v46 }
 0x5a2   : > { %14362 = vmatmul.mubr.msk.f32.gmra.mrb[14].mxu1 %vm1596_vm14, %v18285_v41  ;;  %v18305_v41 = vld [vmem:[#allocation3 + $0xb9] sm:$0xff] }
 0x5a3   : > { %14364 = vmatprep.mubr.msk.f32.mxu1 %vm1596_vm14, %v18289_v30  ;;  %19640 = vst [vmem:[#allocation41_spill] sm:$0xff] %v18305_v41  ;;  %v18309_v30 = vld [vmem:[#allocation3 + $0xc1] sm:$0xff] }
 0x5a4   : > { %19641 = vst [vmem:[#allocation42_spill] sm:$0xff] %v18309_v30 }
 0x5a6   : > { %14365 = vmatmul.mubr.msk.f32.gmra.mrb[16].mxu1 %vm1596_vm14, %v18293_v2  ;;  %v18313_v2 = vld [vmem:[#allocation3 + $0xc9] sm:$0xff] }
 0x5a7   : > { %14367 = vmatprep.mubr.msk.f32.mxu1 %vm1596_vm14, %v18297_v56  ;;  %19642 = vst [vmem:[#allocation43_spill] sm:$0xff] %v18313_v2  ;;  %v18317_v56 = vld [vmem:[#allocation3 + $0xd1] sm:$0xff] }
 0x5a8   : > { %19643 = vst [vmem:[#allocation44_spill] sm:$0xff] %v18317_v56 }
 0x5aa   : > { %14368 = vmatmul.mubr.msk.f32.gmra.mrb[18].mxu1 %vm1596_vm14, %v18301_v46  ;;  %v18321_v46 = vld [vmem:[#allocation3 + $0xd9] sm:$0xff] }
 0x5ab   : > { %14370 = vmatprep.mubr.msk.f32.mxu1 %vm1596_vm14, %v18305_v41  ;;  %19644 = vst [vmem:[#allocation45_spill] sm:$0xff] %v18321_v46  ;;  %v18325_v41 = vld [vmem:[#allocation3 + $0xe1] sm:$0xff] }
 0x5ac   : > { %19645 = vst [vmem:[#allocation46_spill] sm:$0xff] %v18325_v41 }
 0x5ae   : > { %14371 = vmatmul.mubr.msk.f32.gmra.mrb[20].mxu1 %vm1596_vm14, %v18309_v30  ;;  %v18329_v30 = vld [vmem:[#allocation3 + $0xe9] sm:$0xff] }
 0x5af   : > { %14373 = vmatprep.mubr.msk.f32.mxu1 %vm1596_vm14, %v18313_v2  ;;  %19646 = vst [vmem:[#allocation47_spill] sm:$0xff] %v18329_v30  ;;  %v18333_v2 = vld [vmem:[#allocation3 + $0xf1] sm:$0xff] }
 0x5b0   : > { %19647 = vst [vmem:[#allocation48_spill] sm:$0xff] %v18333_v2 }
 0x5b2   : > { %14374 = vmatmul.mubr.msk.f32.gmra.mrb[22].mxu1 %vm1596_vm14, %v18317_v56  ;;  %v18337_v56 = vld [vmem:[#allocation3 + $0xf9] sm:$0xff] }
 0x5b3   : > { %14376 = vmatprep.mubr.msk.f32.mxu1 %vm1596_vm14, %v18321_v46  ;;  %19648 = vst [vmem:[#allocation49_spill] sm:$0xff] %v18337_v56  ;;  %v18341_v46 = vld [vmem:[#allocation3 + $0x101] sm:$0xff] }
 0x5b4   : > { %19649 = vst [vmem:[#allocation50_spill] sm:$0xff] %v18341_v46 }
 0x5b6   : > { %14377 = vmatmul.mubr.msk.f32.gmra.mrb[24].mxu1 %vm1596_vm14, %v18325_v41  ;;  %v18345_v41 = vld [vmem:[#allocation3 + $0x109] sm:$0xff] }
 0x5b7   : > { %14379 = vmatprep.mubr.msk.f32.mxu1 %vm1596_vm14, %v18329_v30  ;;  %19650 = vst [vmem:[#allocation51_spill] sm:$0xff] %v18345_v41  ;;  %v18349_v30 = vld [vmem:[#allocation3 + $0x111] sm:$0xff] }
 0x5b8   : > { %19651 = vst [vmem:[#allocation52_spill] sm:$0xff] %v18349_v30 }
 0x5ba   : > { %14380 = vmatmul.mubr.msk.f32.gmra.mrb[26].mxu1 %vm1596_vm14, %v18333_v2  ;;  %v18353_v2 = vld [vmem:[#allocation3 + $0x119] sm:$0xff] }
 0x5bb   : > { %14382 = vmatprep.mubr.msk.f32.mxu1 %vm1596_vm14, %v18337_v56  ;;  %19652 = vst [vmem:[#allocation53_spill] sm:$0xff] %v18353_v2  ;;  %v18357_v56 = vld [vmem:[#allocation3 + $0x121] sm:$0xff] }
 0x5bc   : > { %19653 = vst [vmem:[#allocation54_spill] sm:$0xff] %v18357_v56 }
 0x5be   : > { %14383 = vmatmul.mubr.msk.f32.gmra.mrb[28].mxu1 %vm1596_vm14, %v18341_v46  ;;  %v18361_v46 = vld [vmem:[#allocation3 + $0x129] sm:$0xff] }
 0x5bf   : > { %14385 = vmatprep.mubr.msk.f32.mxu1 %vm1596_vm14, %v18345_v41  ;;  %19654 = vst [vmem:[#allocation55_spill] sm:$0xff] %v18361_v46  ;;  %v18365_v41 = vld [vmem:[#allocation3 + $0x131] sm:$0xff] }
 0x5c0   : > { %19655 = vst [vmem:[#allocation56_spill] sm:$0xff] %v18365_v41 }
 0x5c2   : > { %14386 = vmatmul.mubr.msk.f32.gmra.mrb[30].mxu1 %vm1596_vm14, %v18349_v30  ;;  %v18369_v30 = vld [vmem:[#allocation3 + $0x139] sm:$0xff] }
 0x5c3   : > { %14388 = vmatprep.mubr.msk.f32.mxu1 %vm1596_vm14, %v18353_v2  ;;  %19656 = vst [vmem:[#allocation57_spill] sm:$0xff] %v18369_v30  ;;  %v18373_v2 = vld [vmem:[#allocation3 + $0x141] sm:$0xff] }
 0x5c4   : > { %19657 = vst [vmem:[#allocation58_spill] sm:$0xff] %v18373_v2 }
 0x5c6   : > { %14389 = vmatmul.mubr.msk.f32.gmra.mrb[32].mxu1 %vm1596_vm14, %v18357_v56  ;;  %v18377_v56 = vld [vmem:[#allocation3 + $0x149] sm:$0xff] }
 0x5c7   : > { %14391 = vmatprep.mubr.msk.f32.mxu1 %vm1596_vm14, %v18361_v46  ;;  %19658 = vst [vmem:[#allocation59_spill] sm:$0xff] %v18377_v56  ;;  %v18381_v46 = vld [vmem:[#allocation3 + $0x151] sm:$0xff] }
 0x5c8   : > { %19659 = vst [vmem:[#allocation60_spill] sm:$0xff] %v18381_v46 }
 0x5ca   : > { %14392 = vmatmul.mubr.msk.f32.gmra.mrb[34].mxu1 %vm1596_vm14, %v18365_v41  ;;  %v18385_v41 = vld [vmem:[#allocation3 + $0x159] sm:$0xff] }
 0x5cb   : > { %14394 = vmatprep.mubr.msk.f32.mxu1 %vm1596_vm14, %v18369_v30  ;;  %19660 = vst [vmem:[#allocation61_spill] sm:$0xff] %v18385_v41  ;;  %v18389_v30 = vld [vmem:[#allocation3 + $0x161] sm:$0xff] }
 0x5cc   : > { %19661 = vst [vmem:[#allocation62_spill] sm:$0xff] %v18389_v30 }
 0x5ce   : > { %14395 = vmatmul.mubr.msk.f32.gmra.mrb[36].mxu1 %vm1596_vm14, %v18373_v2  ;;  %v18393_v2 = vld [vmem:[#allocation3 + $0x169] sm:$0xff] }
 0x5cf   : > { %14397 = vmatprep.mubr.msk.f32.mxu1 %vm1596_vm14, %v18377_v56  ;;  %19662 = vst [vmem:[#allocation63_spill] sm:$0xff] %v18393_v2  ;;  %v18397_v56 = vld [vmem:[#allocation3 + $0x171] sm:$0xff] }
 0x5d0   : > { %19663 = vst [vmem:[#allocation64_spill] sm:$0xff] %v18397_v56 }
 0x5d2   : > { %14398 = vmatmul.mubr.msk.f32.gmra.mrb[38].mxu1 %vm1596_vm14, %v18381_v46  ;;  %v18401_v46 = vld [vmem:[#allocation3 + $0x179] sm:$0xff] }
 0x5d3   : > { %14400 = vmatprep.mubr.msk.f32.mxu1 %vm1596_vm14, %v18385_v41  ;;  %v18405_v41 = vld [vmem:[#allocation3 + $0x181] sm:$0xff] }
 0x5d6   : > { %14401 = vmatmul.mubr.msk.f32.gmra.mrb[40].mxu1 %vm1596_vm14, %v18389_v30  ;;  %v18409_v30 = vld [vmem:[#allocation3 + $0x189] sm:$0xff] }
 0x5d7   : > { %14403 = vmatprep.mubr.msk.f32.mxu1 %vm1596_vm14, %v18393_v2  ;;  %v18413_v2 = vld [vmem:[#allocation3 + $0x191] sm:$0xff] }
 0x5da   : > { %14404 = vmatmul.mubr.msk.f32.gmra.mrb[42].mxu1 %vm1596_vm14, %v18397_v56  ;;  %v12439_v56 = vld [vmem:[%s15924_s6 + $0x14] sm:$0xf] }
 0x5db   : > { %14406 = vmatprep.mubr.msk.f32.mxu1 %vm1596_vm14, %v18401_v46 }
 0x5de   : > { %14407 = vmatmul.mubr.msk.f32.gmra.mrb[44].mxu1 %vm1596_vm14, %v18405_v41 }
 0x5df   : > { %14409 = vmatprep.mubr.msk.f32.mxu1 %vm1596_vm14, %v18409_v30 }
 0x5e2   : > { %14410 = vmatmul.mubr.msk.f32.gmra.mrb[46].mxu1 %vm1596_vm14, %v18413_v2 }
 0x5e3   : > { %14414 = vmatprep.mubr.msk.f32.mxu1 %vm1596_vm14, %v18047_v4  ;;  %v18515_v4 = vld [vmem:[#allocation3 + $0x19f] sm:$0xff] }
 0x5e4   : > { %19664 = vst [vmem:[#allocation65_spill] sm:$0xff] %v18515_v4 }
 0x5e6   : > { %14415 = vmatmul.mubr.msk.f32.vlgmr.msra.gmra.mrb[0].mxu1 %vm1596_vm14, %v18051_v0  ;;  %v18519_v0 = vld [vmem:[#allocation3 + $0x1a7] sm:$0xff] }
 0x5e7   : > { %14417 = vmatprep.mubr.msk.f32.mxu1 %vm1596_vm14, %v18055_v54  ;;  %14487 = vmatpush3.msk.msra.mxu1 %vm1741_vm13, %v18229_v49  ;;  %v18511_v49 = vld [vmem:[#allocation3 + $0x197] sm:$0xff]  ;;  %19665 = vst [vmem:[#allocation66_spill] sm:$0xff] %v18519_v0 }
 0x5e8   : > { %14560 = vmatprep.subr.msk.mxu1 %vm1741_vm13, %v12439_v56  ;;  %v8599_v54 = vld [vmem:[#allocation3 + $0x30] sm:$0xff] }
 0x5ea   : > { %14418 = vmatmul.mubr.msk.f32.gmra.mrb[2].mxu1 %vm1596_vm14, %v18059_v51 }
 0x5eb   : > { %14420 = vmatprep.mubr.msk.f32.mxu1 %vm1596_vm14, %v18063_v57 }
 0x5ee   : > { %14421 = vmatmul.mubr.msk.f32.gmra.mrb[4].mxu1 %vm1596_vm14, %v18067_v59 }
 0x5ef   : > { %14423 = vmatprep.mubr.msk.f32.mxu1 %vm1596_vm14, %v18071_v60 }
 0x5f2   : > { %14424 = vmatmul.mubr.msk.f32.gmra.mrb[6].mxu1 %vm1596_vm14, %v18075_v61 }
 0x5f3   : > { %14426 = vmatprep.mubr.msk.f32.mxu1 %vm1596_vm14, %v18079_v5 }
 0x5f6   : > { %14427 = vmatmul.mubr.msk.f32.gmra.mrb[8].mxu1 %vm1596_vm14, %v18083_v16 }
 0x5f7   : > { %14429 = vmatprep.mubr.msk.f32.mxu1 %vm1596_vm14, %v18087_v15 }
 0x5fa   : > { %14430 = vmatmul.mubr.msk.f32.gmra.mrb[10].mxu1 %vm1596_vm14, %v18091_v14 }
 0x5fb   : > { %14432 = vmatprep.mubr.msk.f32.mxu1 %vm1596_vm14, %v18095_v17 }
 0x5fe   : > { %14433 = vmatmul.mubr.msk.f32.gmra.mrb[12].mxu1 %vm1596_vm14, %v18099_v11 }
 0x5ff   : > { %14435 = vmatprep.mubr.msk.f32.mxu1 %vm1596_vm14, %v18103_v21 }
 0x602   : > { %14436 = vmatmul.mubr.msk.f32.gmra.mrb[14].mxu1 %vm1596_vm14, %v18107_v22 }
 0x603   : > { %14438 = vmatprep.mubr.msk.f32.mxu1 %vm1596_vm14, %v18111_v50 }
 0x606   : > { %14439 = vmatmul.mubr.msk.f32.gmra.mrb[16].mxu1 %vm1596_vm14, %v18115_v23 }
 0x607   : > { %14441 = vmatprep.mubr.msk.f32.mxu1 %vm1596_vm14, %v18119_v27 }
 0x60a   : > { %14442 = vmatmul.mubr.msk.f32.gmra.mrb[18].mxu1 %vm1596_vm14, %v18123_v28 }
 0x60b   : > { %14444 = vmatprep.mubr.msk.f32.mxu1 %vm1596_vm14, %v18127_v24 }
 0x60e   : > { %14445 = vmatmul.mubr.msk.f32.gmra.mrb[20].mxu1 %vm1596_vm14, %v18131_v6 }
 0x60f   : > { %14447 = vmatprep.mubr.msk.f32.mxu1 %vm1596_vm14, %v18135_v35 }
 0x612   : > { %14448 = vmatmul.mubr.msk.f32.gmra.mrb[22].mxu1 %vm1596_vm14, %v18139_v36 }
 0x613   : > { %14450 = vmatprep.mubr.msk.f32.mxu1 %vm1596_vm14, %v18143_v37 }
 0x616   : > { %14451 = vmatmul.mubr.msk.f32.gmra.mrb[24].mxu1 %vm1596_vm14, %v18147_v39 }
 0x617   : > { %14453 = vmatprep.mubr.msk.f32.mxu1 %vm1596_vm14, %v18151_v13 }
 0x61a   : > { %14454 = vmatmul.mubr.msk.f32.gmra.mrb[26].mxu1 %vm1596_vm14, %v18155_v47 }
 0x61b   : > { %14456 = vmatprep.mubr.msk.f32.mxu1 %vm1596_vm14, %v18159_v10 }
 0x61e   : > { %14457 = vmatmul.mubr.msk.f32.gmra.mrb[28].mxu1 %vm1596_vm14, %v18163_v32 }
 0x61f   : > { %14459 = vmatprep.mubr.msk.f32.mxu1 %vm1596_vm14, %v18167_v53 }
 0x622   : > { %14460 = vmatmul.mubr.msk.f32.gmra.mrb[30].mxu1 %vm1596_vm14, %v18171_v26 }
 0x623   : > { %14462 = vmatprep.mubr.msk.f32.mxu1 %vm1596_vm14, %v18175_v42 }
 0x626   : > { %14463 = vmatmul.mubr.msk.f32.gmra.mrb[32].mxu1 %vm1596_vm14, %v18179_v43 }
 0x627   : > { %14465 = vmatprep.mubr.msk.f32.mxu1 %vm1596_vm14, %v18183_v7 }
 0x62a   : > { %14466 = vmatmul.mubr.msk.f32.gmra.mrb[34].mxu1 %vm1596_vm14, %v18187_v63 }
 0x62b   : > { %14468 = vmatprep.mubr.msk.f32.mxu1 %vm1596_vm14, %v18191_v55 }
 0x62e   : > { %14469 = vmatmul.mubr.msk.f32.gmra.mrb[36].mxu1 %vm1596_vm14, %v18195_v25 }
 0x62f   : > { %14471 = vmatprep.mubr.msk.f32.mxu1 %vm1596_vm14, %v18199_v1 }
 0x632   : > { %14472 = vmatmul.mubr.msk.f32.gmra.mrb[38].mxu1 %vm1596_vm14, %v18203_v33 }
 0x633   : > { %14474 = vmatprep.mubr.msk.f32.mxu1 %vm1596_vm14, %v18207_v29 }
 0x636   : > { %14475 = vmatmul.mubr.msk.f32.gmra.mrb[40].mxu1 %vm1596_vm14, %v18211_v38 }
 0x637   : > { %14477 = vmatprep.mubr.msk.f32.mxu1 %vm1596_vm14, %v18215_v12  ;;  %v8601_v12 = vld [vmem:[#allocation3 + $0x40] sm:$0xff] }
 0x63a   : > { %14478 = vmatmul.mubr.msk.f32.gmra.mrb[42].mxu1 %vm1596_vm14, %v18219_v58  ;;  %v8600_v58 = vld [vmem:[#allocation3 + $0x38] sm:$0xff] }
 0x63b   : > { %14480 = vmatprep.mubr.msk.f32.mxu1 %vm1596_vm14, %v18223_v9  ;;  %v18525_v9 = vld [vmem:[%s15924_s6 + $0x18] sm:$0xf] }
 0x63e   : > { %14481 = vmatmul.mubr.msk.f32.gmra.mrb[44].mxu1 %vm1596_vm14, %v18511_v49 }
 0x63f   : > { %14483 = vmatprep.mubr.msk.f32.mxu1 %vm1596_vm14, %v18515_v4  ;;  %v18532_v4 = vld [vmem:[#allocation3 + $0x48] sm:$0xff] }
 0x642   : > { %14484 = vmatmul.mubr.msk.f32.gmra.mrb[46].mxu1 %vm1596_vm14, %v18519_v0  ;;  %v18536_v0 = vld [vmem:[#allocation3 + $0x50] sm:$0xff] }
 0x643   : > { %14488 = vmatprep.mubr.msk.f32.mxu1 %vm1596_vm14, %v8599_v54  ;;  %19666 = vst [vmem:[#allocation67_spill] sm:$0xff] %v18536_v0  ;;  %v18540_v54 = vld [vmem:[#allocation3 + $0x58] sm:$0xff] }
 0x644   : > { %19667 = vst [vmem:[#allocation68_spill] sm:$0xff] %v18540_v54 }
 0x646   : > { %14489 = vmatmul.mubr.msk.f32.vlgmr.msra.gmra.mrb[0].mxu1 %vm1596_vm14, %v8600_v58  ;;  %v18544_v58 = vld [vmem:[#allocation3 + $0x60] sm:$0xff] }
 0x647   : > { %14491 = vmatprep.mubr.msk.f32.mxu1 %vm1596_vm14, %v8601_v12  ;;  %14561 = vmatpush3.msk.msra.mxu1 %vm1741_vm13, %v12439_v56  ;;  %19668 = vst [vmem:[#allocation69_spill] sm:$0xff] %v18544_v58  ;;  %v18548_v56 = vld [vmem:[#allocation3 + $0x68] sm:$0xff]  ;;  %v18552_v12 = vld [vmem:[#allocation3 + $0x70] sm:$0xff] }
 0x648   : > { %14634 = vmatprep.subr.msk.mxu1 %vm1741_vm13, %v18525_v9  ;;  %19669 = vst [vmem:[#allocation70_spill] sm:$0xff] %v18548_v56  ;;  %19670 = vst [vmem:[#allocation71_spill] sm:$0xff] %v18552_v12 }
 0x64a   : > { %14492 = vmatmul.mubr.msk.f32.gmra.mrb[2].mxu1 %vm1596_vm14, %v18532_v4 }
 0x64b   : > { %14494 = vmatprep.mubr.msk.f32.mxu1 %vm1596_vm14, %v18536_v0  ;;  %v18556_v0 = vld [vmem:[#allocation3 + $0x78] sm:$0xff] }
 0x64c   : > { %19671 = vst [vmem:[#allocation72_spill] sm:$0xff] %v18556_v0 }
 0x64e   : > { %14495 = vmatmul.mubr.msk.f32.gmra.mrb[4].mxu1 %vm1596_vm14, %v18540_v54  ;;  %v18560_v54 = vld [vmem:[#allocation3 + $0x80] sm:$0xff] }
 0x64f   : > { %14497 = vmatprep.mubr.msk.f32.mxu1 %vm1596_vm14, %v18544_v58  ;;  %19672 = vst [vmem:[#allocation73_spill] sm:$0xff] %v18560_v54  ;;  %v18564_v58 = vld [vmem:[#allocation3 + $0x88] sm:$0xff] }
 0x652   : > { %14498 = vmatmul.mubr.msk.f32.gmra.mrb[6].mxu1 %vm1596_vm14, %v18548_v56  ;;  %v18568_v56 = vld [vmem:[#allocation3 + $0x90] sm:$0xff] }
 0x653   : > { %14500 = vmatprep.mubr.msk.f32.mxu1 %vm1596_vm14, %v18552_v12  ;;  %v18572_v12 = vld [vmem:[#allocation3 + $0x98] sm:$0xff] }
 0x656   : > { %14501 = vmatmul.mubr.msk.f32.gmra.mrb[8].mxu1 %vm1596_vm14, %v18556_v0  ;;  %v18576_v0 = vld [vmem:[#allocation3 + $0xa0] sm:$0xff] }
 0x657   : > { %14503 = vmatprep.mubr.msk.f32.mxu1 %vm1596_vm14, %v18560_v54  ;;  %v18580_v54 = vld [vmem:[#allocation3 + $0xa8] sm:$0xff] }
 0x65a   : > { %14504 = vmatmul.mubr.msk.f32.gmra.mrb[10].mxu1 %vm1596_vm14, %v18564_v58 }
 0x65b   : > { %14506 = vmatprep.mubr.msk.f32.mxu1 %vm1596_vm14, %v18568_v56 }
 0x65e   : > { %14507 = vmatmul.mubr.msk.f32.gmra.mrb[12].mxu1 %vm1596_vm14, %v18572_v12 }
 0x65f   : > { %14509 = vmatprep.mubr.msk.f32.mxu1 %vm1596_vm14, %v18576_v0 }
 0x662   : > { %14510 = vmatmul.mubr.msk.f32.gmra.mrb[14].mxu1 %vm1596_vm14, %v18580_v54 }
 0x663   : > { %14512 = vmatprep.mubr.msk.f32.mxu1 %vm1596_vm14, %v17894_v31  ;;  %v19673_v31 = vld [vmem:[#allocation5_spill] sm:$0xff] }
 0x666   : > { %14513 = vmatmul.mubr.msk.f32.gmra.mrb[16].mxu1 %vm1596_vm14, %v17899_v34  ;;  %v19674_v34 = vld [vmem:[#allocation6_spill] sm:$0xff] }
 0x667   : > { %14515 = vmatprep.mubr.msk.f32.mxu1 %vm1596_vm14, %v17904_v44  ;;  %v19675_v44 = vld [vmem:[#allocation7_spill] sm:$0xff] }
 0x66a   : > { %14516 = vmatmul.mubr.msk.f32.gmra.mrb[18].mxu1 %vm1596_vm14, %v17909_v48  ;;  %v19676_v48 = vld [vmem:[#allocation8_spill] sm:$0xff] }
 0x66b   : > { %14518 = vmatprep.mubr.msk.f32.mxu1 %vm1596_vm14, %v17914_v52  ;;  %v19677_v52 = vld [vmem:[#allocation9_spill] sm:$0xff] }
 0x66e   : > { %14519 = vmatmul.mubr.msk.f32.gmra.mrb[20].mxu1 %vm1596_vm14, %v17919_v40  ;;  %v19678_v40 = vld [vmem:[#allocation10_spill] sm:$0xff] }
 0x66f   : > { %14521 = vmatprep.mubr.msk.f32.mxu1 %vm1596_vm14, %v17924_v8  ;;  %v19679_v8 = vld [vmem:[#allocation11_spill] sm:$0xff] }
 0x672   : > { %14522 = vmatmul.mubr.msk.f32.gmra.mrb[22].mxu1 %vm1596_vm14, %v17929_v62  ;;  %v19680_v62 = vld [vmem:[#allocation12_spill] sm:$0xff] }
 0x673   : > { %14524 = vmatprep.mubr.msk.f32.mxu1 %vm1596_vm14, %v17934_v45  ;;  %v19681_v45 = vld [vmem:[#allocation13_spill] sm:$0xff] }
 0x676   : > { %14525 = vmatmul.mubr.msk.f32.gmra.mrb[24].mxu1 %vm1596_vm14, %v17939_v3  ;;  %v19682_v3 = vld [vmem:[#allocation14_spill] sm:$0xff] }
 0x677   : > { %14527 = vmatprep.mubr.msk.f32.mxu1 %vm1596_vm14, %v17944_v18  ;;  %v19683_v18 = vld [vmem:[#allocation15_spill] sm:$0xff] }
 0x67a   : > { %14528 = vmatmul.mubr.msk.f32.gmra.mrb[26].mxu1 %vm1596_vm14, %v17949_v19  ;;  %v19684_v19 = vld [vmem:[#allocation16_spill] sm:$0xff] }
 0x67b   : > { %14530 = vmatprep.mubr.msk.f32.mxu1 %vm1596_vm14, %v17954_v20  ;;  %v19685_v20 = vld [vmem:[#allocation17_spill] sm:$0xff] }
 0x67e   : > { %14531 = vmatmul.mubr.msk.f32.gmra.mrb[28].mxu1 %vm1596_vm14, %v19673_v31  ;;  %v19686_v31 = vld [vmem:[#allocation18_spill] sm:$0xff] }
 0x67f   : > { %14533 = vmatprep.mubr.msk.f32.mxu1 %vm1596_vm14, %v19674_v34  ;;  %v19687_v34 = vld [vmem:[#allocation19_spill] sm:$0xff] }
 0x682   : > { %14534 = vmatmul.mubr.msk.f32.gmra.mrb[30].mxu1 %vm1596_vm14, %v19675_v44  ;;  %v19688_v44 = vld [vmem:[#allocation20_spill] sm:$0xff] }
 0x683   : > { %14536 = vmatprep.mubr.msk.f32.mxu1 %vm1596_vm14, %v19676_v48  ;;  %v18642_v48 = vld [vmem:[#allocation3 + $0x198] sm:$0xff] }
 0x686   : > { %14537 = vmatmul.mubr.msk.f32.gmra.mrb[32].mxu1 %vm1596_vm14, %v19677_v52  ;;  %v18646_v52 = vld [vmem:[#allocation3 + $0x1a0] sm:$0xff] }
 0x687   : > { %14539 = vmatprep.mubr.msk.f32.mxu1 %vm1596_vm14, %v19678_v40  ;;  %v18650_v40 = vld [vmem:[#allocation3 + $0x1a8] sm:$0xff] }
 0x68a   : > { %14540 = vmatmul.mubr.msk.f32.gmra.mrb[34].mxu1 %vm1596_vm14, %v19679_v8  ;;  %v19689_v8 = vld [vmem:[#allocation24_spill] sm:$0xff] }
 0x68b   : > { %14542 = vmatprep.mubr.msk.f32.mxu1 %vm1596_vm14, %v19680_v62  ;;  %v12539_v62 = vld [vmem:[%s15924_s6 + $0x1c] sm:$0xf] }
 0x68e   : > { %14543 = vmatmul.mubr.msk.f32.gmra.mrb[36].mxu1 %vm1596_vm14, %v19681_v45  ;;  %v19690_v45 = vld [vmem:[#allocation25_spill] sm:$0xff] }
 0x68f   : > { %14545 = vmatprep.mubr.msk.f32.mxu1 %vm1596_vm14, %v19682_v3  ;;  %v19691_v3 = vld [vmem:[#allocation26_spill] sm:$0xff] }
 0x692   : > { %14546 = vmatmul.mubr.msk.f32.gmra.mrb[38].mxu1 %vm1596_vm14, %v19683_v18  ;;  %v19692_v18 = vld [vmem:[#allocation27_spill] sm:$0xff] }
 0x693   : > { %14548 = vmatprep.mubr.msk.f32.mxu1 %vm1596_vm14, %v19684_v19  ;;  %v19693_v19 = vld [vmem:[#allocation28_spill] sm:$0xff] }
 0x696   : > { %14549 = vmatmul.mubr.msk.f32.gmra.mrb[40].mxu1 %vm1596_vm14, %v19685_v20  ;;  %v19694_v20 = vld [vmem:[#allocation29_spill] sm:$0xff] }
 0x697   : > { %14551 = vmatprep.mubr.msk.f32.mxu1 %vm1596_vm14, %v19686_v31  ;;  %v19695_v31 = vld [vmem:[#allocation30_spill] sm:$0xff] }
 0x69a   : > { %14552 = vmatmul.mubr.msk.f32.gmra.mrb[42].mxu1 %vm1596_vm14, %v19687_v34  ;;  %v19696_v34 = vld [vmem:[#allocation31_spill] sm:$0xff] }
 0x69b   : > { %14554 = vmatprep.mubr.msk.f32.mxu1 %vm1596_vm14, %v19688_v44  ;;  %v19697_v44 = vld [vmem:[#allocation32_spill] sm:$0xff] }
 0x69e   : > { %14555 = vmatmul.mubr.msk.f32.gmra.mrb[44].mxu1 %vm1596_vm14, %v18642_v48 }
 0x69f   : > { %14557 = vmatprep.mubr.msk.f32.mxu1 %vm1596_vm14, %v18646_v52 }
 0x6a2   : > { %14558 = vmatmul.mubr.msk.f32.gmra.mrb[46].mxu1 %vm1596_vm14, %v18650_v40 }
 0x6a3   : > { %14562 = vmatprep.mubr.msk.f32.mxu1 %vm1596_vm14, %v19689_v8  ;;  %v19699_v8 = vld [vmem:[#allocation34_spill] sm:$0xff] }
 0x6a6   : > { %14563 = vmatmul.mubr.msk.f32.vlgmr.msra.gmra.mrb[0].mxu1 %vm1596_vm14, %v19690_v45  ;;  %v19700_v45 = vld [vmem:[#allocation35_spill] sm:$0xff] }
 0x6a7   : > { %14565 = vmatprep.mubr.msk.f32.mxu1 %vm1596_vm14, %v19691_v3  ;;  %14635 = vmatpush3.msk.msra.mxu1 %vm1741_vm13, %v18525_v9  ;;  %v19698_v9 = vld [vmem:[#allocation33_spill] sm:$0xff]  ;;  %v19701_v3 = vld [vmem:[#allocation36_spill] sm:$0xff] }
 0x6a8   : > { %14708 = vmatprep.subr.msk.mxu1 %vm1741_vm13, %v12539_v62 }
 0x6aa   : > { %14566 = vmatmul.mubr.msk.f32.gmra.mrb[2].mxu1 %vm1596_vm14, %v19692_v18  ;;  %v19702_v18 = vld [vmem:[#allocation37_spill] sm:$0xff] }
 0x6ab   : > { %14568 = vmatprep.mubr.msk.f32.mxu1 %vm1596_vm14, %v19693_v19  ;;  %v19703_v19 = vld [vmem:[#allocation38_spill] sm:$0xff] }
 0x6ae   : > { %14569 = vmatmul.mubr.msk.f32.gmra.mrb[4].mxu1 %vm1596_vm14, %v19694_v20  ;;  %v19704_v20 = vld [vmem:[#allocation39_spill] sm:$0xff] }
 0x6af   : > { %14571 = vmatprep.mubr.msk.f32.mxu1 %vm1596_vm14, %v19695_v31  ;;  %v19705_v31 = vld [vmem:[#allocation40_spill] sm:$0xff] }
 0x6b2   : > { %14572 = vmatmul.mubr.msk.f32.gmra.mrb[6].mxu1 %vm1596_vm14, %v19696_v34  ;;  %v19706_v34 = vld [vmem:[#allocation41_spill] sm:$0xff] }
 0x6b3   : > { %14574 = vmatprep.mubr.msk.f32.mxu1 %vm1596_vm14, %v19697_v44  ;;  %v19707_v44 = vld [vmem:[#allocation42_spill] sm:$0xff] }
 0x6b6   : > { %14575 = vmatmul.mubr.msk.f32.gmra.mrb[8].mxu1 %vm1596_vm14, %v19698_v9  ;;  %v19708_v9 = vld [vmem:[#allocation43_spill] sm:$0xff] }
 0x6b7   : > { %14577 = vmatprep.mubr.msk.f32.mxu1 %vm1596_vm14, %v19699_v8  ;;  %v19709_v8 = vld [vmem:[#allocation44_spill] sm:$0xff] }
 0x6ba   : > { %14578 = vmatmul.mubr.msk.f32.gmra.mrb[10].mxu1 %vm1596_vm14, %v19700_v45  ;;  %v19710_v45 = vld [vmem:[#allocation45_spill] sm:$0xff] }
 0x6bb   : > { %14580 = vmatprep.mubr.msk.f32.mxu1 %vm1596_vm14, %v19701_v3  ;;  %v19711_v3 = vld [vmem:[#allocation46_spill] sm:$0xff] }
 0x6be   : > { %14581 = vmatmul.mubr.msk.f32.gmra.mrb[12].mxu1 %vm1596_vm14, %v19702_v18  ;;  %v19712_v18 = vld [vmem:[#allocation47_spill] sm:$0xff] }
 0x6bf   : > { %14583 = vmatprep.mubr.msk.f32.mxu1 %vm1596_vm14, %v19703_v19  ;;  %v19713_v19 = vld [vmem:[#allocation48_spill] sm:$0xff] }
 0x6c2   : > { %14584 = vmatmul.mubr.msk.f32.gmra.mrb[14].mxu1 %vm1596_vm14, %v19704_v20  ;;  %v19714_v20 = vld [vmem:[#allocation49_spill] sm:$0xff] }
 0x6c3   : > { %14586 = vmatprep.mubr.msk.f32.mxu1 %vm1596_vm14, %v19705_v31  ;;  %v19715_v31 = vld [vmem:[#allocation50_spill] sm:$0xff] }
 0x6c6   : > { %14587 = vmatmul.mubr.msk.f32.gmra.mrb[16].mxu1 %vm1596_vm14, %v19706_v34  ;;  %v19716_v34 = vld [vmem:[#allocation51_spill] sm:$0xff] }
 0x6c7   : > { %14589 = vmatprep.mubr.msk.f32.mxu1 %vm1596_vm14, %v19707_v44  ;;  %v19717_v44 = vld [vmem:[#allocation52_spill] sm:$0xff] }
 0x6ca   : > { %14590 = vmatmul.mubr.msk.f32.gmra.mrb[18].mxu1 %vm1596_vm14, %v19708_v9  ;;  %v19718_v9 = vld [vmem:[#allocation53_spill] sm:$0xff] }
 0x6cb   : > { %14592 = vmatprep.mubr.msk.f32.mxu1 %vm1596_vm14, %v19709_v8  ;;  %v19719_v8 = vld [vmem:[#allocation54_spill] sm:$0xff] }
 0x6ce   : > { %14593 = vmatmul.mubr.msk.f32.gmra.mrb[20].mxu1 %vm1596_vm14, %v19710_v45  ;;  %v19720_v45 = vld [vmem:[#allocation55_spill] sm:$0xff] }
 0x6cf   : > { %14595 = vmatprep.mubr.msk.f32.mxu1 %vm1596_vm14, %v19711_v3  ;;  %v19721_v3 = vld [vmem:[#allocation56_spill] sm:$0xff] }
 0x6d2   : > { %14596 = vmatmul.mubr.msk.f32.gmra.mrb[22].mxu1 %vm1596_vm14, %v19712_v18  ;;  %v19722_v18 = vld [vmem:[#allocation57_spill] sm:$0xff] }
 0x6d3   : > { %14598 = vmatprep.mubr.msk.f32.mxu1 %vm1596_vm14, %v19713_v19  ;;  %v19723_v19 = vld [vmem:[#allocation58_spill] sm:$0xff] }
 0x6d6   : > { %14599 = vmatmul.mubr.msk.f32.gmra.mrb[24].mxu1 %vm1596_vm14, %v19714_v20  ;;  %v19724_v20 = vld [vmem:[#allocation59_spill] sm:$0xff] }
 0x6d7   : > { %14601 = vmatprep.mubr.msk.f32.mxu1 %vm1596_vm14, %v19715_v31  ;;  %v19725_v31 = vld [vmem:[#allocation60_spill] sm:$0xff] }
 0x6da   : > { %14602 = vmatmul.mubr.msk.f32.gmra.mrb[26].mxu1 %vm1596_vm14, %v19716_v34  ;;  %v19726_v34 = vld [vmem:[#allocation61_spill] sm:$0xff] }
 0x6db   : > { %14604 = vmatprep.mubr.msk.f32.mxu1 %vm1596_vm14, %v19717_v44  ;;  %v19727_v44 = vld [vmem:[#allocation62_spill] sm:$0xff] }
 0x6de   : > { %14605 = vmatmul.mubr.msk.f32.gmra.mrb[28].mxu1 %vm1596_vm14, %v19718_v9  ;;  %v19728_v9 = vld [vmem:[#allocation63_spill] sm:$0xff] }
 0x6df   : > { %14607 = vmatprep.mubr.msk.f32.mxu1 %vm1596_vm14, %v19719_v8  ;;  %v19729_v8 = vld [vmem:[#allocation64_spill] sm:$0xff] }
 0x6e2   : > { %14608 = vmatmul.mubr.msk.f32.gmra.mrb[30].mxu1 %vm1596_vm14, %v19720_v45  ;;  %v18748_v45 = vld [vmem:[#allocation3 + $0x199] sm:$0xff] }
 0x6e3   : > { %14610 = vmatprep.mubr.msk.f32.mxu1 %vm1596_vm14, %v19721_v3  ;;  %v18752_v3 = vld [vmem:[#allocation3 + $0x1a1] sm:$0xff] }
 0x6e6   : > { %14611 = vmatmul.mubr.msk.f32.gmra.mrb[32].mxu1 %vm1596_vm14, %v19722_v18  ;;  %v10804_v18 = vld [vmem:[#allocation3 + $0x71] sm:$0xff] }
 0x6e7   : > { %14613 = vmatprep.mubr.msk.f32.mxu1 %vm1596_vm14, %v19723_v19  ;;  %v10805_v19 = vld [vmem:[#allocation3 + $0x79] sm:$0xff] }
 0x6ea   : > { %14614 = vmatmul.mubr.msk.f32.gmra.mrb[34].mxu1 %vm1596_vm14, %v19724_v20  ;;  %v10806_v20 = vld [vmem:[#allocation3 + $0x81] sm:$0xff] }
 0x6eb   : > { %14616 = vmatprep.mubr.msk.f32.mxu1 %vm1596_vm14, %v19725_v31  ;;  %v10807_v31 = vld [vmem:[#allocation3 + $0x89] sm:$0xff] }
 0x6ee   : > { %14617 = vmatmul.mubr.msk.f32.gmra.mrb[36].mxu1 %vm1596_vm14, %v19726_v34  ;;  %v10808_v34 = vld [vmem:[#allocation3 + $0x91] sm:$0xff] }
 0x6ef   : > { %14619 = vmatprep.mubr.msk.f32.mxu1 %vm1596_vm14, %v19727_v44  ;;  %v10809_v44 = vld [vmem:[#allocation3 + $0x99] sm:$0xff] }
 0x6f2   : > { %14620 = vmatmul.mubr.msk.f32.gmra.mrb[38].mxu1 %vm1596_vm14, %v19728_v9  ;;  %v10810_v9 = vld [vmem:[#allocation3 + $0xa1] sm:$0xff] }
 0x6f3   : > { %14622 = vmatprep.mubr.msk.f32.mxu1 %vm1596_vm14, %v19729_v8  ;;  %v10811_v8 = vld [vmem:[#allocation3 + $0xa9] sm:$0xff] }
 0x6f6   : > { %14623 = vmatmul.mubr.msk.f32.gmra.mrb[40].mxu1 %vm1596_vm14, %v18401_v46  ;;  %v18756_v46 = vld [vmem:[#allocation3 + $0x1a9] sm:$0xff] }
 0x6f7   : > { %14625 = vmatprep.mubr.msk.f32.mxu1 %vm1596_vm14, %v18405_v41  ;;  %v12589_v41 = vld [vmem:[%s15924_s6 + $0x20] sm:$0xf] }
 0x6fa   : > { %14626 = vmatmul.mubr.msk.f32.gmra.mrb[42].mxu1 %vm1596_vm14, %v18409_v30  ;;  %v10286_v30 = vld [vmem:[#allocation3 + $0x170] sm:$0xff] }
 0x6fb   : > { %14628 = vmatprep.mubr.msk.f32.mxu1 %vm1596_vm14, %v18413_v2  ;;  %v10287_v2 = vld [vmem:[#allocation3 + $0x178] sm:$0xff] }
 0x6fe   : > { %14629 = vmatmul.mubr.msk.f32.gmra.mrb[44].mxu1 %vm1596_vm14, %v18748_v45 }
 0x6ff   : > { %14631 = vmatprep.mubr.msk.f32.mxu1 %vm1596_vm14, %v18752_v3 }
 0x702   : > { %14632 = vmatmul.mubr.msk.f32.gmra.mrb[46].mxu1 %vm1596_vm14, %v18756_v46 }
 0x703   : > { %14636 = vmatprep.mubr.msk.f32.mxu1 %vm1596_vm14, %v18059_v51  ;;  %v19735_v51 = vld [vmem:[#allocation67_spill] sm:$0xff] }
 0x706   : > { %14637 = vmatmul.mubr.msk.f32.vlgmr.msra.gmra.mrb[0].mxu1 %vm1596_vm14, %v18063_v57  ;;  %v19736_v57 = vld [vmem:[#allocation68_spill] sm:$0xff] }
 0x707   : > { %14639 = vmatprep.mubr.msk.f32.mxu1 %vm1596_vm14, %v18067_v59  ;;  %14709 = vmatpush3.msk.msra.mxu1 %vm1741_vm13, %v12539_v62  ;;  %v19737_v59 = vld [vmem:[#allocation69_spill] sm:$0xff] }
 0x708   : > { %14782 = vmatprep.subr.msk.mxu1 %vm1741_vm13, %v12589_v41  ;;  %v10800_v62 = vld [vmem:[#allocation3 + $0x51] sm:$0xff] }
 0x70a   : > { %14640 = vmatmul.mubr.msk.f32.gmra.mrb[2].mxu1 %vm1596_vm14, %v18071_v60  ;;  %v19738_v60 = vld [vmem:[#allocation70_spill] sm:$0xff] }
 0x70b   : > { %14642 = vmatprep.mubr.msk.f32.mxu1 %vm1596_vm14, %v18075_v61  ;;  %v19739_v61 = vld [vmem:[#allocation71_spill] sm:$0xff] }
 0x70e   : > { %14643 = vmatmul.mubr.msk.f32.gmra.mrb[4].mxu1 %vm1596_vm14, %v18079_v5  ;;  %v19740_v5 = vld [vmem:[#allocation72_spill] sm:$0xff] }
 0x70f   : > { %14645 = vmatprep.mubr.msk.f32.mxu1 %vm1596_vm14, %v18083_v16  ;;  %v19741_v16 = vld [vmem:[#allocation73_spill] sm:$0xff] }
 0x712   : > { %14646 = vmatmul.mubr.msk.f32.gmra.mrb[6].mxu1 %vm1596_vm14, %v18087_v15  ;;  %v10262_v15 = vld [vmem:[#allocation3 + $0xb0] sm:$0xff] }
 0x713   : > { %14648 = vmatprep.mubr.msk.f32.mxu1 %vm1596_vm14, %v18091_v14  ;;  %v10263_v14 = vld [vmem:[#allocation3 + $0xb8] sm:$0xff] }
 0x716   : > { %14649 = vmatmul.mubr.msk.f32.gmra.mrb[8].mxu1 %vm1596_vm14, %v18095_v17  ;;  %v10264_v17 = vld [vmem:[#allocation3 + $0xc0] sm:$0xff] }
 0x717   : > { %14651 = vmatprep.mubr.msk.f32.mxu1 %vm1596_vm14, %v18099_v11  ;;  %v10265_v11 = vld [vmem:[#allocation3 + $0xc8] sm:$0xff] }
 0x71a   : > { %14652 = vmatmul.mubr.msk.f32.gmra.mrb[10].mxu1 %vm1596_vm14, %v18103_v21  ;;  %v10266_v21 = vld [vmem:[#allocation3 + $0xd0] sm:$0xff] }
 0x71b   : > { %14654 = vmatprep.mubr.msk.f32.mxu1 %vm1596_vm14, %v18107_v22  ;;  %v10267_v22 = vld [vmem:[#allocation3 + $0xd8] sm:$0xff] }
 0x71e   : > { %14655 = vmatmul.mubr.msk.f32.gmra.mrb[12].mxu1 %vm1596_vm14, %v18111_v50  ;;  %v10268_v50 = vld [vmem:[#allocation3 + $0xe0] sm:$0xff] }
 0x71f   : > { %14657 = vmatprep.mubr.msk.f32.mxu1 %vm1596_vm14, %v18115_v23  ;;  %v10269_v23 = vld [vmem:[#allocation3 + $0xe8] sm:$0xff] }
 0x722   : > { %14658 = vmatmul.mubr.msk.f32.gmra.mrb[14].mxu1 %vm1596_vm14, %v18119_v27  ;;  %v10270_v27 = vld [vmem:[#allocation3 + $0xf0] sm:$0xff] }
 0x723   : > { %14660 = vmatprep.mubr.msk.f32.mxu1 %vm1596_vm14, %v18123_v28  ;;  %v10271_v28 = vld [vmem:[#allocation3 + $0xf8] sm:$0xff] }
 0x726   : > { %14661 = vmatmul.mubr.msk.f32.gmra.mrb[16].mxu1 %vm1596_vm14, %v18127_v24  ;;  %v10272_v24 = vld [vmem:[#allocation3 + $0x100] sm:$0xff] }
 0x727   : > { %14663 = vmatprep.mubr.msk.f32.mxu1 %vm1596_vm14, %v18131_v6  ;;  %v10273_v6 = vld [vmem:[#allocation3 + $0x108] sm:$0xff] }
 0x72a   : > { %14664 = vmatmul.mubr.msk.f32.gmra.mrb[18].mxu1 %vm1596_vm14, %v18135_v35  ;;  %v10274_v35 = vld [vmem:[#allocation3 + $0x110] sm:$0xff] }
 0x72b   : > { %14666 = vmatprep.mubr.msk.f32.mxu1 %vm1596_vm14, %v18139_v36  ;;  %v10275_v36 = vld [vmem:[#allocation3 + $0x118] sm:$0xff] }
 0x72e   : > { %14667 = vmatmul.mubr.msk.f32.gmra.mrb[20].mxu1 %vm1596_vm14, %v18143_v37  ;;  %v10276_v37 = vld [vmem:[#allocation3 + $0x120] sm:$0xff] }
 0x72f   : > { %14669 = vmatprep.mubr.msk.f32.mxu1 %vm1596_vm14, %v18147_v39  ;;  %v10277_v39 = vld [vmem:[#allocation3 + $0x128] sm:$0xff] }
 0x732   : > { %14670 = vmatmul.mubr.msk.f32.gmra.mrb[22].mxu1 %vm1596_vm14, %v18151_v13  ;;  %v10278_v13 = vld [vmem:[#allocation3 + $0x130] sm:$0xff] }
 0x733   : > { %14672 = vmatprep.mubr.msk.f32.mxu1 %vm1596_vm14, %v18155_v47  ;;  %v10279_v47 = vld [vmem:[#allocation3 + $0x138] sm:$0xff] }
 0x736   : > { %14673 = vmatmul.mubr.msk.f32.gmra.mrb[24].mxu1 %vm1596_vm14, %v18159_v10  ;;  %v10280_v10 = vld [vmem:[#allocation3 + $0x140] sm:$0xff] }
 0x737   : > { %14675 = vmatprep.mubr.msk.f32.mxu1 %vm1596_vm14, %v18163_v32  ;;  %v10281_v32 = vld [vmem:[#allocation3 + $0x148] sm:$0xff] }
 0x73a   : > { %14676 = vmatmul.mubr.msk.f32.gmra.mrb[26].mxu1 %vm1596_vm14, %v18167_v53  ;;  %v10282_v53 = vld [vmem:[#allocation3 + $0x150] sm:$0xff] }
 0x73b   : > { %14678 = vmatprep.mubr.msk.f32.mxu1 %vm1596_vm14, %v18171_v26  ;;  %v10283_v26 = vld [vmem:[#allocation3 + $0x158] sm:$0xff] }
 0x73e   : > { %14679 = vmatmul.mubr.msk.f32.gmra.mrb[28].mxu1 %vm1596_vm14, %v18175_v42  ;;  %v10284_v42 = vld [vmem:[#allocation3 + $0x160] sm:$0xff] }
 0x73f   : > { %14681 = vmatprep.mubr.msk.f32.mxu1 %vm1596_vm14, %v18179_v43  ;;  %v10285_v43 = vld [vmem:[#allocation3 + $0x168] sm:$0xff] }
 0x742   : > { %14682 = vmatmul.mubr.msk.f32.gmra.mrb[30].mxu1 %vm1596_vm14, %v18183_v7  ;;  %v19730_v7 = vld [vmem:[#allocation21_spill] sm:$0xff] }
 0x743   : > { %14684 = vmatprep.mubr.msk.f32.mxu1 %vm1596_vm14, %v18187_v63  ;;  %v19731_v63 = vld [vmem:[#allocation22_spill] sm:$0xff] }
 0x746   : > { %14685 = vmatmul.mubr.msk.f32.gmra.mrb[32].mxu1 %vm1596_vm14, %v18191_v55  ;;  %v19732_v55 = vld [vmem:[#allocation23_spill] sm:$0xff] }
 0x747   : > { %14687 = vmatprep.mubr.msk.f32.mxu1 %vm1596_vm14, %v18195_v25  ;;  %v9746_v25 = vld [vmem:[#allocation3 + $0x1bf] sm:$0xff] }
 0x74a   : > { %14688 = vmatmul.mubr.msk.f32.gmra.mrb[34].mxu1 %vm1596_vm14, %v18199_v1  ;;  %v19733_v1 = vld [vmem:[#allocation65_spill] sm:$0xff] }
 0x74b   : > { %14690 = vmatprep.mubr.msk.f32.mxu1 %vm1596_vm14, %v18203_v33  ;;  %v19734_v33 = vld [vmem:[#allocation66_spill] sm:$0xff] }
 0x74e   : > { %14691 = vmatmul.mubr.msk.f32.gmra.mrb[36].mxu1 %vm1596_vm14, %v18207_v29  ;;  %v9745_v29 = vld [vmem:[#allocation3 + $0x1b7] sm:$0xff] }
 0x74f   : > { %14693 = vmatprep.mubr.msk.f32.mxu1 %vm1596_vm14, %v18211_v38  ;;  %v9744_v38 = vld [vmem:[#allocation3 + $0x1af] sm:$0xff] }
 0x752   : > { %14694 = vmatmul.mubr.msk.f32.gmra.mrb[38].mxu1 %vm1596_vm14, %v19730_v7  ;;  %v10813_v7 = vld [vmem:[#allocation3 + $0xb9] sm:$0xff] }
 0x753   : > { %14696 = vmatprep.mubr.msk.f32.mxu1 %vm1596_vm14, %v19731_v63  ;;  %v10814_v63 = vld [vmem:[#allocation3 + $0xc1] sm:$0xff] }
 0x756   : > { %14697 = vmatmul.mubr.msk.f32.gmra.mrb[40].mxu1 %vm1596_vm14, %v19732_v55  ;;  %v10815_v55 = vld [vmem:[#allocation3 + $0xc9] sm:$0xff] }
 0x757   : > { %14699 = vmatprep.mubr.msk.f32.mxu1 %vm1596_vm14, %v18511_v49  ;;  %v10288_v49 = vld [vmem:[#allocation3 + $0x180] sm:$0xff] }
 0x75a   : > { %14700 = vmatmul.mubr.msk.f32.gmra.mrb[42].mxu1 %vm1596_vm14, %v19733_v1  ;;  %v10816_v1 = vld [vmem:[#allocation3 + $0xd1] sm:$0xff] }
 0x75b   : > { %14702 = vmatprep.mubr.msk.f32.mxu1 %vm1596_vm14, %v19734_v33  ;;  %v10817_v33 = vld [vmem:[#allocation3 + $0xd9] sm:$0xff] }
 0x75e   : > { %14703 = vmatmul.mubr.msk.f32.gmra.mrb[44].mxu1 %vm1596_vm14, %v9744_v38  ;;  %v10819_v38 = vld [vmem:[#allocation3 + $0xe9] sm:$0xff] }
 0x75f   : > { %14705 = vmatprep.mubr.msk.f32.mxu1 %vm1596_vm14, %v9745_v29  ;;  %v10818_v29 = vld [vmem:[#allocation3 + $0xe1] sm:$0xff] }
 0x762   : > { %14706 = vmatmul.mubr.msk.f32.gmra.mrb[46].mxu1 %vm1596_vm14, %v9746_v25  ;;  %v10820_v25 = vld [vmem:[#allocation3 + $0xf1] sm:$0xff] }
 0x763   : > { %14710 = vmatprep.mubr.msk.f32.mxu1 %vm1596_vm14, %v18532_v4  ;;  %v10289_v4 = vld [vmem:[#allocation3 + $0x188] sm:$0xff] }
 0x766   : > { %14711 = vmatmul.mubr.msk.f32.vlgmr.msra.gmra.mrb[0].mxu1 %vm1596_vm14, %v19735_v51  ;;  %v10821_v51 = vld [vmem:[#allocation3 + $0xf9] sm:$0xff] }
 0x767   : > { %14713 = vmatprep.mubr.msk.f32.mxu1 %vm1596_vm14, %v19736_v57  ;;  %14783 = vmatpush3.msk.msra.mxu1 %vm1741_vm13, %v12589_v41  ;;  %v10812_v41 = vld [vmem:[#allocation3 + $0xb1] sm:$0xff]  ;;  %v10822_v57 = vld [vmem:[#allocation3 + $0x101] sm:$0xff] }
 0x76a   : > { %14714 = vmatmul.mubr.msk.f32.gmra.mrb[2].mxu1 %vm1596_vm14, %v19737_v59  ;;  %v10823_v59 = vld [vmem:[#allocation3 + $0x109] sm:$0xff] }
 0x76b   : > { %14716 = vmatprep.mubr.msk.f32.mxu1 %vm1596_vm14, %v19738_v60  ;;  %v10824_v60 = vld [vmem:[#allocation3 + $0x111] sm:$0xff] }
 0x76e   : > { %14717 = vmatmul.mubr.msk.f32.gmra.mrb[4].mxu1 %vm1596_vm14, %v19739_v61  ;;  %v10825_v61 = vld [vmem:[#allocation3 + $0x119] sm:$0xff] }
 0x76f   : > { %14719 = vmatprep.mubr.msk.f32.mxu1 %vm1596_vm14, %v19740_v5  ;;  %v10826_v5 = vld [vmem:[#allocation3 + $0x121] sm:$0xff] }
 0x772   : > { %14720 = vmatmul.mubr.msk.f32.gmra.mrb[6].mxu1 %vm1596_vm14, %v19741_v16  ;;  %v10827_v16 = vld [vmem:[#allocation3 + $0x129] sm:$0xff] }
 0x773   : > { %14722 = vmatprep.mubr.msk.f32.mxu1 %vm1596_vm14, %v18564_v58  ;;  %v10295_v58 = vld [vmem:[#allocation3 + $0x1b8] sm:$0xff] }
 0x776   : > { %14723 = vmatmul.mubr.msk.f32.gmra.mrb[8].mxu1 %vm1596_vm14, %v18568_v56  ;;  %v10296_v56 = vld [vmem:[#allocation3 + $0x1c0] sm:$0xff] }
 0x777   : > { %14725 = vmatprep.mubr.msk.f32.mxu1 %vm1596_vm14, %v18572_v12  ;;  %v10799_v12 = vld [vmem:[#allocation3 + $0x49] sm:$0xff] }
 0x77a   : > { %14726 = vmatmul.mubr.msk.f32.gmra.mrb[10].mxu1 %vm1596_vm14, %v18576_v0  ;;  %v10290_v0 = vld [vmem:[#allocation3 + $0x190] sm:$0xff] }
 0x77b   : > { %14728 = vmatprep.mubr.msk.f32.mxu1 %vm1596_vm14, %v18580_v54  ;;  %v10294_v54 = vld [vmem:[#allocation3 + $0x1b0] sm:$0xff] }
 0x77e   : > { %14729 = vmatmul.mubr.msk.f32.gmra.mrb[12].mxu1 %vm1596_vm14, %v10262_v15  ;;  %v10828_v15 = vld [vmem:[#allocation3 + $0x131] sm:$0xff] }
 0x77f   : > { %14731 = vmatprep.mubr.msk.f32.mxu1 %vm1596_vm14, %v10263_v14  ;;  %v10829_v14 = vld [vmem:[#allocation3 + $0x139] sm:$0xff] }
 0x782   : > { %14732 = vmatmul.mubr.msk.f32.gmra.mrb[14].mxu1 %vm1596_vm14, %v10264_v17  ;;  %v10830_v17 = vld [vmem:[#allocation3 + $0x141] sm:$0xff] }
 0x783   : > { %14734 = vmatprep.mubr.msk.f32.mxu1 %vm1596_vm14, %v10265_v11  ;;  %v10831_v11 = vld [vmem:[#allocation3 + $0x149] sm:$0xff] }
 0x786   : > { %14735 = vmatmul.mubr.msk.f32.gmra.mrb[16].mxu1 %vm1596_vm14, %v10266_v21  ;;  %v10832_v21 = vld [vmem:[#allocation3 + $0x151] sm:$0xff] }
 0x787   : > { %14737 = vmatprep.mubr.msk.f32.mxu1 %vm1596_vm14, %v10267_v22  ;;  %v10833_v22 = vld [vmem:[#allocation3 + $0x159] sm:$0xff] }
 0x78a   : > { %14738 = vmatmul.mubr.msk.f32.gmra.mrb[18].mxu1 %vm1596_vm14, %v10268_v50  ;;  %v10834_v50 = vld [vmem:[#allocation3 + $0x161] sm:$0xff] }
 0x78b   : > { %14740 = vmatprep.mubr.msk.f32.mxu1 %vm1596_vm14, %v10269_v23  ;;  %v10835_v23 = vld [vmem:[#allocation3 + $0x169] sm:$0xff] }
 0x78e   : > { %14741 = vmatmul.mubr.msk.f32.gmra.mrb[20].mxu1 %vm1596_vm14, %v10270_v27  ;;  %v10836_v27 = vld [vmem:[#allocation3 + $0x171] sm:$0xff] }
 0x78f   : > { %14743 = vmatprep.mubr.msk.f32.mxu1 %vm1596_vm14, %v10271_v28  ;;  %v10837_v28 = vld [vmem:[#allocation3 + $0x179] sm:$0xff] }
 0x792   : > { %14744 = vmatmul.mubr.msk.f32.gmra.mrb[22].mxu1 %vm1596_vm14, %v10272_v24  ;;  %v10838_v24 = vld [vmem:[#allocation3 + $0x181] sm:$0xff] }
 0x793   : > { %14746 = vmatprep.mubr.msk.f32.mxu1 %vm1596_vm14, %v10273_v6  ;;  %v10839_v6 = vld [vmem:[#allocation3 + $0x189] sm:$0xff] }
 0x796   : > { %14747 = vmatmul.mubr.msk.f32.gmra.mrb[24].mxu1 %vm1596_vm14, %v10274_v35  ;;  %v10840_v35 = vld [vmem:[#allocation3 + $0x191] sm:$0xff] }
 0x797   : > { %14749 = vmatprep.mubr.msk.f32.mxu1 %vm1596_vm14, %v10275_v36  ;;  %v10844_v36 = vld [vmem:[#allocation3 + $0x1b1] sm:$0xff] }
 0x79a   : > { %14750 = vmatmul.mubr.msk.f32.gmra.mrb[26].mxu1 %vm1596_vm14, %v10276_v37  ;;  %v10845_v37 = vld [vmem:[#allocation3 + $0x1b9] sm:$0xff] }
 0x79b   : > { %14752 = vmatprep.mubr.msk.f32.mxu1 %vm1596_vm14, %v10277_v39  ;;  %v10846_v39 = vld [vmem:[#allocation3 + $0x1c1] sm:$0xff] }
 0x79e   : > { %14753 = vmatmul.mubr.msk.f32.gmra.mrb[28].mxu1 %vm1596_vm14, %v10278_v13  ;;  %v11350_v13 = vld [vmem:[#allocation2 + $0x38] sm:$0xff] }
 0x79f   : > { %14755 = vmatprep.mubr.msk.f32.mxu1 %vm1596_vm14, %v10279_v47  ;;  %v11349_v47 = vld [vmem:[#allocation2 + $0x30] sm:$0xff] }
 0x7a2   : > { %14756 = vmatmul.mubr.msk.f32.gmra.mrb[30].mxu1 %vm1596_vm14, %v10280_v10 }
 0x7a3   : > { %14758 = vmatprep.mubr.msk.f32.mxu1 %vm1596_vm14, %v10281_v32 }
 0x7a6   : > { %14759 = vmatmul.mubr.msk.f32.gmra.mrb[32].mxu1 %vm1596_vm14, %v10282_v53 }
 0x7a7   : > { %14761 = vmatprep.mubr.msk.f32.mxu1 %vm1596_vm14, %v10283_v26  ;;  %v11352_v26 = vld [vmem:[#allocation2 + $0x48] sm:$0xff] }
 0x7aa   : > { %14762 = vmatmul.mubr.msk.f32.gmra.mrb[34].mxu1 %vm1596_vm14, %v10284_v42 }
 0x7ab   : > { %14764 = vmatprep.mubr.msk.f32.mxu1 %vm1596_vm14, %v10285_v43  ;;  %v15764_v43 = vld [vmem:[#allocation4] sm:$0xff] }
 0x7ae   : > { %14765 = vmatmul.mubr.msk.f32.gmra.mrb[36].mxu1 %vm1596_vm14, %v10286_v30 }
 0x7af   : > { %14767 = vmatprep.mubr.msk.f32.mxu1 %vm1596_vm14, %v10287_v2 }
 0x7b2   : > { %14768 = vmatmul.mubr.msk.f32.gmra.mrb[38].mxu1 %vm1596_vm14, %v10288_v49 }
 0x7b3   : > { %14770 = vmatprep.mubr.msk.f32.mxu1 %vm1596_vm14, %v10289_v4 }
 0x7b6   : > { %14771 = vmatmul.mubr.msk.f32.gmra.mrb[40].mxu1 %vm1596_vm14, %v10290_v0 }
 0x7b7   : > { %14773 = vmatprep.mubr.msk.f32.mxu1 %vm1596_vm14, %v18642_v48  ;;  %v10801_v48 = vld [vmem:[#allocation3 + $0x59] sm:$0xff] }
 0x7ba   : > { %14774 = vmatmul.mubr.msk.f32.gmra.mrb[42].mxu1 %vm1596_vm14, %v18646_v52  ;;  %v10802_v52 = vld [vmem:[#allocation3 + $0x61] sm:$0xff] }
 0x7bb   : > { %14776 = vmatprep.mubr.msk.f32.mxu1 %vm1596_vm14, %v18650_v40  ;;  %v10803_v40 = vld [vmem:[#allocation3 + $0x69] sm:$0xff] }
 0x7be   : > { %14777 = vmatmul.mubr.msk.f32.gmra.mrb[44].mxu1 %vm1596_vm14, %v10294_v54  ;;  %v11354_v54 = vld [vmem:[#allocation2 + $0x58] sm:$0xff] }
 0x7bf   : > { %14779 = vmatprep.mubr.msk.f32.mxu1 %vm1596_vm14, %v10295_v58  ;;  %v15765_v58 = vld [vmem:[#allocation4 + $0x18] sm:$0xff] }
 0x7c2   : > { %14780 = vmatmul.mubr.msk.f32.gmra.mrb[46].mxu1 %vm1596_vm14, %v10296_v56 }
 0x7c3   : > { %14784 = vmatprep.mubr.msk.f32.mxu1 %vm1596_vm14, %v10799_v12  ;;  %v11353_v12 = vld [vmem:[#allocation2 + $0x50] sm:$0xff] }
 0x7c6   : > { %14785 = vmatmul.mubr.msk.f32.vlgmr.msra.gmra.mrb[0].mxu1 %vm1596_vm14, %v10800_v62  ;;  %v15766_v62 = vld [vmem:[#allocation4 + $0x10] sm:$0xff] }
 0x7c7   : > { %14787 = vmatprep.mubr.msk.f32.mxu1 %vm1596_vm14, %v10801_v48 }
 0x7ca   : > { %14788 = vmatmul.mubr.msk.f32.gmra.mrb[2].mxu1 %vm1596_vm14, %v10802_v52 }
 0x7cb   : > { %14790 = vmatprep.mubr.msk.f32.mxu1 %vm1596_vm14, %v10803_v40 }
 0x7ce   : > { %14791 = vmatmul.mubr.msk.f32.gmra.mrb[4].mxu1 %vm1596_vm14, %v10804_v18 }
 0x7cf   : > { %14793 = vmatprep.mubr.msk.f32.mxu1 %vm1596_vm14, %v10805_v19 }
 0x7d2   : > { %14794 = vmatmul.mubr.msk.f32.gmra.mrb[6].mxu1 %vm1596_vm14, %v10806_v20  ;;  %v11356_v20 = vld [vmem:[#allocation2 + $0x68] sm:$0xff] }
 0x7d3   : > { %14796 = vmatprep.mubr.msk.f32.mxu1 %vm1596_vm14, %v10807_v31  ;;  %v15767_v31 = vld [vmem:[#allocation4 + $0x28] sm:$0xff] }
 0x7d6   : > { %14797 = vmatmul.mubr.msk.f32.gmra.mrb[8].mxu1 %vm1596_vm14, %v10808_v34 }
 0x7d7   : > { %14799 = vmatprep.mubr.msk.f32.mxu1 %vm1596_vm14, %v10809_v44  ;;  %v11355_v44 = vld [vmem:[#allocation2 + $0x60] sm:$0xff] }
 0x7da   : > { %14800 = vmatmul.mubr.msk.f32.gmra.mrb[10].mxu1 %vm1596_vm14, %v10810_v9  ;;  %v15768_v9 = vld [vmem:[#allocation4 + $0x20] sm:$0xff] }
 0x7db   : > { %14802 = vmatprep.mubr.msk.f32.mxu1 %vm1596_vm14, %v10811_v8 }
 0x7de   : > { %14803 = vmatmul.mubr.msk.f32.gmra.mrb[12].mxu1 %vm1596_vm14, %v10812_v41 }
 0x7df   : > { %14805 = vmatprep.mubr.msk.f32.mxu1 %vm1596_vm14, %v10813_v7 }
 0x7e2   : > { %14806 = vmatmul.mubr.msk.f32.gmra.mrb[14].mxu1 %vm1596_vm14, %v10814_v63 }
 0x7e3   : > { %14808 = vmatprep.mubr.msk.f32.mxu1 %vm1596_vm14, %v10815_v55 }
 0x7e6   : > { %14809 = vmatmul.mubr.msk.f32.gmra.mrb[16].mxu1 %vm1596_vm14, %v10816_v1  ;;  %v11358_v1 = vld [vmem:[#allocation2 + $0x78] sm:$0xff] }
 0x7e7   : > { %14811 = vmatprep.mubr.msk.f32.mxu1 %vm1596_vm14, %v10817_v33  ;;  %v15769_v33 = vld [vmem:[#allocation4 + $0x38] sm:$0xff] }
 0x7ea   : > { %14812 = vmatmul.mubr.msk.f32.gmra.mrb[18].mxu1 %vm1596_vm14, %v10818_v29 }
 0x7eb   : > { %14814 = vmatprep.mubr.msk.f32.mxu1 %vm1596_vm14, %v10819_v38  ;;  %v11357_v38 = vld [vmem:[#allocation2 + $0x70] sm:$0xff] }
 0x7ee   : > { %14815 = vmatmul.mubr.msk.f32.gmra.mrb[20].mxu1 %vm1596_vm14, %v10820_v25  ;;  %v15770_v25 = vld [vmem:[#allocation4 + $0x30] sm:$0xff] }
 0x7ef   : > { %14817 = vmatprep.mubr.msk.f32.mxu1 %vm1596_vm14, %v10821_v51 }
 0x7f2   : > { %14818 = vmatmul.mubr.msk.f32.gmra.mrb[22].mxu1 %vm1596_vm14, %v10822_v57 }
 0x7f3   : > { %14820 = vmatprep.mubr.msk.f32.mxu1 %vm1596_vm14, %v10823_v59 }
 0x7f6   : > { %14821 = vmatmul.mubr.msk.f32.gmra.mrb[24].mxu1 %vm1596_vm14, %v10824_v60 }
 0x7f7   : > { %14823 = vmatprep.mubr.msk.f32.mxu1 %vm1596_vm14, %v10825_v61 }
 0x7fa   : > { %14824 = vmatmul.mubr.msk.f32.gmra.mrb[26].mxu1 %vm1596_vm14, %v10826_v5  ;;  %v11360_v5 = vld [vmem:[#allocation2 + $0x88] sm:$0xff] }
 0x7fb   : > { %14826 = vmatprep.mubr.msk.f32.mxu1 %vm1596_vm14, %v10827_v16  ;;  %v15771_v16 = vld [vmem:[#allocation4 + $0x48] sm:$0xff] }
 0x7fe   : > { %14827 = vmatmul.mubr.msk.f32.gmra.mrb[28].mxu1 %vm1596_vm14, %v10828_v15 }
 0x7ff   : > { %14829 = vmatprep.mubr.msk.f32.mxu1 %vm1596_vm14, %v10829_v14  ;;  %v11359_v14 = vld [vmem:[#allocation2 + $0x80] sm:$0xff] }
 0x802   : > { %14830 = vmatmul.mubr.msk.f32.gmra.mrb[30].mxu1 %vm1596_vm14, %v10830_v17  ;;  %v15772_v17 = vld [vmem:[#allocation4 + $0x40] sm:$0xff] }
 0x803   : > { %14832 = vmatprep.mubr.msk.f32.mxu1 %vm1596_vm14, %v10831_v11 }
 0x806   : > { %14833 = vmatmul.mubr.msk.f32.gmra.mrb[32].mxu1 %vm1596_vm14, %v10832_v21 }
 0x807   : > { %14835 = vmatprep.mubr.msk.f32.mxu1 %vm1596_vm14, %v10833_v22 }
 0x80a   : > { %14836 = vmatmul.mubr.msk.f32.gmra.mrb[34].mxu1 %vm1596_vm14, %v10834_v50 }
 0x80b   : > { %14838 = vmatprep.mubr.msk.f32.mxu1 %vm1596_vm14, %v10835_v23 }
 0x80e   : > { %14839 = vmatmul.mubr.msk.f32.gmra.mrb[36].mxu1 %vm1596_vm14, %v10836_v27  ;;  %v11362_v27 = vld [vmem:[#allocation2 + $0x98] sm:$0xff] }
 0x80f   : > { %14841 = vmatprep.mubr.msk.f32.mxu1 %vm1596_vm14, %v10837_v28  ;;  %v15773_v28 = vld [vmem:[#allocation4 + $0x58] sm:$0xff] }
 0x812   : > { %14842 = vmatmul.mubr.msk.f32.gmra.mrb[38].mxu1 %vm1596_vm14, %v10838_v24 }
 0x813   : > { %14844 = vmatprep.mubr.msk.f32.mxu1 %vm1596_vm14, %v10839_v6  ;;  %v11361_v6 = vld [vmem:[#allocation2 + $0x90] sm:$0xff] }
 0x816   : > { %14845 = vmatmul.mubr.msk.f32.gmra.mrb[40].mxu1 %vm1596_vm14, %v10840_v35  ;;  %v15774_v35 = vld [vmem:[#allocation4 + $0x50] sm:$0xff] }
 0x817   : > { %14847 = vmatprep.mubr.msk.f32.mxu1 %vm1596_vm14, %v18748_v45 }
 0x81a   : > { %14848 = vmatmul.mubr.msk.f32.gmra.mrb[42].mxu1 %vm1596_vm14, %v18752_v3  ;;  %v15763_v3 = vld [vmem:[#allocation4 + $0x8] sm:$0xff] }
 0x81b   : > { %14850 = vmatprep.mubr.msk.f32.mxu1 %vm1596_vm14, %v18756_v46  ;;  %v11351_v46 = vld [vmem:[#allocation2 + $0x40] sm:$0xff] }
 0x81e   : > { %14851 = vmatmul.mubr.msk.f32.gmra.mrb[44].mxu1 %vm1596_vm14, %v10844_v36 }
 0x81f   : > { %14853 = vmatprep.mubr.msk.f32.mxu1 %vm1596_vm14, %v10845_v37 }
 0x822   : > { %14854 = vmatmul.mubr.msk.f32.gmra.mrb[46].mxu1 %vm1596_vm14, %v10846_v39 }
 0x899   : > { %v14786_v10 = vpop.f32.mrb[0].mxu1 }
 0x89a   : > { %v11398_v32 = vadd.f32 %v14786_v10, %v11350_v13  ;;  %v11062_v45 = vpop.f32.mrb[1].mxu1  ;;  %v11364_v10 = vld [vmem:[#allocation2 + $0xa8] sm:$0xff] }
 0x89b   : > { %v11397_v53 = vadd.f32 %v11349_v47, %v11062_v45 }
 0x89c   : > { %v18972_v42 = vmul.f32 %v15763_v3, %v11398_v32  ;;  %v15775_v32 = vld [vmem:[#allocation4 + $0x68] sm:$0xff] }
 0x89d   : > { %v18974_v30 = vmul.f32 %v15764_v43, %v11397_v53  ;;  %v14789_v2 = vpop.f32.mrb[2].mxu1  ;;  %v11363_v53 = vld [vmem:[#allocation2 + $0xa0] sm:$0xff] }
 0x89e   : > { %11494 = vst.msk [vmem:[#allocation2 + $0x38] sm:$0xff] %vm1596_vm14, %v18972_v42  ;;  %v11400_v49 = vadd.f32 %v14789_v2, %v11352_v26  ;;  %v11072_v4 = vpop.f32.mrb[3].mxu1  ;;  %v15776_v26 = vld [vmem:[#allocation4 + $0x60] sm:$0xff]  ;;  %11546 = vst.msk [vmem:[%s15914_s27 + $0x8] sm:$0xff] (!%p12639_p8), %vm1596_vm14, %v18972_v42 }
 0x89f   : > { %11493 = vst.msk [vmem:[#allocation2 + $0x30] sm:$0xff] %vm1596_vm14, %v18974_v30  ;;  %v11399_v0 = vadd.f32 %v11351_v46, %v11072_v4  ;;  %v11366_v4 = vld [vmem:[#allocation2 + $0xb8] sm:$0xff]  ;;  %11545 = vst.msk [vmem:[%s15914_s27] sm:$0xff] (!%p12639_p8), %vm1596_vm14, %v18974_v30 }
 0x8a0   : > { %v18980_v56 = vmul.f32 %v15765_v58, %v11400_v49  ;;  %v11365_v58 = vld [vmem:[#allocation2 + $0xb0] sm:$0xff] }
 0x8a1   : > { %v18982_v48 = vmul.f32 %v15766_v62, %v11399_v0  ;;  %v14792_v52 = vpop.f32.mrb[4].mxu1  ;;  %v15777_v0 = vld [vmem:[#allocation4 + $0x78] sm:$0xff] }
 0x8a2   : > { %11496 = vst.msk [vmem:[#allocation2 + $0x48] sm:$0xff] %vm1596_vm14, %v18980_v56  ;;  %v11402_v40 = vadd.f32 %v14792_v52, %v11354_v54  ;;  %v11082_v18 = vpop.f32.mrb[5].mxu1  ;;  %11548 = vst.msk [vmem:[%s15914_s27 + $0x18] sm:$0xff] (!%p12639_p8), %vm1596_vm14, %v18980_v56 }
 0x8a3   : > { %11495 = vst.msk [vmem:[#allocation2 + $0x40] sm:$0xff] %vm1596_vm14, %v18982_v48  ;;  %v11401_v19 = vadd.f32 %v11353_v12, %v11082_v18  ;;  %v15778_v12 = vld [vmem:[#allocation4 + $0x70] sm:$0xff]  ;;  %11547 = vst.msk [vmem:[%s15914_s27 + $0x10] sm:$0xff] (!%p12639_p8), %vm1596_vm14, %v18982_v48 }
 0x8a4   : > { %v18988_v34 = vmul.f32 %v15767_v31, %v11402_v40  ;;  %v15779_v31 = vld [vmem:[#allocation4 + $0x88] sm:$0xff] }
 0x8a5   : > { %v18990_v8 = vmul.f32 %v15768_v9, %v11401_v19  ;;  %v14795_v41 = vpop.f32.mrb[6].mxu1  ;;  %v11367_v9 = vld [vmem:[#allocation2 + $0xc0] sm:$0xff] }
 0x8a6   : > { %11498 = vst.msk [vmem:[#allocation2 + $0x58] sm:$0xff] %vm1596_vm14, %v18988_v34  ;;  %v11404_v7 = vadd.f32 %v14795_v41, %v11356_v20  ;;  %v11092_v63 = vpop.f32.mrb[7].mxu1  ;;  %v11368_v20 = vld [vmem:[#allocation2 + $0xc8] sm:$0xff]  ;;  %v15780_v41 = vld [vmem:[#allocation4 + $0x80] sm:$0xff]  ;;  %11550 = vst.msk [vmem:[%s15914_s27 + $0x28] sm:$0xff] (!%p12639_p8), %vm1596_vm14, %v18988_v34 }
 0x8a7   : > { %11497 = vst.msk [vmem:[#allocation2 + $0x50] sm:$0xff] %vm1596_vm14, %v18990_v8  ;;  %v11403_v55 = vadd.f32 %v11355_v44, %v11092_v63  ;;  %11549 = vst.msk [vmem:[%s15914_s27 + $0x20] sm:$0xff] (!%p12639_p8), %vm1596_vm14, %v18990_v8 }
 0x8a8   : > { %v18996_v29 = vmul.f32 %v15769_v33, %v11404_v7 }
 0x8a9   : > { %v18998_v51 = vmul.f32 %v15770_v25, %v11403_v55  ;;  %v14798_v57 = vpop.f32.mrb[8].mxu1  ;;  %v15781_v25 = vld [vmem:[#allocation4 + $0x98] sm:$0xff] }
 0x8aa   : > { %11500 = vst.msk [vmem:[#allocation2 + $0x68] sm:$0xff] %vm1596_vm14, %v18996_v29  ;;  %v11406_v59 = vadd.f32 %v14798_v57, %v11358_v1  ;;  %v11102_v60 = vpop.f32.mrb[9].mxu1  ;;  %11552 = vst.msk [vmem:[%s15914_s27 + $0x38] sm:$0xff] (!%p12639_p8), %vm1596_vm14, %v18996_v29 }
 0x8ab   : > { %11499 = vst.msk [vmem:[#allocation2 + $0x60] sm:$0xff] %vm1596_vm14, %v18998_v51  ;;  %v11405_v61 = vadd.f32 %v11357_v38, %v11102_v60  ;;  %v11370_v38 = vld [vmem:[#allocation2 + $0xd8] sm:$0xff]  ;;  %v15782_v60 = vld [vmem:[#allocation4 + $0x90] sm:$0xff]  ;;  %11551 = vst.msk [vmem:[%s15914_s27 + $0x30] sm:$0xff] (!%p12639_p8), %vm1596_vm14, %v18998_v51 }
 0x8ac   : > { %v19004_v15 = vmul.f32 %v15771_v16, %v11406_v59  ;;  %v11369_v59 = vld [vmem:[#allocation2 + $0xd0] sm:$0xff] }
 0x8ad   : > { %v19006_v11 = vmul.f32 %v15772_v17, %v11405_v61  ;;  %v14801_v21 = vpop.f32.mrb[10].mxu1 }
 0x8ae   : > { %11502 = vst.msk [vmem:[#allocation2 + $0x78] sm:$0xff] %vm1596_vm14, %v19004_v15  ;;  %v11408_v22 = vadd.f32 %v14801_v21, %v11360_v5  ;;  %v11112_v50 = vpop.f32.mrb[11].mxu1  ;;  %v11372_v21 = vld [vmem:[#allocation2 + $0xe8] sm:$0xff]  ;;  %11554 = vst.msk [vmem:[%s15914_s27 + $0x48] sm:$0xff] (!%p12639_p8), %vm1596_vm14, %v19004_v15 }
 0x8af   : > { %11501 = vst.msk [vmem:[#allocation2 + $0x70] sm:$0xff] %vm1596_vm14, %v19006_v11  ;;  %v11407_v23 = vadd.f32 %v11359_v14, %v11112_v50  ;;  %11553 = vst.msk [vmem:[%s15914_s27 + $0x40] sm:$0xff] (!%p12639_p8), %vm1596_vm14, %v19006_v11 }
 0x8b0   : > { %v19012_v24 = vmul.f32 %v15773_v28, %v11408_v22  ;;  %v15783_v22 = vld [vmem:[#allocation4 + $0xa8] sm:$0xff] }
 0x8b1   : > { %v19014_v36 = vmul.f32 %v15774_v35, %v11407_v23  ;;  %v14804_v37 = vpop.f32.mrb[12].mxu1  ;;  %v11371_v23 = vld [vmem:[#allocation2 + $0xe0] sm:$0xff] }
 0x8b2   : > { %11504 = vst.msk [vmem:[#allocation2 + $0x88] sm:$0xff] %vm1596_vm14, %v19012_v24  ;;  %v11410_v39 = vadd.f32 %v14804_v37, %v11362_v27  ;;  %v11122_v13 = vpop.f32.mrb[13].mxu1  ;;  %v15784_v27 = vld [vmem:[#allocation4 + $0xa0] sm:$0xff]  ;;  %11556 = vst.msk [vmem:[%s15914_s27 + $0x58] sm:$0xff] (!%p12639_p8), %vm1596_vm14, %v19012_v24 }
 0x8b3   : > { %11503 = vst.msk [vmem:[#allocation2 + $0x80] sm:$0xff] %vm1596_vm14, %v19014_v36  ;;  %v11409_v47 = vadd.f32 %v11361_v6, %v11122_v13  ;;  %v11374_v13 = vld [vmem:[#allocation2 + $0xf8] sm:$0xff]  ;;  %11555 = vst.msk [vmem:[%s15914_s27 + $0x50] sm:$0xff] (!%p12639_p8), %vm1596_vm14, %v19014_v36 }
 0x8b4   : > { %v19020_v45 = vmul.f32 %v15775_v32, %v11410_v39  ;;  %v11373_v32 = vld [vmem:[#allocation2 + $0xf0] sm:$0xff] }
 0x8b5   : > { %v19022_v3 = vmul.f32 %v15776_v26, %v11409_v47  ;;  %v14807_v46 = vpop.f32.mrb[14].mxu1  ;;  %v15785_v47 = vld [vmem:[#allocation4 + $0xb8] sm:$0xff] }
 0x8b6   : > { %11506 = vst.msk [vmem:[#allocation2 + $0x98] sm:$0xff] %vm1596_vm14, %v19020_v45  ;;  %v11412_v43 = vadd.f32 %v14807_v46, %v11364_v10  ;;  %v11132_v2 = vpop.f32.mrb[15].mxu1  ;;  %11558 = vst.msk [vmem:[%s15914_s27 + $0x68] sm:$0xff] (!%p12639_p8), %vm1596_vm14, %v19020_v45 }
 0x8b7   : > { %11505 = vst.msk [vmem:[#allocation2 + $0x90] sm:$0xff] %vm1596_vm14, %v19022_v3  ;;  %v11411_v49 = vadd.f32 %v11363_v53, %v11132_v2  ;;  %v15786_v53 = vld [vmem:[#allocation4 + $0xb0] sm:$0xff]  ;;  %11557 = vst.msk [vmem:[%s15914_s27 + $0x60] sm:$0xff] (!%p12639_p8), %vm1596_vm14, %v19022_v3 }
 0x8b8   : > { %v19028_v54 = vmul.f32 %v15777_v0, %v11412_v43  ;;  %v15787_v0 = vld [vmem:[#allocation4 + $0xc8] sm:$0xff] }
 0x8b9   : > { %v19030_v62 = vmul.f32 %v15778_v12, %v11411_v49  ;;  %v14810_v52 = vpop.f32.mrb[16].mxu1  ;;  %v11375_v12 = vld [vmem:[#allocation2 + $0x100] sm:$0xff] }
 0x8ba   : > { %11508 = vst.msk [vmem:[#allocation2 + $0xa8] sm:$0xff] %vm1596_vm14, %v19028_v54  ;;  %v11414_v40 = vadd.f32 %v14810_v52, %v11366_v4  ;;  %v11142_v18 = vpop.f32.mrb[17].mxu1  ;;  %v11376_v4 = vld [vmem:[#allocation2 + $0x108] sm:$0xff]  ;;  %v15788_v52 = vld [vmem:[#allocation4 + $0xc0] sm:$0xff]  ;;  %11560 = vst.msk [vmem:[%s15914_s27 + $0x78] sm:$0xff] (!%p12639_p8), %vm1596_vm14, %v19028_v54 }
 0x8bb   : > { %11507 = vst.msk [vmem:[#allocation2 + $0xa0] sm:$0xff] %vm1596_vm14, %v19030_v62  ;;  %v11413_v19 = vadd.f32 %v11365_v58, %v11142_v18  ;;  %11559 = vst.msk [vmem:[%s15914_s27 + $0x70] sm:$0xff] (!%p12639_p8), %vm1596_vm14, %v19030_v62 }
 0x8bc   : > { %v19036_v44 = vmul.f32 %v15779_v31, %v11414_v40 }
 0x8bd   : > { %v19038_v7 = vmul.f32 %v15780_v41, %v11413_v19  ;;  %v14813_v63 = vpop.f32.mrb[18].mxu1  ;;  %v15789_v41 = vld [vmem:[#allocation4 + $0xd8] sm:$0xff] }
 0x8be   : > { %11510 = vst.msk [vmem:[#allocation2 + $0xb8] sm:$0xff] %vm1596_vm14, %v19036_v44  ;;  %v11416_v55 = vadd.f32 %v14813_v63, %v11368_v20  ;;  %v11152_v1 = vpop.f32.mrb[19].mxu1  ;;  %11562 = vst.msk [vmem:[%s15914_s27 + $0x88] sm:$0xff] (!%p12639_p8), %vm1596_vm14, %v19036_v44 }
 0x8bf   : > { %11509 = vst.msk [vmem:[#allocation2 + $0xb0] sm:$0xff] %vm1596_vm14, %v19038_v7  ;;  %v11415_v33 = vadd.f32 %v11367_v9, %v11152_v1  ;;  %v11378_v9 = vld [vmem:[#allocation2 + $0x118] sm:$0xff]  ;;  %v15790_v1 = vld [vmem:[#allocation4 + $0xd0] sm:$0xff]  ;;  %11561 = vst.msk [vmem:[%s15914_s27 + $0x80] sm:$0xff] (!%p12639_p8), %vm1596_vm14, %v19038_v7 }
 0x8c0   : > { %v19044_v57 = vmul.f32 %v15781_v25, %v11416_v55  ;;  %v11377_v55 = vld [vmem:[#allocation2 + $0x110] sm:$0xff] }
 0x8c1   : > { %v19046_v61 = vmul.f32 %v15782_v60, %v11415_v33  ;;  %v14816_v5 = vpop.f32.mrb[20].mxu1 }
 0x8c2   : > { %11512 = vst.msk [vmem:[#allocation2 + $0xc8] sm:$0xff] %vm1596_vm14, %v19044_v57  ;;  %v11418_v16 = vadd.f32 %v14816_v5, %v11370_v38  ;;  %v11162_v14 = vpop.f32.mrb[21].mxu1  ;;  %v11380_v5 = vld [vmem:[#allocation2 + $0x128] sm:$0xff]  ;;  %11564 = vst.msk [vmem:[%s15914_s27 + $0x98] sm:$0xff] (!%p12639_p8), %vm1596_vm14, %v19044_v57 }
 0x8c3   : > { %11511 = vst.msk [vmem:[#allocation2 + $0xc0] sm:$0xff] %vm1596_vm14, %v19046_v61  ;;  %v11417_v17 = vadd.f32 %v11369_v59, %v11162_v14  ;;  %11563 = vst.msk [vmem:[%s15914_s27 + $0x90] sm:$0xff] (!%p12639_p8), %vm1596_vm14, %v19046_v61 }
 0x8c4   : > { %v19052_v50 = vmul.f32 %v15783_v22, %v11418_v16  ;;  %v15791_v16 = vld [vmem:[#allocation4 + $0xe8] sm:$0xff] }
 0x8c5   : > { %v19054_v28 = vmul.f32 %v15784_v27, %v11417_v17  ;;  %v14819_v6 = vpop.f32.mrb[22].mxu1  ;;  %v11379_v17 = vld [vmem:[#allocation2 + $0x120] sm:$0xff] }
 0x8c6   : > { %11514 = vst.msk [vmem:[#allocation2 + $0xd8] sm:$0xff] %vm1596_vm14, %v19052_v50  ;;  %v11420_v35 = vadd.f32 %v14819_v6, %v11372_v21  ;;  %v11172_v37 = vpop.f32.mrb[23].mxu1  ;;  %v15792_v21 = vld [vmem:[#allocation4 + $0xe0] sm:$0xff]  ;;  %11566 = vst.msk [vmem:[%s15914_s27 + $0xa8] sm:$0xff] (!%p12639_p8), %vm1596_vm14, %v19052_v50 }
 0x8c7   : > { %11513 = vst.msk [vmem:[#allocation2 + $0xd0] sm:$0xff] %vm1596_vm14, %v19054_v28  ;;  %v11419_v39 = vadd.f32 %v11371_v23, %v11172_v37  ;;  %v11382_v37 = vld [vmem:[#allocation2 + $0x138] sm:$0xff]  ;;  %11565 = vst.msk [vmem:[%s15914_s27 + $0xa0] sm:$0xff] (!%p12639_p8), %vm1596_vm14, %v19054_v28 }
 0x8c8   : > { %v19060_v10 = vmul.f32 %v15785_v47, %v11420_v35  ;;  %v11381_v47 = vld [vmem:[#allocation2 + $0x130] sm:$0xff] }
 0x8c9   : > { %v19062_v26 = vmul.f32 %v15786_v53, %v11419_v39  ;;  %v14822_v46 = vpop.f32.mrb[24].mxu1  ;;  %v15793_v39 = vld [vmem:[#allocation4 + $0xf8] sm:$0xff] }
 0x8ca   : > { %11516 = vst.msk [vmem:[#allocation2 + $0xe8] sm:$0xff] %vm1596_vm14, %v19060_v10  ;;  %v11422_v43 = vadd.f32 %v14822_v46, %v11374_v13  ;;  %v11182_v2 = vpop.f32.mrb[25].mxu1  ;;  %11568 = vst.msk [vmem:[%s15914_s27 + $0xb8] sm:$0xff] (!%p12639_p8), %vm1596_vm14, %v19060_v10 }
 0x8cb   : > { %11515 = vst.msk [vmem:[#allocation2 + $0xe0] sm:$0xff] %vm1596_vm14, %v19062_v26  ;;  %v11421_v49 = vadd.f32 %v11373_v32, %v11182_v2  ;;  %v15794_v32 = vld [vmem:[#allocation4 + $0xf0] sm:$0xff]  ;;  %11567 = vst.msk [vmem:[%s15914_s27 + $0xb0] sm:$0xff] (!%p12639_p8), %vm1596_vm14, %v19062_v26 }
 0x8cc   : > { %v19068_v58 = vmul.f32 %v15787_v0, %v11422_v43  ;;  %v15795_v0 = vld [vmem:[#allocation4 + $0x108] sm:$0xff] }
 0x8cd   : > { %v19070_v40 = vmul.f32 %v15788_v52, %v11421_v49  ;;  %v14825_v18 = vpop.f32.mrb[26].mxu1  ;;  %v11383_v52 = vld [vmem:[#allocation2 + $0x140] sm:$0xff] }
 0x8ce   : > { %11518 = vst.msk [vmem:[#allocation2 + $0xf8] sm:$0xff] %vm1596_vm14, %v19068_v58  ;;  %v11424_v19 = vadd.f32 %v14825_v18, %v11376_v4  ;;  %v11192_v20 = vpop.f32.mrb[27].mxu1  ;;  %v11384_v4 = vld [vmem:[#allocation2 + $0x148] sm:$0xff]  ;;  %v15796_v18 = vld [vmem:[#allocation4 + $0x100] sm:$0xff]  ;;  %11570 = vst.msk [vmem:[%s15914_s27 + $0xc8] sm:$0xff] (!%p12639_p8), %vm1596_vm14, %v19068_v58 }
 0x8cf   : > { %11517 = vst.msk [vmem:[#allocation2 + $0xf0] sm:$0xff] %vm1596_vm14, %v19070_v40  ;;  %v11423_v31 = vadd.f32 %v11375_v12, %v11192_v20  ;;  %11569 = vst.msk [vmem:[%s15914_s27 + $0xc0] sm:$0xff] (!%p12639_p8), %vm1596_vm14, %v19070_v40 }
 0x8d0   : > { %v19076_v63 = vmul.f32 %v15789_v41, %v11424_v19 }
 0x8d1   : > { %v19078_v33 = vmul.f32 %v15790_v1, %v11423_v31  ;;  %v14828_v38 = vpop.f32.mrb[28].mxu1  ;;  %v15797_v1 = vld [vmem:[#allocation4 + $0x118] sm:$0xff] }
 0x8d2   : > { %11520 = vst.msk [vmem:[#allocation2 + $0x108] sm:$0xff] %vm1596_vm14, %v19076_v63  ;;  %v11426_v25 = vadd.f32 %v14828_v38, %v11378_v9  ;;  %v11202_v59 = vpop.f32.mrb[29].mxu1  ;;  %11572 = vst.msk [vmem:[%s15914_s27 + $0xd8] sm:$0xff] (!%p12639_p8), %vm1596_vm14, %v19076_v63 }
 0x8d3   : > { %11519 = vst.msk [vmem:[#allocation2 + $0x100] sm:$0xff] %vm1596_vm14, %v19078_v33  ;;  %v11425_v60 = vadd.f32 %v11377_v55, %v11202_v59  ;;  %v11386_v55 = vld [vmem:[#allocation2 + $0x158] sm:$0xff]  ;;  %v15798_v59 = vld [vmem:[#allocation4 + $0x110] sm:$0xff]  ;;  %11571 = vst.msk [vmem:[%s15914_s27 + $0xd0] sm:$0xff] (!%p12639_p8), %vm1596_vm14, %v19078_v33 }
 0x8d4   : > { %v19084_v14 = vmul.f32 %v15791_v16, %v11426_v25  ;;  %v11385_v25 = vld [vmem:[#allocation2 + $0x150] sm:$0xff] }
 0x8d5   : > { %v19086_v22 = vmul.f32 %v15792_v21, %v11425_v60  ;;  %v14831_v23 = vpop.f32.mrb[30].mxu1 }
 0x8d6   : > { %11522 = vst.msk [vmem:[#allocation2 + $0x118] sm:$0xff] %vm1596_vm14, %v19084_v14  ;;  %v11428_v27 = vadd.f32 %v14831_v23, %v11380_v5  ;;  %v11212_v6 = vpop.f32.mrb[31].mxu1  ;;  %v11388_v23 = vld [vmem:[#allocation2 + $0x168] sm:$0xff]  ;;  %11574 = vst.msk [vmem:[%s15914_s27 + $0xe8] sm:$0xff] (!%p12639_p8), %vm1596_vm14, %v19084_v14 }
 0x8d7   : > { %11521 = vst.msk [vmem:[#allocation2 + $0x110] sm:$0xff] %vm1596_vm14, %v19086_v22  ;;  %v11427_v35 = vadd.f32 %v11379_v17, %v11212_v6  ;;  %11573 = vst.msk [vmem:[%s15914_s27 + $0xe0] sm:$0xff] (!%p12639_p8), %vm1596_vm14, %v19086_v22 }
 0x8d8   : > { %v19092_v13 = vmul.f32 %v15793_v39, %v11428_v27  ;;  %v15799_v27 = vld [vmem:[#allocation4 + $0x128] sm:$0xff] }
 0x8d9   : > { %v19094_v53 = vmul.f32 %v15794_v32, %v11427_v35  ;;  %v14834_v46 = vpop.f32.mrb[32].mxu1  ;;  %v11387_v35 = vld [vmem:[#allocation2 + $0x160] sm:$0xff] }
 0x8da   : > { %11524 = vst.msk [vmem:[#allocation2 + $0x128] sm:$0xff] %vm1596_vm14, %v19092_v13  ;;  %v11430_v43 = vadd.f32 %v14834_v46, %v11382_v37  ;;  %v11222_v2 = vpop.f32.mrb[33].mxu1  ;;  %v15800_v37 = vld [vmem:[#allocation4 + $0x120] sm:$0xff]  ;;  %11576 = vst.msk [vmem:[%s15914_s27 + $0xf8] sm:$0xff] (!%p12639_p8), %vm1596_vm14, %v19092_v13 }
 0x8db   : > { %11523 = vst.msk [vmem:[#allocation2 + $0x120] sm:$0xff] %vm1596_vm14, %v19094_v53  ;;  %v11429_v49 = vadd.f32 %v11381_v47, %v11222_v2  ;;  %v11390_v2 = vld [vmem:[#allocation2 + $0x178] sm:$0xff]  ;;  %11575 = vst.msk [vmem:[%s15914_s27 + $0xf0] sm:$0xff] (!%p12639_p8), %vm1596_vm14, %v19094_v53 }
 0x8dc   : > { %v19100_v12 = vmul.f32 %v15795_v0, %v11430_v43  ;;  %v11389_v0 = vld [vmem:[#allocation2 + $0x170] sm:$0xff] }
 0x8dd   : > { %v19102_v19 = vmul.f32 %v15796_v18, %v11429_v49  ;;  %v14837_v20 = vpop.f32.mrb[34].mxu1  ;;  %v15801_v49 = vld [vmem:[#allocation4 + $0x138] sm:$0xff] }
 0x8de   : > { %11526 = vst.msk [vmem:[#allocation2 + $0x138] sm:$0xff] %vm1596_vm14, %v19100_v12  ;;  %v11432_v31 = vadd.f32 %v14837_v20, %v11384_v4  ;;  %v11232_v9 = vpop.f32.mrb[35].mxu1  ;;  %11578 = vst.msk [vmem:[%s15914_s27 + $0x108] sm:$0xff] (!%p12639_p8), %vm1596_vm14, %v19100_v12 }
 0x8df   : > { %11525 = vst.msk [vmem:[#allocation2 + $0x130] sm:$0xff] %vm1596_vm14, %v19102_v19  ;;  %v11431_v41 = vadd.f32 %v11383_v52, %v11232_v9  ;;  %v15802_v52 = vld [vmem:[#allocation4 + $0x130] sm:$0xff]  ;;  %11577 = vst.msk [vmem:[%s15914_s27 + $0x100] sm:$0xff] (!%p12639_p8), %vm1596_vm14, %v19102_v19 }
 0x8e0   : > { %v19108_v38 = vmul.f32 %v15797_v1, %v11432_v31  ;;  %v15803_v1 = vld [vmem:[#allocation4 + $0x148] sm:$0xff] }
 0x8e1   : > { %v19110_v60 = vmul.f32 %v15798_v59, %v11431_v41  ;;  %v14840_v5 = vpop.f32.mrb[36].mxu1  ;;  %v11391_v59 = vld [vmem:[#allocation2 + $0x180] sm:$0xff] }
 0x8e2   : > { %11528 = vst.msk [vmem:[#allocation2 + $0x148] sm:$0xff] %vm1596_vm14, %v19108_v38  ;;  %v11434_v16 = vadd.f32 %v14840_v5, %v11386_v55  ;;  %v11242_v17 = vpop.f32.mrb[37].mxu1  ;;  %v11392_v55 = vld [vmem:[#allocation2 + $0x188] sm:$0xff]  ;;  %v15804_v5 = vld [vmem:[#allocation4 + $0x140] sm:$0xff]  ;;  %11580 = vst.msk [vmem:[%s15914_s27 + $0x118] sm:$0xff] (!%p12639_p8), %vm1596_vm14, %v19108_v38 }
 0x8e3   : > { %11527 = vst.msk [vmem:[#allocation2 + $0x140] sm:$0xff] %vm1596_vm14, %v19110_v60  ;;  %v11433_v21 = vadd.f32 %v11385_v25, %v11242_v17  ;;  %11579 = vst.msk [vmem:[%s15914_s27 + $0x110] sm:$0xff] (!%p12639_p8), %vm1596_vm14, %v19110_v60 }
 0x8e4   : > { %v19116_v6 = vmul.f32 %v15799_v27, %v11434_v16 }
 0x8e5   : > { %v19118_v39 = vmul.f32 %v15800_v37, %v11433_v21  ;;  %v14843_v47 = vpop.f32.mrb[38].mxu1  ;;  %v15805_v37 = vld [vmem:[#allocation4 + $0x158] sm:$0xff] }
 0x8e6   : > { %11530 = vst.msk [vmem:[#allocation2 + $0x158] sm:$0xff] %vm1596_vm14, %v19116_v6  ;;  %v11436_v32 = vadd.f32 %v14843_v47, %v11388_v23  ;;  %v11252_v46 = vpop.f32.mrb[39].mxu1  ;;  %11582 = vst.msk [vmem:[%s15914_s27 + $0x128] sm:$0xff] (!%p12639_p8), %vm1596_vm14, %v19116_v6 }
 0x8e7   : > { %11529 = vst.msk [vmem:[#allocation2 + $0x150] sm:$0xff] %vm1596_vm14, %v19118_v39  ;;  %v11435_v43 = vadd.f32 %v11387_v35, %v11252_v46  ;;  %v11394_v35 = vld [vmem:[#allocation2 + $0x198] sm:$0xff]  ;;  %v15806_v46 = vld [vmem:[#allocation4 + $0x150] sm:$0xff]  ;;  %11581 = vst.msk [vmem:[%s15914_s27 + $0x120] sm:$0xff] (!%p12639_p8), %vm1596_vm14, %v19118_v39 }
 0x8e8   : > { %v19124_v4 = vmul.f32 %v15801_v49, %v11436_v32  ;;  %v11393_v32 = vld [vmem:[#allocation2 + $0x190] sm:$0xff] }
 0x8e9   : > { %v19126_v18 = vmul.f32 %v15802_v52, %v11435_v43  ;;  %v14846_v20 = vpop.f32.mrb[40].mxu1 }
 0x8ea   : > { %11532 = vst.msk [vmem:[#allocation2 + $0x168] sm:$0xff] %vm1596_vm14, %v19124_v4  ;;  %v11438_v31 = vadd.f32 %v14846_v20, %v11390_v2  ;;  %v11262_v9 = vpop.f32.mrb[41].mxu1  ;;  %v11396_v20 = vld [vmem:[#allocation2 + $0x1a8] sm:$0xff]  ;;  %11584 = vst.msk [vmem:[%s15914_s27 + $0x138] sm:$0xff] (!%p12639_p8), %vm1596_vm14, %v19124_v4 }
 0x8eb   : > { %11531 = vst.msk [vmem:[#allocation2 + $0x160] sm:$0xff] %vm1596_vm14, %v19126_v18  ;;  %v11437_v41 = vadd.f32 %v11389_v0, %v11262_v9  ;;  %11583 = vst.msk [vmem:[%s15914_s27 + $0x130] sm:$0xff] (!%p12639_p8), %vm1596_vm14, %v19126_v18 }
 0x8ec   : > { %v19132_v25 = vmul.f32 %v15803_v1, %v11438_v31  ;;  %v15807_v31 = vld [vmem:[#allocation4 + $0x168] sm:$0xff] }
 0x8ed   : > { %v19134_v16 = vmul.f32 %v15804_v5, %v11437_v41  ;;  %v14849_v17 = vpop.f32.mrb[42].mxu1  ;;  %v11395_v41 = vld [vmem:[#allocation2 + $0x1a0] sm:$0xff] }
 0x8ee   : > { %11534 = vst.msk [vmem:[#allocation2 + $0x178] sm:$0xff] %vm1596_vm14, %v19132_v25  ;;  %v11440_v21 = vadd.f32 %v14849_v17, %v11392_v55  ;;  %v11272_v23 = vpop.f32.mrb[43].mxu1  ;;  %v15808_v55 = vld [vmem:[#allocation4 + $0x160] sm:$0xff]  ;;  %11586 = vst.msk [vmem:[%s15914_s27 + $0x148] sm:$0xff] (!%p12639_p8), %vm1596_vm14, %v19132_v25 }
 0x8ef   : > { %11533 = vst.msk [vmem:[#allocation2 + $0x170] sm:$0xff] %vm1596_vm14, %v19134_v16  ;;  %v11439_v27 = vadd.f32 %v11391_v59, %v11272_v23  ;;  %v15809_v23 = vld [vmem:[#allocation4 + $0x178] sm:$0xff]  ;;  %11585 = vst.msk [vmem:[%s15914_s27 + $0x140] sm:$0xff] (!%p12639_p8), %vm1596_vm14, %v19134_v16 }
 0x8f0   : > { %v19140_v47 = vmul.f32 %v15805_v37, %v11440_v21 }
 0x8f1   : > { %v19142_v43 = vmul.f32 %v15806_v46, %v11439_v27  ;;  %v14852_v2 = vpop.f32.mrb[44].mxu1 }
 0x8f2   : > { %11536 = vst.msk [vmem:[#allocation2 + $0x188] sm:$0xff] %vm1596_vm14, %v19140_v47  ;;  %v11442_v49 = vadd.f32 %v14852_v2, %v11394_v35  ;;  %v11282_v0 = vpop.f32.mrb[45].mxu1  ;;  %v15810_v35 = vld [vmem:[#allocation4 + $0x170] sm:$0xff]  ;;  %11588 = vst.msk [vmem:[%s15914_s27 + $0x158] sm:$0xff] (!%p12639_p8), %vm1596_vm14, %v19140_v47 }
 0x8f3   : > { %11535 = vst.msk [vmem:[#allocation2 + $0x180] sm:$0xff] %vm1596_vm14, %v19142_v43  ;;  %v11441_v52 = vadd.f32 %v11393_v32, %v11282_v0  ;;  %11587 = vst.msk [vmem:[%s15914_s27 + $0x150] sm:$0xff] (!%p12639_p8), %vm1596_vm14, %v19142_v43 }
 0x8f4   : > { %v19148_v9 = vmul.f32 %v15807_v31, %v11442_v49 }
 0x8f5   : > { %v11489_v1 = vmul.f32 %v15808_v55, %v11441_v52  ;;  %v14855_v59 = vpop.f32.mrb[46].mxu1  ;;  %11544 = sbr.rel (%p12639_p8) target bundleno = 2300 (0x8fc), region = 40 }
 0x8f6   : > { %11538 = vst.msk [vmem:[#allocation2 + $0x198] sm:$0xff] %vm1596_vm14, %v19148_v9  ;;  %v11444_v5 = vadd.f32 %v14855_v59, %v11396_v20  ;;  %v11292_v17 = vpop.f32.mrb[47].mxu1  ;;  %11590 = vst.msk [vmem:[%s15914_s27 + $0x168] sm:$0xff] (!%p12639_p8), %vm1596_vm14, %v19148_v9 }
 0x8f7   : > { %11537 = vst.msk [vmem:[#allocation2 + $0x190] sm:$0xff] %vm1596_vm14, %v11489_v1  ;;  %v11443_v21 = vadd.f32 %v11395_v41, %v11292_v17  ;;  %11589 = vst.msk [vmem:[%s15914_s27 + $0x160] sm:$0xff] (!%p12639_p8), %vm1596_vm14, %v11489_v1 }
 0x8f8   : > { %v11492_v27 = vmul.f32 %v15809_v23, %v11444_v5 }
 0x8f9   : > { %v11491_v37 = vmul.f32 %v15810_v35, %v11443_v21 }
 0x8fa   : > { %11540 = vst.msk [vmem:[#allocation2 + $0x1a8] sm:$0xff] %vm1596_vm14, %v11492_v27  ;;  %11592 = vst.msk [vmem:[%s15914_s27 + $0x178] sm:$0xff] (!%p12639_p8), %vm1596_vm14, %v11492_v27 }
 0x8fb   : > { %11539 = vst.msk [vmem:[#allocation2 + $0x1a0] sm:$0xff] %vm1596_vm14, %v11491_v37  ;;  %11591 = vst.msk [vmem:[%s15914_s27 + $0x170] sm:$0xff] (!%p12639_p8), %vm1596_vm14, %v11491_v37 }
 0x8fc PF: > { %s13_s16 = sadd.s32 1, %s15849_s16   ;;  %s19742_s12 = smov %s15841_s14 }
 0x8fd   : > { %p10_p9 = scmp.ge.s32.totalorder %s13_s16, 6   ;;  %s19743_s13 = smov %s15845_s15 }
 0x8fe   : > { %s19744_s14 = smov %s19747_s17  ;;  %s19745_s15 = smov %s19751_s18 }
 0x8ff   :  { %12 = sbr.rel (!%p10_p9) target bundleno = 3 (0x3), region = 92 }

</bundles_post_ra>
